<compile_context>
chip_gen: v7x
topology: tpu7x:2x2x1
jax: 0.10.0
libtpu: 0.0.40
codegen_flags: <defaults>
</compile_context>

<pallas_src>
import functools

import jax
import jax.numpy as jnp
from jax.experimental import pallas as pl
from jax.experimental.pallas import tpu as pltpu

DEPTH = 3
BN_EPS = 1e-5
GIN_EPS = 0.0     # PyG GINConv default eps
LANE = 128


def _round_up(v, m):
    return (v + m - 1) // m * m


def _gin_kernel(n_ref, x_ref, adj_hbm, pool_ref, w_ref, v_ref, wf_ref, bf_ref,
                out_ref, adj_buf, h_buf, sem):
    n_pad, d = x_ref.shape
    nt, tm, _ = adj_hbm.shape
    depth = v_ref.shape[0]
    total = depth * nt

    def _copy(step):
        t = step % nt
        slot = step % 2
        return pltpu.make_async_copy(adj_hbm.at[t], adj_buf.at[slot], sem.at[slot])

    _copy(0).start()                                   # prime the DMA pipeline

    n_real = n_ref[0]
    inv_n = 1.0 / n_real.astype(jnp.float32)
    row_ids = jax.lax.broadcasted_iota(jnp.int32, (n_pad, 1), 0)
    node_mask = (row_ids < n_real).astype(jnp.float32)  # [N_pad, 1]

    x = x_ref[...]                                      # f32 [N_pad, D]

    for l in range(depth):
        w1 = w_ref[2 * l]                               # bf16 [D, D]
        w2 = w_ref[2 * l + 1]                           # bf16 [D, D]
        vl = v_ref[l]                                   # f32  [8, D]
        b1, b2 = vl[0:1, :], vl[1:2, :]
        gamma, beta = vl[2:3, :], vl[3:4, :]

        x_bf = x.astype(jnp.bfloat16)                   # MXU operand (once/layer)
        s1 = jnp.zeros((1, d), jnp.float32)             # sum
        s2 = jnp.zeros((1, d), jnp.float32)             # sum of squares

        for t in range(nt):
            step = l * nt + t
            _copy(step).wait()
            if step + 1 < total:
                _copy(step + 1).start()                 # prefetch next adj tile

            r0 = t * tm
            # GINConv aggregation: sum_{j in N(i)} x_j  (bf16 MXU, f32 acc)
            agg = jnp.dot(adj_buf[step % 2], x_bf,
                          preferred_element_type=jnp.float32)      # [TM, D]
            h = (1.0 + GIN_EPS) * x[r0:r0 + tm, :] + agg
            # MLP: Linear -> ReLU -> Linear -> ReLU
            h = jnp.maximum(
                jnp.dot(h.astype(jnp.bfloat16), w1,
                        preferred_element_type=jnp.float32) + b1, 0.0)
            h = jnp.maximum(
                jnp.dot(h.astype(jnp.bfloat16), w2,
                        preferred_element_type=jnp.float32) + b2, 0.0)
            h_buf[r0:r0 + tm, :] = h

            # One-pass BN statistics, masked so padded nodes don't contribute.
            hm = h * node_mask[r0:r0 + tm, :]
            s1 = s1 + jnp.sum(hm, axis=0, keepdims=True)
            s2 = s2 + jnp.sum(hm * h, axis=0, keepdims=True)

        mean = s1 * inv_n
        var = s2 * inv_n - mean * mean                  # biased (training-mode) var
        x = jnp.maximum(
            (h_buf[...] - mean) * jax.lax.rsqrt(var + BN_EPS) * gamma + beta, 0.0)

    # global_add_pool + final linear (tiny; f32)
    pooled = jnp.dot(pool_ref[...], x, preferred_element_type=jnp.float32)
    out_ref[...] = (jnp.dot(pooled, wf_ref[...],
                            preferred_element_type=jnp.float32) + bf_ref[...])


@functools.partial(jax.jit, static_argnames=("tile_m",))
def gin_forward(x, adj, pool, layer_params, wf, bf, *, tile_m=128):
    """x:[N,F] f32, adj:[N,N] dense aggregation operator, pool:[G,N] 0/1."""
    n, f = x.shape
    g = pool.shape[0]
    hdim = layer_params[0][0].shape[1]
    c = wf.shape[1]

    assert tile_m % LANE == 0, "tile_m must be a multiple of 128"
    d = _round_up(max(f, hdim), LANE)
    cl = _round_up(c, LANE)
    n_pad = _round_up(n, tile_m)
    g_pad = _round_up(max(g, 8), 8)
    nt = n_pad // tile_m

    # ---------- host-side padding / packing (plain-JAX glue) ----------
    xp = jnp.zeros((n_pad, d), jnp.float32).at[:n, :f].set(x)
    adjp = jnp.zeros((n_pad, n_pad), jnp.float32).at[:n, :n].set(adj)
    adj_tiles = adjp.astype(jnp.bfloat16).reshape(nt, tile_m, n_pad)   # HBM rows
    poolp = jnp.zeros((g_pad, n_pad), jnp.float32).at[:g, :n].set(pool)

    w_rows, v_rows = [], []
    for (w1, b1, w2, b2, gm, bt) in layer_params:
        w1p = jnp.zeros((d, d), jnp.float32).at[:w1.shape[0], :w1.shape[1]].set(w1)
        w2p = jnp.zeros((d, d), jnp.float32).at[:w2.shape[0], :w2.shape[1]].set(w2)
        w_rows += [w1p, w2p]
        v = jnp.zeros((8, d), jnp.float32)
        v = v.at[0, :hdim].set(b1.reshape(-1))
        v = v.at[1, :hdim].set(b2.reshape(-1))
        v = v.at[2, :hdim].set(gm.reshape(-1))
        v = v.at[3, :hdim].set(bt.reshape(-1))
        v_rows.append(v)
    w_stack = jnp.stack(w_rows).astype(jnp.bfloat16)        # [2*depth, d, d]
    v_stack = jnp.stack(v_rows)                             # [depth, 8, d]
    wfp = jnp.zeros((d, cl), jnp.float32).at[:hdim, :c].set(wf)
    bfp = jnp.zeros((1, cl), jnp.float32).at[0, :c].set(bf.reshape(-1))
    n_real = jnp.array([n], jnp.int32)

    out = pl.pallas_call(
        _gin_kernel,
        out_shape=jax.ShapeDtypeStruct((g_pad, cl), jnp.float32),
        in_specs=[
            pl.BlockSpec(memory_space=pltpu.MemorySpace.SMEM),   # n_real
            pl.BlockSpec(memory_space=pltpu.MemorySpace.VMEM),   # x (padded)
            pl.BlockSpec(memory_space=pl.ANY),                   # adj tiles (HBM)
            pl.BlockSpec(memory_space=pltpu.MemorySpace.VMEM),   # pool
            pl.BlockSpec(memory_space=pltpu.MemorySpace.VMEM),   # weight stack (bf16)
            pl.BlockSpec(memory_space=pltpu.MemorySpace.VMEM),   # vector stack
            pl.BlockSpec(memory_space=pltpu.MemorySpace.VMEM),   # wf
            pl.BlockSpec(memory_space=pltpu.MemorySpace.VMEM),   # bf
        ],
        out_specs=pl.BlockSpec(memory_space=pltpu.MemorySpace.VMEM),
        scratch_shapes=[
            pltpu.VMEM((2, tile_m, n_pad), jnp.bfloat16),   # adj double buffer
            pltpu.VMEM((n_pad, d), jnp.float32),            # per-layer h buffer
            pltpu.SemaphoreType.DMA((2,)),
        ],
        compiler_params=pltpu.CompilerParams(
            vmem_limit_bytes=48 * 1024 * 1024),              # fits v7x's 64 MiB
    )(n_real, xp, adj_tiles, poolp, w_stack, v_stack, wfp, bfp)

    return out[:g, :c]


def ref_forward(x, adj, pool, layer_params, wf, bf):
    """Pure-JAX reference mirroring the kernel's mixed-precision policy
    (bf16 MXU operands, f32 accumulation / elementwise, training-mode BN)."""
    adj_bf = adj.astype(jnp.bfloat16)
    h = x
    for (w1, b1, w2, b2, g, bt) in layer_params:
        agg = jnp.dot(adj_bf, h.astype(jnp.bfloat16),
                      preferred_element_type=jnp.float32)
        h = (1.0 + GIN_EPS) * h + agg
        h = jnp.maximum(jnp.dot(h.astype(jnp.bfloat16), w1.astype(jnp.bfloat16),
                                preferred_element_type=jnp.float32) + b1, 0.0)
        h = jnp.maximum(jnp.dot(h.astype(jnp.bfloat16), w2.astype(jnp.bfloat16),
                                preferred_element_type=jnp.float32) + b2, 0.0)
        mu = h.mean(0, keepdims=True)
        var = ((h - mu) ** 2).mean(0, keepdims=True)
        h = jnp.maximum((h - mu) * jax.lax.rsqrt(var + BN_EPS) * g + bt, 0.0)
    return (pool @ h) @ wf + bf


def make_linear(key, fan_in, fan_out):
    k1, k2 = jax.random.split(key)
    bound = 1.0 / jnp.sqrt(jnp.float32(fan_in))
    w = jax.random.uniform(k1, (fan_in, fan_out), jnp.float32, -bound, bound)
    b = jax.random.uniform(k2, (1, fan_out), jnp.float32, -bound, bound)
    return w, b


if __name__ == "__main__":
    num_features = 16
    hidden_dim = 64
    num_classes = 1
    nodes_per_graph = 100
    num_graphs = 2
    num_nodes = nodes_per_graph * num_graphs   # 200 -> padded to 256 (2 row tiles)
    edges_per_graph = 400

    key = jax.random.PRNGKey(0)
    keys = jax.random.split(key, 16)

    # Node features and batch assignment.
    x = jax.random.normal(keys[0], (num_nodes, num_features), jnp.float32)
    batch = jnp.repeat(jnp.arange(num_graphs, dtype=jnp.int32), nodes_per_graph)

    # Random directed edges, kept within each graph.
    srcs, dsts = [], []
    for gi in range(num_graphs):
        lo, hi = gi * nodes_per_graph, (gi + 1) * nodes_per_graph
        srcs.append(jax.random.randint(keys[1 + 2 * gi], (edges_per_graph,), lo, hi))
        dsts.append(jax.random.randint(keys[2 + 2 * gi], (edges_per_graph,), lo, hi))
    edge_index = jnp.stack([jnp.concatenate(srcs), jnp.concatenate(dsts)], axis=0)

    # Dense aggregation operator (adj @ x == scatter-sum of messages) and
    # pooling matrix (pool @ x == global_add_pool) — host-side glue.
    adj = jnp.zeros((num_nodes, num_nodes), jnp.float32).at[
        edge_index[1], edge_index[0]].add(1.0)
    pool = (jnp.arange(num_graphs)[:, None] == batch[None, :]).astype(jnp.float32)

    # PyTorch-style parameter init (uniform Linear, gamma=1 / beta=0 BN).
    layer_params = []
    kidx = 5
    in_dim = num_features
    for _ in range(DEPTH):
        w1, b1 = make_linear(keys[kidx], in_dim, hidden_dim); kidx += 1
        w2, b2 = make_linear(keys[kidx], hidden_dim, hidden_dim); kidx += 1
        gamma = jnp.ones((1, hidden_dim), jnp.float32)
        beta = jnp.zeros((1, hidden_dim), jnp.float32)
        layer_params.append((w1, b1, w2, b2, gamma, beta))
        in_dim = hidden_dim
    wf, bf = make_linear(keys[kidx], hidden_dim, num_classes)

    out = gin_forward(x, adj, pool, layer_params, wf, bf, tile_m=128)
    out = jax.block_until_ready(out)

    expected = ref_forward(x, adj, pool, layer_params, wf, bf)
    assert out.shape == (num_graphs, num_classes), out.shape
    assert jnp.allclose(out, expected, rtol=2e-2, atol=2e-2), (out, expected)

    print("KERNEL_OK")
</pallas_src>

<mosaic_0001>
module attributes {stable_mosaic.version = 11 : i64} {
  func.func @_gin_kernel(%arg0: memref<1xi32, #tpu.memory_space<smem>>, %arg1: memref<256x128xf32, #tpu.memory_space<vmem>>, %arg2: memref<2x128x256xbf16, #tpu.memory_space<any>>, %arg3: memref<8x256xf32, #tpu.memory_space<vmem>>, %arg4: memref<6x128x128xbf16, #tpu.memory_space<vmem>>, %arg5: memref<3x8x128xf32, #tpu.memory_space<vmem>>, %arg6: memref<128x128xf32, #tpu.memory_space<vmem>>, %arg7: memref<1x128xf32, #tpu.memory_space<vmem>>, %arg8: memref<8x128xf32, #tpu.memory_space<vmem>>, %arg9: memref<2x128x256xbf16, #tpu.memory_space<vmem>>, %arg10: memref<256x128xf32, #tpu.memory_space<vmem>>, %arg11: memref<2x!tpu.dma_semaphore, #tpu.memory_space<semaphore_mem>>) attributes {dimension_semantics = [], scalar_prefetch = 0 : i64, scratch_operands = 3 : i64, tpu.core_type = #tpu.core_type<tc>} {
    %c0_i32 = arith.constant 0 : i32
    %c0_i32_0 = arith.constant 0 : i32
    %c0_i32_1 = arith.constant 0 : i32
    %c0_i32_2 = arith.constant 0 : i32
    %c0_i32_3 = arith.constant 0 : i32
    %0 = tpu.memref_slice %arg2[%c0_i32, %c0_i32_2, %c0_i32_3] : memref<2x128x256xbf16, #tpu.memory_space<any>> -> memref<1x128x256xbf16, #tpu.memory_space<any>>
    %1 = tpu.memref_squeeze %0 : memref<1x128x256xbf16, #tpu.memory_space<any>> -> memref<128x256xbf16, #tpu.memory_space<any>>
    %c0_i32_4 = arith.constant 0 : i32
    %c0_i32_5 = arith.constant 0 : i32
    %2 = tpu.memref_slice %arg9[%c0_i32_0, %c0_i32_4, %c0_i32_5] : memref<2x128x256xbf16, #tpu.memory_space<vmem>> -> memref<1x128x256xbf16, #tpu.memory_space<vmem>>
    %3 = tpu.memref_squeeze %2 : memref<1x128x256xbf16, #tpu.memory_space<vmem>> -> memref<128x256xbf16, #tpu.memory_space<vmem>>
    %4 = tpu.memref_slice %arg11[%c0_i32_1] : memref<2x!tpu.dma_semaphore, #tpu.memory_space<semaphore_mem>> -> memref<1x!tpu.dma_semaphore, #tpu.memory_space<semaphore_mem>>
    %5 = tpu.memref_squeeze %4 : memref<1x!tpu.dma_semaphore, #tpu.memory_space<semaphore_mem>> -> memref<!tpu.dma_semaphore, #tpu.memory_space<semaphore_mem>>
    tpu.enqueue_dma source(%1 : memref<128x256xbf16, #tpu.memory_space<any>>) target(%3 : memref<128x256xbf16, #tpu.memory_space<vmem>>) target_semaphore(%5 : memref<!tpu.dma_semaphore, #tpu.memory_space<semaphore_mem>>)
    %c0 = arith.constant 0 : index
    %6 = memref.load %arg0[%c0] : memref<1xi32, #tpu.memory_space<smem>>
    %7 = arith.sitofp %6 : i32 to f32
    %cst = arith.constant 1.000000e+00 : f32
    %8 = arith.divf %cst, %7 : f32
    %9 = tpu.iota {dimensions = array<i32: 0>} : vector<256x1xi32>
    %10 = vector.broadcast %6 : i32 to vector<256x1xi32>
    %11 = arith.cmpi slt, %9, %10 : vector<256x1xi32>
    %12 = arith.extui %11 : vector<256x1xi1> to vector<256x1xi32>
    %13 = arith.sitofp %12 : vector<256x1xi32> to vector<256x1xf32>
    %c0_6 = arith.constant 0 : index
    %c0_7 = arith.constant 0 : index
    %14 = vector.load %arg1[%c0_6, %c0_7] : memref<256x128xf32, #tpu.memory_space<vmem>>, vector<256x128xf32>
    %c0_8 = arith.constant 0 : index
    %c0_9 = arith.constant 0 : index
    %c0_10 = arith.constant 0 : index
    %15 = vector.load %arg4[%c0_8, %c0_9, %c0_10] : memref<6x128x128xbf16, #tpu.memory_space<vmem>>, vector<1x128x128xbf16>
    %16 = vector.shape_cast %15 : vector<1x128x128xbf16> to vector<128x128xbf16>
    %c1 = arith.constant 1 : index
    %c0_11 = arith.constant 0 : index
    %c0_12 = arith.constant 0 : index
    %17 = vector.load %arg4[%c1, %c0_11, %c0_12] : memref<6x128x128xbf16, #tpu.memory_space<vmem>>, vector<1x128x128xbf16>
    %18 = vector.shape_cast %17 : vector<1x128x128xbf16> to vector<128x128xbf16>
    %c0_13 = arith.constant 0 : index
    %c0_14 = arith.constant 0 : index
    %c0_15 = arith.constant 0 : index
    %19 = vector.load %arg5[%c0_13, %c0_14, %c0_15] : memref<3x8x128xf32, #tpu.memory_space<vmem>>, vector<1x8x128xf32>
    %20 = vector.shape_cast %19 : vector<1x8x128xf32> to vector<8x128xf32>
    %21 = vector.extract_strided_slice %20 {offsets = [0, 0], sizes = [1, 128], strides = [1, 1]} : vector<8x128xf32> to vector<1x128xf32>
    %22 = vector.extract_strided_slice %20 {offsets = [1, 0], sizes = [1, 128], strides = [1, 1]} : vector<8x128xf32> to vector<1x128xf32>
    %23 = vector.extract_strided_slice %20 {offsets = [2, 0], sizes = [1, 128], strides = [1, 1]} : vector<8x128xf32> to vector<1x128xf32>
    %24 = vector.extract_strided_slice %20 {offsets = [3, 0], sizes = [1, 128], strides = [1, 1]} : vector<8x128xf32> to vector<1x128xf32>
    %25 = arith.truncf %14 : vector<256x128xf32> to vector<256x128xbf16>
    %cst_16 = arith.constant 0.000000e+00 : f32
    %26 = vector.broadcast %cst_16 : f32 to vector<1x128xf32>
    %cst_17 = arith.constant 0.000000e+00 : f32
    %27 = vector.broadcast %cst_17 : f32 to vector<1x128xf32>
    %c0_i32_18 = arith.constant 0 : i32
    %c0_i32_19 = arith.constant 0 : i32
    %c0_i32_20 = arith.constant 0 : i32
    %c0_i32_21 = arith.constant 0 : i32
    %c0_i32_22 = arith.constant 0 : i32
    %28 = tpu.memref_slice %arg2[%c0_i32_18, %c0_i32_21, %c0_i32_22] : memref<2x128x256xbf16, #tpu.memory_space<any>> -> memref<1x128x256xbf16, #tpu.memory_space<any>>
    %29 = tpu.memref_squeeze %28 : memref<1x128x256xbf16, #tpu.memory_space<any>> -> memref<128x256xbf16, #tpu.memory_space<any>>
    %c0_i32_23 = arith.constant 0 : i32
    %c0_i32_24 = arith.constant 0 : i32
    %30 = tpu.memref_slice %arg9[%c0_i32_19, %c0_i32_23, %c0_i32_24] : memref<2x128x256xbf16, #tpu.memory_space<vmem>> -> memref<1x128x256xbf16, #tpu.memory_space<vmem>>
    %31 = tpu.memref_squeeze %30 : memref<1x128x256xbf16, #tpu.memory_space<vmem>> -> memref<128x256xbf16, #tpu.memory_space<vmem>>
    %32 = tpu.memref_slice %arg11[%c0_i32_20] : memref<2x!tpu.dma_semaphore, #tpu.memory_space<semaphore_mem>> -> memref<1x!tpu.dma_semaphore, #tpu.memory_space<semaphore_mem>>
    %33 = tpu.memref_squeeze %32 : memref<1x!tpu.dma_semaphore, #tpu.memory_space<semaphore_mem>> -> memref<!tpu.dma_semaphore, #tpu.memory_space<semaphore_mem>>
    tpu.wait_dma2 semaphore(%33 : memref<!tpu.dma_semaphore, #tpu.memory_space<semaphore_mem>>) src(%29 : memref<128x256xbf16, #tpu.memory_space<any>>) dst(%31 : memref<128x256xbf16, #tpu.memory_space<vmem>>)
    %c1_i32 = arith.constant 1 : i32
    %c1_i32_25 = arith.constant 1 : i32
    %c1_i32_26 = arith.constant 1 : i32
    %c0_i32_27 = arith.constant 0 : i32
    %c0_i32_28 = arith.constant 0 : i32
    %34 = tpu.memref_slice %arg2[%c1_i32, %c0_i32_27, %c0_i32_28] : memref<2x128x256xbf16, #tpu.memory_space<any>> -> memref<1x128x256xbf16, #tpu.memory_space<any>>
    %35 = tpu.memref_squeeze %34 : memref<1x128x256xbf16, #tpu.memory_space<any>> -> memref<128x256xbf16, #tpu.memory_space<any>>
    %c0_i32_29 = arith.constant 0 : i32
    %c0_i32_30 = arith.constant 0 : i32
    %36 = tpu.memref_slice %arg9[%c1_i32_25, %c0_i32_29, %c0_i32_30] : memref<2x128x256xbf16, #tpu.memory_space<vmem>> -> memref<1x128x256xbf16, #tpu.memory_space<vmem>>
    %37 = tpu.memref_squeeze %36 : memref<1x128x256xbf16, #tpu.memory_space<vmem>> -> memref<128x256xbf16, #tpu.memory_space<vmem>>
    %38 = tpu.memref_slice %arg11[%c1_i32_26] : memref<2x!tpu.dma_semaphore, #tpu.memory_space<semaphore_mem>> -> memref<1x!tpu.dma_semaphore, #tpu.memory_space<semaphore_mem>>
    %39 = tpu.memref_squeeze %38 : memref<1x!tpu.dma_semaphore, #tpu.memory_space<semaphore_mem>> -> memref<!tpu.dma_semaphore, #tpu.memory_space<semaphore_mem>>
    tpu.enqueue_dma source(%35 : memref<128x256xbf16, #tpu.memory_space<any>>) target(%37 : memref<128x256xbf16, #tpu.memory_space<vmem>>) target_semaphore(%39 : memref<!tpu.dma_semaphore, #tpu.memory_space<semaphore_mem>>)
    %c0_31 = arith.constant 0 : index
    %c0_32 = arith.constant 0 : index
    %c0_33 = arith.constant 0 : index
    %40 = vector.load %arg9[%c0_31, %c0_32, %c0_33] : memref<2x128x256xbf16, #tpu.memory_space<vmem>>, vector<1x128x256xbf16>
    %41 = vector.shape_cast %40 : vector<1x128x256xbf16> to vector<128x256xbf16>
    %cst_34 = arith.constant dense<0.000000e+00> : vector<128x128xf32>
    %42 = tpu.matmul %41, %25, %cst_34 {dimension_numbers = #tpu.dot_dimension_numbers<[1], [0], [0], [1], [0, 0, 1, 1], [], []>} : vector<128x256xbf16>, vector<256x128xbf16>, vector<128x128xf32> -> vector<128x128xf32>
    %43 = vector.extract_strided_slice %14 {offsets = [0, 0], sizes = [128, 128], strides = [1, 1]} : vector<256x128xf32> to vector<128x128xf32>
    %cst_35 = arith.constant 1.000000e+00 : f32
    %44 = vector.broadcast %cst_35 : f32 to vector<128x128xf32>
    %45 = arith.mulf %44, %43 : vector<128x128xf32>
    %46 = arith.addf %45, %42 : vector<128x128xf32>
    %47 = arith.truncf %46 : vector<128x128xf32> to vector<128x128xbf16>
    %cst_36 = arith.constant dense<0.000000e+00> : vector<128x128xf32>
    %48 = tpu.matmul %47, %16, %cst_36 {dimension_numbers = #tpu.dot_dimension_numbers<[1], [0], [0], [1], [0, 0, 1, 1], [], []>} : vector<128x128xbf16>, vector<128x128xbf16>, vector<128x128xf32> -> vector<128x128xf32>
    %49 = vector.broadcast %21 : vector<1x128xf32> to vector<128x128xf32>
    %50 = arith.addf %48, %49 : vector<128x128xf32>
    %cst_37 = arith.constant 0.000000e+00 : f32
    %51 = vector.broadcast %cst_37 : f32 to vector<128x128xf32>
    %52 = arith.maximumf %50, %51 : vector<128x128xf32>
    %53 = arith.truncf %52 : vector<128x128xf32> to vector<128x128xbf16>
    %cst_38 = arith.constant dense<0.000000e+00> : vector<128x128xf32>
    %54 = tpu.matmul %53, %18, %cst_38 {dimension_numbers = #tpu.dot_dimension_numbers<[1], [0], [0], [1], [0, 0, 1, 1], [], []>} : vector<128x128xbf16>, vector<128x128xbf16>, vector<128x128xf32> -> vector<128x128xf32>
    %55 = vector.broadcast %22 : vector<1x128xf32> to vector<128x128xf32>
    %56 = arith.addf %54, %55 : vector<128x128xf32>
    %cst_39 = arith.constant 0.000000e+00 : f32
    %57 = vector.broadcast %cst_39 : f32 to vector<128x128xf32>
    %58 = arith.maximumf %56, %57 : vector<128x128xf32>
    %c0_40 = arith.constant 0 : index
    %c0_41 = arith.constant 0 : index
    %59 = vector.load %arg10[%c0_40, %c0_41] : memref<256x128xf32, #tpu.memory_space<vmem>>, vector<128x128xf32>
    tpu.vector_store %arg10[%c0_40, %c0_41], %58 {strides = array<i32>} : memref<256x128xf32, #tpu.memory_space<vmem>>, vector<128x128xf32>,
    %60 = vector.extract_strided_slice %13 {offsets = [0, 0], sizes = [128, 1], strides = [1, 1]} : vector<256x1xf32> to vector<128x1xf32>
    %61 = vector.broadcast %60 : vector<128x1xf32> to vector<128x128xf32>
    %62 = arith.mulf %58, %61 : vector<128x128xf32>
    %cst_42 = arith.constant dense<0.000000e+00> : vector<128xf32>
    %63 = vector.multi_reduction <add>, %62, %cst_42 [0] : vector<128x128xf32> to vector<128xf32>
    %64 = vector.shape_cast %63 : vector<128xf32> to vector<1x128xf32>
    %65 = arith.addf %26, %64 : vector<1x128xf32>
    %66 = arith.mulf %62, %58 : vector<128x128xf32>
    %cst_43 = arith.constant dense<0.000000e+00> : vector<128xf32>
    %67 = vector.multi_reduction <add>, %66, %cst_43 [0] : vector<128x128xf32> to vector<128xf32>
    %68 = vector.shape_cast %67 : vector<128xf32> to vector<1x128xf32>
    %69 = arith.addf %27, %68 : vector<1x128xf32>
    %c1_i32_44 = arith.constant 1 : i32
    %c1_i32_45 = arith.constant 1 : i32
    %c1_i32_46 = arith.constant 1 : i32
    %c0_i32_47 = arith.constant 0 : i32
    %c0_i32_48 = arith.constant 0 : i32
    %70 = tpu.memref_slice %arg2[%c1_i32_44, %c0_i32_47, %c0_i32_48] : memref<2x128x256xbf16, #tpu.memory_space<any>> -> memref<1x128x256xbf16, #tpu.memory_space<any>>
    %71 = tpu.memref_squeeze %70 : memref<1x128x256xbf16, #tpu.memory_space<any>> -> memref<128x256xbf16, #tpu.memory_space<any>>
    %c0_i32_49 = arith.constant 0 : i32
    %c0_i32_50 = arith.constant 0 : i32
    %72 = tpu.memref_slice %arg9[%c1_i32_45, %c0_i32_49, %c0_i32_50] : memref<2x128x256xbf16, #tpu.memory_space<vmem>> -> memref<1x128x256xbf16, #tpu.memory_space<vmem>>
    %73 = tpu.memref_squeeze %72 : memref<1x128x256xbf16, #tpu.memory_space<vmem>> -> memref<128x256xbf16, #tpu.memory_space<vmem>>
    %74 = tpu.memref_slice %arg11[%c1_i32_46] : memref<2x!tpu.dma_semaphore, #tpu.memory_space<semaphore_mem>> -> memref<1x!tpu.dma_semaphore, #tpu.memory_space<semaphore_mem>>
    %75 = tpu.memref_squeeze %74 : memref<1x!tpu.dma_semaphore, #tpu.memory_space<semaphore_mem>> -> memref<!tpu.dma_semaphore, #tpu.memory_space<semaphore_mem>>
    tpu.wait_dma2 semaphore(%75 : memref<!tpu.dma_semaphore, #tpu.memory_space<semaphore_mem>>) src(%71 : memref<128x256xbf16, #tpu.memory_space<any>>) dst(%73 : memref<128x256xbf16, #tpu.memory_space<vmem>>)
    %c0_i32_51 = arith.constant 0 : i32
    %c0_i32_52 = arith.constant 0 : i32
    %c0_i32_53 = arith.constant 0 : i32
    %c0_i32_54 = arith.constant 0 : i32
    %c0_i32_55 = arith.constant 0 : i32
    %76 = tpu.memref_slice %arg2[%c0_i32_51, %c0_i32_54, %c0_i32_55] : memref<2x128x256xbf16, #tpu.memory_space<any>> -> memref<1x128x256xbf16, #tpu.memory_space<any>>
    %77 = tpu.memref_squeeze %76 : memref<1x128x256xbf16, #tpu.memory_space<any>> -> memref<128x256xbf16, #tpu.memory_space<any>>
    %c0_i32_56 = arith.constant 0 : i32
    %c0_i32_57 = arith.constant 0 : i32
    %78 = tpu.memref_slice %arg9[%c0_i32_52, %c0_i32_56, %c0_i32_57] : memref<2x128x256xbf16, #tpu.memory_space<vmem>> -> memref<1x128x256xbf16, #tpu.memory_space<vmem>>
    %79 = tpu.memref_squeeze %78 : memref<1x128x256xbf16, #tpu.memory_space<vmem>> -> memref<128x256xbf16, #tpu.memory_space<vmem>>
    %80 = tpu.memref_slice %arg11[%c0_i32_53] : memref<2x!tpu.dma_semaphore, #tpu.memory_space<semaphore_mem>> -> memref<1x!tpu.dma_semaphore, #tpu.memory_space<semaphore_mem>>
    %81 = tpu.memref_squeeze %80 : memref<1x!tpu.dma_semaphore, #tpu.memory_space<semaphore_mem>> -> memref<!tpu.dma_semaphore, #tpu.memory_space<semaphore_mem>>
    tpu.enqueue_dma source(%77 : memref<128x256xbf16, #tpu.memory_space<any>>) target(%79 : memref<128x256xbf16, #tpu.memory_space<vmem>>) target_semaphore(%81 : memref<!tpu.dma_semaphore, #tpu.memory_space<semaphore_mem>>)
    %c1_58 = arith.constant 1 : index
    %c0_59 = arith.constant 0 : index
    %c0_60 = arith.constant 0 : index
    %82 = vector.load %arg9[%c1_58, %c0_59, %c0_60] : memref<2x128x256xbf16, #tpu.memory_space<vmem>>, vector<1x128x256xbf16>
    %83 = vector.shape_cast %82 : vector<1x128x256xbf16> to vector<128x256xbf16>
    %cst_61 = arith.constant dense<0.000000e+00> : vector<128x128xf32>
    %84 = tpu.matmul %83, %25, %cst_61 {dimension_numbers = #tpu.dot_dimension_numbers<[1], [0], [0], [1], [0, 0, 1, 1], [], []>} : vector<128x256xbf16>, vector<256x128xbf16>, vector<128x128xf32> -> vector<128x128xf32>
    %85 = vector.extract_strided_slice %14 {offsets = [128, 0], sizes = [128, 128], strides = [1, 1]} : vector<256x128xf32> to vector<128x128xf32>
    %cst_62 = arith.constant 1.000000e+00 : f32
    %86 = vector.broadcast %cst_62 : f32 to vector<128x128xf32>
    %87 = arith.mulf %86, %85 : vector<128x128xf32>
    %88 = arith.addf %87, %84 : vector<128x128xf32>
    %89 = arith.truncf %88 : vector<128x128xf32> to vector<128x128xbf16>
    %cst_63 = arith.constant dense<0.000000e+00> : vector<128x128xf32>
    %90 = tpu.matmul %89, %16, %cst_63 {dimension_numbers = #tpu.dot_dimension_numbers<[1], [0], [0], [1], [0, 0, 1, 1], [], []>} : vector<128x128xbf16>, vector<128x128xbf16>, vector<128x128xf32> -> vector<128x128xf32>
    %91 = vector.broadcast %21 : vector<1x128xf32> to vector<128x128xf32>
    %92 = arith.addf %90, %91 : vector<128x128xf32>
    %cst_64 = arith.constant 0.000000e+00 : f32
    %93 = vector.broadcast %cst_64 : f32 to vector<128x128xf32>
    %94 = arith.maximumf %92, %93 : vector<128x128xf32>
    %95 = arith.truncf %94 : vector<128x128xf32> to vector<128x128xbf16>
    %cst_65 = arith.constant dense<0.000000e+00> : vector<128x128xf32>
    %96 = tpu.matmul %95, %18, %cst_65 {dimension_numbers = #tpu.dot_dimension_numbers<[1], [0], [0], [1], [0, 0, 1, 1], [], []>} : vector<128x128xbf16>, vector<128x128xbf16>, vector<128x128xf32> -> vector<128x128xf32>
    %97 = vector.broadcast %22 : vector<1x128xf32> to vector<128x128xf32>
    %98 = arith.addf %96, %97 : vector<128x128xf32>
    %cst_66 = arith.constant 0.000000e+00 : f32
    %99 = vector.broadcast %cst_66 : f32 to vector<128x128xf32>
    %100 = arith.maximumf %98, %99 : vector<128x128xf32>
    %c128 = arith.constant 128 : index
    %c0_67 = arith.constant 0 : index
    %101 = vector.load %arg10[%c128, %c0_67] : memref<256x128xf32, #tpu.memory_space<vmem>>, vector<128x128xf32>
    tpu.vector_store %arg10[%c128, %c0_67], %100 {strides = array<i32>} : memref<256x128xf32, #tpu.memory_space<vmem>>, vector<128x128xf32>,
    %102 = vector.extract_strided_slice %13 {offsets = [128, 0], sizes = [128, 1], strides = [1, 1]} : vector<256x1xf32> to vector<128x1xf32>
    %103 = vector.broadcast %102 : vector<128x1xf32> to vector<128x128xf32>
    %104 = arith.mulf %100, %103 : vector<128x128xf32>
    %cst_68 = arith.constant dense<0.000000e+00> : vector<128xf32>
    %105 = vector.multi_reduction <add>, %104, %cst_68 [0] : vector<128x128xf32> to vector<128xf32>
    %106 = vector.shape_cast %105 : vector<128xf32> to vector<1x128xf32>
    %107 = arith.addf %65, %106 : vector<1x128xf32>
    %108 = arith.mulf %104, %100 : vector<128x128xf32>
    %cst_69 = arith.constant dense<0.000000e+00> : vector<128xf32>
    %109 = vector.multi_reduction <add>, %108, %cst_69 [0] : vector<128x128xf32> to vector<128xf32>
    %110 = vector.shape_cast %109 : vector<128xf32> to vector<1x128xf32>
    %111 = arith.addf %69, %110 : vector<1x128xf32>
    %112 = vector.broadcast %8 : f32 to vector<1x128xf32>
    %113 = arith.mulf %107, %112 : vector<1x128xf32>
    %114 = vector.broadcast %8 : f32 to vector<1x128xf32>
    %115 = arith.mulf %111, %114 : vector<1x128xf32>
    %116 = arith.mulf %113, %113 : vector<1x128xf32>
    %117 = arith.subf %115, %116 : vector<1x128xf32>
    %c0_70 = arith.constant 0 : index
    %c0_71 = arith.constant 0 : index
    %118 = vector.load %arg10[%c0_70, %c0_71] : memref<256x128xf32, #tpu.memory_space<vmem>>, vector<256x128xf32>
    %119 = vector.broadcast %113 : vector<1x128xf32> to vector<256x128xf32>
    %120 = arith.subf %118, %119 : vector<256x128xf32>
    %cst_72 = arith.constant 9.99999974E-6 : f32
    %121 = vector.broadcast %cst_72 : f32 to vector<1x128xf32>
    %122 = arith.addf %117, %121 : vector<1x128xf32>
    %123 = math.rsqrt %122 : vector<1x128xf32>
    %124 = vector.broadcast %123 : vector<1x128xf32> to vector<256x128xf32>
    %125 = arith.mulf %120, %124 : vector<256x128xf32>
    %126 = vector.broadcast %23 : vector<1x128xf32> to vector<256x128xf32>
    %127 = arith.mulf %125, %126 : vector<256x128xf32>
    %128 = vector.broadcast %24 : vector<1x128xf32> to vector<256x128xf32>
    %129 = arith.addf %127, %128 : vector<256x128xf32>
    %cst_73 = arith.constant 0.000000e+00 : f32
    %130 = vector.broadcast %cst_73 : f32 to vector<256x128xf32>
    %131 = arith.maximumf %129, %130 : vector<256x128xf32>
    %c2 = arith.constant 2 : index
    %c0_74 = arith.constant 0 : index
    %c0_75 = arith.constant 0 : index
    %132 = vector.load %arg4[%c2, %c0_74, %c0_75] : memref<6x128x128xbf16, #tpu.memory_space<vmem>>, vector<1x128x128xbf16>
    %133 = vector.shape_cast %132 : vector<1x128x128xbf16> to vector<128x128xbf16>
    %c3 = arith.constant 3 : index
    %c0_76 = arith.constant 0 : index
    %c0_77 = arith.constant 0 : index
    %134 = vector.load %arg4[%c3, %c0_76, %c0_77] : memref<6x128x128xbf16, #tpu.memory_space<vmem>>, vector<1x128x128xbf16>
    %135 = vector.shape_cast %134 : vector<1x128x128xbf16> to vector<128x128xbf16>
    %c1_78 = arith.constant 1 : index
    %c0_79 = arith.constant 0 : index
    %c0_80 = arith.constant 0 : index
    %136 = vector.load %arg5[%c1_78, %c0_79, %c0_80] : memref<3x8x128xf32, #tpu.memory_space<vmem>>, vector<1x8x128xf32>
    %137 = vector.shape_cast %136 : vector<1x8x128xf32> to vector<8x128xf32>
    %138 = vector.extract_strided_slice %137 {offsets = [0, 0], sizes = [1, 128], strides = [1, 1]} : vector<8x128xf32> to vector<1x128xf32>
    %139 = vector.extract_strided_slice %137 {offsets = [1, 0], sizes = [1, 128], strides = [1, 1]} : vector<8x128xf32> to vector<1x128xf32>
    %140 = vector.extract_strided_slice %137 {offsets = [2, 0], sizes = [1, 128], strides = [1, 1]} : vector<8x128xf32> to vector<1x128xf32>
    %141 = vector.extract_strided_slice %137 {offsets = [3, 0], sizes = [1, 128], strides = [1, 1]} : vector<8x128xf32> to vector<1x128xf32>
    %142 = arith.truncf %131 : vector<256x128xf32> to vector<256x128xbf16>
    %cst_81 = arith.constant 0.000000e+00 : f32
    %143 = vector.broadcast %cst_81 : f32 to vector<1x128xf32>
    %cst_82 = arith.constant 0.000000e+00 : f32
    %144 = vector.broadcast %cst_82 : f32 to vector<1x128xf32>
    %c0_i32_83 = arith.constant 0 : i32
    %c0_i32_84 = arith.constant 0 : i32
    %c0_i32_85 = arith.constant 0 : i32
    %c0_i32_86 = arith.constant 0 : i32
    %c0_i32_87 = arith.constant 0 : i32
    %145 = tpu.memref_slice %arg2[%c0_i32_83, %c0_i32_86, %c0_i32_87] : memref<2x128x256xbf16, #tpu.memory_space<any>> -> memref<1x128x256xbf16, #tpu.memory_space<any>>
    %146 = tpu.memref_squeeze %145 : memref<1x128x256xbf16, #tpu.memory_space<any>> -> memref<128x256xbf16, #tpu.memory_space<any>>
    %c0_i32_88 = arith.constant 0 : i32
    %c0_i32_89 = arith.constant 0 : i32
    %147 = tpu.memref_slice %arg9[%c0_i32_84, %c0_i32_88, %c0_i32_89] : memref<2x128x256xbf16, #tpu.memory_space<vmem>> -> memref<1x128x256xbf16, #tpu.memory_space<vmem>>
    %148 = tpu.memref_squeeze %147 : memref<1x128x256xbf16, #tpu.memory_space<vmem>> -> memref<128x256xbf16, #tpu.memory_space<vmem>>
    %149 = tpu.memref_slice %arg11[%c0_i32_85] : memref<2x!tpu.dma_semaphore, #tpu.memory_space<semaphore_mem>> -> memref<1x!tpu.dma_semaphore, #tpu.memory_space<semaphore_mem>>
    %150 = tpu.memref_squeeze %149 : memref<1x!tpu.dma_semaphore, #tpu.memory_space<semaphore_mem>> -> memref<!tpu.dma_semaphore, #tpu.memory_space<semaphore_mem>>
    tpu.wait_dma2 semaphore(%150 : memref<!tpu.dma_semaphore, #tpu.memory_space<semaphore_mem>>) src(%146 : memref<128x256xbf16, #tpu.memory_space<any>>) dst(%148 : memref<128x256xbf16, #tpu.memory_space<vmem>>)
    %c1_i32_90 = arith.constant 1 : i32
    %c1_i32_91 = arith.constant 1 : i32
    %c1_i32_92 = arith.constant 1 : i32
    %c0_i32_93 = arith.constant 0 : i32
    %c0_i32_94 = arith.constant 0 : i32
    %151 = tpu.memref_slice %arg2[%c1_i32_90, %c0_i32_93, %c0_i32_94] : memref<2x128x256xbf16, #tpu.memory_space<any>> -> memref<1x128x256xbf16, #tpu.memory_space<any>>
    %152 = tpu.memref_squeeze %151 : memref<1x128x256xbf16, #tpu.memory_space<any>> -> memref<128x256xbf16, #tpu.memory_space<any>>
    %c0_i32_95 = arith.constant 0 : i32
    %c0_i32_96 = arith.constant 0 : i32
    %153 = tpu.memref_slice %arg9[%c1_i32_91, %c0_i32_95, %c0_i32_96] : memref<2x128x256xbf16, #tpu.memory_space<vmem>> -> memref<1x128x256xbf16, #tpu.memory_space<vmem>>
    %154 = tpu.memref_squeeze %153 : memref<1x128x256xbf16, #tpu.memory_space<vmem>> -> memref<128x256xbf16, #tpu.memory_space<vmem>>
    %155 = tpu.memref_slice %arg11[%c1_i32_92] : memref<2x!tpu.dma_semaphore, #tpu.memory_space<semaphore_mem>> -> memref<1x!tpu.dma_semaphore, #tpu.memory_space<semaphore_mem>>
    %156 = tpu.memref_squeeze %155 : memref<1x!tpu.dma_semaphore, #tpu.memory_space<semaphore_mem>> -> memref<!tpu.dma_semaphore, #tpu.memory_space<semaphore_mem>>
    tpu.enqueue_dma source(%152 : memref<128x256xbf16, #tpu.memory_space<any>>) target(%154 : memref<128x256xbf16, #tpu.memory_space<vmem>>) target_semaphore(%156 : memref<!tpu.dma_semaphore, #tpu.memory_space<semaphore_mem>>)
    %c0_97 = arith.constant 0 : index
    %c0_98 = arith.constant 0 : index
    %c0_99 = arith.constant 0 : index
    %157 = vector.load %arg9[%c0_97, %c0_98, %c0_99] : memref<2x128x256xbf16, #tpu.memory_space<vmem>>, vector<1x128x256xbf16>
    %158 = vector.shape_cast %157 : vector<1x128x256xbf16> to vector<128x256xbf16>
    %cst_100 = arith.constant dense<0.000000e+00> : vector<128x128xf32>
    %159 = tpu.matmul %158, %142, %cst_100 {dimension_numbers = #tpu.dot_dimension_numbers<[1], [0], [0], [1], [0, 0, 1, 1], [], []>} : vector<128x256xbf16>, vector<256x128xbf16>, vector<128x128xf32> -> vector<128x128xf32>
    %160 = vector.extract_strided_slice %131 {offsets = [0, 0], sizes = [128, 128], strides = [1, 1]} : vector<256x128xf32> to vector<128x128xf32>
    %cst_101 = arith.constant 1.000000e+00 : f32
    %161 = vector.broadcast %cst_101 : f32 to vector<128x128xf32>
    %162 = arith.mulf %161, %160 : vector<128x128xf32>
    %163 = arith.addf %162, %159 : vector<128x128xf32>
    %164 = arith.truncf %163 : vector<128x128xf32> to vector<128x128xbf16>
    %cst_102 = arith.constant dense<0.000000e+00> : vector<128x128xf32>
    %165 = tpu.matmul %164, %133, %cst_102 {dimension_numbers = #tpu.dot_dimension_numbers<[1], [0], [0], [1], [0, 0, 1, 1], [], []>} : vector<128x128xbf16>, vector<128x128xbf16>, vector<128x128xf32> -> vector<128x128xf32>
    %166 = vector.broadcast %138 : vector<1x128xf32> to vector<128x128xf32>
    %167 = arith.addf %165, %166 : vector<128x128xf32>
    %cst_103 = arith.constant 0.000000e+00 : f32
    %168 = vector.broadcast %cst_103 : f32 to vector<128x128xf32>
    %169 = arith.maximumf %167, %168 : vector<128x128xf32>
    %170 = arith.truncf %169 : vector<128x128xf32> to vector<128x128xbf16>
    %cst_104 = arith.constant dense<0.000000e+00> : vector<128x128xf32>
    %171 = tpu.matmul %170, %135, %cst_104 {dimension_numbers = #tpu.dot_dimension_numbers<[1], [0], [0], [1], [0, 0, 1, 1], [], []>} : vector<128x128xbf16>, vector<128x128xbf16>, vector<128x128xf32> -> vector<128x128xf32>
    %172 = vector.broadcast %139 : vector<1x128xf32> to vector<128x128xf32>
    %173 = arith.addf %171, %172 : vector<128x128xf32>
    %cst_105 = arith.constant 0.000000e+00 : f32
    %174 = vector.broadcast %cst_105 : f32 to vector<128x128xf32>
    %175 = arith.maximumf %173, %174 : vector<128x128xf32>
    %c0_106 = arith.constant 0 : index
    %c0_107 = arith.constant 0 : index
    %176 = vector.load %arg10[%c0_106, %c0_107] : memref<256x128xf32, #tpu.memory_space<vmem>>, vector<128x128xf32>
    tpu.vector_store %arg10[%c0_106, %c0_107], %175 {strides = array<i32>} : memref<256x128xf32, #tpu.memory_space<vmem>>, vector<128x128xf32>,
    %177 = vector.extract_strided_slice %13 {offsets = [0, 0], sizes = [128, 1], strides = [1, 1]} : vector<256x1xf32> to vector<128x1xf32>
    %178 = vector.broadcast %177 : vector<128x1xf32> to vector<128x128xf32>
    %179 = arith.mulf %175, %178 : vector<128x128xf32>
    %cst_108 = arith.constant dense<0.000000e+00> : vector<128xf32>
    %180 = vector.multi_reduction <add>, %179, %cst_108 [0] : vector<128x128xf32> to vector<128xf32>
    %181 = vector.shape_cast %180 : vector<128xf32> to vector<1x128xf32>
    %182 = arith.addf %143, %181 : vector<1x128xf32>
    %183 = arith.mulf %179, %175 : vector<128x128xf32>
    %cst_109 = arith.constant dense<0.000000e+00> : vector<128xf32>
    %184 = vector.multi_reduction <add>, %183, %cst_109 [0] : vector<128x128xf32> to vector<128xf32>
    %185 = vector.shape_cast %184 : vector<128xf32> to vector<1x128xf32>
    %186 = arith.addf %144, %185 : vector<1x128xf32>
    %c1_i32_110 = arith.constant 1 : i32
    %c1_i32_111 = arith.constant 1 : i32
    %c1_i32_112 = arith.constant 1 : i32
    %c0_i32_113 = arith.constant 0 : i32
    %c0_i32_114 = arith.constant 0 : i32
    %187 = tpu.memref_slice %arg2[%c1_i32_110, %c0_i32_113, %c0_i32_114] : memref<2x128x256xbf16, #tpu.memory_space<any>> -> memref<1x128x256xbf16, #tpu.memory_space<any>>
    %188 = tpu.memref_squeeze %187 : memref<1x128x256xbf16, #tpu.memory_space<any>> -> memref<128x256xbf16, #tpu.memory_space<any>>
    %c0_i32_115 = arith.constant 0 : i32
    %c0_i32_116 = arith.constant 0 : i32
    %189 = tpu.memref_slice %arg9[%c1_i32_111, %c0_i32_115, %c0_i32_116] : memref<2x128x256xbf16, #tpu.memory_space<vmem>> -> memref<1x128x256xbf16, #tpu.memory_space<vmem>>
    %190 = tpu.memref_squeeze %189 : memref<1x128x256xbf16, #tpu.memory_space<vmem>> -> memref<128x256xbf16, #tpu.memory_space<vmem>>
    %191 = tpu.memref_slice %arg11[%c1_i32_112] : memref<2x!tpu.dma_semaphore, #tpu.memory_space<semaphore_mem>> -> memref<1x!tpu.dma_semaphore, #tpu.memory_space<semaphore_mem>>
    %192 = tpu.memref_squeeze %191 : memref<1x!tpu.dma_semaphore, #tpu.memory_space<semaphore_mem>> -> memref<!tpu.dma_semaphore, #tpu.memory_space<semaphore_mem>>
    tpu.wait_dma2 semaphore(%192 : memref<!tpu.dma_semaphore, #tpu.memory_space<semaphore_mem>>) src(%188 : memref<128x256xbf16, #tpu.memory_space<any>>) dst(%190 : memref<128x256xbf16, #tpu.memory_space<vmem>>)
    %c0_i32_117 = arith.constant 0 : i32
    %c0_i32_118 = arith.constant 0 : i32
    %c0_i32_119 = arith.constant 0 : i32
    %c0_i32_120 = arith.constant 0 : i32
    %c0_i32_121 = arith.constant 0 : i32
    %193 = tpu.memref_slice %arg2[%c0_i32_117, %c0_i32_120, %c0_i32_121] : memref<2x128x256xbf16, #tpu.memory_space<any>> -> memref<1x128x256xbf16, #tpu.memory_space<any>>
    %194 = tpu.memref_squeeze %193 : memref<1x128x256xbf16, #tpu.memory_space<any>> -> memref<128x256xbf16, #tpu.memory_space<any>>
    %c0_i32_122 = arith.constant 0 : i32
    %c0_i32_123 = arith.constant 0 : i32
    %195 = tpu.memref_slice %arg9[%c0_i32_118, %c0_i32_122, %c0_i32_123] : memref<2x128x256xbf16, #tpu.memory_space<vmem>> -> memref<1x128x256xbf16, #tpu.memory_space<vmem>>
    %196 = tpu.memref_squeeze %195 : memref<1x128x256xbf16, #tpu.memory_space<vmem>> -> memref<128x256xbf16, #tpu.memory_space<vmem>>
    %197 = tpu.memref_slice %arg11[%c0_i32_119] : memref<2x!tpu.dma_semaphore, #tpu.memory_space<semaphore_mem>> -> memref<1x!tpu.dma_semaphore, #tpu.memory_space<semaphore_mem>>
    %198 = tpu.memref_squeeze %197 : memref<1x!tpu.dma_semaphore, #tpu.memory_space<semaphore_mem>> -> memref<!tpu.dma_semaphore, #tpu.memory_space<semaphore_mem>>
    tpu.enqueue_dma source(%194 : memref<128x256xbf16, #tpu.memory_space<any>>) target(%196 : memref<128x256xbf16, #tpu.memory_space<vmem>>) target_semaphore(%198 : memref<!tpu.dma_semaphore, #tpu.memory_space<semaphore_mem>>)
    %c1_124 = arith.constant 1 : index
    %c0_125 = arith.constant 0 : index
    %c0_126 = arith.constant 0 : index
    %199 = vector.load %arg9[%c1_124, %c0_125, %c0_126] : memref<2x128x256xbf16, #tpu.memory_space<vmem>>, vector<1x128x256xbf16>
    %200 = vector.shape_cast %199 : vector<1x128x256xbf16> to vector<128x256xbf16>
    %cst_127 = arith.constant dense<0.000000e+00> : vector<128x128xf32>
    %201 = tpu.matmul %200, %142, %cst_127 {dimension_numbers = #tpu.dot_dimension_numbers<[1], [0], [0], [1], [0, 0, 1, 1], [], []>} : vector<128x256xbf16>, vector<256x128xbf16>, vector<128x128xf32> -> vector<128x128xf32>
    %202 = vector.extract_strided_slice %131 {offsets = [128, 0], sizes = [128, 128], strides = [1, 1]} : vector<256x128xf32> to vector<128x128xf32>
    %cst_128 = arith.constant 1.000000e+00 : f32
    %203 = vector.broadcast %cst_128 : f32 to vector<128x128xf32>
    %204 = arith.mulf %203, %202 : vector<128x128xf32>
    %205 = arith.addf %204, %201 : vector<128x128xf32>
    %206 = arith.truncf %205 : vector<128x128xf32> to vector<128x128xbf16>
    %cst_129 = arith.constant dense<0.000000e+00> : vector<128x128xf32>
    %207 = tpu.matmul %206, %133, %cst_129 {dimension_numbers = #tpu.dot_dimension_numbers<[1], [0], [0], [1], [0, 0, 1, 1], [], []>} : vector<128x128xbf16>, vector<128x128xbf16>, vector<128x128xf32> -> vector<128x128xf32>
    %208 = vector.broadcast %138 : vector<1x128xf32> to vector<128x128xf32>
    %209 = arith.addf %207, %208 : vector<128x128xf32>
    %cst_130 = arith.constant 0.000000e+00 : f32
    %210 = vector.broadcast %cst_130 : f32 to vector<128x128xf32>
    %211 = arith.maximumf %209, %210 : vector<128x128xf32>
    %212 = arith.truncf %211 : vector<128x128xf32> to vector<128x128xbf16>
    %cst_131 = arith.constant dense<0.000000e+00> : vector<128x128xf32>
    %213 = tpu.matmul %212, %135, %cst_131 {dimension_numbers = #tpu.dot_dimension_numbers<[1], [0], [0], [1], [0, 0, 1, 1], [], []>} : vector<128x128xbf16>, vector<128x128xbf16>, vector<128x128xf32> -> vector<128x128xf32>
    %214 = vector.broadcast %139 : vector<1x128xf32> to vector<128x128xf32>
    %215 = arith.addf %213, %214 : vector<128x128xf32>
    %cst_132 = arith.constant 0.000000e+00 : f32
    %216 = vector.broadcast %cst_132 : f32 to vector<128x128xf32>
    %217 = arith.maximumf %215, %216 : vector<128x128xf32>
    %c128_133 = arith.constant 128 : index
    %c0_134 = arith.constant 0 : index
    %218 = vector.load %arg10[%c128_133, %c0_134] : memref<256x128xf32, #tpu.memory_space<vmem>>, vector<128x128xf32>
    tpu.vector_store %arg10[%c128_133, %c0_134], %217 {strides = array<i32>} : memref<256x128xf32, #tpu.memory_space<vmem>>, vector<128x128xf32>,
    %219 = vector.extract_strided_slice %13 {offsets = [128, 0], sizes = [128, 1], strides = [1, 1]} : vector<256x1xf32> to vector<128x1xf32>
    %220 = vector.broadcast %219 : vector<128x1xf32> to vector<128x128xf32>
    %221 = arith.mulf %217, %220 : vector<128x128xf32>
    %cst_135 = arith.constant dense<0.000000e+00> : vector<128xf32>
    %222 = vector.multi_reduction <add>, %221, %cst_135 [0] : vector<128x128xf32> to vector<128xf32>
    %223 = vector.shape_cast %222 : vector<128xf32> to vector<1x128xf32>
    %224 = arith.addf %182, %223 : vector<1x128xf32>
    %225 = arith.mulf %221, %217 : vector<128x128xf32>
    %cst_136 = arith.constant dense<0.000000e+00> : vector<128xf32>
    %226 = vector.multi_reduction <add>, %225, %cst_136 [0] : vector<128x128xf32> to vector<128xf32>
    %227 = vector.shape_cast %226 : vector<128xf32> to vector<1x128xf32>
    %228 = arith.addf %186, %227 : vector<1x128xf32>
    %229 = vector.broadcast %8 : f32 to vector<1x128xf32>
    %230 = arith.mulf %224, %229 : vector<1x128xf32>
    %231 = vector.broadcast %8 : f32 to vector<1x128xf32>
    %232 = arith.mulf %228, %231 : vector<1x128xf32>
    %233 = arith.mulf %230, %230 : vector<1x128xf32>
    %234 = arith.subf %232, %233 : vector<1x128xf32>
    %c0_137 = arith.constant 0 : index
    %c0_138 = arith.constant 0 : index
    %235 = vector.load %arg10[%c0_137, %c0_138] : memref<256x128xf32, #tpu.memory_space<vmem>>, vector<256x128xf32>
    %236 = vector.broadcast %230 : vector<1x128xf32> to vector<256x128xf32>
    %237 = arith.subf %235, %236 : vector<256x128xf32>
    %cst_139 = arith.constant 9.99999974E-6 : f32
    %238 = vector.broadcast %cst_139 : f32 to vector<1x128xf32>
    %239 = arith.addf %234, %238 : vector<1x128xf32>
    %240 = math.rsqrt %239 : vector<1x128xf32>
    %241 = vector.broadcast %240 : vector<1x128xf32> to vector<256x128xf32>
    %242 = arith.mulf %237, %241 : vector<256x128xf32>
    %243 = vector.broadcast %140 : vector<1x128xf32> to vector<256x128xf32>
    %244 = arith.mulf %242, %243 : vector<256x128xf32>
    %245 = vector.broadcast %141 : vector<1x128xf32> to vector<256x128xf32>
    %246 = arith.addf %244, %245 : vector<256x128xf32>
    %cst_140 = arith.constant 0.000000e+00 : f32
    %247 = vector.broadcast %cst_140 : f32 to vector<256x128xf32>
    %248 = arith.maximumf %246, %247 : vector<256x128xf32>
    %c4 = arith.constant 4 : index
    %c0_141 = arith.constant 0 : index
    %c0_142 = arith.constant 0 : index
    %249 = vector.load %arg4[%c4, %c0_141, %c0_142] : memref<6x128x128xbf16, #tpu.memory_space<vmem>>, vector<1x128x128xbf16>
    %250 = vector.shape_cast %249 : vector<1x128x128xbf16> to vector<128x128xbf16>
    %c5 = arith.constant 5 : index
    %c0_143 = arith.constant 0 : index
    %c0_144 = arith.constant 0 : index
    %251 = vector.load %arg4[%c5, %c0_143, %c0_144] : memref<6x128x128xbf16, #tpu.memory_space<vmem>>, vector<1x128x128xbf16>
    %252 = vector.shape_cast %251 : vector<1x128x128xbf16> to vector<128x128xbf16>
    %c2_145 = arith.constant 2 : index
    %c0_146 = arith.constant 0 : index
    %c0_147 = arith.constant 0 : index
    %253 = vector.load %arg5[%c2_145, %c0_146, %c0_147] : memref<3x8x128xf32, #tpu.memory_space<vmem>>, vector<1x8x128xf32>
    %254 = vector.shape_cast %253 : vector<1x8x128xf32> to vector<8x128xf32>
    %255 = vector.extract_strided_slice %254 {offsets = [0, 0], sizes = [1, 128], strides = [1, 1]} : vector<8x128xf32> to vector<1x128xf32>
    %256 = vector.extract_strided_slice %254 {offsets = [1, 0], sizes = [1, 128], strides = [1, 1]} : vector<8x128xf32> to vector<1x128xf32>
    %257 = vector.extract_strided_slice %254 {offsets = [2, 0], sizes = [1, 128], strides = [1, 1]} : vector<8x128xf32> to vector<1x128xf32>
    %258 = vector.extract_strided_slice %254 {offsets = [3, 0], sizes = [1, 128], strides = [1, 1]} : vector<8x128xf32> to vector<1x128xf32>
    %259 = arith.truncf %248 : vector<256x128xf32> to vector<256x128xbf16>
    %cst_148 = arith.constant 0.000000e+00 : f32
    %260 = vector.broadcast %cst_148 : f32 to vector<1x128xf32>
    %cst_149 = arith.constant 0.000000e+00 : f32
    %261 = vector.broadcast %cst_149 : f32 to vector<1x128xf32>
    %c0_i32_150 = arith.constant 0 : i32
    %c0_i32_151 = arith.constant 0 : i32
    %c0_i32_152 = arith.constant 0 : i32
    %c0_i32_153 = arith.constant 0 : i32
    %c0_i32_154 = arith.constant 0 : i32
    %262 = tpu.memref_slice %arg2[%c0_i32_150, %c0_i32_153, %c0_i32_154] : memref<2x128x256xbf16, #tpu.memory_space<any>> -> memref<1x128x256xbf16, #tpu.memory_space<any>>
    %263 = tpu.memref_squeeze %262 : memref<1x128x256xbf16, #tpu.memory_space<any>> -> memref<128x256xbf16, #tpu.memory_space<any>>
    %c0_i32_155 = arith.constant 0 : i32
    %c0_i32_156 = arith.constant 0 : i32
    %264 = tpu.memref_slice %arg9[%c0_i32_151, %c0_i32_155, %c0_i32_156] : memref<2x128x256xbf16, #tpu.memory_space<vmem>> -> memref<1x128x256xbf16, #tpu.memory_space<vmem>>
    %265 = tpu.memref_squeeze %264 : memref<1x128x256xbf16, #tpu.memory_space<vmem>> -> memref<128x256xbf16, #tpu.memory_space<vmem>>
    %266 = tpu.memref_slice %arg11[%c0_i32_152] : memref<2x!tpu.dma_semaphore, #tpu.memory_space<semaphore_mem>> -> memref<1x!tpu.dma_semaphore, #tpu.memory_space<semaphore_mem>>
    %267 = tpu.memref_squeeze %266 : memref<1x!tpu.dma_semaphore, #tpu.memory_space<semaphore_mem>> -> memref<!tpu.dma_semaphore, #tpu.memory_space<semaphore_mem>>
    tpu.wait_dma2 semaphore(%267 : memref<!tpu.dma_semaphore, #tpu.memory_space<semaphore_mem>>) src(%263 : memref<128x256xbf16, #tpu.memory_space<any>>) dst(%265 : memref<128x256xbf16, #tpu.memory_space<vmem>>)
    %c1_i32_157 = arith.constant 1 : i32
    %c1_i32_158 = arith.constant 1 : i32
    %c1_i32_159 = arith.constant 1 : i32
    %c0_i32_160 = arith.constant 0 : i32
    %c0_i32_161 = arith.constant 0 : i32
    %268 = tpu.memref_slice %arg2[%c1_i32_157, %c0_i32_160, %c0_i32_161] : memref<2x128x256xbf16, #tpu.memory_space<any>> -> memref<1x128x256xbf16, #tpu.memory_space<any>>
    %269 = tpu.memref_squeeze %268 : memref<1x128x256xbf16, #tpu.memory_space<any>> -> memref<128x256xbf16, #tpu.memory_space<any>>
    %c0_i32_162 = arith.constant 0 : i32
    %c0_i32_163 = arith.constant 0 : i32
    %270 = tpu.memref_slice %arg9[%c1_i32_158, %c0_i32_162, %c0_i32_163] : memref<2x128x256xbf16, #tpu.memory_space<vmem>> -> memref<1x128x256xbf16, #tpu.memory_space<vmem>>
    %271 = tpu.memref_squeeze %270 : memref<1x128x256xbf16, #tpu.memory_space<vmem>> -> memref<128x256xbf16, #tpu.memory_space<vmem>>
    %272 = tpu.memref_slice %arg11[%c1_i32_159] : memref<2x!tpu.dma_semaphore, #tpu.memory_space<semaphore_mem>> -> memref<1x!tpu.dma_semaphore, #tpu.memory_space<semaphore_mem>>
    %273 = tpu.memref_squeeze %272 : memref<1x!tpu.dma_semaphore, #tpu.memory_space<semaphore_mem>> -> memref<!tpu.dma_semaphore, #tpu.memory_space<semaphore_mem>>
    tpu.enqueue_dma source(%269 : memref<128x256xbf16, #tpu.memory_space<any>>) target(%271 : memref<128x256xbf16, #tpu.memory_space<vmem>>) target_semaphore(%273 : memref<!tpu.dma_semaphore, #tpu.memory_space<semaphore_mem>>)
    %c0_164 = arith.constant 0 : index
    %c0_165 = arith.constant 0 : index
    %c0_166 = arith.constant 0 : index
    %274 = vector.load %arg9[%c0_164, %c0_165, %c0_166] : memref<2x128x256xbf16, #tpu.memory_space<vmem>>, vector<1x128x256xbf16>
    %275 = vector.shape_cast %274 : vector<1x128x256xbf16> to vector<128x256xbf16>
    %cst_167 = arith.constant dense<0.000000e+00> : vector<128x128xf32>
    %276 = tpu.matmul %275, %259, %cst_167 {dimension_numbers = #tpu.dot_dimension_numbers<[1], [0], [0], [1], [0, 0, 1, 1], [], []>} : vector<128x256xbf16>, vector<256x128xbf16>, vector<128x128xf32> -> vector<128x128xf32>
    %277 = vector.extract_strided_slice %248 {offsets = [0, 0], sizes = [128, 128], strides = [1, 1]} : vector<256x128xf32> to vector<128x128xf32>
    %cst_168 = arith.constant 1.000000e+00 : f32
    %278 = vector.broadcast %cst_168 : f32 to vector<128x128xf32>
    %279 = arith.mulf %278, %277 : vector<128x128xf32>
    %280 = arith.addf %279, %276 : vector<128x128xf32>
    %281 = arith.truncf %280 : vector<128x128xf32> to vector<128x128xbf16>
    %cst_169 = arith.constant dense<0.000000e+00> : vector<128x128xf32>
    %282 = tpu.matmul %281, %250, %cst_169 {dimension_numbers = #tpu.dot_dimension_numbers<[1], [0], [0], [1], [0, 0, 1, 1], [], []>} : vector<128x128xbf16>, vector<128x128xbf16>, vector<128x128xf32> -> vector<128x128xf32>
    %283 = vector.broadcast %255 : vector<1x128xf32> to vector<128x128xf32>
    %284 = arith.addf %282, %283 : vector<128x128xf32>
    %cst_170 = arith.constant 0.000000e+00 : f32
    %285 = vector.broadcast %cst_170 : f32 to vector<128x128xf32>
    %286 = arith.maximumf %284, %285 : vector<128x128xf32>
    %287 = arith.truncf %286 : vector<128x128xf32> to vector<128x128xbf16>
    %cst_171 = arith.constant dense<0.000000e+00> : vector<128x128xf32>
    %288 = tpu.matmul %287, %252, %cst_171 {dimension_numbers = #tpu.dot_dimension_numbers<[1], [0], [0], [1], [0, 0, 1, 1], [], []>} : vector<128x128xbf16>, vector<128x128xbf16>, vector<128x128xf32> -> vector<128x128xf32>
    %289 = vector.broadcast %256 : vector<1x128xf32> to vector<128x128xf32>
    %290 = arith.addf %288, %289 : vector<128x128xf32>
    %cst_172 = arith.constant 0.000000e+00 : f32
    %291 = vector.broadcast %cst_172 : f32 to vector<128x128xf32>
    %292 = arith.maximumf %290, %291 : vector<128x128xf32>
    %c0_173 = arith.constant 0 : index
    %c0_174 = arith.constant 0 : index
    %293 = vector.load %arg10[%c0_173, %c0_174] : memref<256x128xf32, #tpu.memory_space<vmem>>, vector<128x128xf32>
    tpu.vector_store %arg10[%c0_173, %c0_174], %292 {strides = array<i32>} : memref<256x128xf32, #tpu.memory_space<vmem>>, vector<128x128xf32>,
    %294 = vector.extract_strided_slice %13 {offsets = [0, 0], sizes = [128, 1], strides = [1, 1]} : vector<256x1xf32> to vector<128x1xf32>
    %295 = vector.broadcast %294 : vector<128x1xf32> to vector<128x128xf32>
    %296 = arith.mulf %292, %295 : vector<128x128xf32>
    %cst_175 = arith.constant dense<0.000000e+00> : vector<128xf32>
    %297 = vector.multi_reduction <add>, %296, %cst_175 [0] : vector<128x128xf32> to vector<128xf32>
    %298 = vector.shape_cast %297 : vector<128xf32> to vector<1x128xf32>
    %299 = arith.addf %260, %298 : vector<1x128xf32>
    %300 = arith.mulf %296, %292 : vector<128x128xf32>
    %cst_176 = arith.constant dense<0.000000e+00> : vector<128xf32>
    %301 = vector.multi_reduction <add>, %300, %cst_176 [0] : vector<128x128xf32> to vector<128xf32>
    %302 = vector.shape_cast %301 : vector<128xf32> to vector<1x128xf32>
    %303 = arith.addf %261, %302 : vector<1x128xf32>
    %c1_i32_177 = arith.constant 1 : i32
    %c1_i32_178 = arith.constant 1 : i32
    %c1_i32_179 = arith.constant 1 : i32
    %c0_i32_180 = arith.constant 0 : i32
    %c0_i32_181 = arith.constant 0 : i32
    %304 = tpu.memref_slice %arg2[%c1_i32_177, %c0_i32_180, %c0_i32_181] : memref<2x128x256xbf16, #tpu.memory_space<any>> -> memref<1x128x256xbf16, #tpu.memory_space<any>>
    %305 = tpu.memref_squeeze %304 : memref<1x128x256xbf16, #tpu.memory_space<any>> -> memref<128x256xbf16, #tpu.memory_space<any>>
    %c0_i32_182 = arith.constant 0 : i32
    %c0_i32_183 = arith.constant 0 : i32
    %306 = tpu.memref_slice %arg9[%c1_i32_178, %c0_i32_182, %c0_i32_183] : memref<2x128x256xbf16, #tpu.memory_space<vmem>> -> memref<1x128x256xbf16, #tpu.memory_space<vmem>>
    %307 = tpu.memref_squeeze %306 : memref<1x128x256xbf16, #tpu.memory_space<vmem>> -> memref<128x256xbf16, #tpu.memory_space<vmem>>
    %308 = tpu.memref_slice %arg11[%c1_i32_179] : memref<2x!tpu.dma_semaphore, #tpu.memory_space<semaphore_mem>> -> memref<1x!tpu.dma_semaphore, #tpu.memory_space<semaphore_mem>>
    %309 = tpu.memref_squeeze %308 : memref<1x!tpu.dma_semaphore, #tpu.memory_space<semaphore_mem>> -> memref<!tpu.dma_semaphore, #tpu.memory_space<semaphore_mem>>
    tpu.wait_dma2 semaphore(%309 : memref<!tpu.dma_semaphore, #tpu.memory_space<semaphore_mem>>) src(%305 : memref<128x256xbf16, #tpu.memory_space<any>>) dst(%307 : memref<128x256xbf16, #tpu.memory_space<vmem>>)
    %c1_184 = arith.constant 1 : index
    %c0_185 = arith.constant 0 : index
    %c0_186 = arith.constant 0 : index
    %310 = vector.load %arg9[%c1_184, %c0_185, %c0_186] : memref<2x128x256xbf16, #tpu.memory_space<vmem>>, vector<1x128x256xbf16>
    %311 = vector.shape_cast %310 : vector<1x128x256xbf16> to vector<128x256xbf16>
    %cst_187 = arith.constant dense<0.000000e+00> : vector<128x128xf32>
    %312 = tpu.matmul %311, %259, %cst_187 {dimension_numbers = #tpu.dot_dimension_numbers<[1], [0], [0], [1], [0, 0, 1, 1], [], []>} : vector<128x256xbf16>, vector<256x128xbf16>, vector<128x128xf32> -> vector<128x128xf32>
    %313 = vector.extract_strided_slice %248 {offsets = [128, 0], sizes = [128, 128], strides = [1, 1]} : vector<256x128xf32> to vector<128x128xf32>
    %cst_188 = arith.constant 1.000000e+00 : f32
    %314 = vector.broadcast %cst_188 : f32 to vector<128x128xf32>
    %315 = arith.mulf %314, %313 : vector<128x128xf32>
    %316 = arith.addf %315, %312 : vector<128x128xf32>
    %317 = arith.truncf %316 : vector<128x128xf32> to vector<128x128xbf16>
    %cst_189 = arith.constant dense<0.000000e+00> : vector<128x128xf32>
    %318 = tpu.matmul %317, %250, %cst_189 {dimension_numbers = #tpu.dot_dimension_numbers<[1], [0], [0], [1], [0, 0, 1, 1], [], []>} : vector<128x128xbf16>, vector<128x128xbf16>, vector<128x128xf32> -> vector<128x128xf32>
    %319 = vector.broadcast %255 : vector<1x128xf32> to vector<128x128xf32>
    %320 = arith.addf %318, %319 : vector<128x128xf32>
    %cst_190 = arith.constant 0.000000e+00 : f32
    %321 = vector.broadcast %cst_190 : f32 to vector<128x128xf32>
    %322 = arith.maximumf %320, %321 : vector<128x128xf32>
    %323 = arith.truncf %322 : vector<128x128xf32> to vector<128x128xbf16>
    %cst_191 = arith.constant dense<0.000000e+00> : vector<128x128xf32>
    %324 = tpu.matmul %323, %252, %cst_191 {dimension_numbers = #tpu.dot_dimension_numbers<[1], [0], [0], [1], [0, 0, 1, 1], [], []>} : vector<128x128xbf16>, vector<128x128xbf16>, vector<128x128xf32> -> vector<128x128xf32>
    %325 = vector.broadcast %256 : vector<1x128xf32> to vector<128x128xf32>
    %326 = arith.addf %324, %325 : vector<128x128xf32>
    %cst_192 = arith.constant 0.000000e+00 : f32
    %327 = vector.broadcast %cst_192 : f32 to vector<128x128xf32>
    %328 = arith.maximumf %326, %327 : vector<128x128xf32>
    %c128_193 = arith.constant 128 : index
    %c0_194 = arith.constant 0 : index
    %329 = vector.load %arg10[%c128_193, %c0_194] : memref<256x128xf32, #tpu.memory_space<vmem>>, vector<128x128xf32>
    tpu.vector_store %arg10[%c128_193, %c0_194], %328 {strides = array<i32>} : memref<256x128xf32, #tpu.memory_space<vmem>>, vector<128x128xf32>,
    %330 = vector.extract_strided_slice %13 {offsets = [128, 0], sizes = [128, 1], strides = [1, 1]} : vector<256x1xf32> to vector<128x1xf32>
    %331 = vector.broadcast %330 : vector<128x1xf32> to vector<128x128xf32>
    %332 = arith.mulf %328, %331 : vector<128x128xf32>
    %cst_195 = arith.constant dense<0.000000e+00> : vector<128xf32>
    %333 = vector.multi_reduction <add>, %332, %cst_195 [0] : vector<128x128xf32> to vector<128xf32>
    %334 = vector.shape_cast %333 : vector<128xf32> to vector<1x128xf32>
    %335 = arith.addf %299, %334 : vector<1x128xf32>
    %336 = arith.mulf %332, %328 : vector<128x128xf32>
    %cst_196 = arith.constant dense<0.000000e+00> : vector<128xf32>
    %337 = vector.multi_reduction <add>, %336, %cst_196 [0] : vector<128x128xf32> to vector<128xf32>
    %338 = vector.shape_cast %337 : vector<128xf32> to vector<1x128xf32>
    %339 = arith.addf %303, %338 : vector<1x128xf32>
    %340 = vector.broadcast %8 : f32 to vector<1x128xf32>
    %341 = arith.mulf %335, %340 : vector<1x128xf32>
    %342 = vector.broadcast %8 : f32 to vector<1x128xf32>
    %343 = arith.mulf %339, %342 : vector<1x128xf32>
    %344 = arith.mulf %341, %341 : vector<1x128xf32>
    %345 = arith.subf %343, %344 : vector<1x128xf32>
    %c0_197 = arith.constant 0 : index
    %c0_198 = arith.constant 0 : index
    %346 = vector.load %arg10[%c0_197, %c0_198] : memref<256x128xf32, #tpu.memory_space<vmem>>, vector<256x128xf32>
    %347 = vector.broadcast %341 : vector<1x128xf32> to vector<256x128xf32>
    %348 = arith.subf %346, %347 : vector<256x128xf32>
    %cst_199 = arith.constant 9.99999974E-6 : f32
    %349 = vector.broadcast %cst_199 : f32 to vector<1x128xf32>
    %350 = arith.addf %345, %349 : vector<1x128xf32>
    %351 = math.rsqrt %350 : vector<1x128xf32>
    %352 = vector.broadcast %351 : vector<1x128xf32> to vector<256x128xf32>
    %353 = arith.mulf %348, %352 : vector<256x128xf32>
    %354 = vector.broadcast %257 : vector<1x128xf32> to vector<256x128xf32>
    %355 = arith.mulf %353, %354 : vector<256x128xf32>
    %356 = vector.broadcast %258 : vector<1x128xf32> to vector<256x128xf32>
    %357 = arith.addf %355, %356 : vector<256x128xf32>
    %cst_200 = arith.constant 0.000000e+00 : f32
    %358 = vector.broadcast %cst_200 : f32 to vector<256x128xf32>
    %359 = arith.maximumf %357, %358 : vector<256x128xf32>
    %c0_201 = arith.constant 0 : index
    %c0_202 = arith.constant 0 : index
    %360 = vector.load %arg3[%c0_201, %c0_202] : memref<8x256xf32, #tpu.memory_space<vmem>>, vector<8x256xf32>
    %cst_203 = arith.constant dense<0.000000e+00> : vector<8x128xf32>
    %361 = tpu.matmul %360, %359, %cst_203 {dimension_numbers = #tpu.dot_dimension_numbers<[1], [0], [0], [1], [0, 0, 1, 1], [], []>} : vector<8x256xf32>, vector<256x128xf32>, vector<8x128xf32> -> vector<8x128xf32>
    %c0_204 = arith.constant 0 : index
    %c0_205 = arith.constant 0 : index
    %362 = vector.load %arg6[%c0_204, %c0_205] : memref<128x128xf32, #tpu.memory_space<vmem>>, vector<128x128xf32>
    %cst_206 = arith.constant dense<0.000000e+00> : vector<8x128xf32>
    %363 = tpu.matmul %361, %362, %cst_206 {dimension_numbers = #tpu.dot_dimension_numbers<[1], [0], [0], [1], [0, 0, 1, 1], [], []>} : vector<8x128xf32>, vector<128x128xf32>, vector<8x128xf32> -> vector<8x128xf32>
    %c0_207 = arith.constant 0 : index
    %c0_208 = arith.constant 0 : index
    %364 = vector.load %arg7[%c0_207, %c0_208] : memref<1x128xf32, #tpu.memory_space<vmem>>, vector<1x128xf32>
    %365 = vector.broadcast %364 : vector<1x128xf32> to vector<8x128xf32>
    %366 = arith.addf %363, %365 : vector<8x128xf32>
    %c0_209 = arith.constant 0 : index
    %c0_210 = arith.constant 0 : index
    %367 = vector.load %arg8[%c0_209, %c0_210] : memref<8x128xf32, #tpu.memory_space<vmem>>, vector<8x128xf32>
    tpu.vector_store %arg8[%c0_209, %c0_210], %366 {strides = array<i32>} : memref<8x128xf32, #tpu.memory_space<vmem>>, vector<8x128xf32>,
    return
  }
}

</mosaic_0001>

<bundles_post_ra>
// kernel: gin_forward.1
= control target key start
LH: loop header
LB: loop body
LE: loop exit
PB: predicated region body
PF: predicated region fallthrough
CT: control target
= control target key end

     0   :  { %s10807_s0 = inlined_call_operand.<no memory space> [shape: s32[1], index: 0, kind: input, shape index: {}]   ;;  %s10808_s1 = inlined_call_operand.vmem [shape: f32[256,128], index: 1, kind: input, shape index: {}]   ;;  %s10809_s2 = inlined_call_operand.vmem [shape: bf16[2,128,256], index: 2, kind: input, shape index: {}]   ;;  %s10810_s3 = inlined_call_operand.vmem [shape: f32[8,256], index: 3, kind: input, shape index: {}]   ;;  %s10811_s4 = inlined_call_operand.vmem [shape: bf16[6,128,128], index: 4, kind: input, shape index: {}]   ;;  %s10812_s5 = inlined_call_operand.vmem [shape: f32[3,8,128], index: 5, kind: input, shape index: {}]   ;;  %s10813_s6 = inlined_call_operand.vmem [shape: f32[128,128], index: 6, kind: input, shape index: {}]   ;;  %s10814_s7 = inlined_call_operand.vmem [shape: f32[1,128], index: 7, kind: input, shape index: {}]   ;;  %s10815_s8 = inlined_call_operand.vmem [shape: f32[8,128], index: 8, kind: output, shape index: {}]  }
   0x1   :  { %v46_v0 = vld [vmem:[%s10809_s2] sm:$0xf]  ;;  %v48_v1 = vld [vmem:[%s10809_s2 + $0x8] sm:$0xf]  ;;  %v50_v2 = vld [vmem:[%s10809_s2 + $0x4] sm:$0xf] }
   0x2   :  { %47 = vst [vmem:[#allocation2] sm:$0xf] %v46_v0  ;;  %49 = vst [vmem:[#allocation2 + $0x4] sm:$0xf] %v48_v1  ;;  %v52_v3 = vld [vmem:[%s10809_s2 + $0xc] sm:$0xff]   ;;  %v60_v6 = vld [vmem:[%s10809_s2 + $0x1c] sm:$0xff]  }
   0x3   :  { %51 = vst [vmem:[#allocation2 + $0x8] sm:$0xf] %v50_v2  ;;  %v56_v4 = vld [vmem:[%s10809_s2 + $0x18] sm:$0xf]  ;;  %v58_v5 = vld [vmem:[%s10809_s2 + $0x14] sm:$0xf] }
   0x4   :  { %53 = vst [vmem:[#allocation2 + $0xc] sm:$0xff] %v52_v3   ;;  %57 = vst [vmem:[#allocation2 + $0x14] sm:$0xf] %v56_v4  ;;  %v64_v7 = vld [vmem:[%s10809_s2 + $0x28] sm:$0xf]  ;;  %v68_v9 = vld [vmem:[%s10809_s2 + $0x2c] sm:$0xff]  }
   0x5   :  { %59 = vst [vmem:[#allocation2 + $0x18] sm:$0xf] %v58_v5  ;;  %v66_v8 = vld [vmem:[%s10809_s2 + $0x24] sm:$0xf]  ;;  %61 = vst [vmem:[#allocation2 + $0x1c] sm:$0xff] %v60_v6   ;;  %v76_v12 = vld [vmem:[%s10809_s2 + $0x3c] sm:$0xff]  }
   0x6   :  { %65 = vst [vmem:[#allocation2 + $0x24] sm:$0xf] %v64_v7  ;;  %67 = vst [vmem:[#allocation2 + $0x28] sm:$0xf] %v66_v8  ;;  %v72_v10 = vld [vmem:[%s10809_s2 + $0x38] sm:$0xf] }
   0x7   :  { %v74_v11 = vld [vmem:[%s10809_s2 + $0x34] sm:$0xf]  ;;  %69 = vst [vmem:[#allocation2 + $0x2c] sm:$0xff] %v68_v9   ;;  %73 = vst [vmem:[#allocation2 + $0x34] sm:$0xf] %v72_v10  ;;  %v84_v15 = vld [vmem:[%s10809_s2 + $0x4c] sm:$0xff]  }
   0x8   :  { %75 = vst [vmem:[#allocation2 + $0x38] sm:$0xf] %v74_v11  ;;  %v80_v13 = vld [vmem:[%s10809_s2 + $0x48] sm:$0xf]  ;;  %v82_v14 = vld [vmem:[%s10809_s2 + $0x44] sm:$0xf] }
   0x9   :  { %77 = vst [vmem:[#allocation2 + $0x3c] sm:$0xff] %v76_v12   ;;  %81 = vst [vmem:[#allocation2 + $0x44] sm:$0xf] %v80_v13  ;;  %v88_v16 = vld [vmem:[%s10809_s2 + $0x58] sm:$0xf]  ;;  %v92_v18 = vld [vmem:[%s10809_s2 + $0x5c] sm:$0xff]  }
   0xa   :  { %83 = vst [vmem:[#allocation2 + $0x48] sm:$0xf] %v82_v14  ;;  %v90_v17 = vld [vmem:[%s10809_s2 + $0x54] sm:$0xf]  ;;  %85 = vst [vmem:[#allocation2 + $0x4c] sm:$0xff] %v84_v15   ;;  %v100_v21 = vld [vmem:[%s10809_s2 + $0x6c] sm:$0xff]  }
   0xb   :  { %89 = vst [vmem:[#allocation2 + $0x54] sm:$0xf] %v88_v16  ;;  %91 = vst [vmem:[#allocation2 + $0x58] sm:$0xf] %v90_v17  ;;  %v96_v19 = vld [vmem:[%s10809_s2 + $0x68] sm:$0xf] }
   0xc   :  { %v98_v20 = vld [vmem:[%s10809_s2 + $0x64] sm:$0xf]  ;;  %93 = vst [vmem:[#allocation2 + $0x5c] sm:$0xff] %v92_v18   ;;  %97 = vst [vmem:[#allocation2 + $0x64] sm:$0xf] %v96_v19 }
   0xd   :  { %99 = vst [vmem:[#allocation2 + $0x68] sm:$0xf] %v98_v20  ;;  %v104_v22 = vld [vmem:[%s10809_s2 + $0x78] sm:$0xf]  ;;  %v106_v23 = vld [vmem:[%s10809_s2 + $0x74] sm:$0xf] }
   0xe   :  { %101 = vst [vmem:[#allocation2 + $0x6c] sm:$0xff] %v100_v21   ;;  %105 = vst [vmem:[#allocation2 + $0x74] sm:$0xf] %v104_v22  ;;  %v108_v24 = vld [vmem:[%s10809_s2 + $0x7c] sm:$0xf] }
   0xf   :  { %107 = vst [vmem:[#allocation2 + $0x78] sm:$0xf] %v106_v23  ;;  %109 = vst [vmem:[#allocation2 + $0x7c] sm:$0xf] %v108_v24 }
  0x10   :  { %204 = vsyncadd [#allocation4], 2048  ;;  %s206_s13 = scvt.s32.f32 %s10807_s0  ;;  %v210_v25 = vlaneseq  ;;  %v7019_v26 = vld [vmem:[%s10808_s1] sm:$0xff]  ;;  %v7024_v27 = vld [vmem:[%s10808_s1 + $0x8] sm:$0xff]  ;;  %v7029_v28 = vstv %s10807_s0 }
  0x11   :  { %v7034_v29 = vld [vmem:[%s10808_s1 + $0x10] sm:$0xff]  ;;  %v7039_v30 = vld [vmem:[%s10808_s1 + $0x18] sm:$0xff]  ;;  %v7044_v31 = vld [vmem:[%s10808_s1 + $0x20] sm:$0xff]  ;;  %v7048_v32 = vpack.c.bf16 %v7024_v27, %v7019_v26 }
  0x12   :  { %11003 = vst [vmem:[#allocation18_spill] sm:$0xff] %v7044_v31  ;;  %v207_v33 = vstv %s206_s13  ;;  %v7050_v34 = vshrl.u32 %v210_v25, 7  ;;  %v7055_v35 = vld [vmem:[%s10808_s1 + $0x28] sm:$0xff]  ;;  %v7060_v36 = vld [vmem:[%s10808_s1 + $0x30] sm:$0xff]  ;;  %v7065_v37 = vld [vmem:[%s10808_s1 + $0x38] sm:$0xff]  ;;  %v7069_v38 = vpack.c.bf16 %v7039_v30, %v7034_v29 }
  0x13   :  { %11005 = vst [vmem:[#allocation20_spill] sm:$0xff] %v7055_v35  ;;  %11006 = vst [vmem:[#allocation21_spill] sm:$0xff] %v7060_v36  ;;  %6870 = vrcp.f32 %v207_v33  ;;  %v7073_v39 = vpack.c.bf16 %v7055_v35, %v7044_v31  ;;  %v7077_v40 = vpack.c.bf16 %v7065_v37, %v7060_v36  ;;  %v7193_v9 = vld [vmem:[%s10811_s4] sm:$0xf]  ;;  %v7198_v10 = vld [vmem:[%s10811_s4 + $0x4] sm:$0xf] }
  0x14   :  { %11004 = vst [vmem:[#allocation19_spill] sm:$0xff] %v7050_v34  ;;  %11007 = vst [vmem:[#allocation22_spill] sm:$0xff] %v7065_v37  ;;  %v7080_v41 = vadd.s32 8, %v7050_v34  ;;  %v7083_v42 = vadd.s32 16, %v7050_v34  ;;  %v7086_v43 = vadd.s32 24, %v7050_v34  ;;  %v7089_v44 = vadd.s32 32, %v7050_v34 }
  0x15   :  { %v7092_v45 = vadd.s32 40, %v7050_v34  ;;  %v7095_v46 = vadd.s32 48, %v7050_v34  ;;  %v7098_v47 = vadd.s32 56, %v7050_v34  ;;  %v7101_v48 = vadd.s32 64, %v7050_v34  ;;  %v7211_v11 = vld [vmem:[%s10811_s4 + $0x8] sm:$0xf] }
  0x16   :  { %v7104_v49 = vadd.s32 72, %v7050_v34  ;;  %v7107_v50 = vadd.s32 80, %v7050_v34  ;;  %v7110_v51 = vadd.s32 88, %v7050_v34  ;;  %v7113_v52 = vadd.s32 96, %v7050_v34  ;;  %v7216_v12 = vld [vmem:[%s10811_s4 + $0xc] sm:$0xf] }
  0x17   :  { %v7116_v53 = vadd.s32 104, %v7050_v34  ;;  %v7119_v54 = vadd.s32 112, %v7050_v34  ;;  %v7122_v55 = vadd.s32 120, %v7050_v34  ;;  %v7125_v56 = vadd.s32 128, %v7050_v34  ;;  %v7221_v13 = vld [vmem:[%s10811_s4 + $0x10] sm:$0xf] }
  0x18   :  { %v7128_v57 = vadd.s32 136, %v7050_v34  ;;  %v7131_v58 = vadd.s32 144, %v7050_v34  ;;  %v7134_v59 = vadd.s32 152, %v7050_v34  ;;  %v7137_v60 = vadd.s32 160, %v7050_v34  ;;  %v7234_v14 = vld [vmem:[%s10811_s4 + $0x14] sm:$0xf] }
  0x19   :  { %v7140_v61 = vadd.s32 168, %v7050_v34  ;;  %v7143_v62 = vadd.s32 176, %v7050_v34  ;;  %v7146_v63 = vadd.s32 184, %v7050_v34  ;;  %v7149_v0 = vadd.s32 192, %v7050_v34  ;;  %v7239_v15 = vld [vmem:[%s10811_s4 + $0x18] sm:$0xf] }
  0x1a   :  { %v7152_v1 = vadd.s32 200, %v7050_v34  ;;  %v7155_v2 = vadd.s32 208, %v7050_v34  ;;  %v7158_v3 = vadd.s32 216, %v7050_v34  ;;  %v7161_v4 = vadd.s32 224, %v7050_v34  ;;  %v7244_v16 = vld [vmem:[%s10811_s4 + $0x1c] sm:$0xf] }
  0x1b   :  { %v7164_v5 = vadd.s32 232, %v7050_v34  ;;  %v7167_v6 = vadd.s32 240, %v7050_v34  ;;  %v7170_v7 = vadd.s32 248, %v7050_v34  ;;  %vm244_vm0 = vcmp.lt.s32.totalorder %v7050_v34, %v7029_v28  ;;  %v7257_v17 = vld [vmem:[%s10811_s4 + $0x20] sm:$0xf] }
  0x1c   :  { %vm245_vm1 = vcmp.lt.s32.totalorder %v7080_v41, %v7029_v28  ;;  %vm246_vm2 = vcmp.lt.s32.totalorder %v7083_v42, %v7029_v28  ;;  %vm247_vm3 = vcmp.lt.s32.totalorder %v7086_v43, %v7029_v28  ;;  %vm248_vm4 = vcmp.lt.s32.totalorder %v7089_v44, %v7029_v28  ;;  %v7262_v18 = vld [vmem:[%s10811_s4 + $0x24] sm:$0xf]  ;;  %v7267_v19 = vld [vmem:[%s10811_s4 + $0x28] sm:$0xf]  ;;  %v7280_v20 = vld [vmem:[%s10811_s4 + $0x2c] sm:$0xf] }
  0x1d   :  { %v6871_v8 = vpop.eup %6870  ;;  %vm249_vm5 = vcmp.lt.s32.totalorder %v7092_v45, %v7029_v28  ;;  %vm250_vm6 = vcmp.lt.s32.totalorder %v7095_v46, %v7029_v28  ;;  %vm251_vm7 = vcmp.lt.s32.totalorder %v7098_v47, %v7029_v28  ;;  %vm252_vm8 = vcmp.lt.s32.totalorder %v7101_v48, %v7029_v28  ;;  %v7285_v21 = vld [vmem:[%s10811_s4 + $0x30] sm:$0xf]  ;;  %v7290_v22 = vld [vmem:[%s10811_s4 + $0x34] sm:$0xf]  ;;  %v7303_v23 = vld [vmem:[%s10811_s4 + $0x38] sm:$0xf] }
  0x1e   :  { %6865 = vpush %v6871_v8  ;;  %vm253_vm9 = vcmp.lt.s32.totalorder %v7104_v49, %v7029_v28  ;;  %vm254_vm10 = vcmp.lt.s32.totalorder %v7107_v50, %v7029_v28  ;;  %vm255_vm11 = vcmp.lt.s32.totalorder %v7110_v51, %v7029_v28  ;;  %vm269_vm12 = vcmp.lt.s32.totalorder %v7152_v1, %v7029_v28  ;;  %v7308_v24 = vld [vmem:[%s10811_s4 + $0x3c] sm:$0xf]  ;;  %v7313_v25 = vld [vmem:[%s10811_s4 + $0x40] sm:$0xf]  ;;  %v7330_v37 = vld [vmem:[%s10811_s4 + $0x44] sm:$0xf] }
  0x1f   :  { %vm273_vm13 = vcmp.lt.s32.totalorder %v7164_v5, %v7029_v28  ;;  %vm274_vm14 = vcmp.lt.s32.totalorder %v7167_v6, %v7029_v28  ;;  %vm275_vm15 = vcmp.lt.s32.totalorder %v7170_v7, %v7029_v28  ;;  %v10829_v33 = vmov 0.0   ;;  %v7335_v36 = vld [vmem:[%s10811_s4 + $0x48] sm:$0xf]  ;;  %v7340_v35 = vld [vmem:[%s10812_s5] sm:$0xff]  ;;  %v7369_v41 = vld [vmem:[%s10811_s4 + $0x4c] sm:$0xf] }
  0x20   :  { %v7325_v8 = vsel %vm244_vm0, 1.0, %v10829_v33  ;;  %11009 = vst [vmem:[#allocation24_spill] sm:$0xff] %v7340_v35  ;;  %v7352_v34 = vsel %vm246_vm2, 1.0, %v10829_v33  ;;  %v7358_v31 = vsel %vm247_vm3, 1.0, %v10829_v33  ;;  %v7364_v35 = vsel %vm248_vm4, 1.0, %v10829_v33  ;;  %v7427_v49 = vld [vmem:[%s10808_s1 + $0x40] sm:$0xff] }
  0x21   :  { %11008 = vst [vmem:[#allocation23_spill] sm:$0xff] %v7325_v8  ;;  %v7346_v8 = vsel %vm245_vm1, 1.0, %v10829_v33  ;;  %11011 = vst [vmem:[#allocation26_spill] sm:$0xff] %v7352_v34  ;;  %v7375_v42 = vsel %vm249_vm5, 1.0, %v10829_v33  ;;  %v7381_v43 = vsel %vm250_vm6, 1.0, %v10829_v33  ;;  %v7387_v44 = vsel %vm251_vm7, 1.0, %v10829_v33 }
  0x22   :  { %11010 = vst [vmem:[#allocation25_spill] sm:$0xff] %v7346_v8  ;;  %11012 = vst [vmem:[#allocation27_spill] sm:$0xff] %v7358_v31  ;;  %v7398_v45 = vld [vmem:[%s10811_s4 + $0x50] sm:$0xf]  ;;  %v7404_v46 = vsel %vm253_vm9, 1.0, %v10829_v33  ;;  %v7410_v47 = vsel %vm254_vm10, 1.0, %v10829_v33  ;;  %vm11022_vm0 = vcmp.lt.s32.totalorder %v7113_v52, %v7029_v28  ;;  %vm11025_vm1 = vcmp.lt.s32.totalorder %v7116_v53, %v7029_v28 }
  0x23   :  { %11013 = vst [vmem:[#allocation28_spill] sm:$0xff] %v7364_v35  ;;  %11014 = vst [vmem:[#allocation29_spill] sm:$0xff] %v7375_v42  ;;  %v7393_v35 = vsel %vm252_vm8, 1.0, %v10829_v33  ;;  %v7416_v48 = vsel %vm255_vm11, 1.0, %v10829_v33  ;;  %v7432_v50 = vld [vmem:[%s10808_s1 + $0x48] sm:$0xff]  ;;  %v7443_v52 = vsel %vm11025_vm1, 1.0, %v10829_v33  ;;  %vm11027_vm2 = vcmp.lt.s32.totalorder %v7119_v54, %v7029_v28 }
  0x24   :  { %11015 = vst [vmem:[#allocation30_spill] sm:$0xff] %v7381_v43  ;;  %11016 = vst [vmem:[#allocation31_spill] sm:$0xff] %v7387_v44  ;;  %v7437_v51 = vld [vmem:[%s10811_s4 + $0x54] sm:$0xf]  ;;  %vm11029_vm3 = vcmp.lt.s32.totalorder %v7122_v55, %v7029_v28  ;;  %vm11031_vm4 = vcmp.lt.s32.totalorder %v7125_v56, %v7029_v28  ;;  %v7471_v54 = vld [vmem:[%s10808_s1 + $0x58] sm:$0xff]  ;;  %vm11037_vm5 = vcmp.lt.s32.totalorder %v7128_v57, %v7029_v28 }
  0x25   :  { %11017 = vst [vmem:[#allocation32_spill] sm:$0xff] %v7393_v35  ;;  %11018 = vst [vmem:[#allocation33_spill] sm:$0xff] %v7398_v45  ;;  %v7422_v35 = vsel %vm11022_vm0, 1.0, %v10829_v33  ;;  %v7466_v53 = vld [vmem:[%s10808_s1 + $0x50] sm:$0xff]  ;;  %v7476_v55 = vld [vmem:[%s10808_s1 + $0x60] sm:$0xff]  ;;  %vm11039_vm6 = vcmp.lt.s32.totalorder %v7131_v58, %v7029_v28  ;;  %vm11041_vm7 = vcmp.lt.s32.totalorder %v7134_v59, %v7029_v28  ;;  %vm11043_vm8 = vcmp.lt.s32.totalorder %v7137_v60, %v7029_v28 }
  0x26   :  { %11019 = vst [vmem:[#allocation34_spill] sm:$0xff] %v7404_v46  ;;  %11020 = vst [vmem:[#allocation35_spill] sm:$0xff] %v7410_v47  ;;  %v7461_v46 = vsel %vm11031_vm4, 1.0, %v10829_v33  ;;  %v7481_v56 = vld [vmem:[%s10808_s1 + $0x68] sm:$0xff]  ;;  %v11036_v47 = vmov 0.0   ;;  %v7535_v57 = vld [vmem:[%s10808_s1 + $0x90] sm:$0xff]  ;;  %vm11050_vm9 = vcmp.lt.s32.totalorder %v7140_v61, %v7029_v28  ;;  %vm11052_vm10 = vcmp.lt.s32.totalorder %v7143_v62, %v7029_v28 }
  0x27   :  { %11021 = vst [vmem:[#allocation36_spill] sm:$0xff] %v7416_v48  ;;  %11023 = vst [vmem:[#allocation37_spill] sm:$0xff] %v7422_v35  ;;  %v7449_v35 = vsel %vm11027_vm2, 1.0, %v10829_v33  ;;  %v7455_v48 = vsel %vm11029_vm3, 1.0, %v10829_v33  ;;  %v7486_v33 = vld [vmem:[%s10808_s1 + $0x70] sm:$0xff]  ;;  %v7512_v44 = vsel %vm11037_vm5, 1.0, %v11036_v47  ;;  %vm11054_vm11 = vcmp.lt.s32.totalorder %v7146_v63, %v7029_v28 }
  0x28   :  { %11024 = vst [vmem:[#allocation38_spill] sm:$0xff] %v7437_v51  ;;  %11026 = vst [vmem:[#allocation39_spill] sm:$0xff] %v7443_v52  ;;  %v7501_v52 = vld [vmem:[%s10808_s1 + $0x88] sm:$0xff]  ;;  %v7518_v42 = vsel %vm11039_vm6, 1.0, %v11036_v47  ;;  %v7524_v43 = vsel %vm11041_vm7, 1.0, %v11036_v47  ;;  %v7530_v31 = vsel %vm11043_vm8, 1.0, %v11036_v47  ;;  %vm11056_vm0 = vcmp.lt.s32.totalorder %v7149_v0, %v7029_v28 }
  0x29   :  { %11028 = vst [vmem:[#allocation40_spill] sm:$0xff] %v7449_v35  ;;  %11030 = vst [vmem:[#allocation41_spill] sm:$0xff] %v7455_v48  ;;  %v7496_v48 = vld [vmem:[%s10808_s1 + $0x80] sm:$0xff]  ;;  %v7506_v35 = vld [vmem:[%s10811_s4 + $0x58] sm:$0xf]  ;;  %v7581_v34 = vsel %vm11050_vm9, 1.0, %v11036_v47  ;;  %vm11065_vm1 = vcmp.lt.s32.totalorder %v7155_v2, %v7029_v28  ;;  %vm11067_vm2 = vcmp.lt.s32.totalorder %v7158_v3, %v7029_v28  ;;  %vm11069_vm3 = vcmp.lt.s32.totalorder %v7161_v4, %v7029_v28 }
  0x2a   :  { %11032 = vst [vmem:[#allocation42_spill] sm:$0xff] %v7461_v46  ;;  %v7491_v46 = vld [vmem:[%s10808_s1 + $0x78] sm:$0xff]  ;;  %11033 = vst [vmem:[#allocation43_spill] sm:$0xff] %v7496_v48  ;;  %v7545_v59 = vld [vmem:[%s10808_s1 + $0xa0] sm:$0xff]  ;;  %v7593_v45 = vsel %vm11054_vm11, 1.0, %v11036_v47  ;;  %v7647_v51 = vsel %vm11067_vm2, 1.0, %v11036_v47  ;;  %v7690_v6 = vpack.c.bf16 %v7432_v50, %v7427_v49 }
  0x2b   :  { %11034 = vst [vmem:[#allocation44_spill] sm:$0xff] %v7501_v52  ;;  %11035 = vst [vmem:[#allocation45_spill] sm:$0xff] %v7506_v35  ;;  %v7540_v58 = vld [vmem:[%s10808_s1 + $0x98] sm:$0xff]  ;;  %v7550_v60 = vld [vmem:[%s10808_s1 + $0xa8] sm:$0xff]  ;;  %v7587_v35 = vsel %vm11052_vm10, 1.0, %v11036_v47  ;;  %v7664_v2 = vsel %vm273_vm13, 1.0, %v11036_v47 }
  0x2c   :  { %11038 = vst [vmem:[#allocation46_spill] sm:$0xff] %v7512_v44  ;;  %11040 = vst [vmem:[#allocation47_spill] sm:$0xff] %v7518_v42  ;;  %v7565_v44 = vld [vmem:[%s10808_s1 + $0xc0] sm:$0xff]  ;;  %v7570_v42 = vld [vmem:[%s10808_s1 + $0xc8] sm:$0xff]  ;;  %v7670_v3 = vsel %vm274_vm14, 1.0, %v11036_v47  ;;  %v7676_v4 = vsel %vm275_vm15, 1.0, %v11036_v47 }
  0x2d   :  { %11042 = vst [vmem:[#allocation48_spill] sm:$0xff] %v7524_v43  ;;  %11044 = vst [vmem:[#allocation49_spill] sm:$0xff] %v7530_v31  ;;  %v7555_v31 = vld [vmem:[%s10808_s1 + $0xb0] sm:$0xff]  ;;  %v7560_v43 = vld [vmem:[%s10808_s1 + $0xb8] sm:$0xff] }
  0x2e   :  { %11045 = vst [vmem:[#allocation50_spill] sm:$0xff] %v7540_v58  ;;  %11046 = vst [vmem:[#allocation51_spill] sm:$0xff] %v7550_v60  ;;  %v7575_v8 = vld [vmem:[%s10811_s4 + $0x5c] sm:$0xf]  ;;  %v7604_v61 = vld [vmem:[%s10808_s1 + $0xd0] sm:$0xff] }
  0x2f   :  { %11047 = vst [vmem:[#allocation52_spill] sm:$0xff] %v7565_v44  ;;  %11048 = vst [vmem:[#allocation53_spill] sm:$0xff] %v7570_v42  ;;  %v7609_v62 = vld [vmem:[%s10808_s1 + $0xd8] sm:$0xff]  ;;  %v7614_v63 = vld [vmem:[%s10808_s1 + $0xe0] sm:$0xff] }
  0x30   :  { %11049 = vst [vmem:[#allocation54_spill] sm:$0xff] %v7575_v8  ;;  %11051 = vst [vmem:[#allocation55_spill] sm:$0xff] %v7581_v34  ;;  %v7599_v8 = vsel %vm11056_vm0, 1.0, %v11036_v47  ;;  %v7619_v0 = vld [vmem:[%s10808_s1 + $0xe8] sm:$0xff]  ;;  %v7635_v34 = vsel %vm269_vm12, 1.0, %v11036_v47 }
  0x31   :  { %11053 = vst [vmem:[#allocation56_spill] sm:$0xff] %v7587_v35  ;;  %11055 = vst [vmem:[#allocation57_spill] sm:$0xff] %v7593_v45  ;;  %v7629_v45 = vld [vmem:[%s10811_s4 + $0x60] sm:$0xf]  ;;  %v7641_v35 = vsel %vm11065_vm1, 1.0, %v11036_v47 }
  0x32   :  { %11057 = vst [vmem:[#allocation58_spill] sm:$0xff] %v7599_v8  ;;  %11058 = vst [vmem:[#allocation59_spill] sm:$0xff] %v7604_v61  ;;  %v7624_v8 = vld [vmem:[%s10808_s1 + $0xf0] sm:$0xff]  ;;  %v7658_v1 = vld [vmem:[%s10811_s4 + $0x64] sm:$0xf] }
  0x33   :  { %11059 = vst [vmem:[#allocation60_spill] sm:$0xff] %v7609_v62  ;;  %11060 = vst [vmem:[#allocation61_spill] sm:$0xff] %v7614_v63  ;;  %v7686_v5 = vld [vmem:[%s10811_s4 + $0x68] sm:$0xf]  ;;  %v7695_v28 = vld [vmem:[%s10811_s4 + $0x6c] sm:$0xf] }
  0x34   :  { %11061 = vst [vmem:[#allocation62_spill] sm:$0xff] %v7619_v0  ;;  %11062 = vst [vmem:[#allocation63_spill] sm:$0xff] %v7624_v8  ;;  %v7700_v7 = vld [vmem:[%s10811_s4 + $0x70] sm:$0xf] }
  0x35   :  { %11063 = vst [vmem:[#allocation64_spill] sm:$0xff] %v7629_v45  ;;  %11064 = vst [vmem:[#allocation65_spill] sm:$0xff] %v7635_v34  ;;  %v7653_v45 = vsel %vm11069_vm3, 1.0, %v11036_v47  ;;  %v7705_v47 = vld [vmem:[%s10811_s4 + $0x74] sm:$0xf] }
  0x36   :  { %11066 = vst [vmem:[#allocation66_spill] sm:$0xff] %v7641_v35  ;;  %11068 = vst [vmem:[#allocation67_spill] sm:$0xff] %v7647_v51  ;;  %v7721_v51 = vpack.c.bf16 %v7501_v52, %v7496_v48  ;;  %v7726_v34 = vld [vmem:[%s10811_s4 + $0x78] sm:$0xf]  ;;  %v7731_v35 = vld [vmem:[%s10811_s4 + $0x7c] sm:$0xf]  ;;  %v7743_v52 = vpack.c.bf16 %v7560_v43, %v7555_v31  ;;  %v7747_v48 = vpack.c.bf16 %v7570_v42, %v7565_v44 }
  0x37   :  { %11070 = vst [vmem:[#allocation68_spill] sm:$0xff] %v7653_v45  ;;  %11071 = vst [vmem:[#allocation69_spill] sm:$0xff] %v7664_v2  ;;  %v7681_v45 = vld [vmem:[%s10808_s1 + $0xf8] sm:$0xff]  ;;  %v7713_v2 = vpack.c.bf16 %v7481_v56, %v7476_v55 }
  0x38   :  { %11072 = vst [vmem:[#allocation70_spill] sm:$0xff] %v7670_v3  ;;  %11073 = vst [vmem:[#allocation71_spill] sm:$0xff] %v7676_v4  ;;  %v7709_v4 = vpack.c.bf16 %v7471_v54, %v7466_v53  ;;  %v7717_v3 = vpack.c.bf16 %v7491_v46, %v7486_v33 }
  0x39   :  { %11074 = vst [vmem:[#allocation72_spill] sm:$0xff] %v7681_v45  ;;  %11075 = vst [vmem:[#allocation73_spill] sm:$0xff] %v7700_v7  ;;  %v7735_v7 = vpack.c.bf16 %v7540_v58, %v7535_v57  ;;  %v7755_v58 = vpack.c.bf16 %v7619_v0, %v7614_v63 }
  0x3a   :  { %11076 = vst [vmem:[#allocation74_spill] sm:$0xff] %v7705_v47  ;;  %11077 = vst [vmem:[#allocation75_spill] sm:$0xff] %v7726_v34  ;;  %v7739_v47 = vpack.c.bf16 %v7550_v60, %v7545_v59  ;;  %v7751_v34 = vpack.c.bf16 %v7609_v62, %v7604_v61  ;;  %v7759_v60 = vpack.c.bf16 %v7681_v45, %v7624_v8 }
  0x4f   :  { %s7761_s29 = spop %6865 }
  0x50   :  { %6878 = dma.done.wait [#allocation4], 2048 }
  0x51   :  { %6879 = vsyncadd [#allocation4], 4294965248  ;;  %v5485_v42 = vld [vmem:[%s10809_s2 + $0x80] sm:$0xf]  ;;  %v5486_v62 = vld [vmem:[%s10809_s2 + $0x88] sm:$0xf] }
  0x52   :  { %v5487_v0 = vld [vmem:[%s10809_s2 + $0x84] sm:$0xf]  ;;  %447 = vst [vmem:[#allocation2 + $0x80] sm:$0xf] %v5485_v42  ;;  %449 = vst [vmem:[#allocation2 + $0x84] sm:$0xf] %v5486_v62 }
  0x53   :  { %451 = vst [vmem:[#allocation2 + $0x88] sm:$0xf] %v5487_v0  ;;  %v5488_v45 = vld [vmem:[%s10809_s2 + $0x8c] sm:$0xff]   ;;  %v5490_v8 = vld [vmem:[%s10809_s2 + $0x98] sm:$0xf]  ;;  %v5492_v42 = vld [vmem:[%s10809_s2 + $0x9c] sm:$0xff]  }
  0x54   :  { %v5491_v63 = vld [vmem:[%s10809_s2 + $0x94] sm:$0xf]  ;;  %453 = vst [vmem:[#allocation2 + $0x8c] sm:$0xff] %v5488_v45   ;;  %457 = vst [vmem:[#allocation2 + $0x94] sm:$0xf] %v5490_v8  ;;  %v5496_v8 = vld [vmem:[%s10809_s2 + $0xac] sm:$0xff]  }
  0x55   :  { %459 = vst [vmem:[#allocation2 + $0x98] sm:$0xf] %v5491_v63  ;;  %v5494_v62 = vld [vmem:[%s10809_s2 + $0xa8] sm:$0xf]  ;;  %v5495_v0 = vld [vmem:[%s10809_s2 + $0xa4] sm:$0xf] }
  0x56   :  { %461 = vst [vmem:[#allocation2 + $0x9c] sm:$0xff] %v5492_v42   ;;  %465 = vst [vmem:[#allocation2 + $0xa4] sm:$0xf] %v5494_v62  ;;  %v5498_v45 = vld [vmem:[%s10809_s2 + $0xb8] sm:$0xf]  ;;  %v5500_v42 = vld [vmem:[%s10809_s2 + $0xbc] sm:$0xff]  }
  0x57   :  { %467 = vst [vmem:[#allocation2 + $0xa8] sm:$0xf] %v5495_v0  ;;  %v5499_v63 = vld [vmem:[%s10809_s2 + $0xb4] sm:$0xf]  ;;  %469 = vst [vmem:[#allocation2 + $0xac] sm:$0xff] %v5496_v8   ;;  %v5504_v8 = vld [vmem:[%s10809_s2 + $0xcc] sm:$0xff]  }
  0x58   :  { %473 = vst [vmem:[#allocation2 + $0xb4] sm:$0xf] %v5498_v45  ;;  %475 = vst [vmem:[#allocation2 + $0xb8] sm:$0xf] %v5499_v63  ;;  %v5502_v62 = vld [vmem:[%s10809_s2 + $0xc8] sm:$0xf] }
  0x59   :  { %v5503_v0 = vld [vmem:[%s10809_s2 + $0xc4] sm:$0xf]  ;;  %477 = vst [vmem:[#allocation2 + $0xbc] sm:$0xff] %v5500_v42   ;;  %481 = vst [vmem:[#allocation2 + $0xc4] sm:$0xf] %v5502_v62  ;;  %v5508_v42 = vld [vmem:[%s10809_s2 + $0xdc] sm:$0xff]  }
  0x5a   :  { %483 = vst [vmem:[#allocation2 + $0xc8] sm:$0xf] %v5503_v0  ;;  %v5506_v45 = vld [vmem:[%s10809_s2 + $0xd8] sm:$0xf]  ;;  %v5507_v63 = vld [vmem:[%s10809_s2 + $0xd4] sm:$0xf] }
  0x5b   :  { %485 = vst [vmem:[#allocation2 + $0xcc] sm:$0xff] %v5504_v8   ;;  %489 = vst [vmem:[#allocation2 + $0xd4] sm:$0xf] %v5506_v45  ;;  %v5510_v62 = vld [vmem:[%s10809_s2 + $0xe8] sm:$0xf]  ;;  %v5512_v8 = vld [vmem:[%s10809_s2 + $0xec] sm:$0xff]  }
  0x5c   :  { %491 = vst [vmem:[#allocation2 + $0xd8] sm:$0xf] %v5507_v63  ;;  %v5511_v0 = vld [vmem:[%s10809_s2 + $0xe4] sm:$0xf]  ;;  %493 = vst [vmem:[#allocation2 + $0xdc] sm:$0xff] %v5508_v42  }
  0x5d   :  { %497 = vst [vmem:[#allocation2 + $0xe4] sm:$0xf] %v5510_v62  ;;  %499 = vst [vmem:[#allocation2 + $0xe8] sm:$0xf] %v5511_v0  ;;  %v5514_v45 = vld [vmem:[%s10809_s2 + $0xf8] sm:$0xf] }
  0x5e   :  { %v5515_v63 = vld [vmem:[%s10809_s2 + $0xf4] sm:$0xf]  ;;  %501 = vst [vmem:[#allocation2 + $0xec] sm:$0xff] %v5512_v8   ;;  %505 = vst [vmem:[#allocation2 + $0xf4] sm:$0xf] %v5514_v45 }
  0x5f   :  { %507 = vst [vmem:[#allocation2 + $0xf8] sm:$0xf] %v5515_v63  ;;  %v5516_v42 = vld [vmem:[%s10809_s2 + $0xfc] sm:$0xf] }
  0x60   :  { %509 = vst [vmem:[#allocation2 + $0xfc] sm:$0xf] %v5516_v42 }
  0x61   :  { %604 = vsyncadd [#allocation4 + $0x1], 2048  ;;  %5762 = vmatprep.subr.bf16.mxu0 %v7721_v51  ;;  %v606_v62 = vld [vmem:[#allocation2 + $0x8] sm:$0xff]  ;;  %v7841_v0 = vcombine.low %v7193_v9, %v7198_v10  ;;  %v7845_v61 = vcombine.low %v7211_v11, %v7216_v12  ;;  %v7854_v8 = vcombine.low %v7221_v13, %v7234_v14  ;;  %v7862_v9 = vcombine.low %v7239_v15, %v7244_v16  ;;  %v605_v10 = vld [vmem:[#allocation2] sm:$0xff] }
  0x62   :  { %5763 = vmatpush3.bf16.msra.mxu0 %v7048_v32  ;;  %653 = vmatprep.mubr.bf16.mxu0 %v606_v62  ;;  %v608_v11 = vld [vmem:[#allocation2 + $0x18] sm:$0xff]  ;;  %v607_v12 = vld [vmem:[#allocation2 + $0x10] sm:$0xff]  ;;  %v610_v13 = vld [vmem:[#allocation2 + $0x28] sm:$0xff] }
  0x63   :  { %5764 = vmatprep.subr.bf16.mxu0 %v7735_v7  ;;  %6390 = vmatprep.subr.bf16.mxu1 %v7841_v0  ;;  %v609_v14 = vld [vmem:[#allocation2 + $0x20] sm:$0xff]  ;;  %v612_v15 = vld [vmem:[#allocation2 + $0x38] sm:$0xff]  ;;  %v611_v16 = vld [vmem:[#allocation2 + $0x30] sm:$0xff] }
  0x64   :  { %6391 = vmatpush3.bf16.msra.mxu1 %v7841_v0  ;;  %v614_v45 = vld [vmem:[#allocation2 + $0x48] sm:$0xff]  ;;  %v613_v63 = vld [vmem:[#allocation2 + $0x40] sm:$0xff]  ;;  %v616_v42 = vld [vmem:[#allocation2 + $0x58] sm:$0xff] }
  0x65   :  { %6392 = vmatprep.subr.bf16.mxu1 %v7845_v61  ;;  %v615_v62 = vld [vmem:[#allocation2 + $0x50] sm:$0xff]  ;;  %v618_v44 = vld [vmem:[#allocation2 + $0x68] sm:$0xff] }
  0x66   :  { %5765 = vmatpush3.bf16.msra.mxu0 %v7069_v38 }
  0x67   :  { %5766 = vmatprep.subr.bf16.mxu0 %v7739_v47 }
  0x68   :  { %6393 = vmatpush3.bf16.msra.mxu1 %v7845_v61 }
  0x69   :  { %6394 = vmatprep.subr.bf16.mxu1 %v7854_v8 }
  0x6a   :  { %5767 = vmatpush3.bf16.msra.mxu0 %v7073_v39 }
  0x6b   :  { %5768 = vmatprep.subr.bf16.mxu0 %v7743_v52 }
  0x6c   :  { %6395 = vmatpush3.bf16.msra.mxu1 %v7854_v8 }
  0x6d   :  { %6396 = vmatprep.subr.bf16.mxu1 %v7862_v9 }
  0x6e   :  { %5769 = vmatpush3.bf16.msra.mxu0 %v7077_v40 }
  0x6f   :  { %5770 = vmatprep.subr.bf16.mxu0 %v7747_v48 }
  0x70   :  { %6397 = vmatpush3.bf16.msra.mxu1 %v7862_v9 }
  0x72   :  { %5771 = vmatpush3.bf16.msra.mxu0 %v7690_v6 }
  0x73   :  { %5772 = vmatprep.subr.bf16.mxu0 %v7751_v34 }
  0x76   :  { %5773 = vmatpush3.bf16.msra.mxu0 %v7709_v4 }
  0x77   :  { %5774 = vmatprep.subr.bf16.mxu0 %v7755_v58 }
  0x7a   :  { %5775 = vmatpush3.bf16.msra.mxu0 %v7713_v2 }
  0x7b   :  { %5776 = vmatprep.subr.bf16.mxu0 %v7759_v60 }
  0x7e   :  { %5777 = vmatpush3.bf16.msra.mxu0 %v7717_v3 }
  0x81   :  { %654 = vmatmul.mubr.bf16.vlgmr.msra.gmra.mrb[0].mxu0 %v605_v10  ;;  %v617_v10 = vld [vmem:[#allocation2 + $0x60] sm:$0xff] }
  0x82   :  { %661 = vmatprep.mubr.bf16.mxu0 %v608_v11  ;;  %v620_v11 = vld [vmem:[#allocation2 + $0x78] sm:$0xff] }
  0x89   :  { %662 = vmatmul.mubr.bf16.gmra.mrb[4].mxu0 %v607_v12  ;;  %v619_v12 = vld [vmem:[#allocation2 + $0x70] sm:$0xff] }
  0x8a   :  { %669 = vmatprep.mubr.bf16.mxu0 %v610_v13  ;;  %v7880_v13 = vcombine.low %v7257_v17, %v7262_v18  ;;  %v7898_v17 = vcombine.low %v7303_v23, %v7308_v24  ;;  %v7904_v18 = vcombine.low %v7313_v25, %v7330_v37 }
  0x8c   :  { %6398 = vmatprep.subr.bf16.mxu1 %v7880_v13 }
  0x8d   :  { %6399 = vmatpush3.bf16.msra.mxu1 %v7880_v13 }
  0x91   :  { %670 = vmatmul.mubr.bf16.gmra.mrb[8].mxu0 %v609_v14  ;;  %v7886_v14 = vcombine.low %v7267_v19, %v7280_v20 }
  0x92   :  { %677 = vmatprep.mubr.bf16.mxu0 %v612_v15 }
  0x93   :  { %6400 = vmatprep.subr.bf16.mxu1 %v7886_v14 }
  0x94   :  { %6401 = vmatpush3.bf16.msra.mxu1 %v7886_v14 }
  0x99   :  { %678 = vmatmul.mubr.bf16.gmra.mrb[12].mxu0 %v611_v16 }
  0x9a   :  { %685 = vmatprep.mubr.bf16.mxu0 %v614_v45 }
  0xa1   :  { %686 = vmatmul.mubr.bf16.gmra.mrb[16].mxu0 %v613_v63 }
  0xa2   :  { %693 = vmatprep.mubr.bf16.mxu0 %v616_v42 }
  0xa9   :  { %694 = vmatmul.mubr.bf16.gmra.mrb[20].mxu0 %v615_v62 }
  0xaa   :  { %701 = vmatprep.mubr.bf16.mxu0 %v618_v44  ;;  %v7892_v44 = vcombine.low %v7285_v21, %v7290_v22 }
  0xac   :  { %6402 = vmatprep.subr.bf16.mxu1 %v7892_v44 }
  0xad   :  { %6403 = vmatpush3.bf16.msra.mxu1 %v7892_v44 }
  0xae   :  { %6404 = vmatprep.subr.bf16.mxu1 %v7898_v17 }
  0xb1   :  { %702 = vmatmul.mubr.bf16.gmra.mrb[24].mxu0 %v617_v10  ;;  %6405 = vmatpush3.bf16.msra.mxu1 %v7898_v17 }
  0xb2   :  { %709 = vmatprep.mubr.bf16.mxu0 %v620_v11  ;;  %6422 = vmatprep.subr.bf16.mxu1 %v7904_v18 }
  0xb9   :  { %710 = vmatmul.mubr.bf16.gmra.mrb[28].mxu0 %v619_v12 }
 0x154   :  { %v5778_v19 = vpop.f32.mrb[0].mxu0 }
 0x155   :  { %v5779_v20 = vpop.f32.mrb[1].mxu0 }
 0x156   :  { %v5780_v21 = vadd.f32 %v5779_v20, %v5778_v19  ;;  %v5781_v22 = vpop.f32.mrb[2].mxu0 }
 0x157   :  { %v5782_v15 = vpop.f32.mrb[3].mxu0 }
 0x158   :  { %v5783_v16 = vadd.f32 %v5782_v15, %v5781_v22  ;;  %v718_v45 = vadd.f32 %v5780_v21, %v7019_v26  ;;  %v7913_v22 = vcombine.low %v7335_v36, %v7369_v41 }
 0x15a   :  { %v719_v23 = vadd.f32 %v5783_v16, %v7024_v27 }
 0x15c   :  { %v5784_v24 = vpop.f32.mrb[4].mxu0  ;;  %v734_v63 = vpack.c.bf16 %v719_v23, %v718_v45  ;;  %v11078_v45 = vld [vmem:[#allocation38_spill] sm:$0xff] }
 0x15d   :  { %v5785_v42 = vpop.f32.mrb[5].mxu0 }
 0x15e   :  { %v5786_v62 = vadd.f32 %v5785_v42, %v5784_v24  ;;  %v5787_v10 = vpop.f32.mrb[6].mxu0  ;;  %6406 = vmatprep.mubr.bf16.mxu1 %v734_v63  ;;  %v11081_v63 = vld [vmem:[#allocation20_spill] sm:$0xff] }
 0x15f   :  { %v5788_v37 = vpop.f32.mrb[7].mxu0 }
 0x160   :  { %v5789_v25 = vadd.f32 %v5788_v37, %v5787_v10  ;;  %v720_v11 = vadd.f32 %v5786_v62, %v7034_v29  ;;  %v11079_v29 = vld [vmem:[#allocation33_spill] sm:$0xff]  ;;  %v11082_v62 = vld [vmem:[#allocation54_spill] sm:$0xff] }
 0x161   :  { %v7919_v23 = vcombine.low %v11079_v29, %v11078_v45  ;;  %v11083_v10 = vld [vmem:[#allocation45_spill] sm:$0xff] }
 0x162   :  { %v721_v12 = vadd.f32 %v5789_v25, %v7039_v30  ;;  %v11080_v30 = vld [vmem:[#allocation18_spill] sm:$0xff]  ;;  %v7927_v37 = vcombine.low %v11083_v10, %v11082_v62 }
 0x164   :  { %v735_v19 = vpack.c.bf16 %v721_v12, %v720_v11  ;;  %v5790_v20 = vpop.f32.mrb[8].mxu0 }
 0x165   :  { %v5791_v26 = vpop.f32.mrb[9].mxu0 }
 0x166   :  { %v5792_v27 = vadd.f32 %v5791_v26, %v5790_v20  ;;  %v5793_v21 = vpop.f32.mrb[10].mxu0  ;;  %6407 = vmatmul.mubr.bf16.vlgmr.msra.gmra.mrb[0].mxu1 %v735_v19  ;;  %v11084_v26 = vld [vmem:[#allocation64_spill] sm:$0xff] }
 0x167   :  { %v5794_v15 = vpop.f32.mrb[11].mxu0  ;;  %6423 = vmatpush3.bf16.msra.mxu1 %v7904_v18 }
 0x168   :  { %v5795_v16 = vadd.f32 %v5794_v15, %v5793_v21  ;;  %6424 = vmatprep.subr.bf16.mxu1 %v7913_v22  ;;  %v722_v24 = vadd.f32 %v5792_v27, %v11080_v30  ;;  %v7933_v27 = vcombine.low %v11084_v26, %v7658_v1  ;;  %v11085_v21 = vld [vmem:[#allocation21_spill] sm:$0xff] }
 0x16a   :  { %v723_v42 = vadd.f32 %v5795_v16, %v11081_v63  ;;  %v11086_v16 = vld [vmem:[#allocation22_spill] sm:$0xff] }
 0x16b   :  { %6425 = vmatpush3.bf16.msra.mxu1 %v7913_v22 }
 0x16c   :  { %v736_v36 = vpack.c.bf16 %v723_v42, %v722_v24  ;;  %v5796_v41 = vpop.f32.mrb[12].mxu0  ;;  %6426 = vmatprep.subr.bf16.mxu1 %v7919_v23  ;;  %v7941_v24 = vcombine.low %v7686_v5, %v7695_v28 }
 0x16d   :  { %v5797_v25 = vpop.f32.mrb[13].mxu0 }
 0x16e   :  { %v5798_v11 = vadd.f32 %v5797_v25, %v5796_v41  ;;  %v5799_v12 = vpop.f32.mrb[14].mxu0  ;;  %6410 = vmatprep.mubr.bf16.mxu1 %v736_v36 }
 0x16f   :  { %v5800_v19 = vpop.f32.mrb[15].mxu0  ;;  %6427 = vmatpush3.bf16.msra.mxu1 %v7919_v23 }
 0x170   :  { %v5801_v20 = vadd.f32 %v5800_v19, %v5799_v12  ;;  %6428 = vmatprep.subr.bf16.mxu1 %v7927_v37  ;;  %v724_v15 = vadd.f32 %v5798_v11, %v11085_v21 }
 0x172   :  { %v725_v45 = vadd.f32 %v5801_v20, %v11086_v16 }
 0x173   :  { %6429 = vmatpush3.bf16.msra.mxu1 %v7927_v37 }
 0x174   :  { %v737_v29 = vpack.c.bf16 %v725_v45, %v724_v15  ;;  %v5802_v30 = vpop.f32.mrb[16].mxu0  ;;  %6430 = vmatprep.subr.bf16.mxu1 %v7933_v27 }
 0x175   :  { %v5803_v63 = vpop.f32.mrb[17].mxu0 }
 0x176   :  { %v5804_v42 = vadd.f32 %v5803_v63, %v5802_v30  ;;  %v5805_v36 = vpop.f32.mrb[18].mxu0  ;;  %6411 = vmatmul.mubr.bf16.gmra.mrb[4].mxu1 %v737_v29 }
 0x177   :  { %v5806_v1 = vpop.f32.mrb[19].mxu0  ;;  %6431 = vmatpush3.bf16.msra.mxu1 %v7933_v27 }
 0x178   :  { %v5807_v41 = vadd.f32 %v5806_v1, %v5805_v36  ;;  %6432 = vmatprep.subr.bf16.mxu1 %v7941_v24  ;;  %v726_v62 = vadd.f32 %v5804_v42, %v7427_v49 }
 0x17a   :  { %v727_v10 = vadd.f32 %v5807_v41, %v7432_v50 }
 0x17b   :  { %6433 = vmatpush3.bf16.msra.mxu1 %v7941_v24 }
 0x17c   :  { %v738_v25 = vpack.c.bf16 %v727_v10, %v726_v62  ;;  %v5808_v11 = vpop.f32.mrb[20].mxu0 }
 0x17d   :  { %v5809_v5 = vpop.f32.mrb[21].mxu0 }
 0x17e   :  { %v5810_v28 = vadd.f32 %v5809_v5, %v5808_v11  ;;  %v5811_v12 = vpop.f32.mrb[22].mxu0  ;;  %6414 = vmatprep.mubr.bf16.mxu1 %v738_v25 }
 0x17f   :  { %v5812_v19 = vpop.f32.mrb[23].mxu0 }
 0x180   :  { %v5813_v20 = vadd.f32 %v5812_v19, %v5811_v12  ;;  %v728_v26 = vadd.f32 %v5810_v28, %v7466_v53  ;;  %v11087_v28 = vld [vmem:[#allocation74_spill] sm:$0xff]  ;;  %v11088_v12 = vld [vmem:[#allocation73_spill] sm:$0xff] }
 0x181   :  { %v7956_v19 = vcombine.low %v11088_v12, %v11087_v28 }
 0x182   :  { %v729_v21 = vadd.f32 %v5813_v20, %v7471_v54  ;;  %v11092_v20 = vld [vmem:[#allocation24_spill] sm:$0xff] }
 0x183   :  { %6434 = vmatprep.subr.bf16.mxu1 %v7956_v19 }
 0x184   :  { %v739_v15 = vpack.c.bf16 %v729_v21, %v728_v26  ;;  %v5814_v16 = vpop.f32.mrb[24].mxu0  ;;  %6435 = vmatpush3.bf16.msra.mxu1 %v7956_v19 }
 0x185   :  { %v5815_v45 = vpop.f32.mrb[25].mxu0 }
 0x186   :  { %v5816_v49 = vadd.f32 %v5815_v45, %v5814_v16  ;;  %v5817_v29 = vpop.f32.mrb[26].mxu0  ;;  %6415 = vmatmul.mubr.bf16.gmra.mrb[8].mxu1 %v739_v15 }
 0x187   :  { %v5818_v50 = vpop.f32.mrb[27].mxu0 }
 0x188   :  { %v5819_v30 = vadd.f32 %v5818_v50, %v5817_v29  ;;  %v730_v63 = vadd.f32 %v5816_v49, %v7476_v55  ;;  %v11089_v55 = vld [vmem:[#allocation75_spill] sm:$0xff] }
 0x18a   :  { %v731_v42 = vadd.f32 %v5819_v30, %v7481_v56  ;;  %v7962_v56 = vcombine.low %v11089_v55, %v7731_v35 }
 0x18c   :  { %v740_v36 = vpack.c.bf16 %v731_v42, %v730_v63  ;;  %v5820_v1 = vpop.f32.mrb[28].mxu0  ;;  %6436 = vmatprep.subr.bf16.mxu1 %v7962_v56 }
 0x18d   :  { %v5821_v41 = vpop.f32.mrb[29].mxu0  ;;  %6437 = vmatpush3.bf16.msra.mxu1 %v7962_v56 }
 0x18e   :  { %v5822_v62 = vadd.f32 %v5821_v41, %v5820_v1  ;;  %v5823_v10 = vpop.f32.mrb[30].mxu0  ;;  %6418 = vmatprep.mubr.bf16.mxu1 %v740_v36 }
 0x18f   :  { %v5824_v53 = vpop.f32.mrb[31].mxu0 }
 0x190   :  { %v5825_v54 = vadd.f32 %v5824_v53, %v5823_v10  ;;  %v732_v25 = vadd.f32 %v5822_v62, %v7486_v33  ;;  %v11090_v33 = vld [vmem:[#allocation19_spill] sm:$0xff] }
 0x192   :  { %v733_v11 = vadd.f32 %v5825_v54, %v7491_v46  ;;  %v7967_v46 = vsub.s32 0, %v11090_v33 }
 0x194   :  { %v741_v5 = vpack.c.bf16 %v733_v11, %v732_v25  ;;  %11091 = vst [vmem:[#allocation38_spill] sm:$0xff] %v7967_v46  ;;  %v7971_v26 = vrot.slane %v11092_v20, %v7967_v46 }
 0x196   :  { %6419 = vmatmul.mubr.bf16.gmra.mrb[12].mxu1 %v741_v5 }
 0x239   :  { %v6408_v21 = vpop.f32.mrb[0].mxu1 }
 0x23a   :  { %v837_v15 = vadd.f32 %v6408_v21, %v7971_v26  ;;  %v828_v16 = vpop.f32.mrb[1].mxu1 }
 0x23b   :  { %v829_v45 = vadd.f32 %v828_v16, %v7971_v26  ;;  %v6409_v49 = vpop.f32.mrb[2].mxu1 }
 0x23c   :  { %v840_v35 = vadd.f32 %v6409_v49, %v7971_v26  ;;  %v831_v29 = vpop.f32.mrb[3].mxu1  ;;  %v893_v30 = vmax.f32 %v837_v15, 0.0 }
 0x23d   :  { %v832_v50 = vadd.f32 %v831_v29, %v7971_v26  ;;  %v891_v42 = vmax.f32 %v829_v45, 0.0 }
 0x23e   :  { %v894_v63 = vmax.f32 %v840_v35, 0.0 }
 0x23f   :  { %v892_v36 = vmax.f32 %v832_v50, 0.0 }
 0x240   :  { %v908_v1 = vpack.c.bf16 %v894_v63, %v893_v30 }
 0x241   :  { %v907_v41 = vpack.c.bf16 %v892_v36, %v891_v42 }
 0x243   :  { %6438 = vmatprep.mubr.bf16.mxu1 %v907_v41 }
 0x244   :  { %6439 = vmatmul.mubr.bf16.vlgmr.msra.gmra.mrb[16].mxu1 %v908_v1 }
 0x249   :  { %v6412_v62 = vpop.f32.mrb[4].mxu1 }
 0x24a   :  { %v853_v10 = vadd.f32 %v6412_v62, %v7971_v26  ;;  %v844_v53 = vpop.f32.mrb[5].mxu1 }
 0x24b   :  { %v845_v54 = vadd.f32 %v844_v53, %v7971_v26  ;;  %v6413_v25 = vpop.f32.mrb[6].mxu1 }
 0x24c   :  { %v856_v11 = vadd.f32 %v6413_v25, %v7971_v26  ;;  %v847_v5 = vpop.f32.mrb[7].mxu1  ;;  %v897_v12 = vmax.f32 %v853_v10, 0.0 }
 0x24d   :  { %v848_v28 = vadd.f32 %v847_v5, %v7971_v26  ;;  %v895_v21 = vmax.f32 %v845_v54, 0.0 }
 0x24e   :  { %v898_v55 = vmax.f32 %v856_v11, 0.0 }
 0x24f   :  { %v896_v15 = vmax.f32 %v848_v28, 0.0 }
 0x250   :  { %v910_v16 = vpack.c.bf16 %v898_v55, %v897_v12 }
 0x251   :  { %v909_v45 = vpack.c.bf16 %v896_v15, %v895_v21 }
 0x253   :  { %6442 = vmatprep.mubr.bf16.mxu1 %v909_v45 }
 0x254   :  { %6443 = vmatmul.mubr.bf16.gmra.mrb[20].mxu1 %v910_v16 }
 0x259   :  { %v6416_v49 = vpop.f32.mrb[8].mxu1 }
 0x25a   :  { %v869_v35 = vadd.f32 %v6416_v49, %v7971_v26  ;;  %v860_v29 = vpop.f32.mrb[9].mxu1 }
 0x25b   :  { %v861_v50 = vadd.f32 %v860_v29, %v7971_v26  ;;  %v6417_v30 = vpop.f32.mrb[10].mxu1 }
 0x25c   :  { %v872_v63 = vadd.f32 %v6417_v30, %v7971_v26  ;;  %v863_v42 = vpop.f32.mrb[11].mxu1  ;;  %v901_v1 = vmax.f32 %v869_v35, 0.0  ;;  %v7990_v30 = vsub.s32 1, %v11090_v33 }
 0x25d   :  { %v864_v36 = vadd.f32 %v863_v42, %v7971_v26  ;;  %v899_v62 = vmax.f32 %v861_v50, 0.0 }
 0x25e   :  { %v902_v41 = vmax.f32 %v872_v63, 0.0  ;;  %11093 = vst [vmem:[#allocation33_spill] sm:$0xff] %v7990_v30  ;;  %v7994_v63 = vrot.slane %v11092_v20, %v7990_v30 }
 0x25f   :  { %v900_v10 = vmax.f32 %v864_v36, 0.0 }
 0x260   :  { %v912_v53 = vpack.c.bf16 %v902_v41, %v901_v1 }
 0x261   :  { %v911_v54 = vpack.c.bf16 %v900_v10, %v899_v62 }
 0x263   :  { %6446 = vmatprep.mubr.bf16.mxu1 %v911_v54 }
 0x264   :  { %6447 = vmatmul.mubr.bf16.gmra.mrb[24].mxu1 %v912_v53 }
 0x269   :  { %v6420_v25 = vpop.f32.mrb[12].mxu1 }
 0x26a   :  { %v885_v11 = vadd.f32 %v6420_v25, %v7971_v26  ;;  %v876_v5 = vpop.f32.mrb[13].mxu1 }
 0x26b   :  { %v877_v28 = vadd.f32 %v876_v5, %v7971_v26  ;;  %v6421_v12 = vpop.f32.mrb[14].mxu1  ;;  %v11096_v5 = vld [vmem:[#allocation23_spill] sm:$0xff] }
 0x26c   :  { %v888_v55 = vadd.f32 %v6421_v12, %v7971_v26  ;;  %v879_v21 = vpop.f32.mrb[15].mxu1  ;;  %v905_v16 = vmax.f32 %v885_v11, 0.0 }
 0x26d   :  { %v880_v15 = vadd.f32 %v879_v21, %v7971_v26  ;;  %v903_v49 = vmax.f32 %v877_v28, 0.0  ;;  %v11099_v21 = vld [vmem:[#allocation26_spill] sm:$0xff] }
 0x26e   :  { %v906_v45 = vmax.f32 %v888_v55, 0.0 }
 0x26f   :  { %v904_v35 = vmax.f32 %v880_v15, 0.0 }
 0x270   :  { %v914_v29 = vpack.c.bf16 %v906_v45, %v905_v16  ;;  %v11100_v16 = vld [vmem:[#allocation25_spill] sm:$0xff] }
 0x271   :  { %v913_v50 = vpack.c.bf16 %v904_v35, %v903_v49  ;;  %v11101_v35 = vld [vmem:[#allocation27_spill] sm:$0xff] }
 0x273   :  { %6450 = vmatprep.mubr.bf16.mxu1 %v913_v50 }
 0x274   :  { %6451 = vmatmul.mubr.bf16.gmra.mrb[28].mxu1 %v914_v29 }
 0x317   :  { %v6440_v42 = vpop.f32.mrb[16].mxu1 }
 0x318   :  { %v1010_v36 = vadd.f32 %v6440_v42, %v7994_v63  ;;  %v1001_v1 = vpop.f32.mrb[17].mxu1 }
 0x319   :  { %v1002_v41 = vadd.f32 %v1001_v1, %v7994_v63  ;;  %v6441_v62 = vpop.f32.mrb[18].mxu1 }
 0x31a   :  { %v1013_v10 = vadd.f32 %v6441_v62, %v7994_v63  ;;  %v1004_v53 = vpop.f32.mrb[19].mxu1  ;;  %v7999_v54 = vmax.f32 %v1010_v36, 0.0 }
 0x31b   :  { %v8001_v25 = vmax.f32 %v1002_v41, 0.0  ;;  %v1005_v11 = vadd.f32 %v1004_v53, %v7994_v63 }
 0x31c   :  { %11094 = vst [vmem:[#allocation18_spill] sm:$0xff] %v7999_v54  ;;  %v8006_v12 = vmax.f32 %v1013_v10, 0.0  ;;  %v1098_v15 = vmul.f32 %v11099_v21, %v7999_v54 }
 0x31d   :  { %11095 = vst [vmem:[#allocation20_spill] sm:$0xff] %v8001_v25  ;;  %v1096_v28 = vmul.f32 %v11096_v5, %v8001_v25  ;;  %v8008_v55 = vmax.f32 %v1005_v11, 0.0 }
 0x31e   :  { %11097 = vst [vmem:[#allocation54_spill] sm:$0xff] %v8006_v12  ;;  %v1099_v29 = vmul.f32 %v11101_v35, %v8006_v12  ;;  %v1136_v36 = vmul.f32 %v1098_v15, %v7999_v54 }
 0x31f   :  { %11098 = vst [vmem:[#allocation45_spill] sm:$0xff] %v8008_v55  ;;  %v1097_v45 = vmul.f32 %v11100_v16, %v8008_v55  ;;  %v1134_v49 = vmul.f32 %v1096_v28, %v8001_v25 }
 0x320   :  { %v1137_v62 = vmul.f32 %v1099_v29, %v8006_v12 }
 0x321   :  { %v1112_v50 = vadd.f32 %v1097_v45, %v1096_v28  ;;  %v1135_v42 = vmul.f32 %v1097_v45, %v8008_v55 }
 0x323   :  { %v1113_v1 = vadd.f32 %v1112_v50, %v1098_v15  ;;  %v1150_v41 = vadd.f32 %v1135_v42, %v1134_v49  ;;  %v11104_v49 = vld [vmem:[#allocation28_spill] sm:$0xff] }
 0x325   :  { %v1151_v10 = vadd.f32 %v1150_v41, %v1136_v36  ;;  %v1114_v53 = vadd.f32 %v1113_v1, %v1099_v29  ;;  %v11107_v36 = vld [vmem:[#allocation30_spill] sm:$0xff] }
 0x327   :  { %v6444_v11 = vpop.f32.mrb[20].mxu1  ;;  %v1152_v21 = vadd.f32 %v1151_v10, %v1137_v62  ;;  %v11109_v62 = vld [vmem:[#allocation31_spill] sm:$0xff] }
 0x328   :  { %v1026_v16 = vadd.f32 %v6444_v11, %v7994_v63  ;;  %v1017_v5 = vpop.f32.mrb[21].mxu1 }
 0x329   :  { %v1018_v30 = vadd.f32 %v1017_v5, %v7994_v63  ;;  %v6445_v46 = vpop.f32.mrb[22].mxu1 }
 0x32a   :  { %v1029_v28 = vadd.f32 %v6445_v46, %v7994_v63  ;;  %v1020_v35 = vpop.f32.mrb[23].mxu1  ;;  %v8023_v45 = vmax.f32 %v1026_v16, 0.0  ;;  %v11108_v16 = vld [vmem:[#allocation29_spill] sm:$0xff] }
 0x32b   :  { %v8025_v54 = vmax.f32 %v1018_v30, 0.0  ;;  %v1021_v15 = vadd.f32 %v1020_v35, %v7994_v63 }
 0x32c   :  { %11102 = vst [vmem:[#allocation64_spill] sm:$0xff] %v8023_v45  ;;  %v8030_v50 = vmax.f32 %v1029_v28, 0.0  ;;  %v1102_v5 = vmul.f32 %v11107_v36, %v8023_v45 }
 0x32d   :  { %11103 = vst [vmem:[#allocation21_spill] sm:$0xff] %v8025_v54  ;;  %v1100_v29 = vmul.f32 %v11104_v49, %v8025_v54  ;;  %v8032_v42 = vmax.f32 %v1021_v15, 0.0 }
 0x32e   :  { %11105 = vst [vmem:[#allocation22_spill] sm:$0xff] %v8030_v50  ;;  %v1103_v35 = vmul.f32 %v11109_v62, %v8030_v50  ;;  %v1140_v28 = vmul.f32 %v1102_v5, %v8023_v45 }
 0x32f   :  { %11106 = vst [vmem:[#allocation74_spill] sm:$0xff] %v8032_v42  ;;  %v1115_v1 = vadd.f32 %v1114_v53, %v1100_v29  ;;  %v1138_v46 = vmul.f32 %v1100_v29, %v8025_v54  ;;  %v1101_v41 = vmul.f32 %v11108_v16, %v8032_v42 }
 0x330   :  { %v1141_v12 = vmul.f32 %v1103_v35, %v8030_v50 }
 0x331   :  { %v1153_v30 = vadd.f32 %v1152_v21, %v1138_v46  ;;  %v1116_v10 = vadd.f32 %v1115_v1, %v1101_v41  ;;  %v1139_v11 = vmul.f32 %v1101_v41, %v8032_v42 }
 0x333   :  { %v1117_v15 = vadd.f32 %v1116_v10, %v1102_v5  ;;  %v1154_v49 = vadd.f32 %v1153_v30, %v1139_v11 }
 0x335   :  { %v1155_v36 = vadd.f32 %v1154_v49, %v1140_v28  ;;  %v1118_v53 = vadd.f32 %v1117_v15, %v1103_v35  ;;  %v11112_v49 = vld [vmem:[#allocation32_spill] sm:$0xff] }
 0x336   :  { %v11117_v15 = vld [vmem:[#allocation36_spill] sm:$0xff] }
 0x337   :  { %v6448_v55 = vpop.f32.mrb[24].mxu1  ;;  %v1156_v29 = vadd.f32 %v1155_v36, %v1141_v12 }
 0x338   :  { %v1042_v54 = vadd.f32 %v6448_v55, %v7994_v63  ;;  %v1033_v16 = vpop.f32.mrb[25].mxu1  ;;  %v11115_v55 = vld [vmem:[#allocation35_spill] sm:$0xff] }
 0x339   :  { %v1034_v21 = vadd.f32 %v1033_v16, %v7994_v63  ;;  %v6449_v46 = vpop.f32.mrb[26].mxu1 }
 0x33a   :  { %v1045_v1 = vadd.f32 %v6449_v46, %v7994_v63  ;;  %v1036_v62 = vpop.f32.mrb[27].mxu1  ;;  %v8047_v41 = vmax.f32 %v1042_v54, 0.0  ;;  %v11116_v54 = vld [vmem:[#allocation34_spill] sm:$0xff] }
 0x33b   :  { %v8049_v45 = vmax.f32 %v1034_v21, 0.0  ;;  %v1037_v5 = vadd.f32 %v1036_v62, %v7994_v63 }
 0x33c   :  { %11110 = vst [vmem:[#allocation73_spill] sm:$0xff] %v8047_v41  ;;  %v8054_v35 = vmax.f32 %v1045_v1, 0.0  ;;  %v1106_v36 = vmul.f32 %v11115_v55, %v8047_v41 }
 0x33d   :  { %11111 = vst [vmem:[#allocation75_spill] sm:$0xff] %v8049_v45  ;;  %v1104_v30 = vmul.f32 %v11112_v49, %v8049_v45  ;;  %v8056_v12 = vmax.f32 %v1037_v5, 0.0 }
 0x33e   :  { %11113 = vst [vmem:[#allocation76_spill] sm:$0xff] %v8054_v35  ;;  %v1107_v62 = vmul.f32 %v11117_v15, %v8054_v35  ;;  %v1144_v1 = vmul.f32 %v1106_v36, %v8047_v41 }
 0x33f   :  { %11114 = vst [vmem:[#allocation77_spill] sm:$0xff] %v8056_v12  ;;  %v1119_v16 = vadd.f32 %v1118_v53, %v1104_v30  ;;  %v1142_v10 = vmul.f32 %v1104_v30, %v8049_v45  ;;  %v1105_v11 = vmul.f32 %v11116_v54, %v8056_v12 }
 0x340   :  { %v1145_v50 = vmul.f32 %v1107_v62, %v8054_v35 }
 0x341   :  { %v1157_v28 = vadd.f32 %v1156_v29, %v1142_v10  ;;  %v1120_v21 = vadd.f32 %v1119_v16, %v1105_v11  ;;  %v1143_v46 = vmul.f32 %v1105_v11, %v8056_v12 }
 0x343   :  { %v1121_v5 = vadd.f32 %v1120_v21, %v1106_v36  ;;  %v1158_v49 = vadd.f32 %v1157_v28, %v1143_v46 }
 0x345   :  { %v1159_v55 = vadd.f32 %v1158_v49, %v1144_v1  ;;  %v1122_v53 = vadd.f32 %v1121_v5, %v1107_v62  ;;  %v11120_v49 = vld [vmem:[#allocation37_spill] sm:$0xff] }
 0x346   :  { %v11123_v5 = vld [vmem:[#allocation41_spill] sm:$0xff] }
 0x347   :  { %v6452_v42 = vpop.f32.mrb[28].mxu1  ;;  %v1160_v30 = vadd.f32 %v1159_v55, %v1145_v50 }
 0x348   :  { %v1058_v45 = vadd.f32 %v6452_v42, %v7994_v63  ;;  %v1049_v54 = vpop.f32.mrb[29].mxu1  ;;  %v11121_v42 = vld [vmem:[#allocation40_spill] sm:$0xff] }
 0x349   :  { %v1050_v29 = vadd.f32 %v1049_v54, %v7994_v63  ;;  %v6453_v10 = vpop.f32.mrb[30].mxu1 }
 0x34a   :  { %v1061_v16 = vadd.f32 %v6453_v10, %v7994_v63  ;;  %v1052_v15 = vpop.f32.mrb[31].mxu1  ;;  %v8071_v11 = vmax.f32 %v1058_v45, 0.0  ;;  %v11122_v45 = vld [vmem:[#allocation39_spill] sm:$0xff] }
 0x34b   :  { %v8073_v41 = vmax.f32 %v1050_v29, 0.0  ;;  %v1053_v36 = vadd.f32 %v1052_v15, %v7994_v63 }
 0x34c   :  { %11118 = vst [vmem:[#allocation78_spill] sm:$0xff] %v8071_v11  ;;  %v8078_v62 = vmax.f32 %v1061_v16, 0.0  ;;  %v1110_v55 = vmul.f32 %v11121_v42, %v8071_v11 }
 0x34d   :  { %11119 = vst [vmem:[#allocation79_spill] sm:$0xff] %v8073_v41  ;;  %v1108_v28 = vmul.f32 %v11120_v49, %v8073_v41  ;;  %v8080_v50 = vmax.f32 %v1053_v36, 0.0 }
 0x34e   :  { %v1111_v15 = vmul.f32 %v11123_v5, %v8078_v62  ;;  %v1148_v16 = vmul.f32 %v1110_v55, %v8071_v11 }
 0x34f   :  { %v1123_v54 = vadd.f32 %v1122_v53, %v1108_v28  ;;  %v1146_v21 = vmul.f32 %v1108_v28, %v8073_v41  ;;  %v1109_v46 = vmul.f32 %v11122_v45, %v8080_v50 }
 0x350   :  { %v1149_v35 = vmul.f32 %v1111_v15, %v8078_v62 }
 0x351   :  { %v1161_v1 = vadd.f32 %v1160_v30, %v1146_v21  ;;  %v1124_v29 = vadd.f32 %v1123_v54, %v1109_v46  ;;  %v1147_v10 = vmul.f32 %v1109_v46, %v8080_v50 }
 0x353   :  { %v1125_v36 = vadd.f32 %v1124_v29, %v1110_v55  ;;  %v1162_v49 = vadd.f32 %v1161_v1, %v1147_v10 }
 0x355   :  { %v1126_v42 = vadd.f32 %v1125_v36, %v1111_v15  ;;  %v1163_v53 = vadd.f32 %v1162_v49, %v1148_v16 }
 0x357   :  { %v1127_v12 = vrot.slane %v1126_v42, 4  ;;  %v1164_v28 = vadd.f32 %v1163_v53, %v1149_v35 }
 0x359   :  { %v1128_v41 = vadd.f32 %v1127_v12, %v1126_v42  ;;  %v1165_v25 = vrot.slane %v1164_v28, 4 }
 0x35b   :  { %v1129_v45 = vrot.slane %v1128_v41, 2  ;;  %v1166_v30 = vadd.f32 %v1165_v25, %v1164_v28 }
 0x35d   :  { %v1130_v21 = vadd.f32 %v1129_v45, %v1128_v41  ;;  %v1167_v20 = vrot.slane %v1166_v30, 2 }
 0x35f   :  { %v1131_v5 = vrot.slane %v1130_v21, 1  ;;  %v1168_v54 = vadd.f32 %v1167_v20, %v1166_v30 }
 0x361   :  { %v8092_v33 = vadd.f32 %v1131_v5, %v1130_v21  ;;  %v1169_v46 = vrot.slane %v1168_v54, 1 }
 0x363   :  { %v8094_v11 = vadd.f32 %v1169_v46, %v1168_v54 }
 0x364   :  { %6880 = dma.done.wait [#allocation4 + $0x1], 2048 }
 0x365   :  { %6881 = vsyncadd [#allocation4 + $0x1], 4294965248  ;;  %v1191_v49 = vld [vmem:[%s10809_s2] sm:$0xf]  ;;  %v1193_v35 = vld [vmem:[%s10809_s2 + $0x8] sm:$0xf] }
 0x366   :  { %v1195_v25 = vld [vmem:[%s10809_s2 + $0x4] sm:$0xf]  ;;  %1192 = vst [vmem:[#allocation2] sm:$0xf] %v1191_v49  ;;  %1194 = vst [vmem:[#allocation2 + $0x4] sm:$0xf] %v1193_v35 }
 0x367   :  { %1196 = vst [vmem:[#allocation2 + $0x8] sm:$0xf] %v1195_v25  ;;  %v1197_v20 = vld [vmem:[%s10809_s2 + $0xc] sm:$0xff]   ;;  %v1201_v41 = vld [vmem:[%s10809_s2 + $0x18] sm:$0xf]  ;;  %v1205_v42 = vld [vmem:[%s10809_s2 + $0x1c] sm:$0xff]  }
 0x368   :  { %v1203_v12 = vld [vmem:[%s10809_s2 + $0x14] sm:$0xf]  ;;  %1198 = vst [vmem:[#allocation2 + $0xc] sm:$0xff] %v1197_v20   ;;  %1202 = vst [vmem:[#allocation2 + $0x14] sm:$0xf] %v1201_v41  ;;  %v1213_v1 = vld [vmem:[%s10809_s2 + $0x2c] sm:$0xff]  }
 0x369   :  { %1204 = vst [vmem:[#allocation2 + $0x18] sm:$0xf] %v1203_v12  ;;  %v1209_v55 = vld [vmem:[%s10809_s2 + $0x28] sm:$0xf]  ;;  %v1211_v45 = vld [vmem:[%s10809_s2 + $0x24] sm:$0xf] }
 0x36a   :  { %1206 = vst [vmem:[#allocation2 + $0x1c] sm:$0xff] %v1205_v42   ;;  %1210 = vst [vmem:[#allocation2 + $0x24] sm:$0xf] %v1209_v55  ;;  %v1217_v5 = vld [vmem:[%s10809_s2 + $0x38] sm:$0xf]  ;;  %v1221_v29 = vld [vmem:[%s10809_s2 + $0x3c] sm:$0xff]  }
 0x36b   :  { %1212 = vst [vmem:[#allocation2 + $0x28] sm:$0xf] %v1211_v45  ;;  %v1219_v15 = vld [vmem:[%s10809_s2 + $0x34] sm:$0xf]  ;;  %1214 = vst [vmem:[#allocation2 + $0x2c] sm:$0xff] %v1213_v1   ;;  %v1229_v36 = vld [vmem:[%s10809_s2 + $0x4c] sm:$0xff]  }
 0x36c   :  { %1218 = vst [vmem:[#allocation2 + $0x34] sm:$0xf] %v1217_v5  ;;  %1220 = vst [vmem:[#allocation2 + $0x38] sm:$0xf] %v1219_v15  ;;  %v1225_v10 = vld [vmem:[%s10809_s2 + $0x48] sm:$0xf] }
 0x36d   :  { %v1227_v16 = vld [vmem:[%s10809_s2 + $0x44] sm:$0xf]  ;;  %1222 = vst [vmem:[#allocation2 + $0x3c] sm:$0xff] %v1221_v29   ;;  %1226 = vst [vmem:[#allocation2 + $0x44] sm:$0xf] %v1225_v10  ;;  %v1237_v30 = vld [vmem:[%s10809_s2 + $0x5c] sm:$0xff]  }
 0x36e   :  { %1228 = vst [vmem:[#allocation2 + $0x48] sm:$0xf] %v1227_v16  ;;  %v1233_v53 = vld [vmem:[%s10809_s2 + $0x58] sm:$0xf]  ;;  %v1235_v28 = vld [vmem:[%s10809_s2 + $0x54] sm:$0xf] }
 0x36f   :  { %1230 = vst [vmem:[#allocation2 + $0x4c] sm:$0xff] %v1229_v36   ;;  %1234 = vst [vmem:[#allocation2 + $0x54] sm:$0xf] %v1233_v53  ;;  %v1241_v21 = vld [vmem:[%s10809_s2 + $0x68] sm:$0xf]  ;;  %v1245_v46 = vld [vmem:[%s10809_s2 + $0x6c] sm:$0xff]  }
 0x370   :  { %1236 = vst [vmem:[#allocation2 + $0x58] sm:$0xf] %v1235_v28  ;;  %v1243_v54 = vld [vmem:[%s10809_s2 + $0x64] sm:$0xf]  ;;  %1238 = vst [vmem:[#allocation2 + $0x5c] sm:$0xff] %v1237_v30  }
 0x371   :  { %1242 = vst [vmem:[#allocation2 + $0x64] sm:$0xf] %v1241_v21  ;;  %1244 = vst [vmem:[#allocation2 + $0x68] sm:$0xf] %v1243_v54  ;;  %v1249_v49 = vld [vmem:[%s10809_s2 + $0x78] sm:$0xf] }
 0x372   :  { %v1251_v35 = vld [vmem:[%s10809_s2 + $0x74] sm:$0xf]  ;;  %1246 = vst [vmem:[#allocation2 + $0x6c] sm:$0xff] %v1245_v46   ;;  %1250 = vst [vmem:[#allocation2 + $0x74] sm:$0xf] %v1249_v49 }
 0x373   :  { %1252 = vst [vmem:[#allocation2 + $0x78] sm:$0xf] %v1251_v35  ;;  %v1253_v25 = vld [vmem:[%s10809_s2 + $0x7c] sm:$0xf] }
 0x374   :  { %1254 = vst [vmem:[#allocation2 + $0x7c] sm:$0xf] %v1253_v25 }
 0x375   :  { %1349 = vsyncadd [#allocation4], 2048  ;;  %5858 = vmatprep.subr.bf16.mxu0 %v7721_v51  ;;  %v1351_v20 = vld [vmem:[#allocation2 + $0x88] sm:$0xff]  ;;  %6454 = vmatprep.subr.bf16.mxu1 %v7841_v0  ;;  %v11126_v10 = vld [vmem:[#allocation50_spill] sm:$0xff] }
 0x376   :  { %5859 = vmatpush3.bf16.msra.mxu0 %v7048_v32  ;;  %1398 = vmatprep.mubr.bf16.mxu0 %v1351_v20  ;;  %v1350_v32 = vld [vmem:[#allocation2 + $0x80] sm:$0xff]  ;;  %v1359_v51 = vld [vmem:[#allocation2 + $0xc8] sm:$0xff] }
 0x377   :  { %5860 = vmatprep.subr.bf16.mxu0 %v7735_v7  ;;  %6455 = vmatpush3.bf16.msra.mxu1 %v7841_v0  ;;  %v11127_v35 = vld [vmem:[#allocation51_spill] sm:$0xff] }
 0x378   :  { %6456 = vmatprep.subr.bf16.mxu1 %v7845_v61 }
 0x37a   :  { %5861 = vmatpush3.bf16.msra.mxu0 %v7069_v38  ;;  %v1352_v38 = vld [vmem:[#allocation2 + $0x90] sm:$0xff] }
 0x37b   :  { %5862 = vmatprep.subr.bf16.mxu0 %v7739_v47  ;;  %6457 = vmatpush3.bf16.msra.mxu1 %v7845_v61  ;;  %v1357_v47 = vld [vmem:[#allocation2 + $0xb8] sm:$0xff]  ;;  %v1363_v61 = vld [vmem:[#allocation2 + $0xe8] sm:$0xff] }
 0x37c   :  { %6458 = vmatprep.subr.bf16.mxu1 %v7854_v8 }
 0x37e   :  { %5863 = vmatpush3.bf16.msra.mxu0 %v7073_v39  ;;  %v1355_v39 = vld [vmem:[#allocation2 + $0xa8] sm:$0xff] }
 0x37f   :  { %5864 = vmatprep.subr.bf16.mxu0 %v7743_v52  ;;  %6459 = vmatpush3.bf16.msra.mxu1 %v7854_v8  ;;  %v1358_v52 = vld [vmem:[#allocation2 + $0xc0] sm:$0xff] }
 0x380   :  { %6460 = vmatprep.subr.bf16.mxu1 %v7862_v9 }
 0x382   :  { %5865 = vmatpush3.bf16.msra.mxu0 %v7077_v40  ;;  %v1354_v40 = vld [vmem:[#allocation2 + $0xa0] sm:$0xff] }
 0x383   :  { %5866 = vmatprep.subr.bf16.mxu0 %v7747_v48  ;;  %6461 = vmatpush3.bf16.msra.mxu1 %v7862_v9  ;;  %v1356_v48 = vld [vmem:[#allocation2 + $0xb0] sm:$0xff] }
 0x384   :  { %6462 = vmatprep.subr.bf16.mxu1 %v7880_v13 }
 0x386   :  { %5867 = vmatpush3.bf16.msra.mxu0 %v7690_v6 }
 0x387   :  { %5868 = vmatprep.subr.bf16.mxu0 %v7751_v34  ;;  %6463 = vmatpush3.bf16.msra.mxu1 %v7880_v13  ;;  %v1353_v34 = vld [vmem:[#allocation2 + $0x98] sm:$0xff] }
 0x388   :  { %6464 = vmatprep.subr.bf16.mxu1 %v7886_v14 }
 0x38a   :  { %5869 = vmatpush3.bf16.msra.mxu0 %v7709_v4  ;;  %v1364_v4 = vld [vmem:[#allocation2 + $0xf0] sm:$0xff] }
 0x38b   :  { %5870 = vmatprep.subr.bf16.mxu0 %v7755_v58  ;;  %6465 = vmatpush3.bf16.msra.mxu1 %v7886_v14  ;;  %v1361_v58 = vld [vmem:[#allocation2 + $0xd8] sm:$0xff]  ;;  %v11124_v14 = vld [vmem:[#allocation43_spill] sm:$0xff] }
 0x38c   :  { %6466 = vmatprep.subr.bf16.mxu1 %v7892_v44 }
 0x38e   :  { %5871 = vmatpush3.bf16.msra.mxu0 %v7713_v2  ;;  %v1362_v2 = vld [vmem:[#allocation2 + $0xe0] sm:$0xff] }
 0x38f   :  { %5872 = vmatprep.subr.bf16.mxu0 %v7759_v60  ;;  %6467 = vmatpush3.bf16.msra.mxu1 %v7892_v44  ;;  %v1360_v60 = vld [vmem:[#allocation2 + $0xd0] sm:$0xff] }
 0x390   :  { %6468 = vmatprep.subr.bf16.mxu1 %v7898_v17 }
 0x392   :  { %5873 = vmatpush3.bf16.msra.mxu0 %v7717_v3  ;;  %v1365_v3 = vld [vmem:[#allocation2 + $0xf8] sm:$0xff] }
 0x393   :  { %6469 = vmatpush3.bf16.msra.mxu1 %v7898_v17  ;;  %v11125_v17 = vld [vmem:[#allocation44_spill] sm:$0xff] }
 0x394   :  { %6486 = vmatprep.subr.bf16.mxu1 %v7904_v18 }
 0x395   :  { %1399 = vmatmul.mubr.bf16.vlgmr.msra.gmra.mrb[32].mxu0 %v1350_v32 }
 0x396   :  { %1406 = vmatprep.mubr.bf16.mxu0 %v1353_v34 }
 0x39d   :  { %1407 = vmatmul.mubr.bf16.gmra.mrb[36].mxu0 %v1352_v38 }
 0x39e   :  { %1414 = vmatprep.mubr.bf16.mxu0 %v1355_v39 }
 0x3a5   :  { %1415 = vmatmul.mubr.bf16.gmra.mrb[40].mxu0 %v1354_v40 }
 0x3a6   :  { %1422 = vmatprep.mubr.bf16.mxu0 %v1357_v47 }
 0x3ad   :  { %1423 = vmatmul.mubr.bf16.gmra.mrb[44].mxu0 %v1356_v48 }
 0x3ae   :  { %1430 = vmatprep.mubr.bf16.mxu0 %v1359_v51 }
 0x3b5   :  { %1431 = vmatmul.mubr.bf16.gmra.mrb[48].mxu0 %v1358_v52 }
 0x3b6   :  { %1438 = vmatprep.mubr.bf16.mxu0 %v1361_v58 }
 0x3bd   :  { %1439 = vmatmul.mubr.bf16.gmra.mrb[52].mxu0 %v1360_v60  ;;  %v11128_v60 = vld [vmem:[#allocation52_spill] sm:$0xff] }
 0x3be   :  { %1446 = vmatprep.mubr.bf16.mxu0 %v1363_v61  ;;  %v11129_v61 = vld [vmem:[#allocation53_spill] sm:$0xff] }
 0x3c5   :  { %1447 = vmatmul.mubr.bf16.gmra.mrb[56].mxu0 %v1362_v2 }
 0x3c6   :  { %1454 = vmatprep.mubr.bf16.mxu0 %v1365_v3 }
 0x3cd   :  { %1455 = vmatmul.mubr.bf16.gmra.mrb[60].mxu0 %v1364_v4 }
 0x468   :  { %v5874_v6 = vpop.f32.mrb[32].mxu0 }
 0x469   :  { %v5875_v7 = vpop.f32.mrb[33].mxu0 }
 0x46a   :  { %v5876_v0 = vadd.f32 %v5875_v7, %v5874_v6  ;;  %v5877_v8 = vpop.f32.mrb[34].mxu0 }
 0x46b   :  { %v5878_v9 = vpop.f32.mrb[35].mxu0 }
 0x46c   :  { %v5879_v13 = vadd.f32 %v5878_v9, %v5877_v8  ;;  %v1463_v44 = vadd.f32 %v5876_v0, %v11124_v14  ;;  %v11130_v0 = vld [vmem:[#allocation59_spill] sm:$0xff]  ;;  %v11131_v9 = vld [vmem:[#allocation60_spill] sm:$0xff] }
 0x46e   :  { %v1464_v41 = vadd.f32 %v5879_v13, %v11125_v17 }
 0x470   :  { %v5880_v12 = vpop.f32.mrb[36].mxu0  ;;  %v1479_v42 = vpack.c.bf16 %v1464_v41, %v1463_v44 }
 0x471   :  { %v5881_v55 = vpop.f32.mrb[37].mxu0 }
 0x472   :  { %v5882_v45 = vadd.f32 %v5881_v55, %v5880_v12  ;;  %v5883_v1 = vpop.f32.mrb[38].mxu0  ;;  %6470 = vmatprep.mubr.bf16.mxu1 %v1479_v42  ;;  %v11132_v55 = vld [vmem:[#allocation61_spill] sm:$0xff] }
 0x473   :  { %v5884_v5 = vpop.f32.mrb[39].mxu0 }
 0x474   :  { %v5885_v15 = vadd.f32 %v5884_v5, %v5883_v1  ;;  %v1465_v29 = vadd.f32 %v5882_v45, %v7535_v57 }
 0x476   :  { %v1466_v16 = vadd.f32 %v5885_v15, %v11126_v10 }
 0x478   :  { %v1480_v36 = vpack.c.bf16 %v1466_v16, %v1465_v29  ;;  %v5886_v53 = vpop.f32.mrb[40].mxu0 }
 0x479   :  { %v5887_v28 = vpop.f32.mrb[41].mxu0 }
 0x47a   :  { %v5888_v30 = vadd.f32 %v5887_v28, %v5886_v53  ;;  %v5889_v21 = vpop.f32.mrb[42].mxu0  ;;  %6471 = vmatmul.mubr.bf16.vlgmr.msra.gmra.mrb[32].mxu1 %v1480_v36  ;;  %v11134_v53 = vld [vmem:[#allocation63_spill] sm:$0xff] }
 0x47b   :  { %v5890_v54 = vpop.f32.mrb[43].mxu0  ;;  %6487 = vmatpush3.bf16.msra.mxu1 %v7904_v18 }
 0x47c   :  { %v5891_v46 = vadd.f32 %v5890_v54, %v5889_v21  ;;  %6488 = vmatprep.subr.bf16.mxu1 %v7913_v22  ;;  %v1467_v49 = vadd.f32 %v5888_v30, %v7545_v59  ;;  %v11135_v30 = vld [vmem:[#allocation72_spill] sm:$0xff] }
 0x47e   :  { %v1468_v25 = vadd.f32 %v5891_v46, %v11127_v35 }
 0x47f   :  { %6489 = vmatpush3.bf16.msra.mxu1 %v7913_v22 }
 0x480   :  { %v1481_v57 = vpack.c.bf16 %v1468_v25, %v1467_v49  ;;  %v5892_v20 = vpop.f32.mrb[44].mxu0  ;;  %6490 = vmatprep.subr.bf16.mxu1 %v7919_v23 }
 0x481   :  { %v5893_v32 = vpop.f32.mrb[45].mxu0 }
 0x482   :  { %v5894_v34 = vadd.f32 %v5893_v32, %v5892_v20  ;;  %v5895_v38 = vpop.f32.mrb[46].mxu0  ;;  %6474 = vmatprep.mubr.bf16.mxu1 %v1481_v57 }
 0x483   :  { %v5896_v39 = vpop.f32.mrb[47].mxu0  ;;  %6491 = vmatpush3.bf16.msra.mxu1 %v7919_v23 }
 0x484   :  { %v5897_v18 = vadd.f32 %v5896_v39, %v5895_v38  ;;  %6492 = vmatprep.subr.bf16.mxu1 %v7927_v37  ;;  %v1469_v59 = vadd.f32 %v5894_v34, %v7555_v31 }
 0x486   :  { %v1470_v40 = vadd.f32 %v5897_v18, %v7560_v43 }
 0x487   :  { %6493 = vmatpush3.bf16.msra.mxu1 %v7927_v37 }
 0x488   :  { %v1482_v22 = vpack.c.bf16 %v1470_v40, %v1469_v59  ;;  %v5898_v47 = vpop.f32.mrb[48].mxu0  ;;  %6494 = vmatprep.subr.bf16.mxu1 %v7933_v27 }
 0x489   :  { %v5899_v48 = vpop.f32.mrb[49].mxu0 }
 0x48a   :  { %v5900_v51 = vadd.f32 %v5899_v48, %v5898_v47  ;;  %v5901_v52 = vpop.f32.mrb[50].mxu0  ;;  %6475 = vmatmul.mubr.bf16.gmra.mrb[36].mxu1 %v1482_v22 }
 0x48b   :  { %v5902_v58 = vpop.f32.mrb[51].mxu0  ;;  %6495 = vmatpush3.bf16.msra.mxu1 %v7933_v27 }
 0x48c   :  { %v5903_v23 = vadd.f32 %v5902_v58, %v5901_v52  ;;  %6496 = vmatprep.subr.bf16.mxu1 %v7941_v24  ;;  %v1471_v31 = vadd.f32 %v5900_v51, %v11128_v60 }
 0x48e   :  { %v1472_v43 = vadd.f32 %v5903_v23, %v11129_v61 }
 0x48f   :  { %6497 = vmatpush3.bf16.msra.mxu1 %v7941_v24 }
 0x490   :  { %v1483_v37 = vpack.c.bf16 %v1472_v43, %v1471_v31  ;;  %v5904_v2 = vpop.f32.mrb[52].mxu0  ;;  %6498 = vmatprep.subr.bf16.mxu1 %v7956_v19 }
 0x491   :  { %v5905_v3 = vpop.f32.mrb[53].mxu0 }
 0x492   :  { %v5906_v4 = vadd.f32 %v5905_v3, %v5904_v2  ;;  %v5907_v6 = vpop.f32.mrb[54].mxu0  ;;  %6478 = vmatprep.mubr.bf16.mxu1 %v1483_v37 }
 0x493   :  { %v5908_v7 = vpop.f32.mrb[55].mxu0  ;;  %6499 = vmatpush3.bf16.msra.mxu1 %v7956_v19  ;;  %v11133_v19 = vld [vmem:[#allocation62_spill] sm:$0xff] }
 0x494   :  { %v5909_v27 = vadd.f32 %v5908_v7, %v5907_v6  ;;  %6500 = vmatprep.subr.bf16.mxu1 %v7962_v56  ;;  %v1473_v8 = vadd.f32 %v5906_v4, %v11130_v0 }
 0x496   :  { %v1474_v13 = vadd.f32 %v5909_v27, %v11131_v9 }
 0x497   :  { %6501 = vmatpush3.bf16.msra.mxu1 %v7962_v56 }
 0x498   :  { %v1484_v24 = vpack.c.bf16 %v1474_v13, %v1473_v8  ;;  %v5910_v14 = vpop.f32.mrb[56].mxu0 }
 0x499   :  { %v5911_v44 = vpop.f32.mrb[57].mxu0 }
 0x49a   :  { %v5912_v17 = vadd.f32 %v5911_v44, %v5910_v14  ;;  %v5913_v41 = vpop.f32.mrb[58].mxu0  ;;  %6479 = vmatmul.mubr.bf16.gmra.mrb[40].mxu1 %v1484_v24 }
 0x49b   :  { %v5914_v12 = vpop.f32.mrb[59].mxu0 }
 0x49c   :  { %v5915_v42 = vadd.f32 %v5914_v12, %v5913_v41  ;;  %v1475_v45 = vadd.f32 %v5912_v17, %v11132_v55 }
 0x49e   :  { %v1476_v1 = vadd.f32 %v5915_v42, %v11133_v19 }
 0x4a0   :  { %v1485_v5 = vpack.c.bf16 %v1476_v1, %v1475_v45  ;;  %v5916_v15 = vpop.f32.mrb[60].mxu0 }
 0x4a1   :  { %v5917_v29 = vpop.f32.mrb[61].mxu0 }
 0x4a2   :  { %v5918_v10 = vadd.f32 %v5917_v29, %v5916_v15  ;;  %v5919_v16 = vpop.f32.mrb[62].mxu0  ;;  %6482 = vmatprep.mubr.bf16.mxu1 %v1485_v5 }
 0x4a3   :  { %v5920_v36 = vpop.f32.mrb[63].mxu0 }
 0x4a4   :  { %v5921_v56 = vadd.f32 %v5920_v36, %v5919_v16  ;;  %v1477_v28 = vadd.f32 %v5918_v10, %v11134_v53 }
 0x4a6   :  { %v1478_v21 = vadd.f32 %v5921_v56, %v11135_v30 }
 0x4a8   :  { %v1486_v54 = vpack.c.bf16 %v1478_v21, %v1477_v28 }
 0x4aa   :  { %6483 = vmatmul.mubr.bf16.gmra.mrb[44].mxu1 %v1486_v54 }
 0x54d   :  { %v6472_v46 = vpop.f32.mrb[32].mxu1 }
 0x54e   :  { %v1530_v49 = vadd.f32 %v6472_v46, %v7971_v26  ;;  %v1521_v35 = vpop.f32.mrb[33].mxu1 }
 0x54f   :  { %v1522_v25 = vadd.f32 %v1521_v35, %v7971_v26  ;;  %v6473_v57 = vpop.f32.mrb[34].mxu1 }
 0x550   :  { %v1533_v20 = vadd.f32 %v6473_v57, %v7971_v26  ;;  %v1524_v32 = vpop.f32.mrb[35].mxu1  ;;  %v1586_v38 = vmax.f32 %v1530_v49, 0.0 }
 0x551   :  { %v1525_v34 = vadd.f32 %v1524_v32, %v7971_v26  ;;  %v1584_v18 = vmax.f32 %v1522_v25, 0.0 }
 0x552   :  { %v1587_v39 = vmax.f32 %v1533_v20, 0.0 }
 0x553   :  { %v1585_v59 = vmax.f32 %v1525_v34, 0.0  ;;  %v11136_v34 = vld [vmem:[#allocation42_spill] sm:$0xff] }
 0x554   :  { %v1601_v40 = vpack.c.bf16 %v1587_v39, %v1586_v38 }
 0x555   :  { %v1600_v22 = vpack.c.bf16 %v1585_v59, %v1584_v18  ;;  %v11137_v59 = vld [vmem:[#allocation47_spill] sm:$0xff] }
 0x557   :  { %6502 = vmatprep.mubr.bf16.mxu1 %v1600_v22  ;;  %v11138_v22 = vld [vmem:[#allocation46_spill] sm:$0xff] }
 0x558   :  { %6503 = vmatmul.mubr.bf16.vlgmr.msra.gmra.mrb[48].mxu1 %v1601_v40 }
 0x55d   :  { %v6476_v47 = vpop.f32.mrb[36].mxu1 }
 0x55e   :  { %v1546_v48 = vadd.f32 %v6476_v47, %v7971_v26  ;;  %v1537_v51 = vpop.f32.mrb[37].mxu1 }
 0x55f   :  { %v1538_v52 = vadd.f32 %v1537_v51, %v7971_v26  ;;  %v6477_v58 = vpop.f32.mrb[38].mxu1  ;;  %v8277_v51 = vld [vmem:[%s10811_s4 + $0x84] sm:$0xf] }
 0x560   :  { %v1549_v23 = vadd.f32 %v6477_v58, %v7971_v26  ;;  %v1540_v60 = vpop.f32.mrb[39].mxu1  ;;  %v1590_v61 = vmax.f32 %v1546_v48, 0.0  ;;  %v8272_v48 = vld [vmem:[%s10811_s4 + $0x80] sm:$0xf]  ;;  %v8287_v58 = vld [vmem:[%s10811_s4 + $0x8c] sm:$0xf] }
 0x561   :  { %v1541_v31 = vadd.f32 %v1540_v60, %v7971_v26  ;;  %v1588_v37 = vmax.f32 %v1538_v52, 0.0  ;;  %v8282_v52 = vld [vmem:[%s10811_s4 + $0x88] sm:$0xf]  ;;  %v8297_v60 = vld [vmem:[%s10811_s4 + $0x94] sm:$0xf] }
 0x562   :  { %v1591_v43 = vmax.f32 %v1549_v23, 0.0  ;;  %v8292_v23 = vld [vmem:[%s10811_s4 + $0x90] sm:$0xf] }
 0x563   :  { %v1589_v2 = vmax.f32 %v1541_v31, 0.0 }
 0x564   :  { %v1603_v3 = vpack.c.bf16 %v1591_v43, %v1590_v61  ;;  %v11139_v61 = vld [vmem:[#allocation48_spill] sm:$0xff] }
 0x565   :  { %v1602_v4 = vpack.c.bf16 %v1589_v2, %v1588_v37 }
 0x567   :  { %6506 = vmatprep.mubr.bf16.mxu1 %v1602_v4  ;;  %v8311_v4 = vld [vmem:[%s10811_s4 + $0x9c] sm:$0xf] }
 0x568   :  { %6507 = vmatmul.mubr.bf16.gmra.mrb[52].mxu1 %v1603_v3  ;;  %v8306_v3 = vld [vmem:[%s10811_s4 + $0x98] sm:$0xf] }
 0x56d   :  { %v6480_v6 = vpop.f32.mrb[40].mxu1 }
 0x56e   :  { %v1562_v7 = vadd.f32 %v6480_v6, %v7971_v26  ;;  %v1553_v27 = vpop.f32.mrb[41].mxu1  ;;  %v8316_v6 = vld [vmem:[%s10811_s4 + $0xa0] sm:$0xf] }
 0x56f   :  { %v1554_v0 = vadd.f32 %v1553_v27, %v7971_v26  ;;  %v6481_v8 = vpop.f32.mrb[42].mxu1  ;;  %11140 = vst [vmem:[#allocation43_spill] sm:$0xff] %v8316_v6  ;;  %v8326_v27 = vld [vmem:[%s10811_s4 + $0xa8] sm:$0xf] }
 0x570   :  { %v1565_v9 = vadd.f32 %v6481_v8, %v7971_v26  ;;  %v1556_v13 = vpop.f32.mrb[43].mxu1  ;;  %v1594_v14 = vmax.f32 %v1562_v7, 0.0  ;;  %v8321_v7 = vld [vmem:[%s10811_s4 + $0xa4] sm:$0xf]  ;;  %11142 = vst [vmem:[#allocation50_spill] sm:$0xff] %v8326_v27 }
 0x571   :  { %v1557_v24 = vadd.f32 %v1556_v13, %v7971_v26  ;;  %v1592_v17 = vmax.f32 %v1554_v0, 0.0  ;;  %11141 = vst [vmem:[#allocation44_spill] sm:$0xff] %v8321_v7  ;;  %v8331_v0 = vld [vmem:[%s10811_s4 + $0xac] sm:$0xf] }
 0x572   :  { %v1595_v44 = vmax.f32 %v1565_v9, 0.0  ;;  %11143 = vst [vmem:[#allocation51_spill] sm:$0xff] %v8331_v0 }
 0x573   :  { %v1593_v41 = vmax.f32 %v1557_v24, 0.0  ;;  %v8337_v24 = vld [vmem:[%s10811_s4 + $0xb0] sm:$0xf] }
 0x574   :  { %v1605_v12 = vpack.c.bf16 %v1595_v44, %v1594_v14  ;;  %11144 = vst [vmem:[#allocation52_spill] sm:$0xff] %v8337_v24  ;;  %v8342_v14 = vld [vmem:[%s10811_s4 + $0xb4] sm:$0xf]  ;;  %v8347_v44 = vld [vmem:[%s10811_s4 + $0xb8] sm:$0xf] }
 0x575   :  { %v1604_v42 = vpack.c.bf16 %v1593_v41, %v1592_v17  ;;  %11145 = vst [vmem:[#allocation53_spill] sm:$0xff] %v8342_v14  ;;  %11146 = vst [vmem:[#allocation59_spill] sm:$0xff] %v8347_v44  ;;  %v8352_v17 = vld [vmem:[%s10811_s4 + $0xbc] sm:$0xf]  ;;  %v8357_v41 = vld [vmem:[%s10811_s4 + $0xc0] sm:$0xf] }
 0x576   :  { %11147 = vst [vmem:[#allocation60_spill] sm:$0xff] %v8352_v17  ;;  %11148 = vst [vmem:[#allocation61_spill] sm:$0xff] %v8357_v41 }
 0x577   :  { %6510 = vmatprep.mubr.bf16.mxu1 %v1604_v42 }
 0x578   :  { %6511 = vmatmul.mubr.bf16.gmra.mrb[56].mxu1 %v1605_v12  ;;  %v8362_v12 = vld [vmem:[%s10811_s4 + $0xc4] sm:$0xf] }
 0x579   :  { %11149 = vst [vmem:[#allocation62_spill] sm:$0xff] %v8362_v12 }
 0x57d   :  { %v6484_v55 = vpop.f32.mrb[44].mxu1 }
 0x57e   :  { %v1578_v45 = vadd.f32 %v6484_v55, %v7971_v26  ;;  %v1569_v19 = vpop.f32.mrb[45].mxu1 }
 0x57f   :  { %v1570_v1 = vadd.f32 %v1569_v19, %v7971_v26  ;;  %v6485_v5 = vpop.f32.mrb[46].mxu1  ;;  %v8368_v19 = vld [vmem:[%s10811_s4 + $0xc8] sm:$0xf] }
 0x580   :  { %v1581_v15 = vadd.f32 %v6485_v5, %v7971_v26  ;;  %v1572_v29 = vpop.f32.mrb[47].mxu1  ;;  %v1598_v16 = vmax.f32 %v1578_v45, 0.0  ;;  %11150 = vst [vmem:[#allocation63_spill] sm:$0xff] %v8368_v19  ;;  %v8378_v5 = vld [vmem:[%s10811_s4 + $0xd0] sm:$0xf] }
 0x581   :  { %v1573_v10 = vadd.f32 %v1572_v29, %v7971_v26  ;;  %v1596_v56 = vmax.f32 %v1570_v1, 0.0  ;;  %v8373_v1 = vld [vmem:[%s10811_s4 + $0xcc] sm:$0xf]  ;;  %11152 = vst [vmem:[#allocation80_spill] sm:$0xff] %v8378_v5  ;;  %v8388_v29 = vld [vmem:[%s10811_s4 + $0xd8] sm:$0xf] }
 0x582   :  { %v1599_v36 = vmax.f32 %v1581_v15, 0.0  ;;  %11151 = vst [vmem:[#allocation72_spill] sm:$0xff] %v8373_v1  ;;  %v8383_v15 = vld [vmem:[%s10811_s4 + $0xd4] sm:$0xf]  ;;  %11154 = vst [vmem:[#allocation82_spill] sm:$0xff] %v8388_v29 }
 0x583   :  { %v1597_v53 = vmax.f32 %v1573_v10, 0.0  ;;  %11153 = vst [vmem:[#allocation81_spill] sm:$0xff] %v8383_v15  ;;  %v8393_v10 = vld [vmem:[%s10811_s4 + $0xdc] sm:$0xf]  ;;  %v8513_v15 = vstv %s7761_s29 }
 0x584   :  { %v1607_v28 = vpack.c.bf16 %v1599_v36, %v1598_v16  ;;  %11155 = vst [vmem:[#allocation83_spill] sm:$0xff] %v8393_v10  ;;  %11177 = vst [vmem:[#allocation93_spill] sm:$0xff] %v8513_v15 }
 0x585   :  { %v1606_v30 = vpack.c.bf16 %v1597_v53, %v1596_v56  ;;  %v8398_v56 = vld [vmem:[%s10811_s4 + $0xe0] sm:$0xf]  ;;  %v8403_v53 = vld [vmem:[%s10811_s4 + $0xe4] sm:$0xf] }
 0x586   :  { %11156 = vst [vmem:[#allocation84_spill] sm:$0xff] %v8398_v56  ;;  %11157 = vst [vmem:[#allocation85_spill] sm:$0xff] %v8403_v53 }
 0x587   :  { %6514 = vmatprep.mubr.bf16.mxu1 %v1606_v30 }
 0x588   :  { %6515 = vmatmul.mubr.bf16.gmra.mrb[60].mxu1 %v1607_v28  ;;  %v8408_v28 = vld [vmem:[%s10812_s5 + $0x8] sm:$0xff] }
 0x589   :  { %11158 = vst [vmem:[#allocation86_spill] sm:$0xff] %v8408_v28 }
 0x62b   :  { %v6504_v21 = vpop.f32.mrb[48].mxu1 }
 0x62c   :  { %v1651_v54 = vadd.f32 %v6504_v21, %v7994_v63  ;;  %v1642_v46 = vpop.f32.mrb[49].mxu1 }
 0x62d   :  { %v1643_v49 = vadd.f32 %v1642_v46, %v7994_v63  ;;  %v6505_v35 = vpop.f32.mrb[50].mxu1  ;;  %v8419_v46 = vld [vmem:[%s10811_s4 + $0xec] sm:$0xf] }
 0x62e   :  { %v1654_v25 = vadd.f32 %v6505_v35, %v7994_v63  ;;  %v1645_v57 = vpop.f32.mrb[51].mxu1  ;;  %v8254_v20 = vmax.f32 %v1651_v54, 0.0  ;;  %v8414_v54 = vld [vmem:[%s10811_s4 + $0xe8] sm:$0xf]  ;;  %11160 = vst [vmem:[#allocation88_spill] sm:$0xff] %v8419_v46 }
 0x62f   :  { %v8256_v26 = vmax.f32 %v1643_v49, 0.0  ;;  %v1646_v32 = vadd.f32 %v1645_v57, %v7994_v63  ;;  %11159 = vst [vmem:[#allocation87_spill] sm:$0xff] %v8414_v54  ;;  %v8430_v57 = vld [vmem:[%s10811_s4 + $0xf4] sm:$0xf] }
 0x630   :  { %v8261_v39 = vmax.f32 %v1654_v25, 0.0  ;;  %v1739_v40 = vmul.f32 %v11137_v59, %v8254_v20  ;;  %v8425_v25 = vld [vmem:[%s10811_s4 + $0xf0] sm:$0xf]  ;;  %11162 = vst [vmem:[#allocation90_spill] sm:$0xff] %v8430_v57 }
 0x631   :  { %v1737_v38 = vmul.f32 %v11136_v34, %v8256_v26  ;;  %v8263_v18 = vmax.f32 %v1646_v32, 0.0  ;;  %11161 = vst [vmem:[#allocation89_spill] sm:$0xff] %v8425_v25 }
 0x632   :  { %v1740_v43 = vmul.f32 %v11139_v61, %v8261_v39  ;;  %v1777_v8 = vmul.f32 %v1739_v40, %v8254_v20  ;;  %v11168_v61 = vld [vmem:[#allocation57_spill] sm:$0xff] }
 0x633   :  { %v1738_v47 = vmul.f32 %v11138_v22, %v8263_v18  ;;  %v1775_v31 = vmul.f32 %v1737_v38, %v8256_v26 }
 0x634   :  { %v1778_v42 = vmul.f32 %v1740_v43, %v8261_v39 }
 0x635   :  { %v1753_v37 = vadd.f32 %v1738_v47, %v1737_v38  ;;  %v1776_v2 = vmul.f32 %v1738_v47, %v8263_v18  ;;  %v8441_v47 = vld [vmem:[%s10811_s4 + $0xfc] sm:$0xf] }
 0x636   :  { %11164 = vst [vmem:[#allocation92_spill] sm:$0xff] %v8441_v47 }
 0x637   :  { %v1754_v9 = vadd.f32 %v1753_v37, %v1739_v40  ;;  %v1791_v13 = vadd.f32 %v1776_v2, %v1775_v31  ;;  %v8436_v40 = vld [vmem:[%s10811_s4 + $0xf8] sm:$0xf] }
 0x638   :  { %11163 = vst [vmem:[#allocation91_spill] sm:$0xff] %v8436_v40  ;;  %v11165_v2 = vld [vmem:[#allocation49_spill] sm:$0xff] }
 0x639   :  { %v1792_v55 = vadd.f32 %v1791_v13, %v1777_v8  ;;  %v1755_v45 = vadd.f32 %v1754_v9, %v1740_v43 }
 0x63b   :  { %v6508_v16 = vpop.f32.mrb[52].mxu1  ;;  %v1793_v36 = vadd.f32 %v1792_v55, %v1778_v42  ;;  %v11166_v42 = vld [vmem:[#allocation56_spill] sm:$0xff] }
 0x63c   :  { %v1667_v30 = vadd.f32 %v6508_v16, %v7994_v63  ;;  %v1658_v21 = vpop.f32.mrb[53].mxu1 }
 0x63d   :  { %v1659_v49 = vadd.f32 %v1658_v21, %v7994_v63  ;;  %v6509_v35 = vpop.f32.mrb[54].mxu1 }
 0x63e   :  { %v1670_v32 = vadd.f32 %v6509_v35, %v7994_v63  ;;  %v1661_v38 = vpop.f32.mrb[55].mxu1  ;;  %v8443_v31 = vmax.f32 %v1667_v30, 0.0  ;;  %v11167_v30 = vld [vmem:[#allocation55_spill] sm:$0xff] }
 0x63f   :  { %v8445_v43 = vmax.f32 %v1659_v49, 0.0  ;;  %v1662_v37 = vadd.f32 %v1661_v38, %v7994_v63 }
 0x640   :  { %v8450_v9 = vmax.f32 %v1670_v32, 0.0  ;;  %v1743_v55 = vmul.f32 %v11166_v42, %v8443_v31 }
 0x641   :  { %v1741_v8 = vmul.f32 %v11165_v2, %v8445_v43  ;;  %v8452_v13 = vmax.f32 %v1662_v37, 0.0 }
 0x642   :  { %v1744_v38 = vmul.f32 %v11168_v61, %v8450_v9  ;;  %v1781_v32 = vmul.f32 %v1743_v55, %v8443_v31 }
 0x643   :  { %v1756_v16 = vadd.f32 %v1755_v45, %v1741_v8  ;;  %v1779_v21 = vmul.f32 %v1741_v8, %v8445_v43  ;;  %v1742_v35 = vmul.f32 %v11167_v30, %v8452_v13 }
 0x644   :  { %v1782_v34 = vmul.f32 %v1744_v38, %v8450_v9 }
 0x645   :  { %v1794_v49 = vadd.f32 %v1793_v36, %v1779_v21  ;;  %v1757_v22 = vadd.f32 %v1756_v16, %v1742_v35  ;;  %v1780_v2 = vmul.f32 %v1742_v35, %v8452_v13 }
 0x647   :  { %v1758_v37 = vadd.f32 %v1757_v22, %v1743_v55  ;;  %v1795_v59 = vadd.f32 %v1794_v49, %v1780_v2 }
 0x649   :  { %v1796_v42 = vadd.f32 %v1795_v59, %v1781_v32  ;;  %v1759_v45 = vadd.f32 %v1758_v37, %v1744_v38  ;;  %v11169_v59 = vld [vmem:[#allocation58_spill] sm:$0xff]  ;;  %v11172_v37 = vld [vmem:[#allocation67_spill] sm:$0xff] }
 0x64b   :  { %v6512_v28 = vpop.f32.mrb[56].mxu1  ;;  %v1797_v8 = vadd.f32 %v1796_v42, %v1782_v34 }
 0x64c   :  { %v1683_v40 = vadd.f32 %v6512_v28, %v7994_v63  ;;  %v1674_v30 = vpop.f32.mrb[57].mxu1  ;;  %v11170_v28 = vld [vmem:[#allocation66_spill] sm:$0xff] }
 0x64d   :  { %v1675_v36 = vadd.f32 %v1674_v30, %v7994_v63  ;;  %v6513_v21 = vpop.f32.mrb[58].mxu1 }
 0x64e   :  { %v1686_v16 = vadd.f32 %v6513_v21, %v7994_v63  ;;  %v1677_v61 = vpop.f32.mrb[59].mxu1  ;;  %v8467_v35 = vmax.f32 %v1683_v40, 0.0  ;;  %v11171_v40 = vld [vmem:[#allocation65_spill] sm:$0xff] }
 0x64f   :  { %v8469_v47 = vmax.f32 %v1675_v36, 0.0  ;;  %v1678_v22 = vadd.f32 %v1677_v61, %v7994_v63 }
 0x650   :  { %v8474_v55 = vmax.f32 %v1686_v16, 0.0  ;;  %v1747_v42 = vmul.f32 %v11170_v28, %v8467_v35 }
 0x651   :  { %v1745_v2 = vmul.f32 %v11169_v59, %v8469_v47  ;;  %v8476_v34 = vmax.f32 %v1678_v22, 0.0 }
 0x652   :  { %v1748_v61 = vmul.f32 %v11172_v37, %v8474_v55  ;;  %v1785_v16 = vmul.f32 %v1747_v42, %v8467_v35 }
 0x653   :  { %v1760_v30 = vadd.f32 %v1759_v45, %v1745_v2  ;;  %v1783_v49 = vmul.f32 %v1745_v2, %v8469_v47  ;;  %v1746_v38 = vmul.f32 %v11171_v40, %v8476_v34 }
 0x654   :  { %v1786_v25 = vmul.f32 %v1748_v61, %v8474_v55 }
 0x655   :  { %v1798_v32 = vadd.f32 %v1797_v8, %v1783_v49  ;;  %v1761_v36 = vadd.f32 %v1760_v30, %v1746_v38  ;;  %v1784_v21 = vmul.f32 %v1746_v38, %v8476_v34 }
 0x657   :  { %v1762_v22 = vadd.f32 %v1761_v36, %v1747_v42  ;;  %v1799_v59 = vadd.f32 %v1798_v32, %v1784_v21 }
 0x659   :  { %v1800_v28 = vadd.f32 %v1799_v59, %v1785_v16  ;;  %v1763_v45 = vadd.f32 %v1762_v22, %v1748_v61  ;;  %v11173_v59 = vld [vmem:[#allocation68_spill] sm:$0xff]  ;;  %v11176_v22 = vld [vmem:[#allocation71_spill] sm:$0xff] }
 0x65b   :  { %v6516_v57 = vpop.f32.mrb[60].mxu1  ;;  %v1801_v2 = vadd.f32 %v1800_v28, %v1786_v25 }
 0x65c   :  { %v1699_v54 = vadd.f32 %v6516_v57, %v7994_v63  ;;  %v1690_v40 = vpop.f32.mrb[61].mxu1  ;;  %v11174_v57 = vld [vmem:[#allocation70_spill] sm:$0xff] }
 0x65d   :  { %v1691_v8 = vadd.f32 %v1690_v40, %v7994_v63  ;;  %v6517_v49 = vpop.f32.mrb[62].mxu1 }
 0x65e   :  { %v1702_v30 = vadd.f32 %v6517_v49, %v7994_v63  ;;  %v1693_v37 = vpop.f32.mrb[63].mxu1  ;;  %v8491_v38 = vmax.f32 %v1699_v54, 0.0  ;;  %v11175_v54 = vld [vmem:[#allocation69_spill] sm:$0xff] }
 0x65f   :  { %v8493_v46 = vmax.f32 %v1691_v8, 0.0  ;;  %v1694_v42 = vadd.f32 %v1693_v37, %v7994_v63 }
 0x660   :  { %v8498_v61 = vmax.f32 %v1702_v30, 0.0  ;;  %v1751_v28 = vmul.f32 %v11174_v57, %v8491_v38 }
 0x661   :  { %v1749_v32 = vmul.f32 %v11173_v59, %v8493_v46  ;;  %v8500_v25 = vmax.f32 %v1694_v42, 0.0 }
 0x662   :  { %v1752_v63 = vmul.f32 %v11176_v22, %v8498_v61  ;;  %v1789_v49 = vmul.f32 %v1751_v28, %v8491_v38 }
 0x663   :  { %v1764_v40 = vadd.f32 %v1763_v45, %v1749_v32  ;;  %v1787_v36 = vmul.f32 %v1749_v32, %v8493_v46  ;;  %v1750_v21 = vmul.f32 %v11175_v54, %v8500_v25 }
 0x664   :  { %v1790_v57 = vmul.f32 %v1752_v63, %v8498_v61 }
 0x665   :  { %v1802_v16 = vadd.f32 %v1801_v2, %v1787_v36  ;;  %v1765_v37 = vadd.f32 %v1764_v40, %v1750_v21  ;;  %v1788_v8 = vmul.f32 %v1750_v21, %v8500_v25 }
 0x667   :  { %v1766_v30 = vadd.f32 %v1765_v37, %v1751_v28  ;;  %v1803_v42 = vadd.f32 %v1802_v16, %v1788_v8 }
 0x669   :  { %v1767_v45 = vadd.f32 %v1766_v30, %v1752_v63  ;;  %v1804_v59 = vadd.f32 %v1803_v42, %v1789_v49  ;;  %v11184_v42 = vld [vmem:[#allocation18_spill] sm:$0xff] }
 0x66b   :  { %v1768_v32 = vrot.slane %v1767_v45, 4  ;;  %v1805_v56 = vadd.f32 %v1804_v59, %v1790_v57 }
 0x66d   :  { %v1769_v53 = vadd.f32 %v1768_v32, %v1767_v45  ;;  %v1806_v54 = vrot.slane %v1805_v56, 4  ;;  %v11185_v32 = vld [vmem:[#allocation54_spill] sm:$0xff] }
 0x66f   :  { %v1770_v2 = vrot.slane %v1769_v53, 2  ;;  %v1807_v36 = vadd.f32 %v1806_v54, %v1805_v56 }
 0x671   :  { %v1771_v29 = vadd.f32 %v1770_v2, %v1769_v53  ;;  %v1808_v22 = vrot.slane %v1807_v36, 2 }
 0x673   :  { %v1772_v40 = vrot.slane %v1771_v29, 1  ;;  %v1809_v10 = vadd.f32 %v1808_v22, %v1807_v36  ;;  %v11186_v36 = vld [vmem:[#allocation21_spill] sm:$0xff] }
 0x675   :  { %v1773_v21 = vadd.f32 %v1772_v40, %v1771_v29  ;;  %v1810_v5 = vrot.slane %v1809_v10, 1 }
 0x677   :  { %v1774_v28 = vadd.f32 %v1773_v21, %v8092_v33  ;;  %v1811_v16 = vadd.f32 %v1810_v5, %v1809_v10  ;;  %v11187_v21 = vld [vmem:[#allocation74_spill] sm:$0xff] }
 0x679   :  { %v1812_v63 = vadd.f32 %v1811_v16, %v8094_v11  ;;  %v8518_v37 = vmul.f32 %v8513_v15, %v1774_v28  ;;  %v11188_v16 = vld [vmem:[#allocation64_spill] sm:$0xff] }
 0x67b   :  { %v1815_v59 = vmul.f32 %v8513_v15, %v1812_v63  ;;  %v1816_v56 = vmul.f32 %v8518_v37, %v8518_v37  ;;  %v1866_v29 = vsub.f32 %v8256_v26, %v8518_v37  ;;  %v1867_v57 = vsub.f32 %v8263_v18, %v8518_v37 }
 0x67c   :  { %v1868_v33 = vsub.f32 %v8254_v20, %v8518_v37  ;;  %v1869_v11 = vsub.f32 %v8261_v39, %v8518_v37  ;;  %v1870_v5 = vsub.f32 %v8445_v43, %v8518_v37  ;;  %v1871_v10 = vsub.f32 %v8452_v13, %v8518_v37 }
 0x67d   :  { %v1817_v53 = vsub.f32 %v1815_v59, %v1816_v56  ;;  %v1872_v54 = vsub.f32 %v8443_v31, %v8518_v37  ;;  %v1873_v26 = vsub.f32 %v8450_v9, %v8518_v37  ;;  %v1874_v18 = vsub.f32 %v8469_v47, %v8518_v37  ;;  %v11189_v59 = vld [vmem:[#allocation22_spill] sm:$0xff] }
 0x67e   :  { %v1875_v20 = vsub.f32 %v8476_v34, %v8518_v37  ;;  %v1876_v39 = vsub.f32 %v8467_v35, %v8518_v37  ;;  %v1877_v43 = vsub.f32 %v8474_v55, %v8518_v37  ;;  %v1878_v13 = vsub.f32 %v8493_v46, %v8518_v37  ;;  %v11178_v34 = vld [vmem:[#allocation19_spill] sm:$0xff]  ;;  %v11181_v55 = vld [vmem:[#allocation24_spill] sm:$0xff] }
 0x67f   :  { %v1879_v31 = vsub.f32 %v8500_v25, %v8518_v37  ;;  %v1880_v9 = vsub.f32 %v8491_v38, %v8518_v37  ;;  %v1881_v47 = vsub.f32 %v8498_v61, %v8518_v37  ;;  %v1882_v22 = vadd.f32 1e-05, %v1817_v53  ;;  %v11182_v38 = vld [vmem:[#allocation20_spill] sm:$0xff]  ;;  %v11183_v61 = vld [vmem:[#allocation45_spill] sm:$0xff]  ;;  %v11190_v53 = vld [vmem:[#allocation75_spill] sm:$0xff] }
 0x680   :  { %v8556_v8 = vsub.s32 2, %v11178_v34  ;;  %v8559_v35 = vsub.s32 3, %v11178_v34  ;;  %v1850_v49 = vsub.f32 %v11182_v38, %v8518_v37  ;;  %v1851_v30 = vsub.f32 %v11183_v61, %v8518_v37  ;;  %v11191_v34 = vld [vmem:[#allocation77_spill] sm:$0xff] }
 0x681   :  { %6872 = vrsqrt.f32 %v1882_v22  ;;  %v1852_v45 = vsub.f32 %v11184_v42, %v8518_v37  ;;  %v1853_v2 = vsub.f32 %v11185_v32, %v8518_v37  ;;  %v1854_v40 = vsub.f32 %v11186_v36, %v8518_v37  ;;  %v11192_v38 = vld [vmem:[#allocation73_spill] sm:$0xff]  ;;  %v11193_v42 = vld [vmem:[#allocation76_spill] sm:$0xff] }
 0x682   :  { %11179 = vst [vmem:[#allocation19_spill] sm:$0xff] %v8556_v8  ;;  %11180 = vst [vmem:[#allocation94_spill] sm:$0xff] %v8559_v35  ;;  %v8563_v46 = vrot.slane %v11181_v55, %v8556_v8  ;;  %v8567_v25 = vrot.slane %v11181_v55, %v8559_v35  ;;  %v1855_v28 = vsub.f32 %v11187_v21, %v8518_v37  ;;  %v11194_v21 = vld [vmem:[#allocation79_spill] sm:$0xff] }
 0x683   :  { %v1856_v63 = vsub.f32 %v11188_v16, %v8518_v37  ;;  %v1857_v56 = vsub.f32 %v11189_v59, %v8518_v37  ;;  %v1858_v22 = vsub.f32 %v11190_v53, %v8518_v37  ;;  %v1859_v55 = vsub.f32 %v11191_v34, %v8518_v37  ;;  %v11195_v59 = vld [vmem:[#allocation78_spill] sm:$0xff] }
 0x684   :  { %v1860_v61 = vsub.f32 %v11192_v38, %v8518_v37  ;;  %v1861_v32 = vsub.f32 %v11193_v42, %v8518_v37  ;;  %v1862_v35 = vsub.f32 %v11194_v21, %v8518_v37  ;;  %v1863_v16 = vsub.f32 %v8080_v50, %v8518_v37 }
 0x685   :  { %v1864_v8 = vsub.f32 %v11195_v59, %v8518_v37  ;;  %v1865_v53 = vsub.f32 %v8078_v62, %v8518_v37 }
 0x68b   :  { %v6873_v36 = vpop.eup %6872 }
 0x68c   :  { %v1884_v34 = vmul.f32 %v6873_v36, %v1850_v49  ;;  %v1885_v15 = vmul.f32 %v6873_v36, %v1851_v30  ;;  %v1886_v19 = vmul.f32 %v6873_v36, %v1852_v45  ;;  %v1887_v38 = vmul.f32 %v6873_v36, %v1853_v2 }
 0x68d   :  { %v1888_v1 = vmul.f32 %v6873_v36, %v1854_v40  ;;  %v1889_v41 = vmul.f32 %v6873_v36, %v1855_v28  ;;  %v1890_v42 = vmul.f32 %v6873_v36, %v1856_v63  ;;  %v1891_v12 = vmul.f32 %v6873_v36, %v1857_v56 }
 0x68e   :  { %v1892_v44 = vmul.f32 %v6873_v36, %v1858_v22  ;;  %v1893_v17 = vmul.f32 %v6873_v36, %v1859_v55  ;;  %v1894_v21 = vmul.f32 %v6873_v36, %v1860_v61  ;;  %v1895_v24 = vmul.f32 %v6873_v36, %v1861_v32 }
 0x68f   :  { %v1896_v14 = vmul.f32 %v6873_v36, %v1862_v35  ;;  %v1897_v50 = vmul.f32 %v6873_v36, %v1863_v16  ;;  %v1898_v27 = vmul.f32 %v6873_v36, %v1864_v8  ;;  %v1899_v0 = vmul.f32 %v6873_v36, %v1865_v53 }
 0x690   :  { %v1900_v59 = vmul.f32 %v6873_v36, %v1866_v29  ;;  %v1901_v6 = vmul.f32 %v6873_v36, %v1867_v57  ;;  %v1902_v7 = vmul.f32 %v6873_v36, %v1868_v33  ;;  %v1903_v62 = vmul.f32 %v6873_v36, %v1869_v11 }
 0x691   :  { %v1904_v37 = vmul.f32 %v6873_v36, %v1870_v5  ;;  %v1905_v49 = vmul.f32 %v6873_v36, %v1871_v10  ;;  %v1906_v30 = vmul.f32 %v6873_v36, %v1872_v54  ;;  %v1907_v45 = vmul.f32 %v6873_v36, %v1873_v26 }
 0x692   :  { %v1908_v2 = vmul.f32 %v6873_v36, %v1874_v18  ;;  %v1909_v40 = vmul.f32 %v6873_v36, %v1875_v20  ;;  %v1910_v28 = vmul.f32 %v6873_v36, %v1876_v39  ;;  %v1911_v63 = vmul.f32 %v6873_v36, %v1877_v43 }
 0x693   :  { %v1912_v56 = vmul.f32 %v6873_v36, %v1878_v13  ;;  %v1913_v22 = vmul.f32 %v6873_v36, %v1879_v31  ;;  %v1914_v55 = vmul.f32 %v6873_v36, %v1880_v9  ;;  %v1915_v61 = vmul.f32 %v6873_v36, %v1881_v47 }
 0x694   :  { %v1920_v35 = vmul.f32 %v8563_v46, %v1884_v34  ;;  %v1921_v8 = vmul.f32 %v8563_v46, %v1885_v15  ;;  %v1922_v29 = vmul.f32 %v8563_v46, %v1886_v19  ;;  %v1923_v57 = vmul.f32 %v8563_v46, %v1887_v38 }
 0x695   :  { %v1924_v33 = vmul.f32 %v8563_v46, %v1888_v1  ;;  %v1925_v11 = vmul.f32 %v8563_v46, %v1889_v41  ;;  %v1926_v5 = vmul.f32 %v8563_v46, %v1890_v42  ;;  %v1927_v10 = vmul.f32 %v8563_v46, %v1891_v12 }
 0x696   :  { %v1928_v54 = vmul.f32 %v8563_v46, %v1892_v44  ;;  %v1929_v26 = vmul.f32 %v8563_v46, %v1893_v17  ;;  %v1930_v18 = vmul.f32 %v8563_v46, %v1894_v21  ;;  %v1931_v15 = vmul.f32 %v8563_v46, %v1895_v24 }
 0x697   :  { %v1932_v19 = vmul.f32 %v8563_v46, %v1896_v14  ;;  %v1933_v20 = vmul.f32 %v8563_v46, %v1897_v50  ;;  %v1934_v1 = vmul.f32 %v8563_v46, %v1898_v27  ;;  %v1935_v41 = vmul.f32 %v8563_v46, %v1899_v0 }
 0x698   :  { %v1936_v39 = vmul.f32 %v8563_v46, %v1900_v59  ;;  %v1937_v12 = vmul.f32 %v8563_v46, %v1901_v6  ;;  %v1938_v44 = vmul.f32 %v8563_v46, %v1902_v7  ;;  %v1939_v17 = vmul.f32 %v8563_v46, %v1903_v62 }
 0x699   :  { %v1940_v43 = vmul.f32 %v8563_v46, %v1904_v37  ;;  %v1941_v24 = vmul.f32 %v8563_v46, %v1905_v49  ;;  %v1942_v14 = vmul.f32 %v8563_v46, %v1906_v30  ;;  %v1943_v13 = vmul.f32 %v8563_v46, %v1907_v45 }
 0x69a   :  { %v1944_v27 = vmul.f32 %v8563_v46, %v1908_v2  ;;  %v1945_v0 = vmul.f32 %v8563_v46, %v1909_v40  ;;  %v1946_v31 = vmul.f32 %v8563_v46, %v1910_v28  ;;  %v1947_v6 = vmul.f32 %v8563_v46, %v1911_v63 }
 0x69b   :  { %v1948_v7 = vmul.f32 %v8563_v46, %v1912_v56  ;;  %v1949_v9 = vmul.f32 %v8563_v46, %v1913_v22  ;;  %v1950_v47 = vmul.f32 %v8563_v46, %v1914_v55  ;;  %v1951_v32 = vmul.f32 %v8563_v46, %v1915_v61 }
 0x69c   :  { %v8634_v36 = vadd.f32 %v8567_v25, %v1920_v35  ;;  %v8637_v16 = vadd.f32 %v8567_v25, %v1921_v8  ;;  %v8640_v53 = vadd.f32 %v8567_v25, %v1922_v29  ;;  %v8643_v34 = vadd.f32 %v8567_v25, %v1923_v57 }
 0x69d   :  { %v8646_v38 = vadd.f32 %v8567_v25, %v1924_v33  ;;  %v8649_v42 = vadd.f32 %v8567_v25, %v1925_v11  ;;  %v8652_v46 = vadd.f32 %v8567_v25, %v1926_v5  ;;  %v8655_v21 = vadd.f32 %v8567_v25, %v1927_v10 }
 0x69e   :  { %v8658_v50 = vadd.f32 %v8567_v25, %v1928_v54  ;;  %v8661_v59 = vadd.f32 %v8567_v25, %v1929_v26  ;;  %v8664_v62 = vadd.f32 %v8567_v25, %v1930_v18  ;;  %v8667_v37 = vadd.f32 %v8567_v25, %v1931_v15 }
 0x69f   :  { %v8670_v49 = vadd.f32 %v8567_v25, %v1932_v19  ;;  %v8673_v30 = vadd.f32 %v8567_v25, %v1933_v20  ;;  %v8676_v45 = vadd.f32 %v8567_v25, %v1934_v1  ;;  %v8679_v2 = vadd.f32 %v8567_v25, %v1935_v41 }
 0x6a0   :  { %v8682_v40 = vadd.f32 %v8567_v25, %v1936_v39  ;;  %v8685_v28 = vadd.f32 %v8567_v25, %v1937_v12  ;;  %v8688_v63 = vadd.f32 %v8567_v25, %v1938_v44  ;;  %v8691_v56 = vadd.f32 %v8567_v25, %v1939_v17 }
 0x6a1   :  { %v8694_v22 = vadd.f32 %v8567_v25, %v1940_v43  ;;  %v8697_v55 = vadd.f32 %v8567_v25, %v1941_v24  ;;  %v8700_v61 = vadd.f32 %v8567_v25, %v1942_v14  ;;  %v8703_v35 = vadd.f32 %v8567_v25, %v1943_v13 }
 0x6a2   :  { %v8706_v8 = vadd.f32 %v8567_v25, %v1944_v27  ;;  %v8709_v29 = vadd.f32 %v8567_v25, %v1945_v0  ;;  %v8712_v57 = vadd.f32 %v8567_v25, %v1946_v31  ;;  %v8715_v33 = vadd.f32 %v8567_v25, %v1947_v6 }
 0x6a3   :  { %11196 = vst [vmem:[#allocation24_spill] sm:$0xff] %v8697_v55  ;;  %11197 = vst [vmem:[#allocation20_spill] sm:$0xff] %v8700_v61  ;;  %v8718_v11 = vadd.f32 %v8567_v25, %v1948_v7  ;;  %v8721_v5 = vadd.f32 %v8567_v25, %v1949_v9  ;;  %v8724_v10 = vadd.f32 %v8567_v25, %v1950_v47  ;;  %v10908_v26 = vmax.f32 %v8634_v36, 0.0 }
 0x6a4   :  { %11198 = vst [vmem:[#allocation45_spill] sm:$0xff] %v8703_v35  ;;  %11199 = vst [vmem:[#allocation18_spill] sm:$0xff] %v8706_v8  ;;  %v8727_v54 = vadd.f32 %v8567_v25, %v1951_v32  ;;  %v10897_v18 = vmax.f32 %v8637_v16, 0.0  ;;  %v10905_v15 = vmax.f32 %v8640_v53, 0.0  ;;  %v10898_v19 = vmax.f32 %v8643_v34, 0.0 }
 0x6a5   :  { %11200 = vst [vmem:[#allocation54_spill] sm:$0xff] %v8709_v29  ;;  %11201 = vst [vmem:[#allocation21_spill] sm:$0xff] %v8712_v57  ;;  %v10902_v20 = vmax.f32 %v8646_v38, 0.0  ;;  %v10899_v1 = vmax.f32 %v8649_v42, 0.0  ;;  %v10901_v41 = vmax.f32 %v8652_v46, 0.0  ;;  %v10900_v39 = vmax.f32 %v8655_v21, 0.0 }
 0x6a6   :  { %11202 = vst [vmem:[#allocation74_spill] sm:$0xff] %v8715_v33  ;;  %11203 = vst [vmem:[#allocation64_spill] sm:$0xff] %v8718_v11  ;;  %v10904_v12 = vmax.f32 %v8658_v50, 0.0  ;;  %v10903_v25 = vmax.f32 %v8661_v59, 0.0  ;;  %v10907_v44 = vmax.f32 %v8664_v62, 0.0  ;;  %v10906_v17 = vmax.f32 %v8667_v37, 0.0 }
 0x6a7   :  { %11204 = vst [vmem:[#allocation22_spill] sm:$0xff] %v8721_v5  ;;  %11205 = vst [vmem:[#allocation75_spill] sm:$0xff] %v8724_v10  ;;  %v10910_v43 = vmax.f32 %v8670_v49, 0.0  ;;  %v10909_v24 = vmax.f32 %v8673_v30, 0.0  ;;  %v10911_v47 = vmax.f32 %v8700_v61, 0.0  ;;  %v10915_v14 = vmax.f32 %v8706_v8, 0.0 }
 0x6a8   :  { %11206 = vst [vmem:[#allocation77_spill] sm:$0xff] %v8727_v54  ;;  %v10912_v13 = vmax.f32 %v8709_v29, 0.0  ;;  %v10914_v0 = vmax.f32 %v8715_v33, 0.0  ;;  %v10913_v31 = vmax.f32 %v8718_v11, 0.0  ;;  %v8765_v32 = vpack.c.bf16 %v10897_v18, %v10908_v26 }
 0x6a9   :  { %v8771_v27 = vpack.c.bf16 %v10898_v19, %v10905_v15  ;;  %v8777_v6 = vpack.c.bf16 %v10899_v1, %v10902_v20  ;;  %v8783_v9 = vpack.c.bf16 %v10900_v39, %v10901_v41  ;;  %v8789_v18 = vpack.c.bf16 %v10903_v25, %v10904_v12 }
 0x6aa   :  { %v8795_v19 = vpack.c.bf16 %v10906_v17, %v10907_v44  ;;  %v8801_v1 = vpack.c.bf16 %v10909_v24, %v10910_v43  ;;  %v11207_v39 = vmax.f32 %v8676_v45, 0.0  ;;  %v11208_v41 = vmax.f32 %v8679_v2, 0.0 }
 0x6ab   :  { %v11209_v25 = vmax.f32 %v8682_v40, 0.0  ;;  %v11210_v12 = vmax.f32 %v8685_v28, 0.0  ;;  %v11211_v17 = vmax.f32 %v8688_v63, 0.0  ;;  %v11212_v44 = vmax.f32 %v8691_v56, 0.0 }
 0x6ac   :  { %v8807_v20 = vpack.c.bf16 %v11208_v41, %v11207_v39  ;;  %v11213_v24 = vmax.f32 %v8694_v22, 0.0  ;;  %v11214_v43 = vmax.f32 %v8697_v55, 0.0  ;;  %v11215_v41 = vmax.f32 %v8703_v35, 0.0 }
 0x6ad   :  { %v8813_v15 = vpack.c.bf16 %v11210_v12, %v11209_v25  ;;  %v8819_v26 = vpack.c.bf16 %v11212_v44, %v11211_v17  ;;  %v8837_v12 = vpack.c.bf16 %v10912_v13, %v10915_v14  ;;  %v11216_v25 = vmax.f32 %v8712_v57, 0.0 }
 0x6ae   :  { %v8825_v7 = vpack.c.bf16 %v11214_v43, %v11213_v24  ;;  %v8831_v39 = vpack.c.bf16 %v11215_v41, %v10911_v47  ;;  %v11217_v17 = vmax.f32 %v8721_v5, 0.0  ;;  %v11218_v24 = vmax.f32 %v8724_v10, 0.0 }
 0x6af   :  { %v8843_v44 = vpack.c.bf16 %v10914_v0, %v11216_v25  ;;  %v11219_v41 = vmax.f32 %v8727_v54, 0.0 }
 0x6b0   :  { %v8849_v43 = vpack.c.bf16 %v11217_v17, %v10913_v31 }
 0x6b1   :  { %v8855_v47 = vpack.c.bf16 %v11219_v41, %v11218_v24 }
 0x6b2   :  { %6882 = dma.done.wait [#allocation4], 2048 }
 0x6b3   :  { %6883 = vsyncadd [#allocation4], 4294965248  ;;  %v5598_v13 = vld [vmem:[%s10809_s2 + $0x80] sm:$0xf]  ;;  %v5599_v25 = vld [vmem:[%s10809_s2 + $0x88] sm:$0xf] }
 0x6b4   :  { %v5600_v17 = vld [vmem:[%s10809_s2 + $0x84] sm:$0xf]  ;;  %2092 = vst [vmem:[#allocation2 + $0x80] sm:$0xf] %v5598_v13  ;;  %2094 = vst [vmem:[#allocation2 + $0x84] sm:$0xf] %v5599_v25 }
 0x6b5   :  { %2096 = vst [vmem:[#allocation2 + $0x88] sm:$0xf] %v5600_v17  ;;  %v5601_v24 = vld [vmem:[%s10809_s2 + $0x8c] sm:$0xff]   ;;  %v5603_v41 = vld [vmem:[%s10809_s2 + $0x98] sm:$0xf]  ;;  %v5605_v13 = vld [vmem:[%s10809_s2 + $0x9c] sm:$0xff]  }
 0x6b6   :  { %v5604_v31 = vld [vmem:[%s10809_s2 + $0x94] sm:$0xf]  ;;  %2098 = vst [vmem:[#allocation2 + $0x8c] sm:$0xff] %v5601_v24   ;;  %2102 = vst [vmem:[#allocation2 + $0x94] sm:$0xf] %v5603_v41  ;;  %v5609_v24 = vld [vmem:[%s10809_s2 + $0xac] sm:$0xff]  }
 0x6b7   :  { %2104 = vst [vmem:[#allocation2 + $0x98] sm:$0xf] %v5604_v31  ;;  %v5607_v25 = vld [vmem:[%s10809_s2 + $0xa8] sm:$0xf]  ;;  %v5608_v17 = vld [vmem:[%s10809_s2 + $0xa4] sm:$0xf] }
 0x6b8   :  { %2106 = vst [vmem:[#allocation2 + $0x9c] sm:$0xff] %v5605_v13   ;;  %2110 = vst [vmem:[#allocation2 + $0xa4] sm:$0xf] %v5607_v25  ;;  %v5611_v31 = vld [vmem:[%s10809_s2 + $0xb8] sm:$0xf]  ;;  %v5613_v13 = vld [vmem:[%s10809_s2 + $0xbc] sm:$0xff]  }
 0x6b9   :  { %2112 = vst [vmem:[#allocation2 + $0xa8] sm:$0xf] %v5608_v17  ;;  %v5612_v41 = vld [vmem:[%s10809_s2 + $0xb4] sm:$0xf]  ;;  %2114 = vst [vmem:[#allocation2 + $0xac] sm:$0xff] %v5609_v24   ;;  %v5617_v24 = vld [vmem:[%s10809_s2 + $0xcc] sm:$0xff]  }
 0x6ba   :  { %2118 = vst [vmem:[#allocation2 + $0xb4] sm:$0xf] %v5611_v31  ;;  %2120 = vst [vmem:[#allocation2 + $0xb8] sm:$0xf] %v5612_v41  ;;  %v5615_v25 = vld [vmem:[%s10809_s2 + $0xc8] sm:$0xf] }
 0x6bb   :  { %v5616_v17 = vld [vmem:[%s10809_s2 + $0xc4] sm:$0xf]  ;;  %2122 = vst [vmem:[#allocation2 + $0xbc] sm:$0xff] %v5613_v13   ;;  %2126 = vst [vmem:[#allocation2 + $0xc4] sm:$0xf] %v5615_v25  ;;  %v5621_v13 = vld [vmem:[%s10809_s2 + $0xdc] sm:$0xff]  }
 0x6bc   :  { %2128 = vst [vmem:[#allocation2 + $0xc8] sm:$0xf] %v5616_v17  ;;  %v5619_v31 = vld [vmem:[%s10809_s2 + $0xd8] sm:$0xf]  ;;  %v5620_v41 = vld [vmem:[%s10809_s2 + $0xd4] sm:$0xf] }
 0x6bd   :  { %2130 = vst [vmem:[#allocation2 + $0xcc] sm:$0xff] %v5617_v24   ;;  %2134 = vst [vmem:[#allocation2 + $0xd4] sm:$0xf] %v5619_v31  ;;  %v5623_v25 = vld [vmem:[%s10809_s2 + $0xe8] sm:$0xf]  ;;  %v5625_v24 = vld [vmem:[%s10809_s2 + $0xec] sm:$0xff]  }
 0x6be   :  { %2136 = vst [vmem:[#allocation2 + $0xd8] sm:$0xf] %v5620_v41  ;;  %v5624_v17 = vld [vmem:[%s10809_s2 + $0xe4] sm:$0xf]  ;;  %2138 = vst [vmem:[#allocation2 + $0xdc] sm:$0xff] %v5621_v13  }
 0x6bf   :  { %2142 = vst [vmem:[#allocation2 + $0xe4] sm:$0xf] %v5623_v25  ;;  %2144 = vst [vmem:[#allocation2 + $0xe8] sm:$0xf] %v5624_v17  ;;  %v5627_v31 = vld [vmem:[%s10809_s2 + $0xf8] sm:$0xf] }
 0x6c0   :  { %v5628_v41 = vld [vmem:[%s10809_s2 + $0xf4] sm:$0xf]  ;;  %2146 = vst [vmem:[#allocation2 + $0xec] sm:$0xff] %v5625_v24   ;;  %2150 = vst [vmem:[#allocation2 + $0xf4] sm:$0xf] %v5627_v31 }
 0x6c1   :  { %2152 = vst [vmem:[#allocation2 + $0xf8] sm:$0xf] %v5628_v41  ;;  %v5629_v13 = vld [vmem:[%s10809_s2 + $0xfc] sm:$0xf] }
 0x6c2   :  { %2154 = vst [vmem:[#allocation2 + $0xfc] sm:$0xf] %v5629_v13 }
 0x6c3   :  { %2249 = vsyncadd [#allocation4 + $0x1], 2048  ;;  %5954 = vmatprep.subr.bf16.mxu0 %v8813_v15  ;;  %v2251_v25 = vld [vmem:[#allocation2 + $0x8] sm:$0xff]  ;;  %v8935_v17 = vcombine.low %v8272_v48, %v8277_v51  ;;  %v8939_v0 = vcombine.low %v8282_v52, %v8287_v58  ;;  %v8948_v24 = vcombine.low %v8292_v23, %v8297_v60  ;;  %v8956_v48 = vcombine.low %v8306_v3, %v8311_v4  ;;  %v2250_v51 = vld [vmem:[#allocation2] sm:$0xff] }
 0x6c4   :  { %5955 = vmatpush3.bf16.msra.mxu0 %v8765_v32  ;;  %2298 = vmatprep.mubr.bf16.mxu0 %v2251_v25  ;;  %v2253_v52 = vld [vmem:[#allocation2 + $0x18] sm:$0xff]  ;;  %v2252_v58 = vld [vmem:[#allocation2 + $0x10] sm:$0xff]  ;;  %v2255_v23 = vld [vmem:[#allocation2 + $0x28] sm:$0xff]  ;;  %v11230_v11 = vmax.f32 %v8634_v36, 0.0  ;;  %v11232_v55 = vmax.f32 %v8640_v53, 0.0 }
 0x6c5   :  { %5956 = vmatprep.subr.bf16.mxu0 %v8819_v26  ;;  %6518 = vmatprep.subr.bf16.mxu1 %v8935_v17  ;;  %v2254_v60 = vld [vmem:[#allocation2 + $0x20] sm:$0xff]  ;;  %v2257_v3 = vld [vmem:[#allocation2 + $0x38] sm:$0xff]  ;;  %v2256_v4 = vld [vmem:[#allocation2 + $0x30] sm:$0xff] }
 0x6c6   :  { %6519 = vmatpush3.bf16.msra.mxu1 %v8935_v17  ;;  %v2259_v31 = vld [vmem:[#allocation2 + $0x48] sm:$0xff]  ;;  %v2258_v41 = vld [vmem:[#allocation2 + $0x40] sm:$0xff]  ;;  %v2261_v13 = vld [vmem:[#allocation2 + $0x58] sm:$0xff] }
 0x6c7   :  { %6520 = vmatprep.subr.bf16.mxu1 %v8939_v0  ;;  %v2260_v25 = vld [vmem:[#allocation2 + $0x50] sm:$0xff]  ;;  %v2263_v14 = vld [vmem:[#allocation2 + $0x68] sm:$0xff]  ;;  %v11236_v53 = vld [vmem:[#allocation81_spill] sm:$0xff] }
 0x6c8   :  { %5957 = vmatpush3.bf16.msra.mxu0 %v8771_v27 }
 0x6c9   :  { %5958 = vmatprep.subr.bf16.mxu0 %v8825_v7 }
 0x6ca   :  { %6521 = vmatpush3.bf16.msra.mxu1 %v8939_v0 }
 0x6cb   :  { %6522 = vmatprep.subr.bf16.mxu1 %v8948_v24 }
 0x6cc   :  { %5959 = vmatpush3.bf16.msra.mxu0 %v8777_v6 }
 0x6cd   :  { %5960 = vmatprep.subr.bf16.mxu0 %v8831_v39 }
 0x6ce   :  { %6523 = vmatpush3.bf16.msra.mxu1 %v8948_v24 }
 0x6cf   :  { %6524 = vmatprep.subr.bf16.mxu1 %v8956_v48 }
 0x6d0   :  { %5961 = vmatpush3.bf16.msra.mxu0 %v8783_v9 }
 0x6d1   :  { %5962 = vmatprep.subr.bf16.mxu0 %v8837_v12 }
 0x6d2   :  { %6525 = vmatpush3.bf16.msra.mxu1 %v8956_v48 }
 0x6d4   :  { %5963 = vmatpush3.bf16.msra.mxu0 %v8789_v18 }
 0x6d5   :  { %5964 = vmatprep.subr.bf16.mxu0 %v8843_v44 }
 0x6d8   :  { %5965 = vmatpush3.bf16.msra.mxu0 %v8795_v19 }
 0x6d9   :  { %5966 = vmatprep.subr.bf16.mxu0 %v8849_v43 }
 0x6dc   :  { %5967 = vmatpush3.bf16.msra.mxu0 %v8801_v1 }
 0x6dd   :  { %5968 = vmatprep.subr.bf16.mxu0 %v8855_v47 }
 0x6e0   :  { %5969 = vmatpush3.bf16.msra.mxu0 %v8807_v20 }
 0x6e3   :  { %2299 = vmatmul.mubr.bf16.vlgmr.msra.gmra.mrb[64].mxu0 %v2250_v51  ;;  %v2262_v51 = vld [vmem:[#allocation2 + $0x60] sm:$0xff] }
 0x6e4   :  { %2306 = vmatprep.mubr.bf16.mxu0 %v2253_v52  ;;  %v2265_v52 = vld [vmem:[#allocation2 + $0x78] sm:$0xff] }
 0x6eb   :  { %2307 = vmatmul.mubr.bf16.gmra.mrb[68].mxu0 %v2252_v58  ;;  %v2264_v58 = vld [vmem:[#allocation2 + $0x70] sm:$0xff] }
 0x6ec   :  { %2314 = vmatprep.mubr.bf16.mxu0 %v2255_v23  ;;  %v11220_v23 = vld [vmem:[#allocation44_spill] sm:$0xff] }
 0x6f3   :  { %2315 = vmatmul.mubr.bf16.gmra.mrb[72].mxu0 %v2254_v60  ;;  %v11221_v60 = vld [vmem:[#allocation43_spill] sm:$0xff] }
 0x6f4   :  { %2322 = vmatprep.mubr.bf16.mxu0 %v2257_v3  ;;  %v8974_v3 = vcombine.low %v11221_v60, %v11220_v23  ;;  %v11228_v23 = vld [vmem:[#allocation62_spill] sm:$0xff]  ;;  %v11229_v60 = vld [vmem:[#allocation61_spill] sm:$0xff] }
 0x6f6   :  { %6526 = vmatprep.subr.bf16.mxu1 %v8974_v3 }
 0x6f7   :  { %6527 = vmatpush3.bf16.msra.mxu1 %v8974_v3 }
 0x6fb   :  { %2323 = vmatmul.mubr.bf16.gmra.mrb[76].mxu0 %v2256_v4  ;;  %v11222_v4 = vld [vmem:[#allocation51_spill] sm:$0xff] }
 0x6fc   :  { %2330 = vmatprep.mubr.bf16.mxu0 %v2259_v31  ;;  %v11223_v31 = vld [vmem:[#allocation50_spill] sm:$0xff] }
 0x703   :  { %2331 = vmatmul.mubr.bf16.gmra.mrb[80].mxu0 %v2258_v41  ;;  %v8980_v41 = vcombine.low %v11223_v31, %v11222_v4  ;;  %v8998_v4 = vcombine.low %v11229_v60, %v11228_v23 }
 0x704   :  { %2338 = vmatprep.mubr.bf16.mxu0 %v2261_v13  ;;  %v11225_v13 = vld [vmem:[#allocation52_spill] sm:$0xff] }
 0x705   :  { %6528 = vmatprep.subr.bf16.mxu1 %v8980_v41 }
 0x706   :  { %6529 = vmatpush3.bf16.msra.mxu1 %v8980_v41 }
 0x70b   :  { %2339 = vmatmul.mubr.bf16.gmra.mrb[84].mxu0 %v2260_v25 }
 0x70c   :  { %2346 = vmatprep.mubr.bf16.mxu0 %v2263_v14  ;;  %v11224_v14 = vld [vmem:[#allocation53_spill] sm:$0xff] }
 0x70d   :  { %v8986_v25 = vcombine.low %v11225_v13, %v11224_v14 }
 0x70f   :  { %6530 = vmatprep.subr.bf16.mxu1 %v8986_v25 }
 0x710   :  { %6531 = vmatpush3.bf16.msra.mxu1 %v8986_v25 }
 0x713   :  { %2347 = vmatmul.mubr.bf16.gmra.mrb[88].mxu0 %v2262_v51  ;;  %v11226_v51 = vld [vmem:[#allocation60_spill] sm:$0xff] }
 0x714   :  { %2354 = vmatprep.mubr.bf16.mxu0 %v2265_v52  ;;  %v11227_v52 = vld [vmem:[#allocation59_spill] sm:$0xff] }
 0x71b   :  { %2355 = vmatmul.mubr.bf16.gmra.mrb[92].mxu0 %v2264_v58  ;;  %v8992_v58 = vcombine.low %v11227_v52, %v11226_v51  ;;  %v11231_v52 = vmax.f32 %v8637_v16, 0.0 }
 0x71d   :  { %6532 = vmatprep.subr.bf16.mxu1 %v8992_v58 }
 0x71e   :  { %6533 = vmatpush3.bf16.msra.mxu1 %v8992_v58 }
 0x71f   :  { %6550 = vmatprep.subr.bf16.mxu1 %v8998_v4 }
 0x7b6   :  { %v5970_v31 = vpop.f32.mrb[64].mxu0 }
 0x7b7   :  { %v5971_v14 = vpop.f32.mrb[65].mxu0 }
 0x7b8   :  { %v5972_v13 = vadd.f32 %v5971_v14, %v5970_v31  ;;  %v5973_v54 = vpop.f32.mrb[66].mxu0  ;;  %v11233_v14 = vmax.f32 %v8643_v34, 0.0 }
 0x7b9   :  { %v5974_v10 = vpop.f32.mrb[67].mxu0 }
 0x7ba   :  { %v5975_v5 = vadd.f32 %v5974_v10, %v5973_v54  ;;  %v2363_v51 = vadd.f32 %v5972_v13, %v11230_v11  ;;  %v11234_v11 = vld [vmem:[#allocation72_spill] sm:$0xff]  ;;  %v11235_v13 = vld [vmem:[#allocation63_spill] sm:$0xff] }
 0x7bb   :  { %v9011_v16 = vcombine.low %v11235_v13, %v11234_v11 }
 0x7bc   :  { %v2364_v33 = vadd.f32 %v5975_v5, %v11231_v52 }
 0x7be   :  { %v5976_v57 = vpop.f32.mrb[68].mxu0  ;;  %v2379_v29 = vpack.c.bf16 %v2364_v33, %v2363_v51 }
 0x7bf   :  { %v5977_v8 = vpop.f32.mrb[69].mxu0 }
 0x7c0   :  { %v5978_v35 = vadd.f32 %v5977_v8, %v5976_v57  ;;  %v5979_v23 = vpop.f32.mrb[70].mxu0  ;;  %6534 = vmatprep.mubr.bf16.mxu1 %v2379_v29  ;;  %v11239_v57 = vmax.f32 %v8649_v42, 0.0  ;;  %v11242_v42 = vld [vmem:[#allocation85_spill] sm:$0xff] }
 0x7c1   :  { %v5980_v60 = vpop.f32.mrb[71].mxu0 }
 0x7c2   :  { %v5981_v61 = vadd.f32 %v5980_v60, %v5979_v23  ;;  %v2365_v31 = vadd.f32 %v5978_v35, %v11232_v55  ;;  %v11237_v55 = vld [vmem:[#allocation80_spill] sm:$0xff] }
 0x7c3   :  { %v9017_v34 = vcombine.low %v11237_v55, %v11236_v53 }
 0x7c4   :  { %v2366_v10 = vadd.f32 %v5981_v61, %v11233_v14  ;;  %v11238_v61 = vmax.f32 %v8646_v38, 0.0  ;;  %v11241_v14 = vld [vmem:[#allocation82_spill] sm:$0xff] }
 0x7c6   :  { %v2380_v54 = vpack.c.bf16 %v2366_v10, %v2365_v31  ;;  %v5982_v36 = vpop.f32.mrb[72].mxu0  ;;  %v11240_v31 = vld [vmem:[#allocation83_spill] sm:$0xff] }
 0x7c7   :  { %v5983_v5 = vpop.f32.mrb[73].mxu0  ;;  %v9027_v10 = vcombine.low %v11241_v14, %v11240_v31 }
 0x7c8   :  { %v5984_v33 = vadd.f32 %v5983_v5, %v5982_v36  ;;  %v5985_v51 = vpop.f32.mrb[74].mxu0  ;;  %6535 = vmatmul.mubr.bf16.vlgmr.msra.gmra.mrb[64].mxu1 %v2380_v54  ;;  %v11243_v5 = vld [vmem:[#allocation84_spill] sm:$0xff] }
 0x7c9   :  { %v5986_v8 = vpop.f32.mrb[75].mxu0  ;;  %6551 = vmatpush3.bf16.msra.mxu1 %v8998_v4 }
 0x7ca   :  { %v5987_v29 = vadd.f32 %v5986_v8, %v5985_v51  ;;  %6552 = vmatprep.subr.bf16.mxu1 %v9011_v16  ;;  %v2367_v35 = vadd.f32 %v5984_v33, %v11238_v61  ;;  %v9033_v33 = vcombine.low %v11243_v5, %v11242_v42  ;;  %v11244_v51 = vmax.f32 %v8652_v46, 0.0 }
 0x7cc   :  { %v2368_v52 = vadd.f32 %v5987_v29, %v11239_v57  ;;  %v11245_v29 = vmax.f32 %v8655_v21, 0.0  ;;  %v11247_v57 = vld [vmem:[#allocation87_spill] sm:$0xff]  ;;  %v11248_v21 = vmax.f32 %v8658_v50, 0.0 }
 0x7cd   :  { %6553 = vmatpush3.bf16.msra.mxu1 %v9011_v16 }
 0x7ce   :  { %v2381_v23 = vpack.c.bf16 %v2368_v52, %v2367_v35  ;;  %v5988_v60 = vpop.f32.mrb[76].mxu0  ;;  %6554 = vmatprep.subr.bf16.mxu1 %v9017_v34  ;;  %v11246_v35 = vld [vmem:[#allocation88_spill] sm:$0xff] }
 0x7cf   :  { %v5989_v54 = vpop.f32.mrb[77].mxu0  ;;  %v9043_v52 = vcombine.low %v11247_v57, %v11246_v35 }
 0x7d0   :  { %v5990_v36 = vadd.f32 %v5989_v54, %v5988_v60  ;;  %v5991_v11 = vpop.f32.mrb[78].mxu0  ;;  %6538 = vmatprep.mubr.bf16.mxu1 %v2381_v23 }
 0x7d1   :  { %v5992_v13 = vpop.f32.mrb[79].mxu0  ;;  %6555 = vmatpush3.bf16.msra.mxu1 %v9017_v34 }
 0x7d2   :  { %v5993_v38 = vadd.f32 %v5992_v13, %v5991_v11  ;;  %6556 = vmatprep.subr.bf16.mxu1 %v9027_v10  ;;  %v2369_v8 = vadd.f32 %v5990_v36, %v11244_v51  ;;  %v11249_v36 = vmax.f32 %v8661_v59, 0.0 }
 0x7d4   :  { %v2370_v53 = vadd.f32 %v5993_v38, %v11245_v29 }
 0x7d5   :  { %6557 = vmatpush3.bf16.msra.mxu1 %v9027_v10 }
 0x7d6   :  { %v2382_v55 = vpack.c.bf16 %v2370_v53, %v2369_v8  ;;  %v5994_v61 = vpop.f32.mrb[80].mxu0  ;;  %6558 = vmatprep.subr.bf16.mxu1 %v9033_v33  ;;  %v11250_v53 = vmax.f32 %v8664_v62, 0.0 }
 0x7d7   :  { %v5995_v23 = vpop.f32.mrb[81].mxu0 }
 0x7d8   :  { %v5996_v60 = vadd.f32 %v5995_v23, %v5994_v61  ;;  %v5997_v31 = vpop.f32.mrb[82].mxu0  ;;  %6539 = vmatmul.mubr.bf16.gmra.mrb[68].mxu1 %v2382_v55  ;;  %v11251_v61 = vmax.f32 %v8667_v37, 0.0 }
 0x7d9   :  { %v5998_v14 = vpop.f32.mrb[83].mxu0  ;;  %6559 = vmatpush3.bf16.msra.mxu1 %v9033_v33 }
 0x7da   :  { %v5999_v46 = vadd.f32 %v5998_v14, %v5997_v31  ;;  %6560 = vmatprep.subr.bf16.mxu1 %v9043_v52  ;;  %v2371_v54 = vadd.f32 %v5996_v60, %v11248_v21 }
 0x7dc   :  { %v2372_v11 = vadd.f32 %v5999_v46, %v11249_v36  ;;  %v11252_v46 = vmax.f32 %v8670_v49, 0.0  ;;  %v11256_v49 = vld [vmem:[#allocation90_spill] sm:$0xff] }
 0x7dd   :  { %6561 = vmatpush3.bf16.msra.mxu1 %v9043_v52 }
 0x7de   :  { %v2383_v13 = vpack.c.bf16 %v2372_v11, %v2371_v54  ;;  %v6000_v38 = vpop.f32.mrb[84].mxu0  ;;  %v11253_v54 = vmax.f32 %v8673_v30, 0.0 }
 0x7df   :  { %v6001_v42 = vpop.f32.mrb[85].mxu0 }
 0x7e0   :  { %v6002_v5 = vadd.f32 %v6001_v42, %v6000_v38  ;;  %v6003_v51 = vpop.f32.mrb[86].mxu0  ;;  %6542 = vmatprep.mubr.bf16.mxu1 %v2383_v13 }
 0x7e1   :  { %v6004_v8 = vpop.f32.mrb[87].mxu0 }
 0x7e2   :  { %v6005_v29 = vadd.f32 %v6004_v8, %v6003_v51  ;;  %v2373_v55 = vadd.f32 %v6002_v5, %v11250_v53  ;;  %v11254_v51 = vmax.f32 %v8676_v45, 0.0  ;;  %v11260_v45 = vld [vmem:[#allocation38_spill] sm:$0xff] }
 0x7e4   :  { %v2374_v50 = vadd.f32 %v6005_v29, %v11251_v61  ;;  %v11255_v29 = vmax.f32 %v8679_v2, 0.0  ;;  %v11257_v61 = vld [vmem:[#allocation89_spill] sm:$0xff]  ;;  %v11261_v2 = vld [vmem:[#allocation86_spill] sm:$0xff] }
 0x7e5   :  { %v9066_v30 = vcombine.low %v11257_v61, %v11256_v49 }
 0x7e6   :  { %v2384_v35 = vpack.c.bf16 %v2374_v50, %v2373_v55  ;;  %v6006_v57 = vpop.f32.mrb[88].mxu0  ;;  %v11258_v50 = vld [vmem:[#allocation92_spill] sm:$0xff] }
 0x7e7   :  { %v6007_v59 = vpop.f32.mrb[89].mxu0  ;;  %6562 = vmatprep.subr.bf16.mxu1 %v9066_v30 }
 0x7e8   :  { %v6008_v23 = vadd.f32 %v6007_v59, %v6006_v57  ;;  %v6009_v60 = vpop.f32.mrb[90].mxu0  ;;  %6543 = vmatmul.mubr.bf16.gmra.mrb[72].mxu1 %v2384_v35  ;;  %v11259_v35 = vld [vmem:[#allocation91_spill] sm:$0xff]  ;;  %v9078_v59 = vrot.slane %v11261_v2, %v11260_v45 }
 0x7e9   :  { %v6010_v31 = vpop.f32.mrb[91].mxu0  ;;  %6563 = vmatpush3.bf16.msra.mxu1 %v9066_v30  ;;  %v9072_v57 = vcombine.low %v11259_v35, %v11258_v50 }
 0x7ea   :  { %v6011_v14 = vadd.f32 %v6010_v31, %v6009_v60  ;;  %v2375_v21 = vadd.f32 %v6008_v23, %v11252_v46 }
 0x7eb   :  { %6564 = vmatprep.subr.bf16.mxu1 %v9072_v57 }
 0x7ec   :  { %v2376_v36 = vadd.f32 %v6011_v14, %v11253_v54 }
 0x7ed   :  { %6565 = vmatpush3.bf16.msra.mxu1 %v9072_v57 }
 0x7ee   :  { %v2385_v11 = vpack.c.bf16 %v2376_v36, %v2375_v21  ;;  %v6012_v62 = vpop.f32.mrb[92].mxu0 }
 0x7ef   :  { %v6013_v13 = vpop.f32.mrb[93].mxu0 }
 0x7f0   :  { %v6014_v38 = vadd.f32 %v6013_v13, %v6012_v62  ;;  %v6015_v37 = vpop.f32.mrb[94].mxu0  ;;  %6546 = vmatprep.mubr.bf16.mxu1 %v2385_v11 }
 0x7f1   :  { %v6016_v42 = vpop.f32.mrb[95].mxu0 }
 0x7f2   :  { %v6017_v5 = vadd.f32 %v6016_v42, %v6015_v37  ;;  %v2377_v8 = vadd.f32 %v6014_v38, %v11254_v51 }
 0x7f4   :  { %v2378_v53 = vadd.f32 %v6017_v5, %v11255_v29 }
 0x7f6   :  { %v2386_v55 = vpack.c.bf16 %v2378_v53, %v2377_v8 }
 0x7f8   :  { %6547 = vmatmul.mubr.bf16.gmra.mrb[76].mxu1 %v2386_v55 }
 0x89b   :  { %v6536_v23 = vpop.f32.mrb[64].mxu1 }
 0x89c   :  { %v2482_v60 = vadd.f32 %v6536_v23, %v9078_v59  ;;  %v2473_v31 = vpop.f32.mrb[65].mxu1 }
 0x89d   :  { %v2474_v14 = vadd.f32 %v2473_v31, %v9078_v59  ;;  %v6537_v46 = vpop.f32.mrb[66].mxu1 }
 0x89e   :  { %v2485_v21 = vadd.f32 %v6537_v46, %v9078_v59  ;;  %v2476_v54 = vpop.f32.mrb[67].mxu1  ;;  %v2538_v11 = vmax.f32 %v2482_v60, 0.0 }
 0x89f   :  { %v2477_v36 = vadd.f32 %v2476_v54, %v9078_v59  ;;  %v2536_v13 = vmax.f32 %v2474_v14, 0.0 }
 0x8a0   :  { %v2539_v62 = vmax.f32 %v2485_v21, 0.0 }
 0x8a1   :  { %v2537_v38 = vmax.f32 %v2477_v36, 0.0 }
 0x8a2   :  { %v2553_v37 = vpack.c.bf16 %v2539_v62, %v2538_v11 }
 0x8a3   :  { %v2552_v42 = vpack.c.bf16 %v2537_v38, %v2536_v13 }
 0x8a5   :  { %6566 = vmatprep.mubr.bf16.mxu1 %v2552_v42 }
 0x8a6   :  { %6567 = vmatmul.mubr.bf16.vlgmr.msra.gmra.mrb[80].mxu1 %v2553_v37 }
 0x8ab   :  { %v6540_v5 = vpop.f32.mrb[68].mxu1 }
 0x8ac   :  { %v2498_v51 = vadd.f32 %v6540_v5, %v9078_v59  ;;  %v2489_v8 = vpop.f32.mrb[69].mxu1 }
 0x8ad   :  { %v2490_v29 = vadd.f32 %v2489_v8, %v9078_v59  ;;  %v6541_v53 = vpop.f32.mrb[70].mxu1 }
 0x8ae   :  { %v2501_v55 = vadd.f32 %v6541_v53, %v9078_v59  ;;  %v2492_v49 = vpop.f32.mrb[71].mxu1  ;;  %v2542_v50 = vmax.f32 %v2498_v51, 0.0 }
 0x8af   :  { %v2493_v61 = vadd.f32 %v2492_v49, %v9078_v59  ;;  %v2540_v23 = vmax.f32 %v2490_v29, 0.0 }
 0x8b0   :  { %v2543_v35 = vmax.f32 %v2501_v55, 0.0 }
 0x8b1   :  { %v2541_v60 = vmax.f32 %v2493_v61, 0.0 }
 0x8b2   :  { %v2555_v31 = vpack.c.bf16 %v2543_v35, %v2542_v50 }
 0x8b3   :  { %v2554_v14 = vpack.c.bf16 %v2541_v60, %v2540_v23 }
 0x8b5   :  { %6570 = vmatprep.mubr.bf16.mxu1 %v2554_v14 }
 0x8b6   :  { %6571 = vmatmul.mubr.bf16.gmra.mrb[84].mxu1 %v2555_v31 }
 0x8bb   :  { %v6544_v46 = vpop.f32.mrb[72].mxu1 }
 0x8bc   :  { %v2514_v21 = vadd.f32 %v6544_v46, %v9078_v59  ;;  %v2505_v54 = vpop.f32.mrb[73].mxu1 }
 0x8bd   :  { %v2506_v36 = vadd.f32 %v2505_v54, %v9078_v59  ;;  %v6545_v11 = vpop.f32.mrb[74].mxu1 }
 0x8be   :  { %v2517_v62 = vadd.f32 %v6545_v11, %v9078_v59  ;;  %v2508_v13 = vpop.f32.mrb[75].mxu1  ;;  %v2546_v37 = vmax.f32 %v2514_v21, 0.0  ;;  %v11262_v11 = vld [vmem:[#allocation33_spill] sm:$0xff] }
 0x8bf   :  { %v2509_v38 = vadd.f32 %v2508_v13, %v9078_v59  ;;  %v2544_v5 = vmax.f32 %v2506_v36, 0.0 }
 0x8c0   :  { %v2547_v42 = vmax.f32 %v2517_v62, 0.0  ;;  %v9098_v62 = vrot.slane %v11261_v2, %v11262_v11 }
 0x8c1   :  { %v2545_v51 = vmax.f32 %v2509_v38, 0.0 }
 0x8c2   :  { %v2557_v8 = vpack.c.bf16 %v2547_v42, %v2546_v37  ;;  %11263 = vst [vmem:[#allocation73_spill] sm:$0xff] %v9098_v62 }
 0x8c3   :  { %v2556_v29 = vpack.c.bf16 %v2545_v51, %v2544_v5 }
 0x8c5   :  { %6574 = vmatprep.mubr.bf16.mxu1 %v2556_v29 }
 0x8c6   :  { %6575 = vmatmul.mubr.bf16.gmra.mrb[88].mxu1 %v2557_v8 }
 0x8cb   :  { %v6548_v53 = vpop.f32.mrb[76].mxu1 }
 0x8cc   :  { %v2530_v55 = vadd.f32 %v6548_v53, %v9078_v59  ;;  %v2521_v49 = vpop.f32.mrb[77].mxu1 }
 0x8cd   :  { %v2522_v61 = vadd.f32 %v2521_v49, %v9078_v59  ;;  %v6549_v50 = vpop.f32.mrb[78].mxu1  ;;  %v11266_v49 = vld [vmem:[#allocation23_spill] sm:$0xff] }
 0x8ce   :  { %v2533_v35 = vadd.f32 %v6549_v50, %v9078_v59  ;;  %v2524_v23 = vpop.f32.mrb[79].mxu1  ;;  %v2550_v31 = vmax.f32 %v2530_v55, 0.0 }
 0x8cf   :  { %v2525_v60 = vadd.f32 %v2524_v23, %v9078_v59  ;;  %v2548_v46 = vmax.f32 %v2522_v61, 0.0  ;;  %v11269_v23 = vld [vmem:[#allocation26_spill] sm:$0xff] }
 0x8d0   :  { %v2551_v14 = vmax.f32 %v2533_v35, 0.0 }
 0x8d1   :  { %v2549_v21 = vmax.f32 %v2525_v60, 0.0 }
 0x8d2   :  { %v2559_v54 = vpack.c.bf16 %v2551_v14, %v2550_v31  ;;  %v11270_v31 = vld [vmem:[#allocation25_spill] sm:$0xff] }
 0x8d3   :  { %v2558_v36 = vpack.c.bf16 %v2549_v21, %v2548_v46  ;;  %v11271_v21 = vld [vmem:[#allocation27_spill] sm:$0xff] }
 0x8d5   :  { %6578 = vmatprep.mubr.bf16.mxu1 %v2558_v36 }
 0x8d6   :  { %6579 = vmatmul.mubr.bf16.gmra.mrb[92].mxu1 %v2559_v54 }
 0x979   :  { %v6568_v13 = vpop.f32.mrb[80].mxu1 }
 0x97a   :  { %v2655_v38 = vadd.f32 %v6568_v13, %v9098_v62  ;;  %v2646_v37 = vpop.f32.mrb[81].mxu1 }
 0x97b   :  { %v2647_v42 = vadd.f32 %v2646_v37, %v9098_v62  ;;  %v6569_v5 = vpop.f32.mrb[82].mxu1 }
 0x97c   :  { %v2658_v51 = vadd.f32 %v6569_v5, %v9098_v62  ;;  %v2649_v8 = vpop.f32.mrb[83].mxu1  ;;  %v9103_v29 = vmax.f32 %v2655_v38, 0.0 }
 0x97d   :  { %v9105_v53 = vmax.f32 %v2647_v42, 0.0  ;;  %v2650_v55 = vadd.f32 %v2649_v8, %v9098_v62 }
 0x97e   :  { %11264 = vst [vmem:[#allocation76_spill] sm:$0xff] %v9103_v29  ;;  %v9110_v50 = vmax.f32 %v2658_v51, 0.0  ;;  %v2743_v60 = vmul.f32 %v11269_v23, %v9103_v29 }
 0x97f   :  { %11265 = vst [vmem:[#allocation79_spill] sm:$0xff] %v9105_v53  ;;  %v2741_v61 = vmul.f32 %v11266_v49, %v9105_v53  ;;  %v9112_v35 = vmax.f32 %v2650_v55, 0.0 }
 0x980   :  { %11267 = vst [vmem:[#allocation78_spill] sm:$0xff] %v9110_v50  ;;  %v2744_v54 = vmul.f32 %v11271_v21, %v9110_v50  ;;  %v2781_v38 = vmul.f32 %v2743_v60, %v9103_v29 }
 0x981   :  { %11268 = vst [vmem:[#allocation44_spill] sm:$0xff] %v9112_v35  ;;  %v2742_v14 = vmul.f32 %v11270_v31, %v9112_v35  ;;  %v2779_v46 = vmul.f32 %v2741_v61, %v9105_v53 }
 0x982   :  { %v2782_v5 = vmul.f32 %v2744_v54, %v9110_v50 }
 0x983   :  { %v2757_v36 = vadd.f32 %v2742_v14, %v2741_v61  ;;  %v2780_v13 = vmul.f32 %v2742_v14, %v9112_v35 }
 0x985   :  { %v2758_v37 = vadd.f32 %v2757_v36, %v2743_v60  ;;  %v2795_v42 = vadd.f32 %v2780_v13, %v2779_v46  ;;  %v11274_v46 = vld [vmem:[#allocation28_spill] sm:$0xff] }
 0x987   :  { %v2796_v51 = vadd.f32 %v2795_v42, %v2781_v38  ;;  %v2759_v8 = vadd.f32 %v2758_v37, %v2744_v54  ;;  %v11277_v38 = vld [vmem:[#allocation30_spill] sm:$0xff] }
 0x989   :  { %v6572_v55 = vpop.f32.mrb[84].mxu1  ;;  %v2797_v23 = vadd.f32 %v2796_v51, %v2782_v5  ;;  %v11279_v5 = vld [vmem:[#allocation31_spill] sm:$0xff] }
 0x98a   :  { %v2671_v31 = vadd.f32 %v6572_v55, %v9098_v62  ;;  %v2662_v49 = vpop.f32.mrb[85].mxu1 }
 0x98b   :  { %v2663_v11 = vadd.f32 %v2662_v49, %v9098_v62  ;;  %v6573_v45 = vpop.f32.mrb[86].mxu1 }
 0x98c   :  { %v2674_v61 = vadd.f32 %v6573_v45, %v9098_v62  ;;  %v2665_v21 = vpop.f32.mrb[87].mxu1  ;;  %v9127_v14 = vmax.f32 %v2671_v31, 0.0  ;;  %v11278_v31 = vld [vmem:[#allocation29_spill] sm:$0xff] }
 0x98d   :  { %v9129_v29 = vmax.f32 %v2663_v11, 0.0  ;;  %v2666_v60 = vadd.f32 %v2665_v21, %v9098_v62 }
 0x98e   :  { %11272 = vst [vmem:[#allocation43_spill] sm:$0xff] %v9127_v14  ;;  %v9134_v36 = vmax.f32 %v2674_v61, 0.0  ;;  %v2747_v49 = vmul.f32 %v11277_v38, %v9127_v14 }
 0x98f   :  { %11273 = vst [vmem:[#allocation51_spill] sm:$0xff] %v9129_v29  ;;  %v2745_v54 = vmul.f32 %v11274_v46, %v9129_v29  ;;  %v9136_v13 = vmax.f32 %v2666_v60, 0.0 }
 0x990   :  { %11275 = vst [vmem:[#allocation50_spill] sm:$0xff] %v9134_v36  ;;  %v2748_v21 = vmul.f32 %v11279_v5, %v9134_v36  ;;  %v2785_v61 = vmul.f32 %v2747_v49, %v9127_v14 }
 0x991   :  { %11276 = vst [vmem:[#allocation53_spill] sm:$0xff] %v9136_v13  ;;  %v2760_v37 = vadd.f32 %v2759_v8, %v2745_v54  ;;  %v2783_v45 = vmul.f32 %v2745_v54, %v9129_v29  ;;  %v2746_v42 = vmul.f32 %v11278_v31, %v9136_v13 }
 0x992   :  { %v2786_v50 = vmul.f32 %v2748_v21, %v9134_v36 }
 0x993   :  { %v2798_v11 = vadd.f32 %v2797_v23, %v2783_v45  ;;  %v2761_v51 = vadd.f32 %v2760_v37, %v2746_v42  ;;  %v2784_v55 = vmul.f32 %v2746_v42, %v9136_v13 }
 0x995   :  { %v2762_v60 = vadd.f32 %v2761_v51, %v2747_v49  ;;  %v2799_v46 = vadd.f32 %v2798_v11, %v2784_v55 }
 0x997   :  { %v2800_v38 = vadd.f32 %v2799_v46, %v2785_v61  ;;  %v2763_v8 = vadd.f32 %v2762_v60, %v2748_v21  ;;  %v11282_v46 = vld [vmem:[#allocation32_spill] sm:$0xff] }
 0x998   :  { %v11287_v60 = vld [vmem:[#allocation36_spill] sm:$0xff] }
 0x999   :  { %v6576_v35 = vpop.f32.mrb[88].mxu1  ;;  %v2801_v54 = vadd.f32 %v2800_v38, %v2786_v50 }
 0x99a   :  { %v2687_v29 = vadd.f32 %v6576_v35, %v9098_v62  ;;  %v2678_v31 = vpop.f32.mrb[89].mxu1  ;;  %v11285_v35 = vld [vmem:[#allocation35_spill] sm:$0xff] }
 0x99b   :  { %v2679_v23 = vadd.f32 %v2678_v31, %v9098_v62  ;;  %v6577_v45 = vpop.f32.mrb[90].mxu1 }
 0x99c   :  { %v2690_v37 = vadd.f32 %v6577_v45, %v9098_v62  ;;  %v2681_v5 = vpop.f32.mrb[91].mxu1  ;;  %v9151_v42 = vmax.f32 %v2687_v29, 0.0  ;;  %v11286_v29 = vld [vmem:[#allocation34_spill] sm:$0xff] }
 0x99d   :  { %v9153_v14 = vmax.f32 %v2679_v23, 0.0  ;;  %v2682_v49 = vadd.f32 %v2681_v5, %v9098_v62 }
 0x99e   :  { %11280 = vst [vmem:[#allocation52_spill] sm:$0xff] %v9151_v42  ;;  %v9158_v21 = vmax.f32 %v2690_v37, 0.0  ;;  %v2751_v38 = vmul.f32 %v11285_v35, %v9151_v42 }
 0x99f   :  { %11281 = vst [vmem:[#allocation60_spill] sm:$0xff] %v9153_v14  ;;  %v2749_v11 = vmul.f32 %v11282_v46, %v9153_v14  ;;  %v9160_v50 = vmax.f32 %v2682_v49, 0.0 }
 0x9a0   :  { %11283 = vst [vmem:[#allocation59_spill] sm:$0xff] %v9158_v21  ;;  %v2752_v5 = vmul.f32 %v11287_v60, %v9158_v21  ;;  %v2789_v37 = vmul.f32 %v2751_v38, %v9151_v42 }
 0x9a1   :  { %11284 = vst [vmem:[#allocation62_spill] sm:$0xff] %v9160_v50  ;;  %v2764_v31 = vadd.f32 %v2763_v8, %v2749_v11  ;;  %v2787_v51 = vmul.f32 %v2749_v11, %v9153_v14  ;;  %v2750_v55 = vmul.f32 %v11286_v29, %v9160_v50 }
 0x9a2   :  { %v2790_v36 = vmul.f32 %v2752_v5, %v9158_v21 }
 0x9a3   :  { %v2802_v61 = vadd.f32 %v2801_v54, %v2787_v51  ;;  %v2765_v23 = vadd.f32 %v2764_v31, %v2750_v55  ;;  %v2788_v45 = vmul.f32 %v2750_v55, %v9160_v50 }
 0x9a5   :  { %v2766_v49 = vadd.f32 %v2765_v23, %v2751_v38  ;;  %v2803_v46 = vadd.f32 %v2802_v61, %v2788_v45 }
 0x9a7   :  { %v2804_v35 = vadd.f32 %v2803_v46, %v2789_v37  ;;  %v2767_v8 = vadd.f32 %v2766_v49, %v2752_v5  ;;  %v11290_v46 = vld [vmem:[#allocation37_spill] sm:$0xff] }
 0x9a8   :  { %v11293_v49 = vld [vmem:[#allocation41_spill] sm:$0xff] }
 0x9a9   :  { %v6580_v13 = vpop.f32.mrb[92].mxu1  ;;  %v2805_v11 = vadd.f32 %v2804_v35, %v2790_v36 }
 0x9aa   :  { %v2703_v14 = vadd.f32 %v6580_v13, %v9098_v62  ;;  %v2694_v29 = vpop.f32.mrb[93].mxu1  ;;  %v11291_v13 = vld [vmem:[#allocation40_spill] sm:$0xff] }
 0x9ab   :  { %v2695_v54 = vadd.f32 %v2694_v29, %v9098_v62  ;;  %v6581_v51 = vpop.f32.mrb[94].mxu1 }
 0x9ac   :  { %v2706_v31 = vadd.f32 %v6581_v51, %v9098_v62  ;;  %v2697_v60 = vpop.f32.mrb[95].mxu1  ;;  %v9175_v55 = vmax.f32 %v2703_v14, 0.0  ;;  %v11292_v14 = vld [vmem:[#allocation39_spill] sm:$0xff] }
 0x9ad   :  { %v9177_v42 = vmax.f32 %v2695_v54, 0.0  ;;  %v2698_v38 = vadd.f32 %v2697_v60, %v9098_v62 }
 0x9ae   :  { %11288 = vst [vmem:[#allocation61_spill] sm:$0xff] %v9175_v55  ;;  %v9182_v5 = vmax.f32 %v2706_v31, 0.0  ;;  %v2755_v35 = vmul.f32 %v11291_v13, %v9175_v55 }
 0x9af   :  { %11289 = vst [vmem:[#allocation72_spill] sm:$0xff] %v9177_v42  ;;  %v2753_v61 = vmul.f32 %v11290_v46, %v9177_v42  ;;  %v9184_v36 = vmax.f32 %v2698_v38, 0.0 }
 0x9b0   :  { %v2756_v60 = vmul.f32 %v11293_v49, %v9182_v5  ;;  %v2793_v31 = vmul.f32 %v2755_v35, %v9175_v55 }
 0x9b1   :  { %v2768_v29 = vadd.f32 %v2767_v8, %v2753_v61  ;;  %v2791_v23 = vmul.f32 %v2753_v61, %v9177_v42  ;;  %v2754_v45 = vmul.f32 %v11292_v14, %v9184_v36 }
 0x9b2   :  { %v2794_v21 = vmul.f32 %v2756_v60, %v9182_v5 }
 0x9b3   :  { %v2806_v37 = vadd.f32 %v2805_v11, %v2791_v23  ;;  %v2769_v54 = vadd.f32 %v2768_v29, %v2754_v45  ;;  %v2792_v51 = vmul.f32 %v2754_v45, %v9184_v36 }
 0x9b5   :  { %v2770_v38 = vadd.f32 %v2769_v54, %v2755_v35  ;;  %v2807_v46 = vadd.f32 %v2806_v37, %v2792_v51 }
 0x9b7   :  { %v2771_v13 = vadd.f32 %v2770_v38, %v2756_v60  ;;  %v2808_v8 = vadd.f32 %v2807_v46, %v2793_v31 }
 0x9b9   :  { %v2772_v50 = vrot.slane %v2771_v13, 4  ;;  %v2809_v61 = vadd.f32 %v2808_v8, %v2794_v21 }
 0x9bb   :  { %v2773_v42 = vadd.f32 %v2772_v50, %v2771_v13  ;;  %v2810_v53 = vrot.slane %v2809_v61, 4 }
 0x9bd   :  { %v2774_v14 = vrot.slane %v2773_v42, 2  ;;  %v2811_v11 = vadd.f32 %v2810_v53, %v2809_v61 }
 0x9bf   :  { %v2775_v23 = vadd.f32 %v2774_v14, %v2773_v42  ;;  %v2812_v2 = vrot.slane %v2811_v11, 2 }
 0x9c1   :  { %v2776_v49 = vrot.slane %v2775_v23, 1  ;;  %v2813_v29 = vadd.f32 %v2812_v2, %v2811_v11 }
 0x9c3   :  { %v9196_v62 = vadd.f32 %v2776_v49, %v2775_v23  ;;  %v2814_v45 = vrot.slane %v2813_v29, 1 }
 0x9c5   :  { %v9198_v55 = vadd.f32 %v2814_v45, %v2813_v29 }
 0x9c6   :  { %6884 = dma.done.wait [#allocation4 + $0x1], 2048 }
 0x9c7   :  { %6885 = vsyncadd [#allocation4 + $0x1], 4294965248  ;;  %v2836_v46 = vld [vmem:[%s10809_s2] sm:$0xf]  ;;  %v2838_v21 = vld [vmem:[%s10809_s2 + $0x8] sm:$0xf] }
 0x9c8   :  { %v2840_v53 = vld [vmem:[%s10809_s2 + $0x4] sm:$0xf]  ;;  %2837 = vst [vmem:[#allocation2] sm:$0xf] %v2836_v46  ;;  %2839 = vst [vmem:[#allocation2 + $0x4] sm:$0xf] %v2838_v21 }
 0x9c9   :  { %2841 = vst [vmem:[#allocation2 + $0x8] sm:$0xf] %v2840_v53  ;;  %v2842_v2 = vld [vmem:[%s10809_s2 + $0xc] sm:$0xff]   ;;  %v2846_v42 = vld [vmem:[%s10809_s2 + $0x18] sm:$0xf]  ;;  %v2850_v13 = vld [vmem:[%s10809_s2 + $0x1c] sm:$0xff]  }
 0x9ca   :  { %v2848_v50 = vld [vmem:[%s10809_s2 + $0x14] sm:$0xf]  ;;  %2843 = vst [vmem:[#allocation2 + $0xc] sm:$0xff] %v2842_v2   ;;  %2847 = vst [vmem:[#allocation2 + $0x14] sm:$0xf] %v2846_v42  ;;  %v2858_v37 = vld [vmem:[%s10809_s2 + $0x2c] sm:$0xff]  }
 0x9cb   :  { %2849 = vst [vmem:[#allocation2 + $0x18] sm:$0xf] %v2848_v50  ;;  %v2854_v35 = vld [vmem:[%s10809_s2 + $0x28] sm:$0xf]  ;;  %v2856_v14 = vld [vmem:[%s10809_s2 + $0x24] sm:$0xf] }
 0x9cc   :  { %2851 = vst [vmem:[#allocation2 + $0x1c] sm:$0xff] %v2850_v13   ;;  %2855 = vst [vmem:[#allocation2 + $0x24] sm:$0xf] %v2854_v35  ;;  %v2862_v49 = vld [vmem:[%s10809_s2 + $0x38] sm:$0xf]  ;;  %v2866_v54 = vld [vmem:[%s10809_s2 + $0x3c] sm:$0xff]  }
 0x9cd   :  { %2857 = vst [vmem:[#allocation2 + $0x28] sm:$0xf] %v2856_v14  ;;  %v2864_v60 = vld [vmem:[%s10809_s2 + $0x34] sm:$0xf]  ;;  %2859 = vst [vmem:[#allocation2 + $0x2c] sm:$0xff] %v2858_v37   ;;  %v2874_v38 = vld [vmem:[%s10809_s2 + $0x4c] sm:$0xff]  }
 0x9ce   :  { %2863 = vst [vmem:[#allocation2 + $0x34] sm:$0xf] %v2862_v49  ;;  %2865 = vst [vmem:[#allocation2 + $0x38] sm:$0xf] %v2864_v60  ;;  %v2870_v51 = vld [vmem:[%s10809_s2 + $0x48] sm:$0xf] }
 0x9cf   :  { %v2872_v31 = vld [vmem:[%s10809_s2 + $0x44] sm:$0xf]  ;;  %2867 = vst [vmem:[#allocation2 + $0x3c] sm:$0xff] %v2866_v54   ;;  %2871 = vst [vmem:[#allocation2 + $0x44] sm:$0xf] %v2870_v51  ;;  %v2882_v11 = vld [vmem:[%s10809_s2 + $0x5c] sm:$0xff]  }
 0x9d0   :  { %2873 = vst [vmem:[#allocation2 + $0x48] sm:$0xf] %v2872_v31  ;;  %v2878_v8 = vld [vmem:[%s10809_s2 + $0x58] sm:$0xf]  ;;  %v2880_v61 = vld [vmem:[%s10809_s2 + $0x54] sm:$0xf] }
 0x9d1   :  { %2875 = vst [vmem:[#allocation2 + $0x4c] sm:$0xff] %v2874_v38   ;;  %2879 = vst [vmem:[#allocation2 + $0x54] sm:$0xf] %v2878_v8  ;;  %v2886_v23 = vld [vmem:[%s10809_s2 + $0x68] sm:$0xf]  ;;  %v2890_v45 = vld [vmem:[%s10809_s2 + $0x6c] sm:$0xff]  }
 0x9d2   :  { %2881 = vst [vmem:[#allocation2 + $0x58] sm:$0xf] %v2880_v61  ;;  %v2888_v29 = vld [vmem:[%s10809_s2 + $0x64] sm:$0xf]  ;;  %2883 = vst [vmem:[#allocation2 + $0x5c] sm:$0xff] %v2882_v11  }
 0x9d3   :  { %2887 = vst [vmem:[#allocation2 + $0x64] sm:$0xf] %v2886_v23  ;;  %2889 = vst [vmem:[#allocation2 + $0x68] sm:$0xf] %v2888_v29  ;;  %v2894_v46 = vld [vmem:[%s10809_s2 + $0x78] sm:$0xf] }
 0x9d4   :  { %v2896_v21 = vld [vmem:[%s10809_s2 + $0x74] sm:$0xf]  ;;  %2891 = vst [vmem:[#allocation2 + $0x6c] sm:$0xff] %v2890_v45   ;;  %2895 = vst [vmem:[#allocation2 + $0x74] sm:$0xf] %v2894_v46 }
 0x9d5   :  { %2897 = vst [vmem:[#allocation2 + $0x78] sm:$0xf] %v2896_v21  ;;  %v2898_v53 = vld [vmem:[%s10809_s2 + $0x7c] sm:$0xf] }
 0x9d6   :  { %2899 = vst [vmem:[#allocation2 + $0x7c] sm:$0xf] %v2898_v53 }
 0x9d7   :  { %2994 = vsyncadd [#allocation4], 2048  ;;  %6050 = vmatprep.subr.bf16.mxu0 %v8813_v15  ;;  %v2996_v2 = vld [vmem:[#allocation2 + $0x88] sm:$0xff]  ;;  %6582 = vmatprep.subr.bf16.mxu1 %v8935_v17  ;;  %v2997_v15 = vld [vmem:[#allocation2 + $0x90] sm:$0xff]  ;;  %v11296_v54 = vmax.f32 %v8688_v63, 0.0  ;;  %v11297_v31 = vmax.f32 %v8691_v56, 0.0 }
 0x9d8   :  { %6051 = vmatpush3.bf16.msra.mxu0 %v8765_v32  ;;  %3043 = vmatprep.mubr.bf16.mxu0 %v2996_v2  ;;  %v3007_v32 = vld [vmem:[#allocation2 + $0xe0] sm:$0xff]  ;;  %v11298_v45 = vmax.f32 %v8694_v22, 0.0  ;;  %v11299_v63 = vld [vmem:[#allocation24_spill] sm:$0xff] }
 0x9d9   :  { %6052 = vmatprep.subr.bf16.mxu0 %v8819_v26  ;;  %6583 = vmatpush3.bf16.msra.mxu1 %v8935_v17  ;;  %v2995_v26 = vld [vmem:[#allocation2 + $0x80] sm:$0xff]  ;;  %v11300_v21 = vmax.f32 %v11299_v63, 0.0  ;;  %v11301_v22 = vld [vmem:[#allocation20_spill] sm:$0xff] }
 0x9da   :  { %6584 = vmatprep.subr.bf16.mxu1 %v8939_v0 }
 0x9dc   :  { %6053 = vmatpush3.bf16.msra.mxu0 %v8771_v27  ;;  %v3002_v27 = vld [vmem:[#allocation2 + $0xb8] sm:$0xff] }
 0x9dd   :  { %6054 = vmatprep.subr.bf16.mxu0 %v8825_v7  ;;  %6585 = vmatpush3.bf16.msra.mxu1 %v8939_v0  ;;  %v3001_v0 = vld [vmem:[#allocation2 + $0xb0] sm:$0xff]  ;;  %v3006_v7 = vld [vmem:[#allocation2 + $0xd8] sm:$0xff] }
 0x9de   :  { %6586 = vmatprep.subr.bf16.mxu1 %v8948_v24 }
 0x9e0   :  { %6055 = vmatpush3.bf16.msra.mxu0 %v8777_v6  ;;  %v3004_v6 = vld [vmem:[#allocation2 + $0xc8] sm:$0xff] }
 0x9e1   :  { %6056 = vmatprep.subr.bf16.mxu0 %v8831_v39  ;;  %6587 = vmatpush3.bf16.msra.mxu1 %v8948_v24  ;;  %v3010_v39 = vld [vmem:[#allocation2 + $0xf8] sm:$0xff] }
 0x9e2   :  { %6588 = vmatprep.subr.bf16.mxu1 %v8956_v48 }
 0x9e4   :  { %6057 = vmatpush3.bf16.msra.mxu0 %v8783_v9  ;;  %v3005_v9 = vld [vmem:[#allocation2 + $0xd0] sm:$0xff] }
 0x9e5   :  { %6058 = vmatprep.subr.bf16.mxu0 %v8837_v12  ;;  %6589 = vmatpush3.bf16.msra.mxu1 %v8956_v48  ;;  %v3009_v12 = vld [vmem:[#allocation2 + $0xf0] sm:$0xff] }
 0x9e6   :  { %6590 = vmatprep.subr.bf16.mxu1 %v8974_v3 }
 0x9e8   :  { %6059 = vmatpush3.bf16.msra.mxu0 %v8789_v18  ;;  %v2998_v18 = vld [vmem:[#allocation2 + $0x98] sm:$0xff] }
 0x9e9   :  { %6060 = vmatprep.subr.bf16.mxu0 %v8843_v44  ;;  %6591 = vmatpush3.bf16.msra.mxu1 %v8974_v3 }
 0x9ea   :  { %6592 = vmatprep.subr.bf16.mxu1 %v8980_v41 }
 0x9ec   :  { %6061 = vmatpush3.bf16.msra.mxu0 %v8795_v19  ;;  %v3000_v19 = vld [vmem:[#allocation2 + $0xa8] sm:$0xff] }
 0x9ed   :  { %6062 = vmatprep.subr.bf16.mxu0 %v8849_v43  ;;  %6593 = vmatpush3.bf16.msra.mxu1 %v8980_v41  ;;  %v11294_v41 = vmax.f32 %v8682_v40, 0.0 }
 0x9ee   :  { %6594 = vmatprep.subr.bf16.mxu1 %v8986_v25 }
 0x9f0   :  { %6063 = vmatpush3.bf16.msra.mxu0 %v8801_v1  ;;  %v2999_v1 = vld [vmem:[#allocation2 + $0xa0] sm:$0xff] }
 0x9f1   :  { %6064 = vmatprep.subr.bf16.mxu0 %v8855_v47  ;;  %6595 = vmatpush3.bf16.msra.mxu1 %v8986_v25  ;;  %v3008_v47 = vld [vmem:[#allocation2 + $0xe8] sm:$0xff] }
 0x9f2   :  { %6596 = vmatprep.subr.bf16.mxu1 %v8992_v58 }
 0x9f4   :  { %6065 = vmatpush3.bf16.msra.mxu0 %v8807_v20  ;;  %v3003_v20 = vld [vmem:[#allocation2 + $0xc0] sm:$0xff] }
 0x9f5   :  { %6597 = vmatpush3.bf16.msra.mxu1 %v8992_v58  ;;  %v11295_v58 = vmax.f32 %v8685_v28, 0.0 }
 0x9f6   :  { %6614 = vmatprep.subr.bf16.mxu1 %v8998_v4 }
 0x9f7   :  { %3044 = vmatmul.mubr.bf16.vlgmr.msra.gmra.mrb[96].mxu0 %v2995_v26 }
 0x9f8   :  { %3051 = vmatprep.mubr.bf16.mxu0 %v2998_v18 }
 0x9ff   :  { %3052 = vmatmul.mubr.bf16.gmra.mrb[100].mxu0 %v2997_v15 }
 0xa00   :  { %3059 = vmatprep.mubr.bf16.mxu0 %v3000_v19 }
 0xa07   :  { %3060 = vmatmul.mubr.bf16.gmra.mrb[104].mxu0 %v2999_v1  ;;  %v11302_v1 = vmax.f32 %v11301_v22, 0.0 }
 0xa08   :  { %3067 = vmatprep.mubr.bf16.mxu0 %v3002_v27 }
 0xa0f   :  { %3068 = vmatmul.mubr.bf16.gmra.mrb[108].mxu0 %v3001_v0  ;;  %v11303_v0 = vld [vmem:[#allocation45_spill] sm:$0xff] }
 0xa10   :  { %3075 = vmatprep.mubr.bf16.mxu0 %v3004_v6  ;;  %v11304_v6 = vmax.f32 %v11303_v0, 0.0 }
 0xa17   :  { %3076 = vmatmul.mubr.bf16.gmra.mrb[112].mxu0 %v3003_v20 }
 0xa18   :  { %3083 = vmatprep.mubr.bf16.mxu0 %v3006_v7 }
 0xa1f   :  { %3084 = vmatmul.mubr.bf16.gmra.mrb[116].mxu0 %v3005_v9 }
 0xa20   :  { %3091 = vmatprep.mubr.bf16.mxu0 %v3008_v47 }
 0xa27   :  { %3092 = vmatmul.mubr.bf16.gmra.mrb[120].mxu0 %v3007_v32 }
 0xa28   :  { %3099 = vmatprep.mubr.bf16.mxu0 %v3010_v39 }
 0xa2f   :  { %3100 = vmatmul.mubr.bf16.gmra.mrb[124].mxu0 %v3009_v12  ;;  %v11305_v12 = vld [vmem:[#allocation18_spill] sm:$0xff] }
 0xaca   :  { %v6066_v44 = vpop.f32.mrb[96].mxu0 }
 0xacb   :  { %v6067_v43 = vpop.f32.mrb[97].mxu0 }
 0xacc   :  { %v6068_v17 = vadd.f32 %v6067_v43, %v6066_v44  ;;  %v6069_v24 = vpop.f32.mrb[98].mxu0  ;;  %v11306_v44 = vmax.f32 %v11305_v12, 0.0 }
 0xacd   :  { %v6070_v48 = vpop.f32.mrb[99].mxu0 }
 0xace   :  { %v6071_v3 = vadd.f32 %v6070_v48, %v6069_v24  ;;  %v3108_v25 = vadd.f32 %v6068_v17, %v11294_v41  ;;  %v11307_v17 = vld [vmem:[#allocation54_spill] sm:$0xff] }
 0xacf   :  { %v11308_v24 = vmax.f32 %v11307_v17, 0.0 }
 0xad0   :  { %v3109_v42 = vadd.f32 %v6071_v3, %v11295_v58 }
 0xad2   :  { %v6072_v50 = vpop.f32.mrb[100].mxu0  ;;  %v3124_v13 = vpack.c.bf16 %v3109_v42, %v3108_v25 }
 0xad3   :  { %v6073_v35 = vpop.f32.mrb[101].mxu0 }
 0xad4   :  { %v6074_v14 = vadd.f32 %v6073_v35, %v6072_v50  ;;  %v6075_v37 = vpop.f32.mrb[102].mxu0  ;;  %6598 = vmatprep.mubr.bf16.mxu1 %v3124_v13  ;;  %v11309_v50 = vld [vmem:[#allocation21_spill] sm:$0xff] }
 0xad5   :  { %v6076_v49 = vpop.f32.mrb[103].mxu0  ;;  %v11310_v13 = vmax.f32 %v11309_v50, 0.0 }
 0xad6   :  { %v6077_v60 = vadd.f32 %v6076_v49, %v6075_v37  ;;  %v3110_v51 = vadd.f32 %v6074_v14, %v11296_v54  ;;  %v11311_v14 = vld [vmem:[#allocation74_spill] sm:$0xff] }
 0xad7   :  { %v11312_v37 = vmax.f32 %v11311_v14, 0.0 }
 0xad8   :  { %v3111_v38 = vadd.f32 %v6077_v60, %v11297_v31 }
 0xada   :  { %v3125_v8 = vpack.c.bf16 %v3111_v38, %v3110_v51  ;;  %v6078_v40 = vpop.f32.mrb[104].mxu0 }
 0xadb   :  { %v6079_v61 = vpop.f32.mrb[105].mxu0 }
 0xadc   :  { %v6080_v11 = vadd.f32 %v6079_v61, %v6078_v40  ;;  %v6081_v28 = vpop.f32.mrb[106].mxu0  ;;  %6599 = vmatmul.mubr.bf16.vlgmr.msra.gmra.mrb[96].mxu1 %v3125_v8 }
 0xadd   :  { %v6082_v23 = vpop.f32.mrb[107].mxu0  ;;  %6615 = vmatpush3.bf16.msra.mxu1 %v8998_v4 }
 0xade   :  { %v6083_v29 = vadd.f32 %v6082_v23, %v6081_v28  ;;  %6616 = vmatprep.subr.bf16.mxu1 %v9011_v16  ;;  %v3112_v46 = vadd.f32 %v6080_v11, %v11298_v45  ;;  %v11315_v11 = vld [vmem:[#allocation22_spill] sm:$0xff] }
 0xadf   :  { %v11316_v28 = vmax.f32 %v11315_v11, 0.0 }
 0xae0   :  { %v3113_v53 = vadd.f32 %v6083_v29, %v11300_v21 }
 0xae1   :  { %6617 = vmatpush3.bf16.msra.mxu1 %v9011_v16 }
 0xae2   :  { %v3126_v56 = vpack.c.bf16 %v3113_v53, %v3112_v46  ;;  %v6084_v2 = vpop.f32.mrb[108].mxu0  ;;  %6618 = vmatprep.subr.bf16.mxu1 %v9017_v34 }
 0xae3   :  { %v6085_v26 = vpop.f32.mrb[109].mxu0 }
 0xae4   :  { %v6086_v18 = vadd.f32 %v6085_v26, %v6084_v2  ;;  %v6087_v15 = vpop.f32.mrb[110].mxu0  ;;  %6602 = vmatprep.mubr.bf16.mxu1 %v3126_v56  ;;  %v11317_v56 = vld [vmem:[#allocation75_spill] sm:$0xff] }
 0xae5   :  { %v6088_v4 = vpop.f32.mrb[111].mxu0  ;;  %6619 = vmatpush3.bf16.msra.mxu1 %v9017_v34  ;;  %v11318_v2 = vmax.f32 %v11317_v56, 0.0 }
 0xae6   :  { %v6089_v19 = vadd.f32 %v6088_v4, %v6087_v15  ;;  %6620 = vmatprep.subr.bf16.mxu1 %v9027_v10  ;;  %v3114_v27 = vadd.f32 %v6086_v18, %v11302_v1  ;;  %v11319_v18 = vld [vmem:[#allocation77_spill] sm:$0xff] }
 0xae7   :  { %v11320_v15 = vmax.f32 %v11319_v18, 0.0 }
 0xae8   :  { %v3115_v16 = vadd.f32 %v6089_v19, %v11304_v6 }
 0xae9   :  { %6621 = vmatpush3.bf16.msra.mxu1 %v9027_v10 }
 0xaea   :  { %v3127_v20 = vpack.c.bf16 %v3115_v16, %v3114_v27  ;;  %v6090_v7 = vpop.f32.mrb[112].mxu0  ;;  %6622 = vmatprep.subr.bf16.mxu1 %v9033_v33 }
 0xaeb   :  { %v6091_v9 = vpop.f32.mrb[113].mxu0 }
 0xaec   :  { %v6092_v47 = vadd.f32 %v6091_v9, %v6090_v7  ;;  %v6093_v32 = vpop.f32.mrb[114].mxu0  ;;  %6603 = vmatmul.mubr.bf16.gmra.mrb[100].mxu1 %v3127_v20 }
 0xaed   :  { %v6094_v34 = vpop.f32.mrb[115].mxu0  ;;  %6623 = vmatpush3.bf16.msra.mxu1 %v9033_v33 }
 0xaee   :  { %v6095_v39 = vadd.f32 %v6094_v34, %v6093_v32  ;;  %6624 = vmatprep.subr.bf16.mxu1 %v9043_v52  ;;  %v3116_v43 = vadd.f32 %v6092_v47, %v11306_v44 }
 0xaf0   :  { %v3117_v10 = vadd.f32 %v6095_v39, %v11308_v24 }
 0xaf1   :  { %6625 = vmatpush3.bf16.msra.mxu1 %v9043_v52 }
 0xaf2   :  { %v3128_v48 = vpack.c.bf16 %v3117_v10, %v3116_v43  ;;  %v6096_v3 = vpop.f32.mrb[116].mxu0  ;;  %6626 = vmatprep.subr.bf16.mxu1 %v9066_v30 }
 0xaf3   :  { %v6097_v41 = vpop.f32.mrb[117].mxu0 }
 0xaf4   :  { %v6098_v25 = vadd.f32 %v6097_v41, %v6096_v3  ;;  %v6099_v58 = vpop.f32.mrb[118].mxu0  ;;  %6606 = vmatprep.mubr.bf16.mxu1 %v3128_v48 }
 0xaf5   :  { %v6100_v33 = vpop.f32.mrb[119].mxu0  ;;  %6627 = vmatpush3.bf16.msra.mxu1 %v9066_v30  ;;  %v11313_v30 = vld [vmem:[#allocation64_spill] sm:$0xff] }
 0xaf6   :  { %v6101_v42 = vadd.f32 %v6100_v33, %v6099_v58  ;;  %6628 = vmatprep.subr.bf16.mxu1 %v9072_v57  ;;  %v3118_v35 = vadd.f32 %v6098_v25, %v11310_v13  ;;  %v11314_v40 = vmax.f32 %v11313_v30, 0.0 }
 0xaf8   :  { %v3119_v52 = vadd.f32 %v6101_v42, %v11312_v37 }
 0xaf9   :  { %6629 = vmatpush3.bf16.msra.mxu1 %v9072_v57 }
 0xafa   :  { %v3129_v49 = vpack.c.bf16 %v3119_v52, %v3118_v35  ;;  %v6102_v60 = vpop.f32.mrb[120].mxu0 }
 0xafb   :  { %v6103_v54 = vpop.f32.mrb[121].mxu0 }
 0xafc   :  { %v6104_v51 = vadd.f32 %v6103_v54, %v6102_v60  ;;  %v6105_v31 = vpop.f32.mrb[122].mxu0  ;;  %6607 = vmatmul.mubr.bf16.gmra.mrb[104].mxu1 %v3129_v49 }
 0xafd   :  { %v6106_v38 = vpop.f32.mrb[123].mxu0 }
 0xafe   :  { %v6107_v8 = vadd.f32 %v6106_v38, %v6105_v31  ;;  %v3120_v61 = vadd.f32 %v6104_v51, %v11314_v40 }
 0xb00   :  { %v3121_v23 = vadd.f32 %v6107_v8, %v11316_v28 }
 0xb02   :  { %v3130_v29 = vpack.c.bf16 %v3121_v23, %v3120_v61  ;;  %v6108_v45 = vpop.f32.mrb[124].mxu0 }
 0xb03   :  { %v6109_v46 = vpop.f32.mrb[125].mxu0 }
 0xb04   :  { %v6110_v63 = vadd.f32 %v6109_v46, %v6108_v45  ;;  %v6111_v21 = vpop.f32.mrb[126].mxu0  ;;  %6610 = vmatprep.mubr.bf16.mxu1 %v3130_v29 }
 0xb05   :  { %v6112_v57 = vpop.f32.mrb[127].mxu0 }
 0xb06   :  { %v6113_v53 = vadd.f32 %v6112_v57, %v6111_v21  ;;  %v3122_v26 = vadd.f32 %v6110_v63, %v11318_v2 }
 0xb08   :  { %v3123_v4 = vadd.f32 %v6113_v53, %v11320_v15 }
 0xb0a   :  { %v3131_v19 = vpack.c.bf16 %v3123_v4, %v3122_v26  ;;  %v11321_v4 = vld [vmem:[#allocation73_spill] sm:$0xff] }
 0xb0c   :  { %6611 = vmatmul.mubr.bf16.gmra.mrb[108].mxu1 %v3131_v19 }
 0xbaf   :  { %v6600_v22 = vpop.f32.mrb[96].mxu1 }
 0xbb0   :  { %v3175_v1 = vadd.f32 %v6600_v22, %v9078_v59  ;;  %v3166_v27 = vpop.f32.mrb[97].mxu1 }
 0xbb1   :  { %v3167_v0 = vadd.f32 %v3166_v27, %v9078_v59  ;;  %v6601_v6 = vpop.f32.mrb[98].mxu1 }
 0xbb2   :  { %v3178_v16 = vadd.f32 %v6601_v6, %v9078_v59  ;;  %v3169_v20 = vpop.f32.mrb[99].mxu1  ;;  %v3231_v9 = vmax.f32 %v3175_v1, 0.0 }
 0xbb3   :  { %v3170_v7 = vadd.f32 %v3169_v20, %v9078_v59  ;;  %v3229_v32 = vmax.f32 %v3167_v0, 0.0 }
 0xbb4   :  { %v3232_v47 = vmax.f32 %v3178_v16, 0.0 }
 0xbb5   :  { %v3230_v34 = vmax.f32 %v3170_v7, 0.0  ;;  %v11322_v7 = vld [vmem:[#allocation42_spill] sm:$0xff] }
 0xbb6   :  { %v3246_v39 = vpack.c.bf16 %v3232_v47, %v3231_v9 }
 0xbb7   :  { %v3245_v12 = vpack.c.bf16 %v3230_v34, %v3229_v32  ;;  %v11323_v34 = vld [vmem:[#allocation47_spill] sm:$0xff] }
 0xbb9   :  { %6630 = vmatprep.mubr.bf16.mxu1 %v3245_v12  ;;  %v11324_v12 = vld [vmem:[#allocation46_spill] sm:$0xff] }
 0xbba   :  { %6631 = vmatmul.mubr.bf16.vlgmr.msra.gmra.mrb[112].mxu1 %v3246_v39 }
 0xbbf   :  { %v6604_v44 = vpop.f32.mrb[100].mxu1 }
 0xbc0   :  { %v3191_v43 = vadd.f32 %v6604_v44, %v9078_v59  ;;  %v3182_v17 = vpop.f32.mrb[101].mxu1 }
 0xbc1   :  { %v3183_v24 = vadd.f32 %v3182_v17, %v9078_v59  ;;  %v6605_v10 = vpop.f32.mrb[102].mxu1  ;;  %v9397_v17 = vld [vmem:[%s10811_s4 + $0x104] sm:$0xf] }
 0xbc2   :  { %v3194_v48 = vadd.f32 %v6605_v10, %v9078_v59  ;;  %v3185_v3 = vpop.f32.mrb[103].mxu1  ;;  %v3235_v25 = vmax.f32 %v3191_v43, 0.0  ;;  %v9392_v43 = vld [vmem:[%s10811_s4 + $0x100] sm:$0xf]  ;;  %v9407_v10 = vld [vmem:[%s10811_s4 + $0x10c] sm:$0xf] }
 0xbc3   :  { %v3186_v41 = vadd.f32 %v3185_v3, %v9078_v59  ;;  %v3233_v33 = vmax.f32 %v3183_v24, 0.0  ;;  %v9402_v24 = vld [vmem:[%s10811_s4 + $0x108] sm:$0xf]  ;;  %v9417_v3 = vld [vmem:[%s10811_s4 + $0x114] sm:$0xf] }
 0xbc4   :  { %v3236_v58 = vmax.f32 %v3194_v48, 0.0  ;;  %v9412_v48 = vld [vmem:[%s10811_s4 + $0x110] sm:$0xf] }
 0xbc5   :  { %v3234_v42 = vmax.f32 %v3186_v41, 0.0 }
 0xbc6   :  { %v3248_v50 = vpack.c.bf16 %v3236_v58, %v3235_v25  ;;  %v11325_v25 = vld [vmem:[#allocation48_spill] sm:$0xff] }
 0xbc7   :  { %v3247_v13 = vpack.c.bf16 %v3234_v42, %v3233_v33 }
 0xbc9   :  { %6634 = vmatprep.mubr.bf16.mxu1 %v3247_v13  ;;  %v9431_v13 = vld [vmem:[%s10811_s4 + $0x11c] sm:$0xf] }
 0xbca   :  { %6635 = vmatmul.mubr.bf16.gmra.mrb[116].mxu1 %v3248_v50  ;;  %v9426_v50 = vld [vmem:[%s10811_s4 + $0x118] sm:$0xf] }
 0xbcf   :  { %v6608_v35 = vpop.f32.mrb[104].mxu1 }
 0xbd0   :  { %v3207_v14 = vadd.f32 %v6608_v35, %v9078_v59  ;;  %v3198_v37 = vpop.f32.mrb[105].mxu1  ;;  %v9436_v35 = vld [vmem:[%s10811_s4 + $0x120] sm:$0xf] }
 0xbd1   :  { %v3199_v52 = vadd.f32 %v3198_v37, %v9078_v59  ;;  %v6609_v49 = vpop.f32.mrb[106].mxu1  ;;  %11326 = vst [vmem:[#allocation63_spill] sm:$0xff] %v9436_v35  ;;  %v9446_v37 = vld [vmem:[%s10811_s4 + $0x128] sm:$0xf] }
 0xbd2   :  { %v3210_v60 = vadd.f32 %v6609_v49, %v9078_v59  ;;  %v3201_v54 = vpop.f32.mrb[107].mxu1  ;;  %v3239_v31 = vmax.f32 %v3207_v14, 0.0  ;;  %v9441_v14 = vld [vmem:[%s10811_s4 + $0x124] sm:$0xf]  ;;  %11328 = vst [vmem:[#allocation80_spill] sm:$0xff] %v9446_v37 }
 0xbd3   :  { %v3202_v51 = vadd.f32 %v3201_v54, %v9078_v59  ;;  %v3237_v8 = vmax.f32 %v3199_v52, 0.0  ;;  %11327 = vst [vmem:[#allocation81_spill] sm:$0xff] %v9441_v14  ;;  %v9451_v52 = vld [vmem:[%s10811_s4 + $0x12c] sm:$0xf] }
 0xbd4   :  { %v3240_v38 = vmax.f32 %v3210_v60, 0.0  ;;  %11329 = vst [vmem:[#allocation83_spill] sm:$0xff] %v9451_v52 }
 0xbd5   :  { %v3238_v30 = vmax.f32 %v3202_v51, 0.0  ;;  %v9457_v51 = vld [vmem:[%s10811_s4 + $0x130] sm:$0xf] }
 0xbd6   :  { %v3250_v40 = vpack.c.bf16 %v3240_v38, %v3239_v31  ;;  %11330 = vst [vmem:[#allocation82_spill] sm:$0xff] %v9457_v51  ;;  %v9462_v31 = vld [vmem:[%s10811_s4 + $0x134] sm:$0xf]  ;;  %v9467_v38 = vld [vmem:[%s10811_s4 + $0x138] sm:$0xf] }
 0xbd7   :  { %v3249_v61 = vpack.c.bf16 %v3238_v30, %v3237_v8  ;;  %11331 = vst [vmem:[#allocation85_spill] sm:$0xff] %v9462_v31  ;;  %11332 = vst [vmem:[#allocation84_spill] sm:$0xff] %v9467_v38  ;;  %v9472_v8 = vld [vmem:[%s10811_s4 + $0x13c] sm:$0xf]  ;;  %v9477_v30 = vld [vmem:[%s10811_s4 + $0x140] sm:$0xf] }
 0xbd8   :  { %11333 = vst [vmem:[#allocation88_spill] sm:$0xff] %v9472_v8  ;;  %11334 = vst [vmem:[#allocation87_spill] sm:$0xff] %v9477_v30 }
 0xbd9   :  { %6638 = vmatprep.mubr.bf16.mxu1 %v3249_v61 }
 0xbda   :  { %6639 = vmatmul.mubr.bf16.gmra.mrb[120].mxu1 %v3250_v40  ;;  %v9482_v40 = vld [vmem:[%s10811_s4 + $0x144] sm:$0xf] }
 0xbdb   :  { %11335 = vst [vmem:[#allocation90_spill] sm:$0xff] %v9482_v40 }
 0xbdf   :  { %v6612_v11 = vpop.f32.mrb[108].mxu1 }
 0xbe0   :  { %v3223_v28 = vadd.f32 %v6612_v11, %v9078_v59  ;;  %v3214_v23 = vpop.f32.mrb[109].mxu1 }
 0xbe1   :  { %v3215_v29 = vadd.f32 %v3214_v23, %v9078_v59  ;;  %v6613_v45 = vpop.f32.mrb[110].mxu1  ;;  %v9488_v23 = vld [vmem:[%s10811_s4 + $0x148] sm:$0xf] }
 0xbe2   :  { %v3226_v46 = vadd.f32 %v6613_v45, %v9078_v59  ;;  %v3217_v63 = vpop.f32.mrb[111].mxu1  ;;  %v3243_v57 = vmax.f32 %v3223_v28, 0.0  ;;  %11336 = vst [vmem:[#allocation89_spill] sm:$0xff] %v9488_v23  ;;  %v9498_v45 = vld [vmem:[%s10811_s4 + $0x150] sm:$0xf] }
 0xbe3   :  { %v3218_v21 = vadd.f32 %v3217_v63, %v9078_v59  ;;  %v3241_v56 = vmax.f32 %v3215_v29, 0.0  ;;  %v9493_v29 = vld [vmem:[%s10811_s4 + $0x14c] sm:$0xf]  ;;  %11338 = vst [vmem:[#allocation91_spill] sm:$0xff] %v9498_v45  ;;  %v9508_v63 = vld [vmem:[%s10811_s4 + $0x158] sm:$0xf] }
 0xbe4   :  { %v3244_v53 = vmax.f32 %v3226_v46, 0.0  ;;  %11337 = vst [vmem:[#allocation92_spill] sm:$0xff] %v9493_v29  ;;  %v9503_v46 = vld [vmem:[%s10811_s4 + $0x154] sm:$0xf]  ;;  %11340 = vst [vmem:[#allocation20_spill] sm:$0xff] %v9508_v63 }
 0xbe5   :  { %v3242_v2 = vmax.f32 %v3218_v21, 0.0  ;;  %11339 = vst [vmem:[#allocation24_spill] sm:$0xff] %v9503_v46  ;;  %v9513_v21 = vld [vmem:[%s10811_s4 + $0x15c] sm:$0xf] }
 0xbe6   :  { %v3252_v26 = vpack.c.bf16 %v3244_v53, %v3243_v57  ;;  %11341 = vst [vmem:[#allocation45_spill] sm:$0xff] %v9513_v21 }
 0xbe7   :  { %v3251_v18 = vpack.c.bf16 %v3242_v2, %v3241_v56  ;;  %v9518_v56 = vld [vmem:[%s10811_s4 + $0x160] sm:$0xf]  ;;  %v9523_v2 = vld [vmem:[%s10811_s4 + $0x164] sm:$0xf] }
 0xbe8   :  { %11342 = vst [vmem:[#allocation18_spill] sm:$0xff] %v9518_v56  ;;  %11343 = vst [vmem:[#allocation54_spill] sm:$0xff] %v9523_v2 }
 0xbe9   :  { %6642 = vmatprep.mubr.bf16.mxu1 %v3251_v18 }
 0xbea   :  { %6643 = vmatmul.mubr.bf16.gmra.mrb[124].mxu1 %v3252_v26  ;;  %v9528_v26 = vld [vmem:[%s10812_s5 + $0x10] sm:$0xff] }
 0xbeb   :  { %11344 = vst [vmem:[#allocation21_spill] sm:$0xff] %v9528_v26 }
 0xc8d   :  { %v6632_v15 = vpop.f32.mrb[112].mxu1 }
 0xc8e   :  { %v3296_v19 = vadd.f32 %v6632_v15, %v11321_v4  ;;  %v3287_v22 = vpop.f32.mrb[113].mxu1 }
 0xc8f   :  { %v3288_v1 = vadd.f32 %v3287_v22, %v11321_v4  ;;  %v6633_v27 = vpop.f32.mrb[114].mxu1  ;;  %v9539_v22 = vld [vmem:[%s10811_s4 + $0x16c] sm:$0xf] }
 0xc90   :  { %v3299_v0 = vadd.f32 %v6633_v27, %v11321_v4  ;;  %v3290_v6 = vpop.f32.mrb[115].mxu1  ;;  %v9374_v16 = vmax.f32 %v3296_v19, 0.0  ;;  %v9534_v19 = vld [vmem:[%s10811_s4 + $0x168] sm:$0xf]  ;;  %11346 = vst [vmem:[#allocation64_spill] sm:$0xff] %v9539_v22 }
 0xc91   :  { %v9376_v59 = vmax.f32 %v3288_v1, 0.0  ;;  %v3291_v20 = vadd.f32 %v3290_v6, %v11321_v4  ;;  %11345 = vst [vmem:[#allocation74_spill] sm:$0xff] %v9534_v19  ;;  %v9550_v6 = vld [vmem:[%s10811_s4 + $0x174] sm:$0xf] }
 0xc92   :  { %v9381_v47 = vmax.f32 %v3299_v0, 0.0  ;;  %v3384_v39 = vmul.f32 %v11323_v34, %v9374_v16  ;;  %v9545_v0 = vld [vmem:[%s10811_s4 + $0x170] sm:$0xf]  ;;  %11348 = vst [vmem:[#allocation75_spill] sm:$0xff] %v9550_v6 }
 0xc93   :  { %v3382_v9 = vmul.f32 %v11322_v7, %v9376_v59  ;;  %v9383_v32 = vmax.f32 %v3291_v20, 0.0  ;;  %11347 = vst [vmem:[#allocation22_spill] sm:$0xff] %v9545_v0 }
 0xc94   :  { %v3385_v58 = vmul.f32 %v11325_v25, %v9381_v47  ;;  %v3422_v49 = vmul.f32 %v3384_v39, %v9374_v16  ;;  %v11354_v25 = vld [vmem:[#allocation57_spill] sm:$0xff] }
 0xc95   :  { %v3383_v44 = vmul.f32 %v11324_v12, %v9383_v32  ;;  %v3420_v41 = vmul.f32 %v3382_v9, %v9376_v59 }
 0xc96   :  { %v3423_v61 = vmul.f32 %v3385_v58, %v9381_v47 }
 0xc97   :  { %v3398_v33 = vadd.f32 %v3383_v44, %v3382_v9  ;;  %v3421_v42 = vmul.f32 %v3383_v44, %v9383_v32  ;;  %v9561_v44 = vld [vmem:[%s10811_s4 + $0x17c] sm:$0xf] }
 0xc98   :  { %11350 = vst [vmem:[#allocation73_spill] sm:$0xff] %v9561_v44 }
 0xc99   :  { %v3399_v60 = vadd.f32 %v3398_v33, %v3384_v39  ;;  %v3436_v54 = vadd.f32 %v3421_v42, %v3420_v41  ;;  %v9556_v39 = vld [vmem:[%s10811_s4 + $0x178] sm:$0xf] }
 0xc9a   :  { %11349 = vst [vmem:[#allocation77_spill] sm:$0xff] %v9556_v39  ;;  %v11351_v42 = vld [vmem:[#allocation49_spill] sm:$0xff] }
 0xc9b   :  { %v3437_v11 = vadd.f32 %v3436_v54, %v3422_v49  ;;  %v3400_v28 = vadd.f32 %v3399_v60, %v3385_v58 }
 0xc9d   :  { %v6636_v57 = vpop.f32.mrb[116].mxu1  ;;  %v3438_v53 = vadd.f32 %v3437_v11, %v3423_v61  ;;  %v11352_v61 = vld [vmem:[#allocation56_spill] sm:$0xff] }
 0xc9e   :  { %v3312_v18 = vadd.f32 %v6636_v57, %v11321_v4  ;;  %v3303_v15 = vpop.f32.mrb[117].mxu1 }
 0xc9f   :  { %v3304_v1 = vadd.f32 %v3303_v15, %v11321_v4  ;;  %v6637_v27 = vpop.f32.mrb[118].mxu1 }
 0xca0   :  { %v3315_v20 = vadd.f32 %v6637_v27, %v11321_v4  ;;  %v3306_v9 = vpop.f32.mrb[119].mxu1  ;;  %v9563_v41 = vmax.f32 %v3312_v18, 0.0  ;;  %v11353_v18 = vld [vmem:[#allocation55_spill] sm:$0xff] }
 0xca1   :  { %v9565_v58 = vmax.f32 %v3304_v1, 0.0  ;;  %v3307_v33 = vadd.f32 %v3306_v9, %v11321_v4 }
 0xca2   :  { %v9570_v60 = vmax.f32 %v3315_v20, 0.0  ;;  %v3388_v11 = vmul.f32 %v11352_v61, %v9563_v41 }
 0xca3   :  { %v3386_v49 = vmul.f32 %v11351_v42, %v9565_v58  ;;  %v9572_v54 = vmax.f32 %v3307_v33, 0.0 }
 0xca4   :  { %v3389_v9 = vmul.f32 %v11354_v25, %v9570_v60  ;;  %v3426_v20 = vmul.f32 %v3388_v11, %v9563_v41 }
 0xca5   :  { %v3401_v57 = vadd.f32 %v3400_v28, %v3386_v49  ;;  %v3424_v15 = vmul.f32 %v3386_v49, %v9565_v58  ;;  %v3387_v27 = vmul.f32 %v11353_v18, %v9572_v54 }
 0xca6   :  { %v3427_v7 = vmul.f32 %v3389_v9, %v9570_v60 }
 0xca7   :  { %v3439_v1 = vadd.f32 %v3438_v53, %v3424_v15  ;;  %v3402_v12 = vadd.f32 %v3401_v57, %v3387_v27  ;;  %v3425_v42 = vmul.f32 %v3387_v27, %v9572_v54 }
 0xca9   :  { %v3403_v33 = vadd.f32 %v3402_v12, %v3388_v11  ;;  %v3440_v34 = vadd.f32 %v3439_v1, %v3425_v42 }
 0xcab   :  { %v3441_v61 = vadd.f32 %v3440_v34, %v3426_v20  ;;  %v3404_v28 = vadd.f32 %v3403_v33, %v3389_v9  ;;  %v11355_v34 = vld [vmem:[#allocation58_spill] sm:$0xff]  ;;  %v11358_v33 = vld [vmem:[#allocation67_spill] sm:$0xff] }
 0xcad   :  { %v6640_v26 = vpop.f32.mrb[120].mxu1  ;;  %v3442_v49 = vadd.f32 %v3441_v61, %v3427_v7 }
 0xcae   :  { %v3328_v39 = vadd.f32 %v6640_v26, %v11321_v4  ;;  %v3319_v18 = vpop.f32.mrb[121].mxu1  ;;  %v11356_v26 = vld [vmem:[#allocation66_spill] sm:$0xff] }
 0xcaf   :  { %v3320_v53 = vadd.f32 %v3319_v18, %v11321_v4  ;;  %v6641_v15 = vpop.f32.mrb[122].mxu1 }
 0xcb0   :  { %v3331_v57 = vadd.f32 %v6641_v15, %v11321_v4  ;;  %v3322_v25 = vpop.f32.mrb[123].mxu1  ;;  %v9587_v27 = vmax.f32 %v3328_v39, 0.0  ;;  %v11357_v39 = vld [vmem:[#allocation65_spill] sm:$0xff] }
 0xcb1   :  { %v9589_v44 = vmax.f32 %v3320_v53, 0.0  ;;  %v3323_v12 = vadd.f32 %v3322_v25, %v11321_v4 }
 0xcb2   :  { %v9594_v11 = vmax.f32 %v3331_v57, 0.0  ;;  %v3392_v61 = vmul.f32 %v11356_v26, %v9587_v27 }
 0xcb3   :  { %v3390_v42 = vmul.f32 %v11355_v34, %v9589_v44  ;;  %v9596_v7 = vmax.f32 %v3323_v12, 0.0 }
 0xcb4   :  { %v3393_v25 = vmul.f32 %v11358_v33, %v9594_v11  ;;  %v3430_v57 = vmul.f32 %v3392_v61, %v9587_v27 }
 0xcb5   :  { %v3405_v18 = vadd.f32 %v3404_v28, %v3390_v42  ;;  %v3428_v1 = vmul.f32 %v3390_v42, %v9589_v44  ;;  %v3391_v9 = vmul.f32 %v11357_v39, %v9596_v7 }
 0xcb6   :  { %v3431_v0 = vmul.f32 %v3393_v25, %v9594_v11 }
 0xcb7   :  { %v3443_v20 = vadd.f32 %v3442_v49, %v3428_v1  ;;  %v3406_v53 = vadd.f32 %v3405_v18, %v3391_v9  ;;  %v3429_v15 = vmul.f32 %v3391_v9, %v9596_v7 }
 0xcb9   :  { %v3407_v12 = vadd.f32 %v3406_v53, %v3392_v61  ;;  %v3444_v34 = vadd.f32 %v3443_v20, %v3429_v15 }
 0xcbb   :  { %v3445_v26 = vadd.f32 %v3444_v34, %v3430_v57  ;;  %v3408_v28 = vadd.f32 %v3407_v12, %v3393_v25  ;;  %v11359_v34 = vld [vmem:[#allocation68_spill] sm:$0xff]  ;;  %v11362_v12 = vld [vmem:[#allocation71_spill] sm:$0xff] }
 0xcbd   :  { %v6644_v6 = vpop.f32.mrb[124].mxu1  ;;  %v3446_v42 = vadd.f32 %v3445_v26, %v3431_v0 }
 0xcbe   :  { %v3344_v19 = vadd.f32 %v6644_v6, %v11321_v4  ;;  %v3335_v39 = vpop.f32.mrb[125].mxu1  ;;  %v11360_v6 = vld [vmem:[#allocation70_spill] sm:$0xff] }
 0xcbf   :  { %v3336_v49 = vadd.f32 %v3335_v39, %v11321_v4  ;;  %v6645_v1 = vpop.f32.mrb[126].mxu1 }
 0xcc0   :  { %v3347_v18 = vadd.f32 %v6645_v1, %v11321_v4  ;;  %v3338_v33 = vpop.f32.mrb[127].mxu1  ;;  %v9611_v9 = vmax.f32 %v3344_v19, 0.0  ;;  %v11361_v19 = vld [vmem:[#allocation69_spill] sm:$0xff] }
 0xcc1   :  { %v9613_v22 = vmax.f32 %v3336_v49, 0.0  ;;  %v3339_v61 = vadd.f32 %v3338_v33, %v11321_v4 }
 0xcc2   :  { %v9618_v25 = vmax.f32 %v3347_v18, 0.0  ;;  %v3396_v26 = vmul.f32 %v11360_v6, %v9611_v9 }
 0xcc3   :  { %v3394_v20 = vmul.f32 %v11359_v34, %v9613_v22  ;;  %v9620_v0 = vmax.f32 %v3339_v61, 0.0 }
 0xcc4   :  { %v3397_v4 = vmul.f32 %v11362_v12, %v9618_v25  ;;  %v3434_v1 = vmul.f32 %v3396_v26, %v9611_v9 }
 0xcc5   :  { %v3409_v39 = vadd.f32 %v3408_v28, %v3394_v20  ;;  %v3432_v53 = vmul.f32 %v3394_v20, %v9613_v22  ;;  %v3395_v15 = vmul.f32 %v11361_v19, %v9620_v0 }
 0xcc6   :  { %v3435_v34 = vmul.f32 %v3397_v4, %v9618_v25 }
 0xcc7   :  { %v3447_v57 = vadd.f32 %v3446_v42, %v3432_v53  ;;  %v3410_v33 = vadd.f32 %v3409_v39, %v3395_v15  ;;  %v3433_v49 = vmul.f32 %v3395_v15, %v9620_v0 }
 0xcc9   :  { %v3411_v18 = vadd.f32 %v3410_v33, %v3396_v26  ;;  %v3448_v61 = vadd.f32 %v3447_v57, %v3433_v49  ;;  %v11363_v33 = vld [vmem:[#allocation93_spill] sm:$0xff]  ;;  %v11366_v49 = vld [vmem:[#allocation94_spill] sm:$0xff] }
 0xccb   :  { %v3412_v6 = vadd.f32 %v3411_v18, %v3397_v4  ;;  %v3449_v28 = vadd.f32 %v3448_v61, %v3434_v1 }
 0xccd   :  { %v3413_v56 = vrot.slane %v3412_v6, 4  ;;  %v3450_v20 = vadd.f32 %v3449_v28, %v3435_v34 }
 0xccf   :  { %v3414_v2 = vadd.f32 %v3413_v56, %v3412_v6  ;;  %v3451_v63 = vrot.slane %v3450_v20, 4 }
 0xcd1   :  { %v3415_v19 = vrot.slane %v3414_v2, 2  ;;  %v3452_v42 = vadd.f32 %v3451_v63, %v3450_v20  ;;  %v11371_v20 = vld [vmem:[#allocation51_spill] sm:$0xff] }
 0xcd3   :  { %v3416_v53 = vadd.f32 %v3415_v19, %v3414_v2  ;;  %v3453_v21 = vrot.slane %v3452_v42, 2 }
 0xcd5   :  { %v3417_v12 = vrot.slane %v3416_v53, 1  ;;  %v3454_v39 = vadd.f32 %v3453_v21, %v3452_v42 }
 0xcd7   :  { %v3418_v45 = vadd.f32 %v3417_v12, %v3416_v53  ;;  %v3455_v15 = vrot.slane %v3454_v39, 1  ;;  %v11365_v12 = vld [vmem:[#allocation86_spill] sm:$0xff]  ;;  %v11372_v53 = vld [vmem:[#allocation53_spill] sm:$0xff] }
 0xcd9   :  { %v3419_v46 = vadd.f32 %v3418_v45, %v9196_v62  ;;  %v3456_v26 = vadd.f32 %v3455_v15, %v3454_v39  ;;  %v11373_v15 = vld [vmem:[#allocation43_spill] sm:$0xff] }
 0xcdb   :  { %v3457_v57 = vadd.f32 %v3456_v26, %v9198_v55  ;;  %v9635_v4 = vmul.f32 %v3419_v46, %v11363_v33 }
 0xcdd   :  { %v3459_v34 = vmul.f32 %v3457_v57, %v11363_v33  ;;  %v3460_v56 = vmul.f32 %v9635_v4, %v9635_v4  ;;  %v3510_v2 = vsub.f32 %v9376_v59, %v9635_v4  ;;  %v3511_v21 = vsub.f32 %v9383_v32, %v9635_v4  ;;  %v11374_v57 = vld [vmem:[#allocation50_spill] sm:$0xff] }
 0xcde   :  { %v3512_v62 = vsub.f32 %v9374_v16, %v9635_v4  ;;  %v3513_v55 = vsub.f32 %v9381_v47, %v9635_v4  ;;  %v3514_v45 = vsub.f32 %v9565_v58, %v9635_v4  ;;  %v3515_v46 = vsub.f32 %v9572_v54, %v9635_v4 }
 0xcdf   :  { %v3461_v63 = vsub.f32 %v3459_v34, %v3460_v56  ;;  %v3516_v6 = vsub.f32 %v9563_v41, %v9635_v4  ;;  %v3517_v59 = vsub.f32 %v9570_v60, %v9635_v4  ;;  %v3518_v32 = vsub.f32 %v9589_v44, %v9635_v4  ;;  %v11375_v56 = vld [vmem:[#allocation60_spill] sm:$0xff] }
 0xce0   :  { %v3519_v16 = vsub.f32 %v9596_v7, %v9635_v4  ;;  %v3520_v47 = vsub.f32 %v9587_v27, %v9635_v4  ;;  %v3521_v58 = vsub.f32 %v9594_v11, %v9635_v4  ;;  %v3522_v54 = vsub.f32 %v9613_v22, %v9635_v4  ;;  %v11364_v7 = vld [vmem:[#allocation19_spill] sm:$0xff] }
 0xce1   :  { %v3523_v41 = vsub.f32 %v9620_v0, %v9635_v4  ;;  %v3524_v60 = vsub.f32 %v9611_v9, %v9635_v4  ;;  %v3525_v44 = vsub.f32 %v9618_v25, %v9635_v4  ;;  %v3526_v19 = vadd.f32 1e-05, %v3461_v63  ;;  %v11367_v22 = vld [vmem:[#allocation79_spill] sm:$0xff]  ;;  %v11368_v0 = vld [vmem:[#allocation44_spill] sm:$0xff]  ;;  %v11370_v25 = vld [vmem:[#allocation78_spill] sm:$0xff] }
 0xce2   :  { %v9674_v27 = vrot.slane %v11365_v12, %v11364_v7  ;;  %v9678_v11 = vrot.slane %v11365_v12, %v11366_v49  ;;  %v3494_v1 = vsub.f32 %v11367_v22, %v9635_v4  ;;  %v3495_v18 = vsub.f32 %v11368_v0, %v9635_v4  ;;  %v11369_v9 = vld [vmem:[#allocation76_spill] sm:$0xff] }
 0xce3   :  { %6874 = vrsqrt.f32 %v3526_v19  ;;  %v3496_v61 = vsub.f32 %v11369_v9, %v9635_v4  ;;  %v3497_v28 = vsub.f32 %v11370_v25, %v9635_v4  ;;  %v3498_v42 = vsub.f32 %v11371_v20, %v9635_v4  ;;  %v11376_v19 = vld [vmem:[#allocation62_spill] sm:$0xff]  ;;  %v11377_v22 = vld [vmem:[#allocation52_spill] sm:$0xff]  ;;  %v11378_v9 = vld [vmem:[#allocation59_spill] sm:$0xff] }
 0xce4   :  { %v3499_v39 = vsub.f32 %v11372_v53, %v9635_v4  ;;  %v3500_v26 = vsub.f32 %v11373_v15, %v9635_v4  ;;  %v3501_v34 = vsub.f32 %v11374_v57, %v9635_v4  ;;  %v3502_v63 = vsub.f32 %v11375_v56, %v9635_v4  ;;  %v11379_v53 = vld [vmem:[#allocation72_spill] sm:$0xff]  ;;  %v11380_v57 = vld [vmem:[#allocation61_spill] sm:$0xff] }
 0xce5   :  { %v3503_v12 = vsub.f32 %v11376_v19, %v9635_v4  ;;  %v3504_v0 = vsub.f32 %v11377_v22, %v9635_v4  ;;  %v3505_v25 = vsub.f32 %v11378_v9, %v9635_v4  ;;  %v3506_v49 = vsub.f32 %v11379_v53, %v9635_v4 }
 0xce6   :  { %v3507_v15 = vsub.f32 %v9184_v36, %v9635_v4  ;;  %v3508_v7 = vsub.f32 %v11380_v57, %v9635_v4  ;;  %v3509_v56 = vsub.f32 %v9182_v5, %v9635_v4 }
 0xced   :  { %v6875_v20 = vpop.eup %6874 }
 0xcee   :  { %v3528_v19 = vmul.f32 %v6875_v20, %v3494_v1  ;;  %v3529_v33 = vmul.f32 %v6875_v20, %v3495_v18  ;;  %v3530_v23 = vmul.f32 %v6875_v20, %v3496_v61  ;;  %v3531_v22 = vmul.f32 %v6875_v20, %v3497_v28 }
 0xcef   :  { %v3532_v29 = vmul.f32 %v6875_v20, %v3498_v42  ;;  %v3533_v30 = vmul.f32 %v6875_v20, %v3499_v39  ;;  %v3534_v9 = vmul.f32 %v6875_v20, %v3500_v26  ;;  %v3535_v40 = vmul.f32 %v6875_v20, %v3501_v34 }
 0xcf0   :  { %v3536_v38 = vmul.f32 %v6875_v20, %v3502_v63  ;;  %v3537_v8 = vmul.f32 %v6875_v20, %v3503_v12  ;;  %v3538_v53 = vmul.f32 %v6875_v20, %v3504_v0  ;;  %v3539_v51 = vmul.f32 %v6875_v20, %v3505_v25 }
 0xcf1   :  { %v3540_v31 = vmul.f32 %v6875_v20, %v3506_v49  ;;  %v3541_v36 = vmul.f32 %v6875_v20, %v3507_v15  ;;  %v3542_v37 = vmul.f32 %v6875_v20, %v3508_v7  ;;  %v3543_v52 = vmul.f32 %v6875_v20, %v3509_v56 }
 0xcf2   :  { %v3544_v57 = vmul.f32 %v6875_v20, %v3510_v2  ;;  %v3545_v35 = vmul.f32 %v6875_v20, %v3511_v21  ;;  %v3546_v14 = vmul.f32 %v6875_v20, %v3512_v62  ;;  %v3547_v5 = vmul.f32 %v6875_v20, %v3513_v55 }
 0xcf3   :  { %v3548_v4 = vmul.f32 %v6875_v20, %v3514_v45  ;;  %v3549_v1 = vmul.f32 %v6875_v20, %v3515_v46  ;;  %v3550_v18 = vmul.f32 %v6875_v20, %v3516_v6  ;;  %v3551_v61 = vmul.f32 %v6875_v20, %v3517_v59 }
 0xcf4   :  { %v3552_v28 = vmul.f32 %v6875_v20, %v3518_v32  ;;  %v3553_v42 = vmul.f32 %v6875_v20, %v3519_v16  ;;  %v3554_v39 = vmul.f32 %v6875_v20, %v3520_v47  ;;  %v3555_v26 = vmul.f32 %v6875_v20, %v3521_v58 }
 0xcf5   :  { %v3556_v34 = vmul.f32 %v6875_v20, %v3522_v54  ;;  %v3557_v63 = vmul.f32 %v6875_v20, %v3523_v41  ;;  %v3558_v12 = vmul.f32 %v6875_v20, %v3524_v60  ;;  %v3559_v0 = vmul.f32 %v6875_v20, %v3525_v44 }
 0xcf6   :  { %v3564_v49 = vmul.f32 %v9674_v27, %v3528_v19  ;;  %v3565_v7 = vmul.f32 %v9674_v27, %v3529_v33  ;;  %v3566_v2 = vmul.f32 %v9674_v27, %v3530_v23  ;;  %v3567_v21 = vmul.f32 %v9674_v27, %v3531_v22 }
 0xcf7   :  { %v3568_v62 = vmul.f32 %v9674_v27, %v3532_v29  ;;  %v3569_v55 = vmul.f32 %v9674_v27, %v3533_v30  ;;  %v3570_v45 = vmul.f32 %v9674_v27, %v3534_v9  ;;  %v3571_v46 = vmul.f32 %v9674_v27, %v3535_v40 }
 0xcf8   :  { %v3572_v6 = vmul.f32 %v9674_v27, %v3536_v38  ;;  %v3573_v59 = vmul.f32 %v9674_v27, %v3537_v8  ;;  %v3574_v32 = vmul.f32 %v9674_v27, %v3538_v53  ;;  %v3575_v33 = vmul.f32 %v9674_v27, %v3539_v51 }
 0xcf9   :  { %v3576_v23 = vmul.f32 %v9674_v27, %v3540_v31  ;;  %v3577_v16 = vmul.f32 %v9674_v27, %v3541_v36  ;;  %v3578_v29 = vmul.f32 %v9674_v27, %v3542_v37  ;;  %v3579_v30 = vmul.f32 %v9674_v27, %v3543_v52 }
 0xcfa   :  { %v3580_v47 = vmul.f32 %v9674_v27, %v3544_v57  ;;  %v3581_v40 = vmul.f32 %v9674_v27, %v3545_v35  ;;  %v3582_v38 = vmul.f32 %v9674_v27, %v3546_v14  ;;  %v3583_v8 = vmul.f32 %v9674_v27, %v3547_v5 }
 0xcfb   :  { %v3584_v58 = vmul.f32 %v9674_v27, %v3548_v4  ;;  %v3585_v51 = vmul.f32 %v9674_v27, %v3549_v1  ;;  %v3586_v31 = vmul.f32 %v9674_v27, %v3550_v18  ;;  %v3587_v54 = vmul.f32 %v9674_v27, %v3551_v61 }
 0xcfc   :  { %v3588_v37 = vmul.f32 %v9674_v27, %v3552_v28  ;;  %v3589_v52 = vmul.f32 %v9674_v27, %v3553_v42  ;;  %v3590_v41 = vmul.f32 %v9674_v27, %v3554_v39  ;;  %v3591_v35 = vmul.f32 %v9674_v27, %v3555_v26 }
 0xcfd   :  { %v3592_v14 = vmul.f32 %v9674_v27, %v3556_v34  ;;  %v3593_v60 = vmul.f32 %v9674_v27, %v3557_v63  ;;  %v3594_v44 = vmul.f32 %v9674_v27, %v3558_v12  ;;  %v3595_v25 = vmul.f32 %v9674_v27, %v3559_v0 }
 0xcfe   :  { %v9745_v20 = vadd.f32 %v9678_v11, %v3564_v49  ;;  %v9748_v15 = vadd.f32 %v9678_v11, %v3565_v7  ;;  %v9751_v56 = vadd.f32 %v9678_v11, %v3566_v2  ;;  %v9754_v19 = vadd.f32 %v9678_v11, %v3567_v21 }
 0xcff   :  { %v9757_v22 = vadd.f32 %v9678_v11, %v3568_v62  ;;  %v9760_v9 = vadd.f32 %v9678_v11, %v3569_v55  ;;  %v9763_v27 = vadd.f32 %v9678_v11, %v3570_v45  ;;  %v9766_v53 = vadd.f32 %v9678_v11, %v3571_v46 }
 0xd00   :  { %v9769_v36 = vadd.f32 %v9678_v11, %v3572_v6  ;;  %v9772_v57 = vadd.f32 %v9678_v11, %v3573_v59  ;;  %v9775_v5 = vadd.f32 %v9678_v11, %v3574_v32  ;;  %v9778_v4 = vadd.f32 %v9678_v11, %v3575_v33 }
 0xd01   :  { %v9781_v1 = vadd.f32 %v9678_v11, %v3576_v23  ;;  %v9784_v18 = vadd.f32 %v9678_v11, %v3577_v16  ;;  %v9787_v61 = vadd.f32 %v9678_v11, %v3578_v29  ;;  %v9790_v28 = vadd.f32 %v9678_v11, %v3579_v30 }
 0xd02   :  { %v9793_v42 = vadd.f32 %v9678_v11, %v3580_v47  ;;  %v9796_v39 = vadd.f32 %v9678_v11, %v3581_v40  ;;  %v9799_v26 = vadd.f32 %v9678_v11, %v3582_v38  ;;  %v9802_v34 = vadd.f32 %v9678_v11, %v3583_v8 }
 0xd03   :  { %v9805_v63 = vadd.f32 %v9678_v11, %v3584_v58  ;;  %v9808_v12 = vadd.f32 %v9678_v11, %v3585_v51  ;;  %v9811_v0 = vadd.f32 %v9678_v11, %v3586_v31  ;;  %v9814_v49 = vadd.f32 %v9678_v11, %v3587_v54 }
 0xd04   :  { %v9817_v7 = vadd.f32 %v9678_v11, %v3588_v37  ;;  %v9820_v2 = vadd.f32 %v9678_v11, %v3589_v52  ;;  %v9823_v21 = vadd.f32 %v9678_v11, %v3590_v41  ;;  %v9826_v62 = vadd.f32 %v9678_v11, %v3591_v35 }
 0xd05   :  { %11381 = vst [vmem:[#allocation86_spill] sm:$0xff] %v9808_v12  ;;  %11382 = vst [vmem:[#allocation79_spill] sm:$0xff] %v9811_v0  ;;  %v9829_v55 = vadd.f32 %v9678_v11, %v3592_v14  ;;  %v9832_v45 = vadd.f32 %v9678_v11, %v3593_v60  ;;  %v9835_v46 = vadd.f32 %v9678_v11, %v3594_v44  ;;  %v10957_v59 = vmax.f32 %v9745_v20, 0.0 }
 0xd06   :  { %11383 = vst [vmem:[#allocation44_spill] sm:$0xff] %v9814_v49  ;;  %11384 = vst [vmem:[#allocation76_spill] sm:$0xff] %v9817_v7  ;;  %v9838_v6 = vadd.f32 %v9678_v11, %v3595_v25  ;;  %v10946_v32 = vmax.f32 %v9748_v15, 0.0  ;;  %v10954_v33 = vmax.f32 %v9751_v56, 0.0  ;;  %v10947_v23 = vmax.f32 %v9754_v19, 0.0 }
 0xd07   :  { %11385 = vst [vmem:[#allocation78_spill] sm:$0xff] %v9820_v2  ;;  %11386 = vst [vmem:[#allocation51_spill] sm:$0xff] %v9823_v21  ;;  %v10951_v16 = vmax.f32 %v9757_v22, 0.0  ;;  %v10948_v29 = vmax.f32 %v9760_v9, 0.0  ;;  %v10950_v30 = vmax.f32 %v9763_v27, 0.0  ;;  %v10949_v47 = vmax.f32 %v9766_v53, 0.0 }
 0xd08   :  { %11387 = vst [vmem:[#allocation53_spill] sm:$0xff] %v9826_v62  ;;  %11388 = vst [vmem:[#allocation43_spill] sm:$0xff] %v9829_v55  ;;  %v10953_v40 = vmax.f32 %v9769_v36, 0.0  ;;  %v10952_v11 = vmax.f32 %v9772_v57, 0.0  ;;  %v10956_v38 = vmax.f32 %v9775_v5, 0.0  ;;  %v10955_v8 = vmax.f32 %v9778_v4, 0.0 }
 0xd09   :  { %11389 = vst [vmem:[#allocation50_spill] sm:$0xff] %v9832_v45  ;;  %11390 = vst [vmem:[#allocation60_spill] sm:$0xff] %v9835_v46  ;;  %v10959_v58 = vmax.f32 %v9781_v1, 0.0  ;;  %v10958_v51 = vmax.f32 %v9784_v18, 0.0  ;;  %v10960_v44 = vmax.f32 %v9811_v0, 0.0  ;;  %v10964_v31 = vmax.f32 %v9817_v7, 0.0 }
 0xd0a   :  { %11391 = vst [vmem:[#allocation62_spill] sm:$0xff] %v9838_v6  ;;  %v10961_v54 = vmax.f32 %v9820_v2, 0.0  ;;  %v10963_v52 = vmax.f32 %v9826_v62, 0.0  ;;  %v10962_v41 = vmax.f32 %v9829_v55, 0.0  ;;  %v9876_v25 = vpack.c.bf16 %v10946_v32, %v10957_v59 }
 0xd0b   :  { %v9882_v37 = vpack.c.bf16 %v10947_v23, %v10954_v33  ;;  %v9888_v35 = vpack.c.bf16 %v10948_v29, %v10951_v16  ;;  %v9894_v60 = vpack.c.bf16 %v10949_v47, %v10950_v30  ;;  %v9900_v32 = vpack.c.bf16 %v10952_v11, %v10953_v40 }
 0xd0c   :  { %v9906_v23 = vpack.c.bf16 %v10955_v8, %v10956_v38  ;;  %v9912_v29 = vpack.c.bf16 %v10958_v51, %v10959_v58  ;;  %v11392_v47 = vmax.f32 %v9787_v61, 0.0  ;;  %v11393_v30 = vmax.f32 %v9790_v28, 0.0 }
 0xd0d   :  { %v11394_v11 = vmax.f32 %v9793_v42, 0.0  ;;  %v11395_v40 = vmax.f32 %v9796_v39, 0.0  ;;  %v11396_v8 = vmax.f32 %v9799_v26, 0.0  ;;  %v11397_v38 = vmax.f32 %v9802_v34, 0.0 }
 0xd0e   :  { %v9918_v16 = vpack.c.bf16 %v11393_v30, %v11392_v47  ;;  %v11398_v51 = vmax.f32 %v9805_v63, 0.0  ;;  %v11399_v58 = vmax.f32 %v9808_v12, 0.0  ;;  %v11400_v30 = vmax.f32 %v9814_v49, 0.0 }
 0xd0f   :  { %v9924_v33 = vpack.c.bf16 %v11395_v40, %v11394_v11  ;;  %v9930_v59 = vpack.c.bf16 %v11397_v38, %v11396_v8  ;;  %v9948_v40 = vpack.c.bf16 %v10961_v54, %v10964_v31  ;;  %v11401_v11 = vmax.f32 %v9823_v21, 0.0 }
 0xd10   :  { %v9936_v14 = vpack.c.bf16 %v11399_v58, %v11398_v51  ;;  %v9942_v47 = vpack.c.bf16 %v11400_v30, %v10960_v44  ;;  %v11402_v8 = vmax.f32 %v9832_v45, 0.0  ;;  %v11403_v51 = vmax.f32 %v9835_v46, 0.0 }
 0xd11   :  { %v9954_v38 = vpack.c.bf16 %v10963_v52, %v11401_v11  ;;  %v11404_v30 = vmax.f32 %v9838_v6, 0.0 }
 0xd12   :  { %v9960_v58 = vpack.c.bf16 %v11402_v8, %v10962_v41 }
 0xd13   :  { %v9966_v44 = vpack.c.bf16 %v11404_v30, %v11403_v51 }
 0xd14   :  { %6886 = dma.done.wait [#allocation4], 2048 }
 0xd15   :  { %6887 = vsyncadd [#allocation4], 4294965248  ;;  %v5711_v54 = vld [vmem:[%s10809_s2 + $0x80] sm:$0xf]  ;;  %v5712_v11 = vld [vmem:[%s10809_s2 + $0x88] sm:$0xf] }
 0xd16   :  { %v5713_v8 = vld [vmem:[%s10809_s2 + $0x84] sm:$0xf]  ;;  %3736 = vst [vmem:[#allocation2 + $0x80] sm:$0xf] %v5711_v54  ;;  %3738 = vst [vmem:[#allocation2 + $0x84] sm:$0xf] %v5712_v11 }
 0xd17   :  { %3740 = vst [vmem:[#allocation2 + $0x88] sm:$0xf] %v5713_v8  ;;  %v5714_v51 = vld [vmem:[%s10809_s2 + $0x8c] sm:$0xff]   ;;  %v5716_v30 = vld [vmem:[%s10809_s2 + $0x98] sm:$0xf]  ;;  %v5718_v54 = vld [vmem:[%s10809_s2 + $0x9c] sm:$0xff]  }
 0xd18   :  { %v5717_v41 = vld [vmem:[%s10809_s2 + $0x94] sm:$0xf]  ;;  %3742 = vst [vmem:[#allocation2 + $0x8c] sm:$0xff] %v5714_v51   ;;  %3746 = vst [vmem:[#allocation2 + $0x94] sm:$0xf] %v5716_v30  ;;  %v5722_v51 = vld [vmem:[%s10809_s2 + $0xac] sm:$0xff]  }
 0xd19   :  { %3748 = vst [vmem:[#allocation2 + $0x98] sm:$0xf] %v5717_v41  ;;  %v5720_v11 = vld [vmem:[%s10809_s2 + $0xa8] sm:$0xf]  ;;  %v5721_v8 = vld [vmem:[%s10809_s2 + $0xa4] sm:$0xf] }
 0xd1a   :  { %3750 = vst [vmem:[#allocation2 + $0x9c] sm:$0xff] %v5718_v54   ;;  %3754 = vst [vmem:[#allocation2 + $0xa4] sm:$0xf] %v5720_v11  ;;  %v5724_v41 = vld [vmem:[%s10809_s2 + $0xb8] sm:$0xf]  ;;  %v5726_v54 = vld [vmem:[%s10809_s2 + $0xbc] sm:$0xff]  }
 0xd1b   :  { %3756 = vst [vmem:[#allocation2 + $0xa8] sm:$0xf] %v5721_v8  ;;  %v5725_v30 = vld [vmem:[%s10809_s2 + $0xb4] sm:$0xf]  ;;  %3758 = vst [vmem:[#allocation2 + $0xac] sm:$0xff] %v5722_v51   ;;  %v5730_v51 = vld [vmem:[%s10809_s2 + $0xcc] sm:$0xff]  }
 0xd1c   :  { %3762 = vst [vmem:[#allocation2 + $0xb4] sm:$0xf] %v5724_v41  ;;  %3764 = vst [vmem:[#allocation2 + $0xb8] sm:$0xf] %v5725_v30  ;;  %v5728_v11 = vld [vmem:[%s10809_s2 + $0xc8] sm:$0xf] }
 0xd1d   :  { %v5729_v8 = vld [vmem:[%s10809_s2 + $0xc4] sm:$0xf]  ;;  %3766 = vst [vmem:[#allocation2 + $0xbc] sm:$0xff] %v5726_v54   ;;  %3770 = vst [vmem:[#allocation2 + $0xc4] sm:$0xf] %v5728_v11  ;;  %v5734_v54 = vld [vmem:[%s10809_s2 + $0xdc] sm:$0xff]  }
 0xd1e   :  { %3772 = vst [vmem:[#allocation2 + $0xc8] sm:$0xf] %v5729_v8  ;;  %v5732_v41 = vld [vmem:[%s10809_s2 + $0xd8] sm:$0xf]  ;;  %v5733_v30 = vld [vmem:[%s10809_s2 + $0xd4] sm:$0xf] }
 0xd1f   :  { %3774 = vst [vmem:[#allocation2 + $0xcc] sm:$0xff] %v5730_v51   ;;  %3778 = vst [vmem:[#allocation2 + $0xd4] sm:$0xf] %v5732_v41  ;;  %v5736_v11 = vld [vmem:[%s10809_s2 + $0xe8] sm:$0xf]  ;;  %v5738_v51 = vld [vmem:[%s10809_s2 + $0xec] sm:$0xff]  }
 0xd20   :  { %3780 = vst [vmem:[#allocation2 + $0xd8] sm:$0xf] %v5733_v30  ;;  %v5737_v8 = vld [vmem:[%s10809_s2 + $0xe4] sm:$0xf]  ;;  %3782 = vst [vmem:[#allocation2 + $0xdc] sm:$0xff] %v5734_v54  }
 0xd21   :  { %3786 = vst [vmem:[#allocation2 + $0xe4] sm:$0xf] %v5736_v11  ;;  %3788 = vst [vmem:[#allocation2 + $0xe8] sm:$0xf] %v5737_v8  ;;  %v5740_v41 = vld [vmem:[%s10809_s2 + $0xf8] sm:$0xf] }
 0xd22   :  { %v5741_v30 = vld [vmem:[%s10809_s2 + $0xf4] sm:$0xf]  ;;  %3790 = vst [vmem:[#allocation2 + $0xec] sm:$0xff] %v5738_v51   ;;  %3794 = vst [vmem:[#allocation2 + $0xf4] sm:$0xf] %v5740_v41 }
 0xd23   :  { %3796 = vst [vmem:[#allocation2 + $0xf8] sm:$0xf] %v5741_v30  ;;  %v5742_v54 = vld [vmem:[%s10809_s2 + $0xfc] sm:$0xf] }
 0xd24   :  { %3798 = vst [vmem:[#allocation2 + $0xfc] sm:$0xf] %v5742_v54 }
 0xd25   :  { %3893 = vsyncadd [#allocation4 + $0x1], 2048  ;;  %6146 = vmatprep.subr.bf16.mxu0 %v9924_v33  ;;  %v3895_v11 = vld [vmem:[#allocation2 + $0x8] sm:$0xff]  ;;  %v10046_v8 = vcombine.low %v9392_v43, %v9397_v17  ;;  %v10050_v52 = vcombine.low %v9402_v24, %v9407_v10  ;;  %v10059_v51 = vcombine.low %v9412_v48, %v9417_v3  ;;  %v10067_v43 = vcombine.low %v9426_v50, %v9431_v13  ;;  %v3894_v17 = vld [vmem:[#allocation2] sm:$0xff] }
 0xd26   :  { %6147 = vmatpush3.bf16.msra.mxu0 %v9876_v25  ;;  %3942 = vmatprep.mubr.bf16.mxu0 %v3895_v11  ;;  %v3897_v24 = vld [vmem:[#allocation2 + $0x18] sm:$0xff]  ;;  %v3896_v10 = vld [vmem:[#allocation2 + $0x10] sm:$0xff]  ;;  %v3899_v48 = vld [vmem:[#allocation2 + $0x28] sm:$0xff]  ;;  %v11415_v55 = vmax.f32 %v9745_v20, 0.0  ;;  %v11417_v12 = vmax.f32 %v9751_v56, 0.0 }
 0xd27   :  { %6148 = vmatprep.subr.bf16.mxu0 %v9930_v59  ;;  %6646 = vmatprep.subr.bf16.mxu1 %v10046_v8  ;;  %v3898_v3 = vld [vmem:[#allocation2 + $0x20] sm:$0xff]  ;;  %v3901_v50 = vld [vmem:[#allocation2 + $0x38] sm:$0xff]  ;;  %v3900_v13 = vld [vmem:[#allocation2 + $0x30] sm:$0xff] }
 0xd28   :  { %6647 = vmatpush3.bf16.msra.mxu1 %v10046_v8  ;;  %v3903_v41 = vld [vmem:[#allocation2 + $0x48] sm:$0xff]  ;;  %v3902_v30 = vld [vmem:[#allocation2 + $0x40] sm:$0xff]  ;;  %v3905_v54 = vld [vmem:[#allocation2 + $0x58] sm:$0xff] }
 0xd29   :  { %6648 = vmatprep.subr.bf16.mxu1 %v10050_v52  ;;  %v3904_v11 = vld [vmem:[#allocation2 + $0x50] sm:$0xff]  ;;  %v3907_v31 = vld [vmem:[#allocation2 + $0x68] sm:$0xff] }
 0xd2a   :  { %6149 = vmatpush3.bf16.msra.mxu0 %v9882_v37  ;;  %v11421_v56 = vld [vmem:[#allocation24_spill] sm:$0xff] }
 0xd2b   :  { %6150 = vmatprep.subr.bf16.mxu0 %v9936_v14 }
 0xd2c   :  { %6649 = vmatpush3.bf16.msra.mxu1 %v10050_v52 }
 0xd2d   :  { %6650 = vmatprep.subr.bf16.mxu1 %v10059_v51 }
 0xd2e   :  { %6151 = vmatpush3.bf16.msra.mxu0 %v9888_v35 }
 0xd2f   :  { %6152 = vmatprep.subr.bf16.mxu0 %v9942_v47 }
 0xd30   :  { %6651 = vmatpush3.bf16.msra.mxu1 %v10059_v51 }
 0xd31   :  { %6652 = vmatprep.subr.bf16.mxu1 %v10067_v43 }
 0xd32   :  { %6153 = vmatpush3.bf16.msra.mxu0 %v9894_v60 }
 0xd33   :  { %6154 = vmatprep.subr.bf16.mxu0 %v9948_v40 }
 0xd34   :  { %6653 = vmatpush3.bf16.msra.mxu1 %v10067_v43 }
 0xd36   :  { %6155 = vmatpush3.bf16.msra.mxu0 %v9900_v32 }
 0xd37   :  { %6156 = vmatprep.subr.bf16.mxu0 %v9954_v38 }
 0xd3a   :  { %6157 = vmatpush3.bf16.msra.mxu0 %v9906_v23 }
 0xd3b   :  { %6158 = vmatprep.subr.bf16.mxu0 %v9960_v58 }
 0xd3e   :  { %6159 = vmatpush3.bf16.msra.mxu0 %v9912_v29 }
 0xd3f   :  { %6160 = vmatprep.subr.bf16.mxu0 %v9966_v44 }
 0xd42   :  { %6161 = vmatpush3.bf16.msra.mxu0 %v9918_v16 }
 0xd43   :  { %6242 = vmatprep.subr.bf16.mxu0 %v9924_v33 }
 0xd45   :  { %3943 = vmatmul.mubr.bf16.vlgmr.msra.gmra.mrb[128].mxu0 %v3894_v17  ;;  %v3906_v17 = vld [vmem:[#allocation2 + $0x60] sm:$0xff] }
 0xd46   :  { %3950 = vmatprep.mubr.bf16.mxu0 %v3897_v24  ;;  %v3909_v24 = vld [vmem:[#allocation2 + $0x78] sm:$0xff] }
 0xd4d   :  { %3951 = vmatmul.mubr.bf16.gmra.mrb[132].mxu0 %v3896_v10  ;;  %v3908_v10 = vld [vmem:[#allocation2 + $0x70] sm:$0xff] }
 0xd4e   :  { %3958 = vmatprep.mubr.bf16.mxu0 %v3899_v48  ;;  %v11405_v48 = vld [vmem:[#allocation81_spill] sm:$0xff] }
 0xd55   :  { %3959 = vmatmul.mubr.bf16.gmra.mrb[136].mxu0 %v3898_v3  ;;  %v11406_v3 = vld [vmem:[#allocation63_spill] sm:$0xff] }
 0xd56   :  { %3966 = vmatprep.mubr.bf16.mxu0 %v3901_v50  ;;  %v10085_v50 = vcombine.low %v11406_v3, %v11405_v48  ;;  %v11413_v48 = vld [vmem:[#allocation90_spill] sm:$0xff]  ;;  %v11414_v3 = vld [vmem:[#allocation87_spill] sm:$0xff] }
 0xd58   :  { %6654 = vmatprep.subr.bf16.mxu1 %v10085_v50 }
 0xd59   :  { %6655 = vmatpush3.bf16.msra.mxu1 %v10085_v50 }
 0xd5d   :  { %3967 = vmatmul.mubr.bf16.gmra.mrb[140].mxu0 %v3900_v13  ;;  %v11407_v13 = vld [vmem:[#allocation83_spill] sm:$0xff] }
 0xd5e   :  { %3974 = vmatprep.mubr.bf16.mxu0 %v3903_v41  ;;  %v11408_v41 = vld [vmem:[#allocation80_spill] sm:$0xff] }
 0xd65   :  { %3975 = vmatmul.mubr.bf16.gmra.mrb[144].mxu0 %v3902_v30  ;;  %v10091_v30 = vcombine.low %v11408_v41, %v11407_v13  ;;  %v10109_v13 = vcombine.low %v11414_v3, %v11413_v48 }
 0xd66   :  { %3982 = vmatprep.mubr.bf16.mxu0 %v3905_v54  ;;  %v11410_v54 = vld [vmem:[#allocation82_spill] sm:$0xff] }
 0xd67   :  { %6656 = vmatprep.subr.bf16.mxu1 %v10091_v30 }
 0xd68   :  { %6657 = vmatpush3.bf16.msra.mxu1 %v10091_v30 }
 0xd6d   :  { %3983 = vmatmul.mubr.bf16.gmra.mrb[148].mxu0 %v3904_v11 }
 0xd6e   :  { %3990 = vmatprep.mubr.bf16.mxu0 %v3907_v31  ;;  %v11409_v31 = vld [vmem:[#allocation85_spill] sm:$0xff] }
 0xd6f   :  { %v10097_v11 = vcombine.low %v11410_v54, %v11409_v31 }
 0xd71   :  { %6658 = vmatprep.subr.bf16.mxu1 %v10097_v11 }
 0xd72   :  { %6659 = vmatpush3.bf16.msra.mxu1 %v10097_v11 }
 0xd75   :  { %3991 = vmatmul.mubr.bf16.gmra.mrb[152].mxu0 %v3906_v17  ;;  %v11411_v17 = vld [vmem:[#allocation88_spill] sm:$0xff] }
 0xd76   :  { %3998 = vmatprep.mubr.bf16.mxu0 %v3909_v24  ;;  %v11412_v24 = vld [vmem:[#allocation84_spill] sm:$0xff] }
 0xd7d   :  { %3999 = vmatmul.mubr.bf16.gmra.mrb[156].mxu0 %v3908_v10  ;;  %v10103_v10 = vcombine.low %v11412_v24, %v11411_v17  ;;  %v11416_v24 = vmax.f32 %v9748_v15, 0.0 }
 0xd7f   :  { %6660 = vmatprep.subr.bf16.mxu1 %v10103_v10 }
 0xd80   :  { %6661 = vmatpush3.bf16.msra.mxu1 %v10103_v10 }
 0xd81   :  { %6678 = vmatprep.subr.bf16.mxu1 %v10109_v13 }
 0xe18   :  { %v6162_v41 = vpop.f32.mrb[128].mxu0 }
 0xe19   :  { %v6163_v31 = vpop.f32.mrb[129].mxu0 }
 0xe1a   :  { %v6164_v54 = vadd.f32 %v6163_v31, %v6162_v41  ;;  %v6165_v6 = vpop.f32.mrb[130].mxu0  ;;  %v11418_v31 = vmax.f32 %v9754_v19, 0.0 }
 0xe1b   :  { %v6166_v46 = vpop.f32.mrb[131].mxu0 }
 0xe1c   :  { %v6167_v45 = vadd.f32 %v6166_v46, %v6165_v6  ;;  %v4007_v17 = vadd.f32 %v6164_v54, %v11415_v55  ;;  %v11419_v55 = vld [vmem:[#allocation92_spill] sm:$0xff]  ;;  %v11420_v54 = vld [vmem:[#allocation89_spill] sm:$0xff] }
 0xe1d   :  { %v10122_v15 = vcombine.low %v11420_v54, %v11419_v55 }
 0xe1e   :  { %v4008_v62 = vadd.f32 %v6167_v45, %v11416_v24 }
 0xe20   :  { %v6168_v21 = vpop.f32.mrb[132].mxu0  ;;  %v4023_v2 = vpack.c.bf16 %v4008_v62, %v4007_v17 }
 0xe21   :  { %v6169_v7 = vpop.f32.mrb[133].mxu0 }
 0xe22   :  { %v6170_v49 = vadd.f32 %v6169_v7, %v6168_v21  ;;  %v6171_v48 = vpop.f32.mrb[134].mxu0  ;;  %6662 = vmatprep.mubr.bf16.mxu1 %v4023_v2  ;;  %v11424_v21 = vmax.f32 %v9760_v9, 0.0  ;;  %v11427_v9 = vld [vmem:[#allocation54_spill] sm:$0xff] }
 0xe23   :  { %v6172_v3 = vpop.f32.mrb[135].mxu0 }
 0xe24   :  { %v6173_v0 = vadd.f32 %v6172_v3, %v6171_v48  ;;  %v4009_v41 = vadd.f32 %v6170_v49, %v11417_v12  ;;  %v11422_v12 = vld [vmem:[#allocation91_spill] sm:$0xff] }
 0xe25   :  { %v10128_v19 = vcombine.low %v11422_v12, %v11421_v56 }
 0xe26   :  { %v4010_v46 = vadd.f32 %v6173_v0, %v11418_v31  ;;  %v11423_v0 = vmax.f32 %v9757_v22, 0.0  ;;  %v11426_v31 = vld [vmem:[#allocation20_spill] sm:$0xff] }
 0xe28   :  { %v4024_v6 = vpack.c.bf16 %v4010_v46, %v4009_v41  ;;  %v6174_v20 = vpop.f32.mrb[136].mxu0  ;;  %v11425_v41 = vld [vmem:[#allocation45_spill] sm:$0xff] }
 0xe29   :  { %v6175_v45 = vpop.f32.mrb[137].mxu0  ;;  %v10138_v46 = vcombine.low %v11426_v31, %v11425_v41 }
 0xe2a   :  { %v6176_v62 = vadd.f32 %v6175_v45, %v6174_v20  ;;  %v6177_v17 = vpop.f32.mrb[138].mxu0  ;;  %6663 = vmatmul.mubr.bf16.vlgmr.msra.gmra.mrb[128].mxu1 %v4024_v6  ;;  %v11428_v45 = vld [vmem:[#allocation18_spill] sm:$0xff] }
 0xe2b   :  { %v6178_v7 = vpop.f32.mrb[139].mxu0  ;;  %6679 = vmatpush3.bf16.msra.mxu1 %v10109_v13 }
 0xe2c   :  { %v6179_v2 = vadd.f32 %v6178_v7, %v6177_v17  ;;  %6680 = vmatprep.subr.bf16.mxu1 %v10122_v15  ;;  %v4011_v49 = vadd.f32 %v6176_v62, %v11423_v0  ;;  %v10144_v62 = vcombine.low %v11428_v45, %v11427_v9  ;;  %v11429_v17 = vmax.f32 %v9763_v27, 0.0 }
 0xe2e   :  { %v4012_v24 = vadd.f32 %v6179_v2, %v11424_v21  ;;  %v11430_v2 = vmax.f32 %v9766_v53, 0.0  ;;  %v11432_v21 = vld [vmem:[#allocation74_spill] sm:$0xff]  ;;  %v11433_v53 = vmax.f32 %v9769_v36, 0.0 }
 0xe2f   :  { %6681 = vmatpush3.bf16.msra.mxu1 %v10122_v15 }
 0xe30   :  { %v4025_v48 = vpack.c.bf16 %v4012_v24, %v4011_v49  ;;  %v6180_v3 = vpop.f32.mrb[140].mxu0  ;;  %6682 = vmatprep.subr.bf16.mxu1 %v10128_v19  ;;  %v11431_v49 = vld [vmem:[#allocation64_spill] sm:$0xff] }
 0xe31   :  { %v6181_v6 = vpop.f32.mrb[141].mxu0  ;;  %v10154_v24 = vcombine.low %v11432_v21, %v11431_v49 }
 0xe32   :  { %v6182_v20 = vadd.f32 %v6181_v6, %v6180_v3  ;;  %v6183_v55 = vpop.f32.mrb[142].mxu0  ;;  %6666 = vmatprep.mubr.bf16.mxu1 %v4025_v48 }
 0xe33   :  { %v6184_v54 = vpop.f32.mrb[143].mxu0  ;;  %6683 = vmatpush3.bf16.msra.mxu1 %v10128_v19 }
 0xe34   :  { %v6185_v22 = vadd.f32 %v6184_v54, %v6183_v55  ;;  %6684 = vmatprep.subr.bf16.mxu1 %v10138_v46  ;;  %v4013_v7 = vadd.f32 %v6182_v20, %v11429_v17  ;;  %v11434_v20 = vmax.f32 %v9772_v57, 0.0 }
 0xe36   :  { %v4014_v56 = vadd.f32 %v6185_v22, %v11430_v2 }
 0xe37   :  { %6685 = vmatpush3.bf16.msra.mxu1 %v10138_v46 }
 0xe38   :  { %v4026_v12 = vpack.c.bf16 %v4014_v56, %v4013_v7  ;;  %v6186_v0 = vpop.f32.mrb[144].mxu0  ;;  %6686 = vmatprep.subr.bf16.mxu1 %v10144_v62  ;;  %v11435_v56 = vmax.f32 %v9775_v5, 0.0 }
 0xe39   :  { %v6187_v48 = vpop.f32.mrb[145].mxu0 }
 0xe3a   :  { %v6188_v3 = vadd.f32 %v6187_v48, %v6186_v0  ;;  %v6189_v41 = vpop.f32.mrb[146].mxu0  ;;  %6667 = vmatmul.mubr.bf16.gmra.mrb[132].mxu1 %v4026_v12  ;;  %v11436_v0 = vmax.f32 %v9778_v4, 0.0 }
 0xe3b   :  { %v6190_v31 = vpop.f32.mrb[147].mxu0  ;;  %6687 = vmatpush3.bf16.msra.mxu1 %v10144_v62 }
 0xe3c   :  { %v6191_v27 = vadd.f32 %v6190_v31, %v6189_v41  ;;  %6688 = vmatprep.subr.bf16.mxu1 %v10154_v24  ;;  %v4015_v6 = vadd.f32 %v6188_v3, %v11433_v53 }
 0xe3e   :  { %v4016_v55 = vadd.f32 %v6191_v27, %v11434_v20  ;;  %v11437_v27 = vmax.f32 %v9781_v1, 0.0  ;;  %v11441_v1 = vld [vmem:[#allocation75_spill] sm:$0xff] }
 0xe3f   :  { %6689 = vmatpush3.bf16.msra.mxu1 %v10154_v24 }
 0xe40   :  { %v4027_v54 = vpack.c.bf16 %v4016_v55, %v4015_v6  ;;  %v6192_v22 = vpop.f32.mrb[148].mxu0  ;;  %v11438_v6 = vmax.f32 %v9784_v18, 0.0 }
 0xe41   :  { %v6193_v9 = vpop.f32.mrb[149].mxu0 }
 0xe42   :  { %v6194_v45 = vadd.f32 %v6193_v9, %v6192_v22  ;;  %v6195_v17 = vpop.f32.mrb[150].mxu0  ;;  %6670 = vmatprep.mubr.bf16.mxu1 %v4027_v54 }
 0xe43   :  { %v6196_v7 = vpop.f32.mrb[151].mxu0 }
 0xe44   :  { %v6197_v2 = vadd.f32 %v6196_v7, %v6195_v17  ;;  %v4017_v12 = vadd.f32 %v6194_v45, %v11435_v56  ;;  %v11439_v17 = vmax.f32 %v9787_v61, 0.0  ;;  %v11445_v61 = vld [vmem:[#allocation38_spill] sm:$0xff] }
 0xe46   :  { %v4018_v36 = vadd.f32 %v6197_v2, %v11436_v0  ;;  %v11440_v2 = vmax.f32 %v9790_v28, 0.0  ;;  %v11442_v0 = vld [vmem:[#allocation22_spill] sm:$0xff]  ;;  %v11446_v28 = vld [vmem:[#allocation21_spill] sm:$0xff] }
 0xe47   :  { %v10177_v18 = vcombine.low %v11442_v0, %v11441_v1 }
 0xe48   :  { %v4028_v49 = vpack.c.bf16 %v4018_v36, %v4017_v12  ;;  %v6198_v21 = vpop.f32.mrb[152].mxu0  ;;  %v11443_v36 = vld [vmem:[#allocation73_spill] sm:$0xff] }
 0xe49   :  { %v6199_v57 = vpop.f32.mrb[153].mxu0  ;;  %6690 = vmatprep.subr.bf16.mxu1 %v10177_v18 }
 0xe4a   :  { %v6200_v48 = vadd.f32 %v6199_v57, %v6198_v21  ;;  %v6201_v3 = vpop.f32.mrb[154].mxu0  ;;  %6671 = vmatmul.mubr.bf16.gmra.mrb[136].mxu1 %v4028_v49  ;;  %v11444_v49 = vld [vmem:[#allocation77_spill] sm:$0xff]  ;;  %v10189_v57 = vrot.slane %v11446_v28, %v11445_v61 }
 0xe4b   :  { %v6202_v41 = vpop.f32.mrb[155].mxu0  ;;  %6691 = vmatpush3.bf16.msra.mxu1 %v10177_v18  ;;  %v10183_v21 = vcombine.low %v11444_v49, %v11443_v36 }
 0xe4c   :  { %v6203_v31 = vadd.f32 %v6202_v41, %v6201_v3  ;;  %v4019_v53 = vadd.f32 %v6200_v48, %v11437_v27 }
 0xe4d   :  { %6692 = vmatprep.subr.bf16.mxu1 %v10183_v21 }
 0xe4e   :  { %v4020_v20 = vadd.f32 %v6203_v31, %v11438_v6 }
 0xe4f   :  { %6693 = vmatpush3.bf16.msra.mxu1 %v10183_v21 }
 0xe50   :  { %v4029_v55 = vpack.c.bf16 %v4020_v20, %v4019_v53  ;;  %v6204_v5 = vpop.f32.mrb[156].mxu0 }
 0xe51   :  { %v6205_v54 = vpop.f32.mrb[157].mxu0 }
 0xe52   :  { %v6206_v22 = vadd.f32 %v6205_v54, %v6204_v5  ;;  %v6207_v4 = vpop.f32.mrb[158].mxu0  ;;  %6674 = vmatprep.mubr.bf16.mxu1 %v4029_v55 }
 0xe53   :  { %v6208_v9 = vpop.f32.mrb[159].mxu0 }
 0xe54   :  { %v6209_v45 = vadd.f32 %v6208_v9, %v6207_v4  ;;  %v4021_v7 = vadd.f32 %v6206_v22, %v11439_v17 }
 0xe56   :  { %v4022_v56 = vadd.f32 %v6209_v45, %v11440_v2 }
 0xe58   :  { %v4030_v12 = vpack.c.bf16 %v4022_v56, %v4021_v7 }
 0xe5a   :  { %6675 = vmatmul.mubr.bf16.gmra.mrb[140].mxu1 %v4030_v12 }
 0xefd   :  { %v6664_v48 = vpop.f32.mrb[128].mxu1 }
 0xefe   :  { %v4126_v3 = vadd.f32 %v6664_v48, %v10189_v57  ;;  %v4117_v41 = vpop.f32.mrb[129].mxu1 }
 0xeff   :  { %v4118_v31 = vadd.f32 %v4117_v41, %v10189_v57  ;;  %v6665_v27 = vpop.f32.mrb[130].mxu1 }
 0xf00   :  { %v4129_v53 = vadd.f32 %v6665_v27, %v10189_v57  ;;  %v4120_v6 = vpop.f32.mrb[131].mxu1  ;;  %v4182_v55 = vmax.f32 %v4126_v3, 0.0 }
 0xf01   :  { %v4121_v20 = vadd.f32 %v4120_v6, %v10189_v57  ;;  %v4180_v54 = vmax.f32 %v4118_v31, 0.0 }
 0xf02   :  { %v4183_v5 = vmax.f32 %v4129_v53, 0.0 }
 0xf03   :  { %v4181_v22 = vmax.f32 %v4121_v20, 0.0 }
 0xf04   :  { %v4197_v4 = vpack.c.bf16 %v4183_v5, %v4182_v55 }
 0xf05   :  { %v4196_v9 = vpack.c.bf16 %v4181_v22, %v4180_v54 }
 0xf07   :  { %6694 = vmatprep.mubr.bf16.mxu1 %v4196_v9 }
 0xf08   :  { %6695 = vmatmul.mubr.bf16.vlgmr.msra.gmra.mrb[144].mxu1 %v4197_v4 }
 0xf0d   :  { %v6668_v45 = vpop.f32.mrb[132].mxu1 }
 0xf0e   :  { %v4142_v17 = vadd.f32 %v6668_v45, %v10189_v57  ;;  %v4133_v7 = vpop.f32.mrb[133].mxu1 }
 0xf0f   :  { %v4134_v2 = vadd.f32 %v4133_v7, %v10189_v57  ;;  %v6669_v56 = vpop.f32.mrb[134].mxu1 }
 0xf10   :  { %v4145_v12 = vadd.f32 %v6669_v56, %v10189_v57  ;;  %v4136_v1 = vpop.f32.mrb[135].mxu1  ;;  %v4186_v36 = vmax.f32 %v4142_v17, 0.0 }
 0xf11   :  { %v4137_v0 = vadd.f32 %v4136_v1, %v10189_v57  ;;  %v4184_v61 = vmax.f32 %v4134_v2, 0.0 }
 0xf12   :  { %v4187_v49 = vmax.f32 %v4145_v12, 0.0 }
 0xf13   :  { %v4185_v48 = vmax.f32 %v4137_v0, 0.0 }
 0xf14   :  { %v4199_v3 = vpack.c.bf16 %v4187_v49, %v4186_v36 }
 0xf15   :  { %v4198_v41 = vpack.c.bf16 %v4185_v48, %v4184_v61 }
 0xf17   :  { %6698 = vmatprep.mubr.bf16.mxu1 %v4198_v41 }
 0xf18   :  { %6699 = vmatmul.mubr.bf16.gmra.mrb[148].mxu1 %v4199_v3 }
 0xf1d   :  { %v6672_v31 = vpop.f32.mrb[136].mxu1 }
 0xf1e   :  { %v4158_v27 = vadd.f32 %v6672_v31, %v10189_v57  ;;  %v4149_v53 = vpop.f32.mrb[137].mxu1 }
 0xf1f   :  { %v4150_v6 = vadd.f32 %v4149_v53, %v10189_v57  ;;  %v6673_v20 = vpop.f32.mrb[138].mxu1 }
 0xf20   :  { %v4161_v55 = vadd.f32 %v6673_v20, %v10189_v57  ;;  %v4152_v5 = vpop.f32.mrb[139].mxu1  ;;  %v4190_v22 = vmax.f32 %v4158_v27, 0.0 }
 0xf21   :  { %v4153_v54 = vadd.f32 %v4152_v5, %v10189_v57  ;;  %v4188_v9 = vmax.f32 %v4150_v6, 0.0  ;;  %v11447_v6 = vld [vmem:[#allocation33_spill] sm:$0xff] }
 0xf22   :  { %v4191_v4 = vmax.f32 %v4161_v55, 0.0  ;;  %v10209_v20 = vrot.slane %v11446_v28, %v11447_v6 }
 0xf23   :  { %v4189_v45 = vmax.f32 %v4153_v54, 0.0 }
 0xf24   :  { %v4201_v17 = vpack.c.bf16 %v4191_v4, %v4190_v22  ;;  %11448 = vst [vmem:[#allocation52_spill] sm:$0xff] %v10209_v20 }
 0xf25   :  { %v4200_v7 = vpack.c.bf16 %v4189_v45, %v4188_v9 }
 0xf27   :  { %6702 = vmatprep.mubr.bf16.mxu1 %v4200_v7 }
 0xf28   :  { %6703 = vmatmul.mubr.bf16.gmra.mrb[152].mxu1 %v4201_v17 }
 0xf2d   :  { %v6676_v2 = vpop.f32.mrb[140].mxu1 }
 0xf2e   :  { %v4174_v56 = vadd.f32 %v6676_v2, %v10189_v57  ;;  %v4165_v12 = vpop.f32.mrb[141].mxu1 }
 0xf2f   :  { %v4166_v1 = vadd.f32 %v4165_v12, %v10189_v57  ;;  %v6677_v0 = vpop.f32.mrb[142].mxu1 }
 0xf30   :  { %v4177_v36 = vadd.f32 %v6677_v0, %v10189_v57  ;;  %v4168_v49 = vpop.f32.mrb[143].mxu1  ;;  %v4194_v48 = vmax.f32 %v4174_v56, 0.0  ;;  %v11451_v56 = vld [vmem:[#allocation23_spill] sm:$0xff] }
 0xf31   :  { %v4169_v61 = vadd.f32 %v4168_v49, %v10189_v57  ;;  %v4192_v41 = vmax.f32 %v4166_v1, 0.0 }
 0xf32   :  { %v4195_v3 = vmax.f32 %v4177_v36, 0.0  ;;  %v11454_v36 = vld [vmem:[#allocation26_spill] sm:$0xff] }
 0xf33   :  { %v4193_v31 = vmax.f32 %v4169_v61, 0.0  ;;  %v11455_v61 = vld [vmem:[#allocation25_spill] sm:$0xff] }
 0xf34   :  { %v4203_v27 = vpack.c.bf16 %v4195_v3, %v4194_v48 }
 0xf35   :  { %v4202_v53 = vpack.c.bf16 %v4193_v31, %v4192_v41  ;;  %v11456_v41 = vld [vmem:[#allocation27_spill] sm:$0xff] }
 0xf37   :  { %6706 = vmatprep.mubr.bf16.mxu1 %v4202_v53 }
 0xf38   :  { %6707 = vmatmul.mubr.bf16.gmra.mrb[156].mxu1 %v4203_v27 }
 0xfdb   :  { %v6696_v55 = vpop.f32.mrb[144].mxu1 }
 0xfdc   :  { %v4299_v5 = vadd.f32 %v6696_v55, %v10209_v20  ;;  %v4290_v54 = vpop.f32.mrb[145].mxu1 }
 0xfdd   :  { %v4291_v22 = vadd.f32 %v4290_v54, %v10209_v20  ;;  %v6697_v4 = vpop.f32.mrb[146].mxu1 }
 0xfde   :  { %v4302_v9 = vadd.f32 %v6697_v4, %v10209_v20  ;;  %v4293_v45 = vpop.f32.mrb[147].mxu1  ;;  %v10214_v17 = vmax.f32 %v4299_v5, 0.0 }
 0xfdf   :  { %v10216_v7 = vmax.f32 %v4291_v22, 0.0  ;;  %v4294_v2 = vadd.f32 %v4293_v45, %v10209_v20 }
 0xfe0   :  { %11449 = vst [vmem:[#allocation59_spill] sm:$0xff] %v10214_v17  ;;  %v10221_v1 = vmax.f32 %v4302_v9, 0.0  ;;  %v4387_v49 = vmul.f32 %v11454_v36, %v10214_v17 }
 0xfe1   :  { %11450 = vst [vmem:[#allocation72_spill] sm:$0xff] %v10216_v7  ;;  %v4385_v12 = vmul.f32 %v11451_v56, %v10216_v7  ;;  %v10223_v0 = vmax.f32 %v4294_v2, 0.0 }
 0xfe2   :  { %11452 = vst [vmem:[#allocation61_spill] sm:$0xff] %v10221_v1  ;;  %v4388_v31 = vmul.f32 %v11456_v41, %v10221_v1  ;;  %v4425_v6 = vmul.f32 %v4387_v49, %v10214_v17 }
 0xfe3   :  { %11453 = vst [vmem:[#allocation81_spill] sm:$0xff] %v10223_v0  ;;  %v4386_v48 = vmul.f32 %v11455_v61, %v10223_v0  ;;  %v4423_v3 = vmul.f32 %v4385_v12, %v10216_v7 }
 0xfe4   :  { %v4426_v54 = vmul.f32 %v4388_v31, %v10221_v1 }
 0xfe5   :  { %v4401_v27 = vadd.f32 %v4386_v48, %v4385_v12  ;;  %v4424_v53 = vmul.f32 %v4386_v48, %v10223_v0 }
 0xfe7   :  { %v4402_v55 = vadd.f32 %v4401_v27, %v4387_v49  ;;  %v4439_v5 = vadd.f32 %v4424_v53, %v4423_v3  ;;  %v11459_v3 = vld [vmem:[#allocation28_spill] sm:$0xff] }
 0xfe9   :  { %v4440_v22 = vadd.f32 %v4439_v5, %v4425_v6  ;;  %v4403_v4 = vadd.f32 %v4402_v55, %v4388_v31  ;;  %v11462_v6 = vld [vmem:[#allocation30_spill] sm:$0xff] }
 0xfeb   :  { %v6700_v9 = vpop.f32.mrb[148].mxu1  ;;  %v4441_v45 = vadd.f32 %v4440_v22, %v4426_v54  ;;  %v11463_v22 = vld [vmem:[#allocation29_spill] sm:$0xff] }
 0xfec   :  { %v4315_v2 = vadd.f32 %v6700_v9, %v10209_v20  ;;  %v4306_v56 = vpop.f32.mrb[149].mxu1 }
 0xfed   :  { %v4307_v36 = vadd.f32 %v4306_v56, %v10209_v20  ;;  %v6701_v61 = vpop.f32.mrb[150].mxu1  ;;  %v11464_v56 = vld [vmem:[#allocation31_spill] sm:$0xff] }
 0xfee   :  { %v4318_v12 = vadd.f32 %v6701_v61, %v10209_v20  ;;  %v4309_v41 = vpop.f32.mrb[151].mxu1  ;;  %v10238_v48 = vmax.f32 %v4315_v2, 0.0 }
 0xfef   :  { %v10240_v17 = vmax.f32 %v4307_v36, 0.0  ;;  %v4310_v49 = vadd.f32 %v4309_v41, %v10209_v20 }
 0xff0   :  { %11457 = vst [vmem:[#allocation63_spill] sm:$0xff] %v10238_v48  ;;  %v10245_v27 = vmax.f32 %v4318_v12, 0.0  ;;  %v4391_v55 = vmul.f32 %v11462_v6, %v10238_v48 }
 0xff1   :  { %11458 = vst [vmem:[#allocation83_spill] sm:$0xff] %v10240_v17  ;;  %v4389_v31 = vmul.f32 %v11459_v3, %v10240_v17  ;;  %v10247_v53 = vmax.f32 %v4310_v49, 0.0 }
 0xff2   :  { %11460 = vst [vmem:[#allocation80_spill] sm:$0xff] %v10245_v27  ;;  %v4392_v36 = vmul.f32 %v11464_v56, %v10245_v27  ;;  %v4429_v12 = vmul.f32 %v4391_v55, %v10238_v48 }
 0xff3   :  { %11461 = vst [vmem:[#allocation85_spill] sm:$0xff] %v10247_v53  ;;  %v4404_v5 = vadd.f32 %v4403_v4, %v4389_v31  ;;  %v4427_v54 = vmul.f32 %v4389_v31, %v10240_v17  ;;  %v4390_v9 = vmul.f32 %v11463_v22, %v10247_v53 }
 0xff4   :  { %v4430_v1 = vmul.f32 %v4392_v36, %v10245_v27 }
 0xff5   :  { %v4442_v2 = vadd.f32 %v4441_v45, %v4427_v54  ;;  %v4405_v61 = vadd.f32 %v4404_v5, %v4390_v9  ;;  %v4428_v41 = vmul.f32 %v4390_v9, %v10247_v53 }
 0xff7   :  { %v4406_v49 = vadd.f32 %v4405_v61, %v4391_v55  ;;  %v4443_v3 = vadd.f32 %v4442_v2, %v4428_v41  ;;  %v11467_v2 = vld [vmem:[#allocation32_spill] sm:$0xff] }
 0xff9   :  { %v4444_v6 = vadd.f32 %v4443_v3, %v4429_v12  ;;  %v4407_v4 = vadd.f32 %v4406_v49, %v4392_v36 }
 0xffb   :  { %v6704_v0 = vpop.f32.mrb[152].mxu1  ;;  %v4445_v31 = vadd.f32 %v4444_v6, %v4430_v1 }
 0xffc   :  { %v4331_v17 = vadd.f32 %v6704_v0, %v10209_v20  ;;  %v4322_v22 = vpop.f32.mrb[153].mxu1  ;;  %v11470_v0 = vld [vmem:[#allocation35_spill] sm:$0xff] }
 0xffd   :  { %v4323_v45 = vadd.f32 %v4322_v22, %v10209_v20  ;;  %v6705_v54 = vpop.f32.mrb[154].mxu1  ;;  %v11472_v22 = vld [vmem:[#allocation36_spill] sm:$0xff] }
 0xffe   :  { %v4334_v5 = vadd.f32 %v6705_v54, %v10209_v20  ;;  %v4325_v56 = vpop.f32.mrb[155].mxu1  ;;  %v10262_v9 = vmax.f32 %v4331_v17, 0.0  ;;  %v11471_v17 = vld [vmem:[#allocation34_spill] sm:$0xff] }
 0xfff   :  { %v10264_v48 = vmax.f32 %v4323_v45, 0.0  ;;  %v4326_v55 = vadd.f32 %v4325_v56, %v10209_v20 }
0x1000   :  { %11465 = vst [vmem:[#allocation82_spill] sm:$0xff] %v10262_v9  ;;  %v10269_v61 = vmax.f32 %v4334_v5, 0.0  ;;  %v4395_v41 = vmul.f32 %v11470_v0, %v10262_v9 }
0x1001   :  { %11466 = vst [vmem:[#allocation88_spill] sm:$0xff] %v10264_v48  ;;  %v4393_v36 = vmul.f32 %v11467_v2, %v10264_v48  ;;  %v10271_v1 = vmax.f32 %v4326_v55, 0.0 }
0x1002   :  { %11468 = vst [vmem:[#allocation84_spill] sm:$0xff] %v10269_v61  ;;  %v4396_v45 = vmul.f32 %v11472_v22, %v10269_v61  ;;  %v4433_v5 = vmul.f32 %v4395_v41, %v10262_v9 }
0x1003   :  { %11469 = vst [vmem:[#allocation90_spill] sm:$0xff] %v10271_v1  ;;  %v4408_v12 = vadd.f32 %v4407_v4, %v4393_v36  ;;  %v4431_v49 = vmul.f32 %v4393_v36, %v10264_v48  ;;  %v4394_v3 = vmul.f32 %v11471_v17, %v10271_v1 }
0x1004   :  { %v4434_v27 = vmul.f32 %v4396_v45, %v10269_v61 }
0x1005   :  { %v4446_v6 = vadd.f32 %v4445_v31, %v4431_v49  ;;  %v4409_v54 = vadd.f32 %v4408_v12, %v4394_v3  ;;  %v4432_v56 = vmul.f32 %v4394_v3, %v10271_v1 }
0x1007   :  { %v4410_v55 = vadd.f32 %v4409_v54, %v4395_v41  ;;  %v4447_v2 = vadd.f32 %v4446_v6, %v4432_v56  ;;  %v11475_v6 = vld [vmem:[#allocation37_spill] sm:$0xff] }
0x1009   :  { %v4448_v0 = vadd.f32 %v4447_v2, %v4433_v5  ;;  %v4411_v4 = vadd.f32 %v4410_v55, %v4396_v45 }
0x100b   :  { %v6708_v53 = vpop.f32.mrb[156].mxu1  ;;  %v4449_v36 = vadd.f32 %v4448_v0, %v4434_v27 }
0x100c   :  { %v4347_v48 = vadd.f32 %v6708_v53, %v10209_v20  ;;  %v4338_v17 = vpop.f32.mrb[157].mxu1  ;;  %v11476_v53 = vld [vmem:[#allocation40_spill] sm:$0xff] }
0x100d   :  { %v4339_v31 = vadd.f32 %v4338_v17, %v10209_v20  ;;  %v6709_v49 = vpop.f32.mrb[158].mxu1  ;;  %v11478_v17 = vld [vmem:[#allocation41_spill] sm:$0xff] }
0x100e   :  { %v4350_v12 = vadd.f32 %v6709_v49, %v10209_v20  ;;  %v4341_v22 = vpop.f32.mrb[159].mxu1  ;;  %v10286_v3 = vmax.f32 %v4347_v48, 0.0  ;;  %v11477_v48 = vld [vmem:[#allocation39_spill] sm:$0xff] }
0x100f   :  { %v10288_v9 = vmax.f32 %v4339_v31, 0.0  ;;  %v4342_v41 = vadd.f32 %v4341_v22, %v10209_v20 }
0x1010   :  { %11473 = vst [vmem:[#allocation87_spill] sm:$0xff] %v10286_v3  ;;  %v10293_v54 = vmax.f32 %v4350_v12, 0.0  ;;  %v4399_v56 = vmul.f32 %v11476_v53, %v10286_v3 }
0x1011   :  { %11474 = vst [vmem:[#allocation92_spill] sm:$0xff] %v10288_v9  ;;  %v4397_v45 = vmul.f32 %v11475_v6, %v10288_v9  ;;  %v10295_v27 = vmax.f32 %v4342_v41, 0.0 }
0x1012   :  { %v4400_v31 = vmul.f32 %v11478_v17, %v10293_v54  ;;  %v4437_v12 = vmul.f32 %v4399_v56, %v10286_v3 }
0x1013   :  { %v4412_v5 = vadd.f32 %v4411_v4, %v4397_v45  ;;  %v4435_v55 = vmul.f32 %v4397_v45, %v10288_v9  ;;  %v4398_v2 = vmul.f32 %v11477_v48, %v10295_v27 }
0x1014   :  { %v4438_v61 = vmul.f32 %v4400_v31, %v10293_v54 }
0x1015   :  { %v4450_v0 = vadd.f32 %v4449_v36, %v4435_v55  ;;  %v4413_v49 = vadd.f32 %v4412_v5, %v4398_v2  ;;  %v4436_v22 = vmul.f32 %v4398_v2, %v10295_v27 }
0x1017   :  { %v4414_v41 = vadd.f32 %v4413_v49, %v4399_v56  ;;  %v4451_v6 = vadd.f32 %v4450_v0, %v4436_v22 }
0x1019   :  { %v4415_v53 = vadd.f32 %v4414_v41, %v4400_v31  ;;  %v4452_v4 = vadd.f32 %v4451_v6, %v4437_v12 }
0x101b   :  { %v4416_v1 = vrot.slane %v4415_v53, 4  ;;  %v4453_v45 = vadd.f32 %v4452_v4, %v4438_v61 }
0x101d   :  { %v4417_v9 = vadd.f32 %v4416_v1, %v4415_v53  ;;  %v4454_v7 = vrot.slane %v4453_v45, 4 }
0x101f   :  { %v4418_v48 = vrot.slane %v4417_v9, 2  ;;  %v4455_v36 = vadd.f32 %v4454_v7, %v4453_v45 }
0x1021   :  { %v4419_v55 = vadd.f32 %v4418_v48, %v4417_v9  ;;  %v4456_v28 = vrot.slane %v4455_v36, 2 }
0x1023   :  { %v4420_v17 = vrot.slane %v4419_v55, 1  ;;  %v4457_v5 = vadd.f32 %v4456_v28, %v4455_v36 }
0x1025   :  { %v10307_v20 = vadd.f32 %v4420_v17, %v4419_v55  ;;  %v4458_v2 = vrot.slane %v4457_v5, 1 }
0x1027   :  { %v10309_v3 = vadd.f32 %v4458_v2, %v4457_v5 }
0x1028   :  { %6888 = dma.done.wait [#allocation4 + $0x1], 2048 }
0x1029   :  { %6889 = vsyncadd [#allocation4 + $0x1], 4294965248  ;;  %6710 = vmatprep.subr.bf16.mxu1 %v10046_v8  ;;  %6243 = vmatpush3.bf16.msra.mxu0 %v9876_v25  ;;  %v4464_v33 = vld [vmem:[#allocation2 + $0x88] sm:$0xff]  ;;  %v11480_v28 = vmax.f32 %v9796_v39, 0.0  ;;  %v11481_v22 = vmax.f32 %v9799_v26, 0.0  ;;  %v11482_v41 = vmax.f32 %v9802_v34, 0.0 }
0x102a   :  { %6711 = vmatpush3.bf16.msra.mxu1 %v10046_v8  ;;  %6244 = vmatprep.subr.bf16.mxu0 %v9930_v59  ;;  %v4463_v59 = vld [vmem:[#allocation2 + $0x80] sm:$0xff]  ;;  %v4476_v25 = vld [vmem:[#allocation2 + $0xe8] sm:$0xff]  ;;  %v11483_v55 = vmax.f32 %v9805_v63, 0.0  ;;  %vm6892_vm12 = vmmov 0  }
0x102b   :  { %6712 = vmatprep.subr.bf16.mxu1 %v10050_v52  ;;  %4511 = vmatprep.mubr.bf16.mxu0 %v4464_v33  ;;  %v11484_v26 = vld [vmem:[#allocation86_spill] sm:$0xff]  ;;  %v11486_v63 = vld [vmem:[#allocation79_spill] sm:$0xff] }
0x102c   :  { %v11485_v5 = vmax.f32 %v11484_v26, 0.0 }
0x102d   :  { %6245 = vmatpush3.bf16.msra.mxu0 %v9882_v37  ;;  %v4468_v37 = vld [vmem:[#allocation2 + $0xa8] sm:$0xff] }
0x102e   :  { %6713 = vmatpush3.bf16.msra.mxu1 %v10050_v52  ;;  %6246 = vmatprep.subr.bf16.mxu0 %v9936_v14  ;;  %v4470_v52 = vld [vmem:[#allocation2 + $0xb8] sm:$0xff]  ;;  %v4472_v14 = vld [vmem:[#allocation2 + $0xc8] sm:$0xff] }
0x102f   :  { %6714 = vmatprep.subr.bf16.mxu1 %v10059_v51 }
0x1031   :  { %6247 = vmatpush3.bf16.msra.mxu0 %v9888_v35  ;;  %v4469_v35 = vld [vmem:[#allocation2 + $0xb0] sm:$0xff] }
0x1032   :  { %6715 = vmatpush3.bf16.msra.mxu1 %v10059_v51  ;;  %6248 = vmatprep.subr.bf16.mxu0 %v9942_v47  ;;  %v4475_v47 = vld [vmem:[#allocation2 + $0xe0] sm:$0xff] }
0x1033   :  { %6716 = vmatprep.subr.bf16.mxu1 %v10067_v43 }
0x1035   :  { %6249 = vmatpush3.bf16.msra.mxu0 %v9894_v60  ;;  %v4474_v60 = vld [vmem:[#allocation2 + $0xd8] sm:$0xff] }
0x1036   :  { %6717 = vmatpush3.bf16.msra.mxu1 %v10067_v43  ;;  %6250 = vmatprep.subr.bf16.mxu0 %v9948_v40  ;;  %v4478_v40 = vld [vmem:[#allocation2 + $0xf8] sm:$0xff] }
0x1037   :  { %6718 = vmatprep.subr.bf16.mxu1 %v10085_v50 }
0x1039   :  { %6251 = vmatpush3.bf16.msra.mxu0 %v9900_v32  ;;  %v4466_v32 = vld [vmem:[#allocation2 + $0x98] sm:$0xff] }
0x103a   :  { %6719 = vmatpush3.bf16.msra.mxu1 %v10085_v50  ;;  %6252 = vmatprep.subr.bf16.mxu0 %v9954_v38  ;;  %v4477_v38 = vld [vmem:[#allocation2 + $0xf0] sm:$0xff] }
0x103b   :  { %6720 = vmatprep.subr.bf16.mxu1 %v10091_v30 }
0x103d   :  { %6253 = vmatpush3.bf16.msra.mxu0 %v9906_v23  ;;  %v4465_v23 = vld [vmem:[#allocation2 + $0x90] sm:$0xff] }
0x103e   :  { %6721 = vmatpush3.bf16.msra.mxu1 %v10091_v30  ;;  %6254 = vmatprep.subr.bf16.mxu0 %v9960_v58 }
0x103f   :  { %6722 = vmatprep.subr.bf16.mxu1 %v10097_v11 }
0x1041   :  { %6255 = vmatpush3.bf16.msra.mxu0 %v9912_v29  ;;  %v4467_v29 = vld [vmem:[#allocation2 + $0xa0] sm:$0xff] }
0x1042   :  { %6723 = vmatpush3.bf16.msra.mxu1 %v10097_v11  ;;  %6256 = vmatprep.subr.bf16.mxu0 %v9966_v44  ;;  %v4473_v44 = vld [vmem:[#allocation2 + $0xd0] sm:$0xff]  ;;  %v11479_v11 = vmax.f32 %v9793_v42, 0.0 }
0x1043   :  { %6724 = vmatprep.subr.bf16.mxu1 %v10103_v10 }
0x1045   :  { %6257 = vmatpush3.bf16.msra.mxu0 %v9918_v16  ;;  %v4471_v16 = vld [vmem:[#allocation2 + $0xc0] sm:$0xff] }
0x1046   :  { %6725 = vmatpush3.bf16.msra.mxu1 %v10103_v10 }
0x1047   :  { %6742 = vmatprep.subr.bf16.mxu1 %v10109_v13 }
0x1048   :  { %4512 = vmatmul.mubr.bf16.vlgmr.msra.gmra.mrb[160].mxu0 %v4463_v59 }
0x1049   :  { %4519 = vmatprep.mubr.bf16.mxu0 %v4466_v32 }
0x1050   :  { %4520 = vmatmul.mubr.bf16.gmra.mrb[164].mxu0 %v4465_v23 }
0x1051   :  { %4527 = vmatprep.mubr.bf16.mxu0 %v4468_v37 }
0x1058   :  { %4528 = vmatmul.mubr.bf16.gmra.mrb[168].mxu0 %v4467_v29  ;;  %v11487_v29 = vmax.f32 %v11486_v63, 0.0 }
0x1059   :  { %4535 = vmatprep.mubr.bf16.mxu0 %v4470_v52 }
0x1060   :  { %4536 = vmatmul.mubr.bf16.gmra.mrb[172].mxu0 %v4469_v35  ;;  %v11488_v35 = vld [vmem:[#allocation44_spill] sm:$0xff] }
0x1061   :  { %4543 = vmatprep.mubr.bf16.mxu0 %v4472_v14  ;;  %v11489_v14 = vmax.f32 %v11488_v35, 0.0 }
0x1068   :  { %4544 = vmatmul.mubr.bf16.gmra.mrb[176].mxu0 %v4471_v16 }
0x1069   :  { %4551 = vmatprep.mubr.bf16.mxu0 %v4474_v60 }
0x1070   :  { %4552 = vmatmul.mubr.bf16.gmra.mrb[180].mxu0 %v4473_v44 }
0x1071   :  { %4559 = vmatprep.mubr.bf16.mxu0 %v4476_v25 }
0x1078   :  { %4560 = vmatmul.mubr.bf16.gmra.mrb[184].mxu0 %v4475_v47 }
0x1079   :  { %4567 = vmatprep.mubr.bf16.mxu0 %v4478_v40 }
0x1080   :  { %4568 = vmatmul.mubr.bf16.gmra.mrb[188].mxu0 %v4477_v38  ;;  %v11490_v38 = vld [vmem:[#allocation76_spill] sm:$0xff] }
0x111b   :  { %v6258_v58 = vpop.f32.mrb[160].mxu0 }
0x111c   :  { %v6259_v8 = vpop.f32.mrb[161].mxu0 }
0x111d   :  { %v6260_v51 = vadd.f32 %v6259_v8, %v6258_v58  ;;  %v6261_v43 = vpop.f32.mrb[162].mxu0  ;;  %v11491_v58 = vmax.f32 %v11490_v38, 0.0 }
0x111e   :  { %v6262_v50 = vpop.f32.mrb[163].mxu0 }
0x111f   :  { %v6263_v30 = vadd.f32 %v6262_v50, %v6261_v43  ;;  %v4576_v10 = vadd.f32 %v6260_v51, %v11479_v11  ;;  %v11492_v51 = vld [vmem:[#allocation78_spill] sm:$0xff] }
0x1120   :  { %v11493_v43 = vmax.f32 %v11492_v51, 0.0 }
0x1121   :  { %v4577_v7 = vadd.f32 %v6263_v30, %v11480_v28 }
0x1123   :  { %v6264_v9 = vpop.f32.mrb[164].mxu0  ;;  %v4592_v61 = vpack.c.bf16 %v4577_v7, %v4576_v10 }
0x1124   :  { %v6265_v1 = vpop.f32.mrb[165].mxu0 }
0x1125   :  { %v6266_v56 = vadd.f32 %v6265_v1, %v6264_v9  ;;  %v6267_v0 = vpop.f32.mrb[166].mxu0  ;;  %6726 = vmatprep.mubr.bf16.mxu1 %v4592_v61  ;;  %v11494_v9 = vld [vmem:[#allocation51_spill] sm:$0xff] }
0x1126   :  { %v6268_v31 = vpop.f32.mrb[167].mxu0  ;;  %v11495_v61 = vmax.f32 %v11494_v9, 0.0 }
0x1127   :  { %v6269_v49 = vadd.f32 %v6268_v31, %v6267_v0  ;;  %v4578_v12 = vadd.f32 %v6266_v56, %v11481_v22  ;;  %v11496_v56 = vld [vmem:[#allocation53_spill] sm:$0xff] }
0x1128   :  { %v11497_v0 = vmax.f32 %v11496_v56, 0.0 }
0x1129   :  { %v4579_v6 = vadd.f32 %v6269_v49, %v11482_v41 }
0x112b   :  { %v4593_v53 = vpack.c.bf16 %v4579_v6, %v4578_v12  ;;  %v6270_v42 = vpop.f32.mrb[168].mxu0 }
0x112c   :  { %v6271_v4 = vpop.f32.mrb[169].mxu0 }
0x112d   :  { %v6272_v45 = vadd.f32 %v6271_v4, %v6270_v42  ;;  %v6273_v39 = vpop.f32.mrb[170].mxu0  ;;  %6727 = vmatmul.mubr.bf16.vlgmr.msra.gmra.mrb[160].mxu1 %v4593_v53 }
0x112e   :  { %v6274_v48 = vpop.f32.mrb[171].mxu0  ;;  %6743 = vmatpush3.bf16.msra.mxu1 %v10109_v13 }
0x112f   :  { %v6275_v36 = vadd.f32 %v6274_v48, %v6273_v39  ;;  %6744 = vmatprep.subr.bf16.mxu1 %v10122_v15  ;;  %v4580_v17 = vadd.f32 %v6272_v45, %v11483_v55  ;;  %v11500_v45 = vld [vmem:[#allocation50_spill] sm:$0xff] }
0x1130   :  { %v11501_v39 = vmax.f32 %v11500_v45, 0.0 }
0x1131   :  { %v4581_v2 = vadd.f32 %v6275_v36, %v11485_v5 }
0x1132   :  { %6745 = vmatpush3.bf16.msra.mxu1 %v10122_v15 }
0x1133   :  { %v4594_v34 = vpack.c.bf16 %v4581_v2, %v4580_v17  ;;  %v6276_v33 = vpop.f32.mrb[172].mxu0  ;;  %6746 = vmatprep.subr.bf16.mxu1 %v10128_v19 }
0x1134   :  { %v6277_v59 = vpop.f32.mrb[173].mxu0 }
0x1135   :  { %v6278_v32 = vadd.f32 %v6277_v59, %v6276_v33  ;;  %v6279_v23 = vpop.f32.mrb[174].mxu0  ;;  %6730 = vmatprep.mubr.bf16.mxu1 %v4594_v34  ;;  %v11502_v34 = vld [vmem:[#allocation60_spill] sm:$0xff] }
0x1136   :  { %v6280_v13 = vpop.f32.mrb[175].mxu0  ;;  %6747 = vmatpush3.bf16.msra.mxu1 %v10128_v19  ;;  %v11503_v33 = vmax.f32 %v11502_v34, 0.0 }
0x1137   :  { %v6281_v37 = vadd.f32 %v6280_v13, %v6279_v23  ;;  %6748 = vmatprep.subr.bf16.mxu1 %v10138_v46  ;;  %v4582_v52 = vadd.f32 %v6278_v32, %v11487_v29  ;;  %v11504_v32 = vld [vmem:[#allocation62_spill] sm:$0xff] }
0x1138   :  { %v11505_v23 = vmax.f32 %v11504_v32, 0.0 }
0x1139   :  { %v4583_v15 = vadd.f32 %v6281_v37, %v11489_v14 }
0x113a   :  { %6749 = vmatpush3.bf16.msra.mxu1 %v10138_v46 }
0x113b   :  { %v4595_v16 = vpack.c.bf16 %v4583_v15, %v4582_v52  ;;  %v6282_v60 = vpop.f32.mrb[176].mxu0  ;;  %6750 = vmatprep.subr.bf16.mxu1 %v10144_v62 }
0x113c   :  { %v6283_v44 = vpop.f32.mrb[177].mxu0 }
0x113d   :  { %v6284_v25 = vadd.f32 %v6283_v44, %v6282_v60  ;;  %v6285_v47 = vpop.f32.mrb[178].mxu0  ;;  %6731 = vmatmul.mubr.bf16.gmra.mrb[164].mxu1 %v4595_v16 }
0x113e   :  { %v6286_v19 = vpop.f32.mrb[179].mxu0  ;;  %6751 = vmatpush3.bf16.msra.mxu1 %v10144_v62 }
0x113f   :  { %v6287_v40 = vadd.f32 %v6286_v19, %v6285_v47  ;;  %6752 = vmatprep.subr.bf16.mxu1 %v10154_v24  ;;  %v4584_v8 = vadd.f32 %v6284_v25, %v11491_v58 }
0x1141   :  { %v4585_v46 = vadd.f32 %v6287_v40, %v11493_v43 }
0x1142   :  { %6753 = vmatpush3.bf16.msra.mxu1 %v10154_v24 }
0x1143   :  { %v4596_v50 = vpack.c.bf16 %v4585_v46, %v4584_v8  ;;  %v6288_v30 = vpop.f32.mrb[180].mxu0  ;;  %6754 = vmatprep.subr.bf16.mxu1 %v10177_v18 }
0x1144   :  { %v6289_v11 = vpop.f32.mrb[181].mxu0 }
0x1145   :  { %v6290_v10 = vadd.f32 %v6289_v11, %v6288_v30  ;;  %v6291_v28 = vpop.f32.mrb[182].mxu0  ;;  %6734 = vmatprep.mubr.bf16.mxu1 %v4596_v50 }
0x1146   :  { %v6292_v62 = vpop.f32.mrb[183].mxu0  ;;  %6755 = vmatpush3.bf16.msra.mxu1 %v10177_v18  ;;  %v11498_v18 = vld [vmem:[#allocation43_spill] sm:$0xff] }
0x1147   :  { %v6293_v7 = vadd.f32 %v6292_v62, %v6291_v28  ;;  %6756 = vmatprep.subr.bf16.mxu1 %v10183_v21  ;;  %v4586_v1 = vadd.f32 %v6290_v10, %v11495_v61  ;;  %v11499_v42 = vmax.f32 %v11498_v18, 0.0 }
0x1149   :  { %v4587_v24 = vadd.f32 %v6293_v7, %v11497_v0 }
0x114a   :  { %6757 = vmatpush3.bf16.msra.mxu1 %v10183_v21 }
0x114b   :  { %v4597_v31 = vpack.c.bf16 %v4587_v24, %v4586_v1  ;;  %v6294_v49 = vpop.f32.mrb[184].mxu0 }
0x114c   :  { %v6295_v22 = vpop.f32.mrb[185].mxu0 }
0x114d   :  { %v6296_v12 = vadd.f32 %v6295_v22, %v6294_v49  ;;  %v6297_v41 = vpop.f32.mrb[186].mxu0  ;;  %6735 = vmatmul.mubr.bf16.gmra.mrb[168].mxu1 %v4597_v31 }
0x114e   :  { %v6298_v6 = vpop.f32.mrb[187].mxu0 }
0x114f   :  { %v6299_v53 = vadd.f32 %v6298_v6, %v6297_v41  ;;  %v4588_v4 = vadd.f32 %v6296_v12, %v11499_v42 }
0x1151   :  { %v4589_v48 = vadd.f32 %v6299_v53, %v11501_v39 }
0x1153   :  { %v4598_v36 = vpack.c.bf16 %v4589_v48, %v4588_v4  ;;  %v6300_v55 = vpop.f32.mrb[188].mxu0 }
0x1154   :  { %v6301_v17 = vpop.f32.mrb[189].mxu0 }
0x1155   :  { %v6302_v26 = vadd.f32 %v6301_v17, %v6300_v55  ;;  %v6303_v5 = vpop.f32.mrb[190].mxu0  ;;  %6738 = vmatprep.mubr.bf16.mxu1 %v4598_v36 }
0x1156   :  { %v6304_v21 = vpop.f32.mrb[191].mxu0 }
0x1157   :  { %v6305_v2 = vadd.f32 %v6304_v21, %v6303_v5  ;;  %v4590_v59 = vadd.f32 %v6302_v26, %v11503_v33 }
0x1159   :  { %v4591_v13 = vadd.f32 %v6305_v2, %v11505_v23 }
0x115b   :  { %v4599_v37 = vpack.c.bf16 %v4591_v13, %v4590_v59  ;;  %v11506_v13 = vld [vmem:[#allocation52_spill] sm:$0xff] }
0x115d   :  { %6739 = vmatmul.mubr.bf16.gmra.mrb[172].mxu1 %v4599_v37 }
0x1200   :  { %v6728_v63 = vpop.f32.mrb[160].mxu1 }
0x1201   :  { %v4643_v29 = vadd.f32 %v6728_v63, %v10189_v57  ;;  %v4634_v52 = vpop.f32.mrb[161].mxu1 }
0x1202   :  { %v4635_v35 = vadd.f32 %v4634_v52, %v10189_v57  ;;  %v6729_v14 = vpop.f32.mrb[162].mxu1 }
0x1203   :  { %v4646_v15 = vadd.f32 %v6729_v14, %v10189_v57  ;;  %v4637_v16 = vpop.f32.mrb[163].mxu1  ;;  %v4699_v44 = vmax.f32 %v4643_v29, 0.0 }
0x1204   :  { %v4638_v60 = vadd.f32 %v4637_v16, %v10189_v57  ;;  %v4697_v47 = vmax.f32 %v4635_v35, 0.0 }
0x1205   :  { %v4700_v25 = vmax.f32 %v4646_v15, 0.0 }
0x1206   :  { %v4698_v19 = vmax.f32 %v4638_v60, 0.0  ;;  %v11507_v60 = vld [vmem:[#allocation42_spill] sm:$0xff] }
0x1207   :  { %v4714_v40 = vpack.c.bf16 %v4700_v25, %v4699_v44 }
0x1208   :  { %v4713_v38 = vpack.c.bf16 %v4698_v19, %v4697_v47  ;;  %v11508_v19 = vld [vmem:[#allocation47_spill] sm:$0xff] }
0x120a   :  { %6758 = vmatprep.mubr.bf16.mxu1 %v4713_v38  ;;  %v11509_v38 = vld [vmem:[#allocation46_spill] sm:$0xff] }
0x120b   :  { %6759 = vmatmul.mubr.bf16.vlgmr.msra.gmra.mrb[176].mxu1 %v4714_v40 }
0x1210   :  { %v6732_v58 = vpop.f32.mrb[164].mxu1 }
0x1211   :  { %v4659_v8 = vadd.f32 %v6732_v58, %v10189_v57  ;;  %v4650_v51 = vpop.f32.mrb[165].mxu1 }
0x1212   :  { %v4651_v43 = vadd.f32 %v4650_v51, %v10189_v57  ;;  %v6733_v46 = vpop.f32.mrb[166].mxu1  ;;  %v11510_v51 = vld [vmem:[#allocation48_spill] sm:$0xff] }
0x1213   :  { %v4662_v50 = vadd.f32 %v6733_v46, %v10189_v57  ;;  %v4653_v30 = vpop.f32.mrb[167].mxu1  ;;  %v4703_v10 = vmax.f32 %v4659_v8, 0.0 }
0x1214   :  { %v4654_v11 = vadd.f32 %v4653_v30, %v10189_v57  ;;  %v4701_v62 = vmax.f32 %v4651_v43, 0.0  ;;  %v5133_v30 = vld [vmem:[%s10810_s3 + $0x8] sm:$0xff] }
0x1215   :  { %v4704_v28 = vmax.f32 %v4662_v50, 0.0  ;;  %5198 = vmatprep.mubr.f32.mxu0 %v5133_v30  ;;  %v5214_v30 = vld [vmem:[%s10813_s6 + $0x50] sm:$0xff] }
0x1216   :  { %v4702_v7 = vmax.f32 %v4654_v11, 0.0 }
0x1217   :  { %v4716_v9 = vpack.c.bf16 %v4704_v28, %v4703_v10 }
0x1218   :  { %v4715_v61 = vpack.c.bf16 %v4702_v7, %v4701_v62 }
0x121a   :  { %6762 = vmatprep.mubr.bf16.mxu1 %v4715_v61  ;;  %v5204_v61 = vld [vmem:[%s10813_s6] sm:$0xff] }
0x121b   :  { %6763 = vmatmul.mubr.bf16.gmra.mrb[180].mxu1 %v4716_v9 }
0x1220   :  { %v6736_v1 = vpop.f32.mrb[168].mxu1 }
0x1221   :  { %v4675_v56 = vadd.f32 %v6736_v1, %v10189_v57  ;;  %v4666_v0 = vpop.f32.mrb[169].mxu1  ;;  %v5205_v1 = vld [vmem:[%s10813_s6 + $0x8] sm:$0xff] }
0x1222   :  { %v4667_v24 = vadd.f32 %v4666_v0, %v10189_v57  ;;  %v6737_v31 = vpop.f32.mrb[170].mxu1  ;;  %v6891_v0 = vmov 0.0|0.0  }
0x1223   :  { %v4678_v49 = vadd.f32 %v6737_v31, %v10189_v57  ;;  %v4669_v22 = vpop.f32.mrb[171].mxu1  ;;  %v4707_v41 = vmax.f32 %v4675_v56, 0.0  ;;  %v5206_v56 = vld [vmem:[%s10813_s6 + $0x10] sm:$0xff]  ;;  %6841 = vmatprep.subr.bf16.mxu1 %v6891_v0  ;;  %v5207_v31 = vld [vmem:[%s10813_s6 + $0x18] sm:$0xff] }
0x1224   :  { %v4670_v12 = vadd.f32 %v4669_v22, %v10189_v57  ;;  %v4705_v53 = vmax.f32 %v4667_v24, 0.0  ;;  %v6842_v24 = vpack.c.bf16 %v5205_v1, %v5204_v61 }
0x1225   :  { %v4708_v6 = vmax.f32 %v4678_v49, 0.0 }
0x1226   :  { %v4706_v18 = vmax.f32 %v4670_v12, 0.0  ;;  %6843 = vmatpush3.bf16.msra.mxu1 %v6842_v24  ;;  %v5217_v24 = vld [vmem:[%s10813_s6 + $0x68] sm:$0xff] }
0x1227   :  { %v4718_v42 = vpack.c.bf16 %v4708_v6, %v4707_v41  ;;  %v6845_v6 = vpack.c.bf16 %v5207_v31, %v5206_v56  ;;  %6844 = vmatprep.subr.bf16.mxu1 %v6891_v0  ;;  %v5216_v56 = vld [vmem:[%s10813_s6 + $0x60] sm:$0xff] }
0x1228   :  { %v4717_v4 = vpack.c.bf16 %v4706_v18, %v4705_v53 }
0x122a   :  { %6766 = vmatprep.mubr.bf16.mxu1 %v4717_v4  ;;  %v5209_v4 = vld [vmem:[%s10813_s6 + $0x28] sm:$0xff]  ;;  %6846 = vmatpush3.bf16.msra.mxu1 %v6845_v6  ;;  %v6860_v6 = vpack.c.bf16 %v5217_v24, %v5216_v56 }
0x122b   :  { %6767 = vmatmul.mubr.bf16.gmra.mrb[184].mxu1 %v4718_v42  ;;  %v5208_v42 = vld [vmem:[%s10813_s6 + $0x20] sm:$0xff]  ;;  %6847 = vmatprep.subr.bf16.mxu1 %v6891_v0  ;;  %v11522_v56 = vld [vmem:[#allocation71_spill] sm:$0xff] }
0x1230   :  { %v6740_v45 = vpop.f32.mrb[172].mxu1 }
0x1231   :  { %v4691_v39 = vadd.f32 %v6740_v45, %v10189_v57  ;;  %v4682_v48 = vpop.f32.mrb[173].mxu1 }
0x1232   :  { %v4683_v36 = vadd.f32 %v4682_v48, %v10189_v57  ;;  %v6741_v55 = vpop.f32.mrb[174].mxu1 }
0x1233   :  { %v4694_v17 = vadd.f32 %v6741_v55, %v10189_v57  ;;  %v4685_v26 = vpop.f32.mrb[175].mxu1  ;;  %v4711_v21 = vmax.f32 %v4691_v39, 0.0 }
0x1234   :  { %v4686_v5 = vadd.f32 %v4685_v26, %v10189_v57  ;;  %v4709_v34 = vmax.f32 %v4683_v36, 0.0  ;;  %v11511_v26 = vld [vmem:[#allocation49_spill] sm:$0xff] }
0x1235   :  { %v4712_v2 = vmax.f32 %v4694_v17, 0.0  ;;  %v6848_v17 = vpack.c.bf16 %v5209_v4, %v5208_v42 }
0x1236   :  { %v4710_v33 = vmax.f32 %v4686_v5, 0.0 }
0x1237   :  { %v4720_v59 = vpack.c.bf16 %v4712_v2, %v4711_v21  ;;  %6849 = vmatpush3.bf16.msra.mxu1 %v6848_v17 }
0x1238   :  { %v4719_v32 = vpack.c.bf16 %v4710_v33, %v4709_v34  ;;  %v5210_v34 = vld [vmem:[%s10813_s6 + $0x30] sm:$0xff]  ;;  %v5211_v33 = vld [vmem:[%s10813_s6 + $0x38] sm:$0xff]  ;;  %6850 = vmatprep.subr.bf16.mxu1 %v6891_v0 }
0x123a   :  { %6770 = vmatprep.mubr.bf16.mxu1 %v4719_v32 }
0x123b   :  { %6771 = vmatmul.mubr.bf16.gmra.mrb[188].mxu1 %v4720_v59  ;;  %v11512_v59 = vld [vmem:[#allocation56_spill] sm:$0xff] }
0x12de   :  { %v6760_v23 = vpop.f32.mrb[176].mxu1 }
0x12df   :  { %v4764_v37 = vadd.f32 %v6760_v23, %v11506_v13  ;;  %v4755_v63 = vpop.f32.mrb[177].mxu1 }
0x12e0   :  { %v4756_v29 = vadd.f32 %v4755_v63, %v11506_v13  ;;  %v6761_v52 = vpop.f32.mrb[178].mxu1  ;;  %v11513_v63 = vld [vmem:[#allocation55_spill] sm:$0xff] }
0x12e1   :  { %v4767_v35 = vadd.f32 %v6761_v52, %v11506_v13  ;;  %v4758_v14 = vpop.f32.mrb[179].mxu1  ;;  %v10410_v15 = vmax.f32 %v4764_v37, 0.0  ;;  %v6851_v52 = vpack.c.bf16 %v5211_v33, %v5210_v34  ;;  %v11518_v33 = vld [vmem:[#allocation67_spill] sm:$0xff] }
0x12e2   :  { %v10412_v57 = vmax.f32 %v4756_v29, 0.0  ;;  %v4759_v16 = vadd.f32 %v4758_v14, %v11506_v13  ;;  %v11514_v14 = vld [vmem:[#allocation57_spill] sm:$0xff] }
0x12e3   :  { %v10417_v25 = vmax.f32 %v4767_v35, 0.0  ;;  %v4852_v40 = vmul.f32 %v11508_v19, %v10410_v15  ;;  %v5212_v19 = vld [vmem:[%s10813_s6 + $0x40] sm:$0xff]  ;;  %6852 = vmatpush3.bf16.msra.mxu1 %v6851_v52 }
0x12e4   :  { %v4850_v44 = vmul.f32 %v11507_v60, %v10412_v57  ;;  %v10419_v47 = vmax.f32 %v4759_v16, 0.0  ;;  %6853 = vmatprep.subr.bf16.mxu1 %v6891_v0 }
0x12e5   :  { %v4853_v43 = vmul.f32 %v11510_v51, %v10417_v25  ;;  %v4890_v11 = vmul.f32 %v4852_v40, %v10410_v15 }
0x12e6   :  { %v4851_v58 = vmul.f32 %v11509_v38, %v10419_v47  ;;  %v4888_v8 = vmul.f32 %v4850_v44, %v10412_v57 }
0x12e7   :  { %v4891_v62 = vmul.f32 %v4853_v43, %v10417_v25 }
0x12e8   :  { %v4866_v46 = vadd.f32 %v4851_v58, %v4850_v44  ;;  %v4889_v50 = vmul.f32 %v4851_v58, %v10419_v47 }
0x12ea   :  { %v4867_v10 = vadd.f32 %v4866_v46, %v4852_v40  ;;  %v4904_v28 = vadd.f32 %v4889_v50, %v4888_v8  ;;  %v5213_v40 = vld [vmem:[%s10813_s6 + $0x48] sm:$0xff] }
0x12eb   :  { %v6854_v51 = vpack.c.bf16 %v5213_v40, %v5212_v19 }
0x12ec   :  { %v4905_v7 = vadd.f32 %v4904_v28, %v4890_v11  ;;  %v4868_v9 = vadd.f32 %v4867_v10, %v4853_v43  ;;  %v5215_v11 = vld [vmem:[%s10813_s6 + $0x58] sm:$0xff] }
0x12ed   :  { %6855 = vmatpush3.bf16.msra.mxu1 %v6854_v51 }
0x12ee   :  { %v6764_v49 = vpop.f32.mrb[180].mxu1  ;;  %v4906_v22 = vadd.f32 %v4905_v7, %v4891_v62  ;;  %6856 = vmatprep.subr.bf16.mxu1 %v6891_v0 }
0x12ef   :  { %v4780_v12 = vadd.f32 %v6764_v49, %v11506_v13  ;;  %v4771_v41 = vpop.f32.mrb[181].mxu1 }
0x12f0   :  { %v4772_v53 = vadd.f32 %v4771_v41, %v11506_v13  ;;  %v6765_v18 = vpop.f32.mrb[182].mxu1 }
0x12f1   :  { %v4783_v45 = vadd.f32 %v6765_v18, %v11506_v13  ;;  %v4774_v39 = vpop.f32.mrb[183].mxu1  ;;  %v10457_v48 = vmax.f32 %v4780_v12, 0.0 }
0x12f2   :  { %v10459_v36 = vmax.f32 %v4772_v53, 0.0  ;;  %v4775_v55 = vadd.f32 %v4774_v39, %v11506_v13  ;;  %v11515_v53 = vld [vmem:[#allocation58_spill] sm:$0xff] }
0x12f3   :  { %v10464_v21 = vmax.f32 %v4783_v45, 0.0  ;;  %v4856_v32 = vmul.f32 %v11512_v59, %v10457_v48  ;;  %v11516_v45 = vld [vmem:[#allocation66_spill] sm:$0xff] }
0x12f4   :  { %v4854_v5 = vmul.f32 %v11511_v26, %v10459_v36  ;;  %v10466_v2 = vmax.f32 %v4775_v55, 0.0  ;;  %v11517_v26 = vld [vmem:[#allocation65_spill] sm:$0xff] }
0x12f5   :  { %v4857_v16 = vmul.f32 %v11514_v14, %v10464_v21  ;;  %v4894_v38 = vmul.f32 %v4856_v32, %v10457_v48 }
0x12f6   :  { %v4869_v23 = vadd.f32 %v4868_v9, %v4854_v5  ;;  %v4892_v37 = vmul.f32 %v4854_v5, %v10459_v36  ;;  %v4855_v29 = vmul.f32 %v11513_v63, %v10466_v2  ;;  %v6857_v9 = vpack.c.bf16 %v5215_v11, %v5214_v30 }
0x12f7   :  { %v4895_v43 = vmul.f32 %v4857_v16, %v10464_v21 }
0x12f8   :  { %v4907_v35 = vadd.f32 %v4906_v22, %v4892_v37  ;;  %v4870_v60 = vadd.f32 %v4869_v23, %v4855_v29  ;;  %v4893_v44 = vmul.f32 %v4855_v29, %v10466_v2  ;;  %6858 = vmatpush3.bf16.msra.mxu1 %v6857_v9  ;;  %v11521_v9 = vld [vmem:[#allocation69_spill] sm:$0xff] }
0x12f9   :  { %6859 = vmatprep.subr.bf16.mxu1 %v6891_v0 }
0x12fa   :  { %v4871_v58 = vadd.f32 %v4870_v60, %v4856_v32  ;;  %v4908_v8 = vadd.f32 %v4907_v35, %v4893_v44 }
0x12fc   :  { %v4909_v46 = vadd.f32 %v4908_v8, %v4894_v38  ;;  %v4872_v50 = vadd.f32 %v4871_v58, %v4857_v16  ;;  %6861 = vmatpush3.bf16.msra.mxu1 %v6860_v6 }
0x12fd   :  { %6862 = vmatprep.subr.bf16.mxu1 %v6891_v0 }
0x12fe   :  { %v6768_v10 = vpop.f32.mrb[184].mxu1  ;;  %v4910_v28 = vadd.f32 %v4909_v46, %v4895_v43  ;;  %v11519_v46 = vld [vmem:[#allocation68_spill] sm:$0xff] }
0x12ff   :  { %v4796_v62 = vadd.f32 %v6768_v10, %v11506_v13  ;;  %v4787_v7 = vpop.f32.mrb[185].mxu1  ;;  %v11520_v10 = vld [vmem:[#allocation70_spill] sm:$0xff] }
0x1300   :  { %v4788_v61 = vadd.f32 %v4787_v7, %v11506_v13  ;;  %v6769_v1 = vpop.f32.mrb[186].mxu1 }
0x1301   :  { %v4799_v31 = vadd.f32 %v6769_v1, %v11506_v13  ;;  %v4790_v49 = vpop.f32.mrb[187].mxu1  ;;  %v10509_v22 = vmax.f32 %v4796_v62, 0.0 }
0x1302   :  { %v10511_v12 = vmax.f32 %v4788_v61, 0.0  ;;  %v4791_v41 = vadd.f32 %v4790_v49, %v11506_v13 }
0x1303   :  { %v10516_v42 = vmax.f32 %v4799_v31, 0.0  ;;  %v4860_v39 = vmul.f32 %v11516_v45, %v10509_v22 }
0x1304   :  { %v4858_v18 = vmul.f32 %v11515_v53, %v10511_v12  ;;  %v10518_v4 = vmax.f32 %v4791_v41, 0.0 }
0x1305   :  { %v4861_v59 = vmul.f32 %v11518_v33, %v10516_v42  ;;  %v4898_v37 = vmul.f32 %v4860_v39, %v10509_v22 }
0x1306   :  { %v4873_v55 = vadd.f32 %v4872_v50, %v4858_v18  ;;  %v4896_v17 = vmul.f32 %v4858_v18, %v10511_v12  ;;  %v4859_v5 = vmul.f32 %v11517_v26, %v10518_v4 }
0x1307   :  { %v4899_v52 = vmul.f32 %v4861_v59, %v10516_v42 }
0x1308   :  { %v4911_v34 = vadd.f32 %v4910_v28, %v4896_v17  ;;  %v4874_v32 = vadd.f32 %v4873_v55, %v4859_v5  ;;  %v4897_v23 = vmul.f32 %v4859_v5, %v10518_v4 }
0x130a   :  { %v4875_v63 = vadd.f32 %v4874_v32, %v4860_v39  ;;  %v4912_v29 = vadd.f32 %v4911_v34, %v4897_v23 }
0x130c   :  { %v4913_v35 = vadd.f32 %v4912_v29, %v4898_v37  ;;  %v4876_v14 = vadd.f32 %v4875_v63, %v4861_v59 }
0x130e   :  { %v6772_v16 = vpop.f32.mrb[188].mxu1  ;;  %v4914_v60 = vadd.f32 %v4913_v35, %v4899_v52 }
0x130f   :  { %v4812_v44 = vadd.f32 %v6772_v16, %v11506_v13  ;;  %v4803_v19 = vpop.f32.mrb[189].mxu1 }
0x1310   :  { %v4804_v40 = vadd.f32 %v4803_v19, %v11506_v13  ;;  %v6773_v38 = vpop.f32.mrb[190].mxu1 }
0x1311   :  { %v4815_v58 = vadd.f32 %v6773_v38, %v11506_v13  ;;  %v4806_v8 = vpop.f32.mrb[191].mxu1  ;;  %v10535_v0 = vmax.f32 %v4812_v44, 0.0 }
0x1312   :  { %v10537_v51 = vmax.f32 %v4804_v40, 0.0  ;;  %v4807_v43 = vadd.f32 %v4806_v8, %v11506_v13 }
0x1313   :  { %v10542_v30 = vmax.f32 %v4815_v58, 0.0  ;;  %v4864_v28 = vmul.f32 %v11520_v10, %v10535_v0  ;;  %v11526_v10 = vld [vmem:[#allocation94_spill] sm:$0xff] }
0x1314   :  { %v4862_v50 = vmul.f32 %v11519_v46, %v10537_v51  ;;  %v10544_v11 = vmax.f32 %v4807_v43, 0.0 }
0x1315   :  { %v4865_v13 = vmul.f32 %v11522_v56, %v10542_v30  ;;  %v4902_v49 = vmul.f32 %v4864_v28, %v10535_v0  ;;  %v11532_v56 = vld [vmem:[#allocation85_spill] sm:$0xff] }
0x1316   :  { %v4877_v62 = vadd.f32 %v4876_v14, %v4862_v50  ;;  %v4900_v7 = vmul.f32 %v4862_v50, %v10537_v51  ;;  %v4863_v61 = vmul.f32 %v11521_v9, %v10544_v11  ;;  %v11523_v14 = vld [vmem:[#allocation93_spill] sm:$0xff] }
0x1317   :  { %v4903_v53 = vmul.f32 %v4865_v13, %v10542_v30 }
0x1318   :  { %v4915_v1 = vadd.f32 %v4914_v60, %v4900_v7  ;;  %v4878_v24 = vadd.f32 %v4877_v62, %v4863_v61  ;;  %v4901_v31 = vmul.f32 %v4863_v61, %v10544_v11  ;;  %v11531_v61 = vld [vmem:[#allocation83_spill] sm:$0xff] }
0x131a   :  { %v4879_v41 = vadd.f32 %v4878_v24, %v4864_v28  ;;  %v4916_v6 = vadd.f32 %v4915_v1, %v4901_v31  ;;  %v11533_v24 = vld [vmem:[#allocation63_spill] sm:$0xff] }
0x131c   :  { %v4880_v18 = vadd.f32 %v4879_v41, %v4865_v13  ;;  %v4917_v45 = vadd.f32 %v4916_v6, %v4902_v49  ;;  %v11534_v49 = vld [vmem:[#allocation80_spill] sm:$0xff] }
0x131d   :  { %v11535_v6 = vld [vmem:[#allocation88_spill] sm:$0xff] }
0x131e   :  { %v4881_v39 = vrot.slane %v4880_v18, 4  ;;  %v4918_v55 = vadd.f32 %v4917_v45, %v4903_v53 }
0x1320   :  { %v4882_v17 = vadd.f32 %v4881_v39, %v4880_v18  ;;  %v4919_v26 = vrot.slane %v4918_v55, 4  ;;  %v11536_v18 = vld [vmem:[#allocation90_spill] sm:$0xff] }
0x1321   :  { %v11537_v39 = vld [vmem:[#allocation82_spill] sm:$0xff] }
0x1322   :  { %v4883_v5 = vrot.slane %v4882_v17, 2  ;;  %v4920_v34 = vadd.f32 %v4919_v26, %v4918_v55 }
0x1324   :  { %v4884_v33 = vadd.f32 %v4883_v5, %v4882_v17  ;;  %v4921_v59 = vrot.slane %v4920_v34, 2  ;;  %v11538_v17 = vld [vmem:[#allocation84_spill] sm:$0xff] }
0x1326   :  { %v4885_v32 = vrot.slane %v4884_v33, 1  ;;  %v4922_v23 = vadd.f32 %v4921_v59, %v4920_v34  ;;  %v11539_v34 = vld [vmem:[#allocation92_spill] sm:$0xff] }
0x1328   :  { %v4886_v37 = vadd.f32 %v4885_v32, %v4884_v33  ;;  %v4923_v63 = vrot.slane %v4922_v23, 1  ;;  %v11540_v32 = vld [vmem:[#allocation87_spill] sm:$0xff] }
0x132a   :  { %v4887_v29 = vadd.f32 %v4886_v37, %v10307_v20  ;;  %v4924_v52 = vadd.f32 %v4923_v63, %v4922_v23 }
0x132c   :  { %v4925_v35 = vadd.f32 %v4924_v52, %v10309_v3  ;;  %v10559_v16 = vmul.f32 %v4887_v29, %v11523_v14 }
0x132e   :  { %v4927_v60 = vmul.f32 %v4925_v35, %v11523_v14  ;;  %v4928_v44 = vmul.f32 %v10559_v16, %v10559_v16  ;;  %v4991_v19 = vsub.f32 %v10544_v11, %v10559_v16  ;;  %v4978_v40 = vsub.f32 %v10412_v57, %v10559_v16  ;;  %v11525_v11 = vld [vmem:[#allocation21_spill] sm:$0xff] }
0x132f   :  { %v4979_v20 = vsub.f32 %v10419_v47, %v10559_v16  ;;  %v4980_v3 = vsub.f32 %v10410_v15, %v10559_v16  ;;  %v4981_v38 = vsub.f32 %v10417_v25, %v10559_v16  ;;  %v4982_v58 = vsub.f32 %v10459_v36, %v10559_v16 }
0x1330   :  { %v4929_v8 = vsub.f32 %v4927_v60, %v4928_v44  ;;  %v4983_v43 = vsub.f32 %v10466_v2, %v10559_v16  ;;  %v4984_v46 = vsub.f32 %v10457_v48, %v10559_v16  ;;  %v4985_v57 = vsub.f32 %v10464_v21, %v10559_v16 }
0x1331   :  { %v4986_v47 = vsub.f32 %v10511_v12, %v10559_v16  ;;  %v4987_v15 = vsub.f32 %v10518_v4, %v10559_v16  ;;  %v4988_v25 = vsub.f32 %v10509_v22, %v10559_v16  ;;  %v4989_v36 = vsub.f32 %v10516_v42, %v10559_v16  ;;  %v11524_v12 = vld [vmem:[#allocation19_spill] sm:$0xff]  ;;  %v11527_v42 = vld [vmem:[#allocation72_spill] sm:$0xff] }
0x1332   :  { %v4994_v50 = vadd.f32 1e-05, %v4929_v8  ;;  %v4990_v2 = vsub.f32 %v10537_v51, %v10559_v16  ;;  %v4992_v48 = vsub.f32 %v10535_v0, %v10559_v16  ;;  %v4993_v21 = vsub.f32 %v10542_v30, %v10559_v16  ;;  %v11528_v51 = vld [vmem:[#allocation81_spill] sm:$0xff]  ;;  %v11529_v0 = vld [vmem:[#allocation59_spill] sm:$0xff] }
0x1333   :  { %v10598_v4 = vrot.slane %v11525_v11, %v11524_v12  ;;  %v10602_v22 = vrot.slane %v11525_v11, %v11526_v10  ;;  %v4962_v28 = vsub.f32 %v11527_v42, %v10559_v16  ;;  %v4963_v62 = vsub.f32 %v11528_v51, %v10559_v16  ;;  %v11530_v30 = vld [vmem:[#allocation61_spill] sm:$0xff] }
0x1334   :  { %6876 = vrsqrt.f32 %v4994_v50  ;;  %v4964_v7 = vsub.f32 %v11529_v0, %v10559_v16  ;;  %v4965_v9 = vsub.f32 %v11530_v30, %v10559_v16  ;;  %v4966_v1 = vsub.f32 %v11531_v61, %v10559_v16 }
0x1335   :  { %v4967_v13 = vsub.f32 %v11532_v56, %v10559_v16  ;;  %v4968_v31 = vsub.f32 %v11533_v24, %v10559_v16  ;;  %v4969_v41 = vsub.f32 %v11534_v49, %v10559_v16  ;;  %v4970_v53 = vsub.f32 %v11535_v6, %v10559_v16 }
0x1336   :  { %v4971_v45 = vsub.f32 %v11536_v18, %v10559_v16  ;;  %v4972_v55 = vsub.f32 %v11537_v39, %v10559_v16  ;;  %v4973_v26 = vsub.f32 %v11538_v17, %v10559_v16  ;;  %v4974_v33 = vsub.f32 %v11539_v34, %v10559_v16 }
0x1337   :  { %v4975_v59 = vsub.f32 %v10295_v27, %v10559_v16  ;;  %v4976_v23 = vsub.f32 %v11540_v32, %v10559_v16  ;;  %v4977_v37 = vsub.f32 %v10293_v54, %v10559_v16 }
0x133e   :  { %v10628_v5 = vpop.eup %6876 }
0x133f   :  { %v10639_v63 = vmul.f32 %v10628_v5, %v4991_v19  ;;  %v5012_v29 = vmul.f32 %v10628_v5, %v4978_v40  ;;  %v5013_v52 = vmul.f32 %v10628_v5, %v4979_v20  ;;  %v5014_v35 = vmul.f32 %v10628_v5, %v4980_v3 }
0x1340   :  { %v5015_v14 = vmul.f32 %v10628_v5, %v4981_v38  ;;  %v5016_v60 = vmul.f32 %v10628_v5, %v4982_v58  ;;  %v5017_v44 = vmul.f32 %v10628_v5, %v4983_v43  ;;  %v5018_v8 = vmul.f32 %v10628_v5, %v4984_v46 }
0x1341   :  { %v5019_v50 = vmul.f32 %v10628_v5, %v4985_v57  ;;  %v5020_v12 = vmul.f32 %v10628_v5, %v4986_v47  ;;  %v10651_v19 = vmul.f32 %v10628_v5, %v4987_v15  ;;  %v10654_v40 = vmul.f32 %v10628_v5, %v4988_v25 }
0x1342   :  { %v10657_v20 = vmul.f32 %v10628_v5, %v4989_v36  ;;  %v10660_v3 = vmul.f32 %v10628_v5, %v4990_v2  ;;  %v10663_v38 = vmul.f32 %v10628_v5, %v4992_v48  ;;  %v10666_v58 = vmul.f32 %v10628_v5, %v4993_v21 }
0x1343   :  { %v5048_v43 = vmul.f32 %v10598_v4, %v5012_v29  ;;  %v5049_v46 = vmul.f32 %v10598_v4, %v5013_v52  ;;  %v4996_v57 = vmul.f32 %v10628_v5, %v4962_v28  ;;  %v4997_v47 = vmul.f32 %v10628_v5, %v4963_v62 }
0x1344   :  { %v5050_v15 = vmul.f32 %v10598_v4, %v5014_v35  ;;  %v5051_v25 = vmul.f32 %v10598_v4, %v5015_v14  ;;  %v4998_v36 = vmul.f32 %v10628_v5, %v4964_v7  ;;  %v4999_v2 = vmul.f32 %v10628_v5, %v4965_v9 }
0x1345   :  { %v5084_v48 = vadd.f32 %v10602_v22, %v5048_v43  ;;  %v5085_v21 = vadd.f32 %v10602_v22, %v5049_v46  ;;  %v5032_v11 = vmul.f32 %v10598_v4, %v4996_v57  ;;  %v5033_v10 = vmul.f32 %v10598_v4, %v4997_v47 }
0x1346   :  { %v5086_v42 = vadd.f32 %v10602_v22, %v5050_v15  ;;  %v5087_v28 = vadd.f32 %v10602_v22, %v5051_v25  ;;  %v5034_v51 = vmul.f32 %v10598_v4, %v4998_v36  ;;  %v5035_v62 = vmul.f32 %v10598_v4, %v4999_v2 }
0x1347   :  { %v5116_v0 = vmax.f32 %v5084_v48, 0.0  ;;  %v5117_v7 = vmax.f32 %v5085_v21, 0.0  ;;  %v5068_v30 = vadd.f32 %v10602_v22, %v5032_v11  ;;  %v5069_v9 = vadd.f32 %v10602_v22, %v5033_v10 }
0x1348   :  { %v5118_v29 = vmax.f32 %v5086_v42, 0.0  ;;  %v5119_v52 = vmax.f32 %v5087_v28, 0.0  ;;  %v5070_v35 = vadd.f32 %v10602_v22, %v5034_v51  ;;  %v5071_v14 = vadd.f32 %v10602_v22, %v5035_v62 }
0x1349   :  { %v6809_v43 = vpack.c.bf16 %v5117_v7, %v5116_v0  ;;  %v5100_v46 = vmax.f32 %v5068_v30, 0.0  ;;  %v5101_v57 = vmax.f32 %v5069_v9, 0.0  ;;  %v5052_v47 = vmul.f32 %v10598_v4, %v5016_v60 }
0x134a   :  { %v6813_v15 = vpack.c.bf16 %v5119_v52, %v5118_v29  ;;  %v5102_v25 = vmax.f32 %v5070_v35, 0.0  ;;  %v5103_v36 = vmax.f32 %v5071_v14, 0.0  ;;  %v5053_v2 = vmul.f32 %v10598_v4, %v5017_v44 }
0x134b   :  { %6810 = vmatprep.subr.bf16.mxu0 %v6809_v43  ;;  %v6811_v48 = vpack.c.bf16 %v5101_v57, %v5100_v46  ;;  %v5088_v21 = vadd.f32 %v10602_v22, %v5052_v47  ;;  %v5000_v11 = vmul.f32 %v10628_v5, %v4966_v1  ;;  %v5001_v10 = vmul.f32 %v10628_v5, %v4967_v13 }
0x134c   :  { %v6815_v60 = vpack.c.bf16 %v5103_v36, %v5102_v25  ;;  %v5089_v42 = vadd.f32 %v10602_v22, %v5053_v2  ;;  %v5054_v28 = vmul.f32 %v10598_v4, %v5018_v8  ;;  %v5055_v44 = vmul.f32 %v10598_v4, %v5019_v50 }
0x134d   :  { %6812 = vmatpush3.bf16.msra.mxu0 %v6811_v48  ;;  %v5120_v51 = vmax.f32 %v5088_v21, 0.0  ;;  %v5036_v62 = vmul.f32 %v10598_v4, %v5000_v11  ;;  %v5037_v61 = vmul.f32 %v10598_v4, %v5001_v10  ;;  %v5002_v1 = vmul.f32 %v10628_v5, %v4968_v31 }
0x134e   :  { %6814 = vmatprep.subr.bf16.mxu0 %v6813_v15  ;;  %v5121_v56 = vmax.f32 %v5089_v42, 0.0  ;;  %v5090_v13 = vadd.f32 %v10602_v22, %v5054_v28  ;;  %v5091_v0 = vadd.f32 %v10602_v22, %v5055_v44  ;;  %v5003_v8 = vmul.f32 %v10628_v5, %v4969_v41 }
0x134f   :  { %v5072_v50 = vadd.f32 %v10602_v22, %v5036_v62  ;;  %v5073_v7 = vadd.f32 %v10602_v22, %v5037_v61  ;;  %v5038_v30 = vmul.f32 %v10598_v4, %v5002_v1  ;;  %v5056_v24 = vmul.f32 %v10598_v4, %v5020_v12 }
0x1350   :  { %v6817_v31 = vpack.c.bf16 %v5121_v56, %v5120_v51  ;;  %v5122_v9 = vmax.f32 %v5090_v13, 0.0  ;;  %v5123_v29 = vmax.f32 %v5091_v0, 0.0  ;;  %v5039_v52 = vmul.f32 %v10598_v4, %v5003_v8 }
0x1351   :  { %6816 = vmatpush3.bf16.msra.mxu0 %v6815_v60  ;;  %v5104_v35 = vmax.f32 %v5072_v50, 0.0  ;;  %v5105_v14 = vmax.f32 %v5073_v7, 0.0  ;;  %v5074_v49 = vadd.f32 %v10602_v22, %v5038_v30  ;;  %v5057_v41 = vmul.f32 %v10598_v4, %v10651_v19 }
0x1352   :  { %6818 = vmatprep.subr.bf16.mxu0 %v6817_v31  ;;  %v6821_v43 = vpack.c.bf16 %v5123_v29, %v5122_v9  ;;  %v5075_v46 = vadd.f32 %v10602_v22, %v5039_v52  ;;  %v5092_v57 = vadd.f32 %v10602_v22, %v5056_v24  ;;  %v5004_v12 = vmul.f32 %v10628_v5, %v4970_v53 }
0x1353   :  { %v6819_v47 = vpack.c.bf16 %v5105_v14, %v5104_v35  ;;  %v5106_v15 = vmax.f32 %v5074_v49, 0.0  ;;  %v5093_v25 = vadd.f32 %v10602_v22, %v5057_v41  ;;  %v5005_v19 = vmul.f32 %v10628_v5, %v4971_v45 }
0x1354   :  { %v5107_v36 = vmax.f32 %v5075_v46, 0.0  ;;  %v5124_v2 = vmax.f32 %v5092_v57, 0.0  ;;  %v5040_v48 = vmul.f32 %v10598_v4, %v5004_v12  ;;  %v5058_v21 = vmul.f32 %v10598_v4, %v10654_v40 }
0x1355   :  { %6820 = vmatpush3.bf16.msra.mxu0 %v6819_v47  ;;  %v5125_v6 = vmax.f32 %v5093_v25, 0.0  ;;  %v5041_v53 = vmul.f32 %v10598_v4, %v5005_v19  ;;  %v5059_v11 = vmul.f32 %v10598_v4, %v10657_v20  ;;  %v5006_v18 = vmul.f32 %v10628_v5, %v4972_v55  ;;  %v5218_v25 = vld [vmem:[%s10813_s6 + $0x70] sm:$0xff] }
0x1356   :  { %6822 = vmatprep.subr.bf16.mxu0 %v6821_v43  ;;  %v6823_v45 = vpack.c.bf16 %v5107_v36, %v5106_v15  ;;  %v5076_v10 = vadd.f32 %v10602_v22, %v5040_v48  ;;  %v5094_v60 = vadd.f32 %v10602_v22, %v5058_v21  ;;  %v5007_v40 = vmul.f32 %v10628_v5, %v4973_v26 }
0x1357   :  { %v6825_v42 = vpack.c.bf16 %v5125_v6, %v5124_v2  ;;  %v5077_v28 = vadd.f32 %v10602_v22, %v5041_v53  ;;  %v5095_v20 = vadd.f32 %v10602_v22, %v5059_v11  ;;  %v5042_v39 = vmul.f32 %v10598_v4, %v5006_v18  ;;  %v5759_v6 = vld [vmem:[%s10814_s7] ss:$0 sm:$0xff] }
0x1358   :  { %v5108_v44 = vmax.f32 %v5076_v10, 0.0  ;;  %v5126_v55 = vmax.f32 %v5094_v60, 0.0  ;;  %v5043_v51 = vmul.f32 %v10598_v4, %v5007_v40  ;;  %v5060_v62 = vmul.f32 %v10598_v4, %v10660_v3 }
0x1359   :  { %6824 = vmatpush3.bf16.msra.mxu0 %v6823_v45  ;;  %v5109_v61 = vmax.f32 %v5077_v28, 0.0  ;;  %v5127_v1 = vmax.f32 %v5095_v20, 0.0  ;;  %v5078_v17 = vadd.f32 %v10602_v22, %v5042_v39  ;;  %v5061_v26 = vmul.f32 %v10598_v4, %v10639_v63 }
0x135a   :  { %6826 = vmatprep.subr.bf16.mxu0 %v6825_v42  ;;  %v5079_v56 = vadd.f32 %v10602_v22, %v5043_v51  ;;  %v5096_v13 = vadd.f32 %v10602_v22, %v5060_v62  ;;  %v5008_v0 = vmul.f32 %v10628_v5, %v4974_v33  ;;  %v5009_v3 = vmul.f32 %v10628_v5, %v4975_v59 }
0x135b   :  { %v6827_v8 = vpack.c.bf16 %v5109_v61, %v5108_v44  ;;  %v6829_v50 = vpack.c.bf16 %v5127_v1, %v5126_v55  ;;  %v5110_v7 = vmax.f32 %v5078_v17, 0.0  ;;  %v5097_v63 = vadd.f32 %v10602_v22, %v5061_v26 }
0x135c   :  { %v5111_v30 = vmax.f32 %v5079_v56, 0.0  ;;  %v5128_v24 = vmax.f32 %v5096_v13, 0.0  ;;  %v5044_v31 = vmul.f32 %v10598_v4, %v5008_v0  ;;  %v5045_v9 = vmul.f32 %v10598_v4, %v5009_v3 }
0x135d   :  { %6828 = vmatpush3.bf16.msra.mxu0 %v6827_v8  ;;  %v5129_v34 = vmax.f32 %v5097_v63, 0.0  ;;  %v5062_v33 = vmul.f32 %v10598_v4, %v10663_v38  ;;  %v5063_v27 = vmul.f32 %v10598_v4, %v10666_v58  ;;  %v5010_v59 = vmul.f32 %v10628_v5, %v4976_v23 }
0x135e   :  { %6830 = vmatprep.subr.bf16.mxu0 %v6829_v50  ;;  %v6831_v29 = vpack.c.bf16 %v5111_v30, %v5110_v7  ;;  %v5080_v52 = vadd.f32 %v10602_v22, %v5044_v31  ;;  %v5081_v35 = vadd.f32 %v10602_v22, %v5045_v9  ;;  %v5011_v14 = vmul.f32 %v10628_v5, %v4977_v37 }
0x135f   :  { %v6833_v38 = vpack.c.bf16 %v5129_v34, %v5128_v24  ;;  %v5098_v49 = vadd.f32 %v10602_v22, %v5062_v33  ;;  %v5099_v58 = vadd.f32 %v10602_v22, %v5063_v27  ;;  %v5046_v32 = vmul.f32 %v10598_v4, %v5010_v59 }
0x1360   :  { %v5112_v41 = vmax.f32 %v5080_v52, 0.0  ;;  %v5113_v23 = vmax.f32 %v5081_v35, 0.0  ;;  %v5047_v43 = vmul.f32 %v10598_v4, %v5011_v14  ;;  %v5132_v4 = vld [vmem:[%s10810_s3] sm:$0xff]  ;;  %v11541_v36 = vmov 0.0  }
0x1361   :  { %6832 = vmatpush3.bf16.msra.mxu0 %v6831_v29  ;;  %v5130_v46 = vmax.f32 %v5098_v49, 0.0  ;;  %v5131_v57 = vmax.f32 %v5099_v58, 0.0  ;;  %v5082_v12 = vadd.f32 %v10602_v22, %v5046_v32  ;;  %6806 = vmatprep.mubr.msk.f32.mxu1 %vm6892_vm12, %v11541_v36 }
0x1362   :  { %6834 = vmatprep.subr.bf16.mxu0 %v6833_v38  ;;  %v6835_v54 = vpack.c.bf16 %v5113_v23, %v5112_v41  ;;  %v5083_v16 = vadd.f32 %v10602_v22, %v5047_v43  ;;  %v5219_v22 = vld [vmem:[%s10813_s6 + $0x78] sm:$0xff] }
0x1363   :  { %v6837_v5 = vpack.c.bf16 %v5131_v57, %v5130_v46  ;;  %v5114_v37 = vmax.f32 %v5082_v12, 0.0  ;;  %v6863_v19 = vpack.c.bf16 %v5219_v22, %v5218_v25 }
0x1364   :  { %v5115_v47 = vmax.f32 %v5083_v16, 0.0 }
0x1365   :  { %6836 = vmatpush3.bf16.msra.mxu0 %v6835_v54  ;;  %6864 = vmatpush3.bf16.msra.mxu1 %v6863_v19 }
0x1366   :  { %6838 = vmatprep.subr.bf16.mxu0 %v6837_v5  ;;  %v6839_v15 = vpack.c.bf16 %v5115_v47, %v5114_v37 }
0x1369   :  { %6840 = vmatpush3.bf16.msra.mxu0 %v6839_v15 }
0x136c   :  { %5199 = vmatmul.mubr.f32.vlgmr.msra.gmra.mrb[192].mxu0 %v5132_v4 }
0x143f   :  { %v6370_v2 = vpop.f32.mrb[192].mxu0 }
0x1440   :  { %v6371_v48 = vpop.f32.mrb[193].mxu0 }
0x1441   :  { %v6372_v21 = vadd.f32 %v6371_v48, %v6370_v2 }
0x1443   :  { %6807 = vmatmul.mubr.f32.vlgmr.msra.gmra.mrb[192].mxu1 %v6372_v21 }
0x1516   :  { %v5293_v53 = vpop.f32.mrb[192].mxu1 }
0x1517   :  { %v5294_v11 = vadd.f32 %v5759_v6, %v5293_v53  ;;  %v6808_v18 = vpop.f32.mrb[193].mxu1 }
0x1519   :  { %5297 = vst [vmem:[%s10815_s8] sm:$0xff] %v5294_v11 }
0x151a   :  { %5302 = vsyncmov [#allocation4] }
0x151d   :  { %s5303_s6 = vpop.sfrf %5302 }
0x151e   :  { %p5760_p0 = scmp.ne.s32.totalorder %s5303_s6, 0 }
0x1520   :  { %5307 = shalt.err (%p5760_p0)  }
0x1521   :  { %5309 = vsyncmov [#allocation4 + $0x1] }
0x1524   :  { %s5310_s17 = vpop.sfrf %5309 }
0x1525   :  { %p5761_p1 = scmp.ne.s32.totalorder %s5310_s17, 0 }
0x1527   :  { %5314 = shalt.err (%p5761_p1)  }

</bundles_post_ra>
